<compile_context>
chip_gen: v7x
topology: tpu7x:2x2x1
jax: 0.10.0
libtpu: 0.0.40
codegen_flags: <defaults>
</compile_context>

<pallas_src>
import functools
import math

import jax
import jax.numpy as jnp
from jax.experimental import pallas as pl
from jax.experimental.pallas import tpu as pltpu

_PAD = 128  # lane width: every packed weight / bias segment is 128-aligned.


# ---------------------------------------------------------------------------
# Host-side helpers
# ---------------------------------------------------------------------------

def positional_encoding(d_model, max_len):
    position = jnp.arange(max_len, dtype=jnp.float32)[:, None]
    div_term = jnp.exp(jnp.arange(0, d_model, 2, dtype=jnp.float32)
                       * (-math.log(10000.0) / d_model))
    pe = jnp.zeros((max_len, d_model), jnp.float32)
    pe = pe.at[:, 0::2].set(jnp.sin(position * div_term))
    pe = pe.at[:, 1::2].set(jnp.cos(position * div_term))
    return pe


def _pad_cols(a, pad=_PAD):
    w = a.shape[1]
    wp = ((w + pad - 1) // pad) * pad
    if wp == w:
        return a
    return jnp.pad(a, ((0, 0), (0, wp - w)))


def _pack_cols(entries, pad=_PAD):
    """Concat 2-D arrays along columns, each padded to a 128-lane boundary.

    Returns (packed_array, {key: (col_start, logical_width)}).
    """
    offs, pieces, cur = {}, [], 0
    rows = entries[0][1].shape[0]
    for key, a in entries:
        assert a.ndim == 2 and a.shape[0] == rows, (key, a.shape)
        ap = _pad_cols(a, pad)
        offs[key] = (cur, a.shape[1])
        pieces.append(ap)
        cur += ap.shape[1]
    return jnp.concatenate(pieces, axis=1), offs


def init_params(key, vocab, dim, nhead, num_encoders, num_decoders, dff):
    """PyTorch-like parameter structure (f32), deterministic random init."""
    D, F, V = dim, dff, vocab
    keys = iter(jax.random.split(key, 256))

    def w(*shape, scale=0.02):
        return jax.random.normal(next(keys), shape, jnp.float32) * scale

    def gain(*shape):
        return 1.0 + jax.random.normal(next(keys), shape, jnp.float32) * 0.02

    def enc_layer():
        return dict(
            wq=w(D, D), wk=w(D, D), wv=w(D, D), wo=w(D, D),
            bq=w(1, D), bk=w(1, D), bv=w(1, D), bo=w(1, D),
            ln1_g=gain(1, D), ln1_b=w(1, D),
            w1=w(D, F), b1=w(1, F), w2=w(F, D), b2=w(1, D),
            ln2_g=gain(1, D), ln2_b=w(1, D))

    def dec_layer():
        return dict(
            sa_wq=w(D, D), sa_wk=w(D, D), sa_wv=w(D, D), sa_wo=w(D, D),
            sa_bq=w(1, D), sa_bk=w(1, D), sa_bv=w(1, D), sa_bo=w(1, D),
            ln1_g=gain(1, D), ln1_b=w(1, D),
            ca_wq=w(D, D), ca_wk=w(D, D), ca_wv=w(D, D), ca_wo=w(D, D),
            ca_bq=w(1, D), ca_bk=w(1, D), ca_bv=w(1, D), ca_bo=w(1, D),
            ln2_g=gain(1, D), ln2_b=w(1, D),
            w1=w(D, F), b1=w(1, F), w2=w(F, D), b2=w(1, D),
            ln3_g=gain(1, D), ln3_b=w(1, D))

    return dict(
        src_emb=w(V, D, scale=1.0),
        tgt_emb=w(V, D, scale=1.0),
        enc_layers=[enc_layer() for _ in range(num_encoders)],
        dec_layers=[dec_layer() for _ in range(num_decoders)],
        enc_norm_g=gain(1, D), enc_norm_b=w(1, D),
        dec_norm_g=gain(1, D), dec_norm_b=w(1, D),
        policy_w1=w(D, V), policy_b1=w(1, V),
        policy_w2=w(V, V), policy_b2=w(1, V),
        value_w1=w(D, D), value_b1=w(1, D),
        value_w2=w(D, 1), value_b2=w(1, 1))


def pack_params(params, dim, nhead, dff, vocab):
    """Pack all parameters into a few 128-lane-aligned VMEM slabs (bf16 weights)."""
    PAD = _PAD
    D, F, V = dim, dff, vocab
    assert D <= PAD and V <= PAD - 1, "layout assumes D, V+1 <= 128"

    wd_entries, wf_entries, vec_entries = [], [], []

    for l, lp in enumerate(params['enc_layers']):
        p = f"enc{l}_"
        wd_entries += [(p + 'wq', lp['wq']), (p + 'wk', lp['wk']), (p + 'wv', lp['wv']),
                       (p + 'wo', lp['wo']), (p + 'w1', lp['w1'])]
        wf_entries += [(p + 'w2', lp['w2'])]
        vec_entries += [(p + 'bq', lp['bq']), (p + 'bk', lp['bk']), (p + 'bv', lp['bv']),
                        (p + 'bo', lp['bo']), (p + 'ln1_g', lp['ln1_g']),
                        (p + 'ln1_b', lp['ln1_b']), (p + 'b1', lp['b1']),
                        (p + 'b2', lp['b2']), (p + 'ln2_g', lp['ln2_g']),
                        (p + 'ln2_b', lp['ln2_b'])]

    for l, lp in enumerate(params['dec_layers']):
        p = f"dec{l}_"
        wd_entries += [(p + 'sa_wq', lp['sa_wq']), (p + 'sa_wk', lp['sa_wk']),
                       (p + 'sa_wv', lp['sa_wv']), (p + 'sa_wo', lp['sa_wo']),
                       (p + 'ca_wq', lp['ca_wq']), (p + 'ca_wk', lp['ca_wk']),
                       (p + 'ca_wv', lp['ca_wv']), (p + 'ca_wo', lp['ca_wo']),
                       (p + 'w1', lp['w1'])]
        wf_entries += [(p + 'w2', lp['w2'])]
        vec_entries += [(p + 'sa_bq', lp['sa_bq']), (p + 'sa_bk', lp['sa_bk']),
                        (p + 'sa_bv', lp['sa_bv']), (p + 'sa_bo', lp['sa_bo']),
                        (p + 'ln1_g', lp['ln1_g']), (p + 'ln1_b', lp['ln1_b']),
                        (p + 'ca_bq', lp['ca_bq']), (p + 'ca_bk', lp['ca_bk']),
                        (p + 'ca_bv', lp['ca_bv']), (p + 'ca_bo', lp['ca_bo']),
                        (p + 'ln2_g', lp['ln2_g']), (p + 'ln2_b', lp['ln2_b']),
                        (p + 'b1', lp['b1']), (p + 'b2', lp['b2']),
                        (p + 'ln3_g', lp['ln3_g']), (p + 'ln3_b', lp['ln3_b'])]

    wd_entries += [('head_w1p', params['policy_w1']), ('head_w1v', params['value_w1'])]
    vec_entries += [('enc_norm_g', params['enc_norm_g']), ('enc_norm_b', params['enc_norm_b']),
                    ('dec_norm_g', params['dec_norm_g']), ('dec_norm_b', params['dec_norm_b']),
                    ('head_b1p', params['policy_b1']), ('head_b1v', params['value_b1'])]

    # Fused head second layer: block matrix mapping the padded hidden (2*PAD)
    # onto one lane-dense 128-wide output: cols [0:V] = policy logits, col V = value.
    w2c = jnp.zeros((2 * PAD, PAD), jnp.float32)
    w2c = w2c.at[0:V, 0:V].set(params['policy_w2'])
    w2c = w2c.at[PAD:PAD + D, V:V + 1].set(params['value_w2'])
    b2c = jnp.zeros((1, PAD), jnp.float32)
    b2c = b2c.at[:, 0:V].set(params['policy_b1'] * 0 + params['policy_b2'])
    b2c = b2c.at[:, V:V + 1].set(params['value_b2'])
    vec_entries += [('head_b2c', b2c)]

    wd, wd_off = _pack_cols(wd_entries, PAD)
    wf, wf_off = _pack_cols(wf_entries, PAD)
    vec, vec_off = _pack_cols(vec_entries, PAD)

    # Layout assumptions used by the kernel's fused (QKV / KV / head) slices.
    for l in range(len(params['enc_layers'])):
        assert wd_off[f"enc{l}_wk"][0] == wd_off[f"enc{l}_wq"][0] + PAD
        assert wd_off[f"enc{l}_wv"][0] == wd_off[f"enc{l}_wq"][0] + 2 * PAD
    for l in range(len(params['dec_layers'])):
        assert wd_off[f"dec{l}_sa_wk"][0] == wd_off[f"dec{l}_sa_wq"][0] + PAD
        assert wd_off[f"dec{l}_sa_wv"][0] == wd_off[f"dec{l}_sa_wq"][0] + 2 * PAD
        assert wd_off[f"dec{l}_ca_wv"][0] == wd_off[f"dec{l}_ca_wk"][0] + PAD
    assert wd_off['head_w1v'][0] == wd_off['head_w1p'][0] + PAD
    assert vec_off['head_b1v'][0] == vec_off['head_b1p'][0] + PAD

    arrays = dict(
        emb=jnp.concatenate([params['src_emb'], params['tgt_emb']], axis=0).astype(jnp.bfloat16),
        wd=wd.astype(jnp.bfloat16),
        wf=wf.astype(jnp.bfloat16),
        whead2=w2c.astype(jnp.bfloat16),
        vec=vec)                     # biases / LN params stay f32
    meta = dict(D=D, F=F, V=V, H=nhead, PAD=PAD, eps=1e-5,
                n_enc=len(params['enc_layers']), n_dec=len(params['dec_layers']),
                wd_off=wd_off, wf_off=wf_off, vec_off=vec_off)
    return arrays, meta


def make_consts(dim, nhead, batch, s_src, s_tgt):
    """Positional-encoding rows (batch-tiled), block/causal masks, head selector."""
    pe = positional_encoding(dim, max(s_src, s_tgt))
    pe_cat = jnp.concatenate([jnp.tile(pe[:s_src], (batch, 1)),
                              jnp.tile(pe[:s_tgt], (batch, 1))], axis=0)

    def block_mask(sq, sk, causal):
        rq = jnp.arange(batch * sq)
        rk = jnp.arange(batch * sk)
        ok = (rq[:, None] // sq) == (rk[None, :] // sk)       # same batch element
        if causal:
            ok = ok & ((rk[None, :] % sk) <= (rq[:, None] % sq))
        return jnp.where(ok, 0.0, -1e30).astype(jnp.float32)

    dh = dim // nhead
    head_of_col = jnp.arange(dim) // dh
    hmt = (jnp.arange(nhead)[:, None] == head_of_col[None, :]).astype(jnp.float32)

    return dict(pe_cat=pe_cat,
                enc_mask=block_mask(s_src, s_src, False),
                dec_mask=block_mask(s_tgt, s_tgt, True),
                cross_mask=block_mask(s_tgt, s_src, False),
                hmt=hmt)


# ---------------------------------------------------------------------------
# The fused whole-model kernel (single program, batch folded into rows)
# ---------------------------------------------------------------------------

def _fused_kernel(src_ids_ref, tgt_ids_ref, emb_ref, pe_ref,
                  enc_mask_ref, dec_mask_ref, cross_mask_ref, hmt_ref,
                  wd_ref, wf_ref, whead2_ref, vec_ref, out_ref, *, meta):
    D, V, H = meta['D'], meta['V'], meta['H']
    PAD, eps = meta['PAD'], meta['eps']
    n_enc, n_dec = meta['n_enc'], meta['n_dec']
    wd_off, wf_off, vec_off = meta['wd_off'], meta['wf_off'], meta['vec_off']
    bf16 = jnp.bfloat16

    Ms = src_ids_ref.shape[0]
    Mt = tgt_ids_ref.shape[0]
    scale = 1.0 / math.sqrt(D // H)

    def wd_slab(key, width):               # 128-aligned multi-segment weight slice
        return wd_ref[:, wd_off[key][0]:wd_off[key][0] + width]

    def wd_w(key):
        s, w = wd_off[key]
        return wd_ref[:, s:s + w]

    def wf_w(key):
        s, w = wf_off[key]
        return wf_ref[:, s:s + w]

    def vb(key, width=None):
        s, w = vec_off[key]
        if width is not None:
            w = width
        return vec_ref[:, s:s + w]

    def matmul(x, w):                       # bf16 MXU, f32 accumulation
        return jnp.dot(x.astype(bf16), w, preferred_element_type=jnp.float32)

    def layernorm(x, g, b):
        mu = jnp.mean(x, axis=-1, keepdims=True)
        var = jnp.mean(jnp.square(x - mu), axis=-1, keepdims=True)
        return (x - mu) * jax.lax.rsqrt(var + eps) * g + b

    hmt = hmt_ref[...]                      # (H, D) 0/1 head-column selector

    def head_expand(x):                     # (Mk, D) -> (H*Mk, D), block h = x * mask_h
        return jnp.concatenate([x * hmt[h:h + 1, :] for h in range(H)], axis=0)

    def attention(q, k, v, mask):
        # q (Mq, D), k/v (Mk, D) f32; mask (Mq, Mk) additive f32.
        Mk = k.shape[0]
        kh = head_expand(k).astype(bf16)                               # (H*Mk, D)
        vh = head_expand(v).astype(bf16)                               # (H*Mk, D)
        s = jnp.einsum('qd,kd->qk', q.astype(bf16), kh,
                       preferred_element_type=jnp.float32) * scale     # (Mq, H*Mk)
        probs = []
        for h in range(H):                  # blockwise softmax via static lane slices
            sh = s[:, h * Mk:(h + 1) * Mk] + mask
            mh = jnp.max(sh, axis=-1, keepdims=True)
            eh = jnp.exp(sh - mh)
            ph = eh * pl.reciprocal(jnp.sum(eh, axis=-1, keepdims=True), approx=True)
            probs.append(ph)
        p = jnp.concatenate(probs, axis=-1).astype(bf16)               # (Mq, H*Mk)
        return jnp.dot(p, vh, preferred_element_type=jnp.float32)      # (Mq, D) concat-heads

    # ---- token embeddings via one-hot matmul (in-kernel gather) + pos-enc ----
    iota_s = jax.lax.broadcasted_iota(jnp.int32, (Ms, V), 1)
    iota_t = jax.lax.broadcasted_iota(jnp.int32, (Mt, V), 1)
    oh_s = jnp.where(src_ids_ref[...] == iota_s, 1.0, 0.0).astype(bf16)
    oh_t = jnp.where(tgt_ids_ref[...] == iota_t, 1.0, 0.0).astype(bf16)
    x_src = jnp.dot(oh_s, emb_ref[0:V, :], preferred_element_type=jnp.float32) + pe_ref[0:Ms, :]
    x_tgt = jnp.dot(oh_t, emb_ref[V:2 * V, :], preferred_element_type=jnp.float32) + pe_ref[Ms:Ms + Mt, :]

    enc_mask = enc_mask_ref[...]
    dec_mask = dec_mask_ref[...]
    cross_mask = cross_mask_ref[...]

    # ---------------- encoder ----------------
    mem = x_src
    for l in range(n_enc):
        p = f"enc{l}_"
        qkv = matmul(mem, wd_slab(p + 'wq', 3 * PAD))      # (Ms, 3*128) aligned Q|K|V
        q = qkv[:, 0:D] + vb(p + 'bq')
        k = qkv[:, PAD:PAD + D] + vb(p + 'bk')
        v = qkv[:, 2 * PAD:2 * PAD + D] + vb(p + 'bv')
        a = matmul(attention(q, k, v, enc_mask), wd_w(p + 'wo')) + vb(p + 'bo')
        mem = layernorm(mem + a, vb(p + 'ln1_g'), vb(p + 'ln1_b'))
        h = jnp.maximum(matmul(mem, wd_w(p + 'w1')) + vb(p + 'b1'), 0.0)
        h = matmul(h, wf_w(p + 'w2')) + vb(p + 'b2')
        mem = layernorm(mem + h, vb(p + 'ln2_g'), vb(p + 'ln2_b'))
    mem = layernorm(mem, vb('enc_norm_g'), vb('enc_norm_b'))

    # ---------------- decoder ----------------
    out = x_tgt
    for l in range(n_dec):
        p = f"dec{l}_"
        qkv = matmul(out, wd_slab(p + 'sa_wq', 3 * PAD))
        q = qkv[:, 0:D] + vb(p + 'sa_bq')
        k = qkv[:, PAD:PAD + D] + vb(p + 'sa_bk')
        v = qkv[:, 2 * PAD:2 * PAD + D] + vb(p + 'sa_bv')
        a = matmul(attention(q, k, v, dec_mask), wd_w(p + 'sa_wo')) + vb(p + 'sa_bo')
        out = layernorm(out + a, vb(p + 'ln1_g'), vb(p + 'ln1_b'))

        q = matmul(out, wd_w(p + 'ca_wq')) + vb(p + 'ca_bq')
        kv = matmul(mem, wd_slab(p + 'ca_wk', 2 * PAD))    # (Ms, 2*128) aligned K|V
        k = kv[:, 0:D] + vb(p + 'ca_bk')
        v = kv[:, PAD:PAD + D] + vb(p + 'ca_bv')
        a = matmul(attention(q, k, v, cross_mask), wd_w(p + 'ca_wo')) + vb(p + 'ca_bo')
        out = layernorm(out + a, vb(p + 'ln2_g'), vb(p + 'ln2_b'))

        h = jnp.maximum(matmul(out, wd_w(p + 'w1')) + vb(p + 'b1'), 0.0)
        h = matmul(h, wf_w(p + 'w2')) + vb(p + 'b2')
        out = layernorm(out + h, vb(p + 'ln3_g'), vb(p + 'ln3_b'))
    out = layernorm(out, vb('dec_norm_g'), vb('dec_norm_b'))

    # ---- fused policy + value heads -> single lane-dense 128-wide output ----
    hidden = jnp.maximum(
        matmul(out, wd_slab('head_w1p', 2 * PAD)) + vb('head_b1p', 2 * PAD), 0.0)
    out_ref[...] = jnp.dot(hidden.astype(bf16), whead2_ref[...],
                           preferred_element_type=jnp.float32) + vb('head_b2c')


# ---------------------------------------------------------------------------
# Host-side wrapper
# ---------------------------------------------------------------------------

def build_forward(meta):
    V, PAD = meta['V'], meta['PAD']
    D, F, H = meta['D'], meta['F'], meta['H']
    n_enc, n_dec = meta['n_enc'], meta['n_dec']

    def fwd(arrays, consts, src, tgt):
        B, Ss = src.shape
        _, St = tgt.shape
        Ms, Mt = B * Ss, B * St

        src_ids = src.reshape(Ms, 1).astype(jnp.int32)
        tgt_ids = tgt.reshape(Mt, 1).astype(jnp.int32)

        operands = (src_ids, tgt_ids, arrays['emb'], consts['pe_cat'],
                    consts['enc_mask'], consts['dec_mask'], consts['cross_mask'],
                    consts['hmt'], arrays['wd'], arrays['wf'], arrays['whead2'],
                    arrays['vec'])

        def spec(x):
            return pl.BlockSpec(x.shape, lambda i, nd=x.ndim: (0,) * nd)

        def mm(m, k, n):
            return 2 * m * k * n

        flops = mm(Ms, V, D) + mm(Mt, V, D)
        flops += n_enc * (mm(Ms, D, 3 * PAD) + 2 * mm(Ms, D, H * Ms)
                          + mm(Ms, D, D) + mm(Ms, D, F) + mm(Ms, F, D))
        flops += n_dec * (mm(Mt, D, 3 * PAD) + 2 * mm(Mt, D, H * Mt) + mm(Mt, D, D)
                          + mm(Mt, D, D) + mm(Ms, D, 2 * PAD) + 2 * mm(Mt, D, H * Ms)
                          + mm(Mt, D, D) + mm(Mt, D, F) + mm(Mt, F, D))
        flops += mm(Mt, D, 2 * PAD) + mm(Mt, 2 * PAD, PAD)
        transcendentals = n_enc * Ms * H * Ms + n_dec * (Mt * H * Mt + Mt * H * Ms)
        bytes_accessed = sum(int(x.size) * x.dtype.itemsize for x in operands) + Mt * PAD * 4

        kernel = functools.partial(_fused_kernel, meta=meta)

        head_out = pl.pallas_call(
            kernel,
            out_shape=jax.ShapeDtypeStruct((Mt, PAD), jnp.float32),
            grid_spec=pltpu.PrefetchScalarGridSpec(
                num_scalar_prefetch=0,
                grid=(1,),
                in_specs=[spec(x) for x in operands],
                out_specs=pl.BlockSpec((Mt, PAD), lambda i: (0, 0)),
            ),
            compiler_params=pltpu.CompilerParams(
                dimension_semantics=("arbitrary",)),
            cost_estimate=pl.CostEstimate(flops=flops,
                                          transcendentals=transcendentals,
                                          bytes_accessed=bytes_accessed),
        )(*operands)

        policy = head_out[:, :V].reshape(B, St, V)
        value = head_out[:, V:V + 1].reshape(B, St, 1)
        return policy, value

    return jax.jit(fwd)


# ---------------------------------------------------------------------------
# Pure-JAX f32 reference (PyTorch-equivalent math) for validation
# ---------------------------------------------------------------------------

def reference_forward(params, src, tgt, nhead, eps=1e-5):
    D = params['src_emb'].shape[1]
    dh = D // nhead
    B, Ss = src.shape
    _, St = tgt.shape
    pe = positional_encoding(D, max(Ss, St))

    x_src = jnp.take(params['src_emb'], src, axis=0) + pe[None, :Ss, :]
    x_tgt = jnp.take(params['tgt_emb'], tgt, axis=0) + pe[None, :St, :]

    def ln(x, g, b):
        mu = jnp.mean(x, axis=-1, keepdims=True)
        var = jnp.mean(jnp.square(x - mu), axis=-1, keepdims=True)
        return (x - mu) / jnp.sqrt(var + eps) * g + b

    def mha(xq, xkv, wq, bq, wk, bk, wv, bv, wo, bo, mask=None):
        Sq, Sk = xq.shape[1], xkv.shape[1]
        q = (xq @ wq + bq).reshape(B, Sq, nhead, dh).transpose(0, 2, 1, 3)
        k = (xkv @ wk + bk).reshape(B, Sk, nhead, dh).transpose(0, 2, 1, 3)
        v = (xkv @ wv + bv).reshape(B, Sk, nhead, dh).transpose(0, 2, 1, 3)
        s = jnp.einsum('bhqd,bhkd->bhqk', q, k) / math.sqrt(dh)
        if mask is not None:
            s = s + mask
        p = jax.nn.softmax(s, axis=-1)
        o = jnp.einsum('bhqk,bhkd->bhqd', p, v).transpose(0, 2, 1, 3).reshape(B, Sq, D)
        return o @ wo + bo

    idx = jnp.arange(St)
    causal = jnp.where(idx[None, :] > idx[:, None], -1e30, 0.0).astype(jnp.float32)

    mem = x_src
    for lp in params['enc_layers']:
        a = mha(mem, mem, lp['wq'], lp['bq'], lp['wk'], lp['bk'],
                lp['wv'], lp['bv'], lp['wo'], lp['bo'])
        mem = ln(mem + a, lp['ln1_g'], lp['ln1_b'])
        h = jnp.maximum(mem @ lp['w1'] + lp['b1'], 0.0) @ lp['w2'] + lp['b2']
        mem = ln(mem + h, lp['ln2_g'], lp['ln2_b'])
    mem = ln(mem, params['enc_norm_g'], params['enc_norm_b'])

    out = x_tgt
    for lp in params['dec_layers']:
        a = mha(out, out, lp['sa_wq'], lp['sa_bq'], lp['sa_wk'], lp['sa_bk'],
                lp['sa_wv'], lp['sa_bv'], lp['sa_wo'], lp['sa_bo'], mask=causal)
        out = ln(out + a, lp['ln1_g'], lp['ln1_b'])
        a = mha(out, mem, lp['ca_wq'], lp['ca_bq'], lp['ca_wk'], lp['ca_bk'],
                lp['ca_wv'], lp['ca_bv'], lp['ca_wo'], lp['ca_bo'])
        out = ln(out + a, lp['ln2_g'], lp['ln2_b'])
        h = jnp.maximum(out @ lp['w1'] + lp['b1'], 0.0) @ lp['w2'] + lp['b2']
        out = ln(out + h, lp['ln3_g'], lp['ln3_b'])
    out = ln(out, params['dec_norm_g'], params['dec_norm_b'])

    pol = jnp.maximum(out @ params['policy_w1'] + params['policy_b1'], 0.0) \
        @ params['policy_w2'] + params['policy_b2']
    val = jnp.maximum(out @ params['value_w1'] + params['value_b1'], 0.0) \
        @ params['value_w2'] + params['value_b2']
    return pol, val


# ---------------------------------------------------------------------------
# Main
# ---------------------------------------------------------------------------

if __name__ == "__main__":
    DIM, NHEAD, NENC, NDEC, DFF = 64, 8, 2, 2, 256
    VOCAB = 16
    B, S_SRC, S_TGT = 2, 8, 8

    root = jax.random.PRNGKey(0)
    k_params, k_src, k_tgt = jax.random.split(root, 3)

    params = init_params(k_params, VOCAB, DIM, NHEAD, NENC, NDEC, DFF)
    arrays, meta = pack_params(params, DIM, NHEAD, DFF, VOCAB)
    consts = make_consts(DIM, NHEAD, B, S_SRC, S_TGT)

    src = jax.random.randint(k_src, (B, S_SRC), 0, VOCAB, dtype=jnp.int32)
    tgt = jax.random.randint(k_tgt, (B, S_TGT), 0, VOCAB, dtype=jnp.int32)

    fwd = build_forward(meta)
    policy_logits, value_est = fwd(arrays, consts, src, tgt)
    jax.block_until_ready((policy_logits, value_est))

    assert policy_logits.shape == (B, S_TGT, VOCAB)
    assert value_est.shape == (B, S_TGT, 1)
    assert bool(jnp.all(jnp.isfinite(policy_logits)))
    assert bool(jnp.all(jnp.isfinite(value_est)))

    # Validate against the pure-JAX f32 reference (loose tolerance: bf16 MXU +
    # approximate-reciprocal softmax in the kernel).
    ref_pol, ref_val = reference_forward(params, src, tgt, NHEAD)
    perr = float(jnp.max(jnp.abs(policy_logits - ref_pol)))
    verr = float(jnp.max(jnp.abs(value_est - ref_val)))
    assert perr < 5e-2 and verr < 5e-2, (perr, verr)

    print("KERNEL_OK")
</pallas_src>

<mosaic_0001>
module attributes {stable_mosaic.version = 11 : i64} {
  func.func @_fused_kernel(%arg0: i32, %arg1: memref<16x1xi32, #tpu.memory_space<vmem>>, %arg2: memref<16x1xi32, #tpu.memory_space<vmem>>, %arg3: memref<32x64xbf16, #tpu.memory_space<vmem>>, %arg4: memref<32x64xf32, #tpu.memory_space<vmem>>, %arg5: memref<16x16xf32, #tpu.memory_space<vmem>>, %arg6: memref<16x16xf32, #tpu.memory_space<vmem>>, %arg7: memref<16x16xf32, #tpu.memory_space<vmem>>, %arg8: memref<8x64xf32, #tpu.memory_space<vmem>>, %arg9: memref<64x4352xbf16, #tpu.memory_space<vmem>>, %arg10: memref<256x512xbf16, #tpu.memory_space<vmem>>, %arg11: memref<256x128xbf16, #tpu.memory_space<vmem>>, %arg12: memref<1x8064xf32, #tpu.memory_space<vmem>>, %arg13: memref<16x128xf32, #tpu.memory_space<vmem>>) attributes {dimension_semantics = [#tpu.dimension_semantics<arbitrary>], iteration_bounds = array<i64: 1>, scalar_prefetch = 0 : i64, scratch_operands = 0 : i64, tpu.core_type = #tpu.core_type<tc>, window_params = [{pipeline_mode = #tpu.pipeline_mode<synchronous>, transform_indices = @transform_0, window_bounds = array<i64: 16, 1>}, {pipeline_mode = #tpu.pipeline_mode<synchronous>, transform_indices = @transform_1, window_bounds = array<i64: 16, 1>}, {pipeline_mode = #tpu.pipeline_mode<synchronous>, transform_indices = @transform_2, window_bounds = array<i64: 32, 64>}, {pipeline_mode = #tpu.pipeline_mode<synchronous>, transform_indices = @transform_3, window_bounds = array<i64: 32, 64>}, {pipeline_mode = #tpu.pipeline_mode<synchronous>, transform_indices = @transform_4, window_bounds = array<i64: 16, 16>}, {pipeline_mode = #tpu.pipeline_mode<synchronous>, transform_indices = @transform_5, window_bounds = array<i64: 16, 16>}, {pipeline_mode = #tpu.pipeline_mode<synchronous>, transform_indices = @transform_6, window_bounds = array<i64: 16, 16>}, {pipeline_mode = #tpu.pipeline_mode<synchronous>, transform_indices = @transform_7, window_bounds = array<i64: 8, 64>}, {pipeline_mode = #tpu.pipeline_mode<synchronous>, transform_indices = @transform_8, window_bounds = array<i64: 64, 4352>}, {pipeline_mode = #tpu.pipeline_mode<synchronous>, transform_indices = @transform_9, window_bounds = array<i64: 256, 512>}, {pipeline_mode = #tpu.pipeline_mode<synchronous>, transform_indices = @transform_10, window_bounds = array<i64: 256, 128>}, {pipeline_mode = #tpu.pipeline_mode<synchronous>, transform_indices = @transform_11, window_bounds = array<i64: 1, 8064>}, {pipeline_mode = #tpu.pipeline_mode<synchronous>, transform_indices = @transform_12, window_bounds = array<i64: 16, 128>}]} {
    %c0 = arith.constant 0 : index
    %c0_0 = arith.constant 0 : index
    %0 = vector.load %arg8[%c0, %c0_0] : memref<8x64xf32, #tpu.memory_space<vmem>>, vector<8x64xf32>
    %1 = tpu.iota {dimensions = array<i32: 1>} : vector<16x16xi32>
    %2 = tpu.iota {dimensions = array<i32: 1>} : vector<16x16xi32>
    %c0_1 = arith.constant 0 : index
    %c0_2 = arith.constant 0 : index
    %3 = vector.load %arg1[%c0_1, %c0_2] : memref<16x1xi32, #tpu.memory_space<vmem>>, vector<16x1xi32>
    %4 = vector.broadcast %3 : vector<16x1xi32> to vector<16x16xi32>
    %5 = arith.cmpi eq, %4, %1 : vector<16x16xi32>
    %cst = arith.constant 1.000000e+00 : f32
    %cst_3 = arith.constant 0.000000e+00 : f32
    %6 = vector.broadcast %cst : f32 to vector<16x16xf32>
    %7 = vector.broadcast %cst_3 : f32 to vector<16x16xf32>
    %8 = arith.select %5, %6, %7 : vector<16x16xi1>, vector<16x16xf32>
    %9 = arith.truncf %8 : vector<16x16xf32> to vector<16x16xbf16>
    %c0_4 = arith.constant 0 : index
    %c0_5 = arith.constant 0 : index
    %10 = vector.load %arg2[%c0_4, %c0_5] : memref<16x1xi32, #tpu.memory_space<vmem>>, vector<16x1xi32>
    %11 = vector.broadcast %10 : vector<16x1xi32> to vector<16x16xi32>
    %12 = arith.cmpi eq, %11, %2 : vector<16x16xi32>
    %cst_6 = arith.constant 1.000000e+00 : f32
    %cst_7 = arith.constant 0.000000e+00 : f32
    %13 = vector.broadcast %cst_6 : f32 to vector<16x16xf32>
    %14 = vector.broadcast %cst_7 : f32 to vector<16x16xf32>
    %15 = arith.select %12, %13, %14 : vector<16x16xi1>, vector<16x16xf32>
    %16 = arith.truncf %15 : vector<16x16xf32> to vector<16x16xbf16>
    %c0_8 = arith.constant 0 : index
    %c0_9 = arith.constant 0 : index
    %17 = vector.load %arg3[%c0_8, %c0_9] : memref<32x64xbf16, #tpu.memory_space<vmem>>, vector<16x64xbf16>
    %cst_10 = arith.constant dense<0.000000e+00> : vector<16x64xf32>
    %18 = tpu.matmul %9, %17, %cst_10 {dimension_numbers = #tpu.dot_dimension_numbers<[1], [0], [0], [1], [0, 0, 1, 1], [], []>} : vector<16x16xbf16>, vector<16x64xbf16>, vector<16x64xf32> -> vector<16x64xf32>
    %c0_11 = arith.constant 0 : index
    %c0_12 = arith.constant 0 : index
    %19 = vector.load %arg4[%c0_11, %c0_12] : memref<32x64xf32, #tpu.memory_space<vmem>>, vector<16x64xf32>
    %20 = arith.addf %18, %19 : vector<16x64xf32>
    %c16 = arith.constant 16 : index
    %c0_13 = arith.constant 0 : index
    %21 = vector.load %arg3[%c16, %c0_13] : memref<32x64xbf16, #tpu.memory_space<vmem>>, vector<16x64xbf16>
    %cst_14 = arith.constant dense<0.000000e+00> : vector<16x64xf32>
    %22 = tpu.matmul %16, %21, %cst_14 {dimension_numbers = #tpu.dot_dimension_numbers<[1], [0], [0], [1], [0, 0, 1, 1], [], []>} : vector<16x16xbf16>, vector<16x64xbf16>, vector<16x64xf32> -> vector<16x64xf32>
    %c16_15 = arith.constant 16 : index
    %c0_16 = arith.constant 0 : index
    %23 = vector.load %arg4[%c16_15, %c0_16] : memref<32x64xf32, #tpu.memory_space<vmem>>, vector<16x64xf32>
    %24 = arith.addf %22, %23 : vector<16x64xf32>
    %c0_17 = arith.constant 0 : index
    %c0_18 = arith.constant 0 : index
    %25 = vector.load %arg5[%c0_17, %c0_18] : memref<16x16xf32, #tpu.memory_space<vmem>>, vector<16x16xf32>
    %c0_19 = arith.constant 0 : index
    %c0_20 = arith.constant 0 : index
    %26 = vector.load %arg6[%c0_19, %c0_20] : memref<16x16xf32, #tpu.memory_space<vmem>>, vector<16x16xf32>
    %c0_21 = arith.constant 0 : index
    %c0_22 = arith.constant 0 : index
    %27 = vector.load %arg7[%c0_21, %c0_22] : memref<16x16xf32, #tpu.memory_space<vmem>>, vector<16x16xf32>
    %c0_23 = arith.constant 0 : index
    %c0_24 = arith.constant 0 : index
    %28 = vector.load %arg9[%c0_23, %c0_24] : memref<64x4352xbf16, #tpu.memory_space<vmem>>, vector<64x384xbf16>
    %29 = arith.truncf %20 : vector<16x64xf32> to vector<16x64xbf16>
    %cst_25 = arith.constant dense<0.000000e+00> : vector<16x384xf32>
    %30 = tpu.matmul %29, %28, %cst_25 {dimension_numbers = #tpu.dot_dimension_numbers<[1], [0], [0], [1], [0, 0, 1, 1], [], []>} : vector<16x64xbf16>, vector<64x384xbf16>, vector<16x384xf32> -> vector<16x384xf32>
    %31 = vector.extract_strided_slice %30 {offsets = [0, 0], sizes = [16, 64], strides = [1, 1]} : vector<16x384xf32> to vector<16x64xf32>
    %c0_26 = arith.constant 0 : index
    %c0_27 = arith.constant 0 : index
    %32 = vector.load %arg12[%c0_26, %c0_27] : memref<1x8064xf32, #tpu.memory_space<vmem>>, vector<1x64xf32>
    %33 = vector.broadcast %32 : vector<1x64xf32> to vector<16x64xf32>
    %34 = arith.addf %31, %33 : vector<16x64xf32>
    %35 = vector.extract_strided_slice %30 {offsets = [0, 128], sizes = [16, 64], strides = [1, 1]} : vector<16x384xf32> to vector<16x64xf32>
    %c0_28 = arith.constant 0 : index
    %c128 = arith.constant 128 : index
    %36 = vector.load %arg12[%c0_28, %c128] : memref<1x8064xf32, #tpu.memory_space<vmem>>, vector<1x64xf32>
    %37 = vector.broadcast %36 : vector<1x64xf32> to vector<16x64xf32>
    %38 = arith.addf %35, %37 : vector<16x64xf32>
    %39 = vector.extract_strided_slice %30 {offsets = [0, 256], sizes = [16, 64], strides = [1, 1]} : vector<16x384xf32> to vector<16x64xf32>
    %c0_29 = arith.constant 0 : index
    %c256 = arith.constant 256 : index
    %40 = vector.load %arg12[%c0_29, %c256] : memref<1x8064xf32, #tpu.memory_space<vmem>>, vector<1x64xf32>
    %41 = vector.broadcast %40 : vector<1x64xf32> to vector<16x64xf32>
    %42 = arith.addf %39, %41 : vector<16x64xf32>
    %43 = vector.extract_strided_slice %0 {offsets = [0, 0], sizes = [1, 64], strides = [1, 1]} : vector<8x64xf32> to vector<1x64xf32>
    %44 = vector.broadcast %43 : vector<1x64xf32> to vector<16x64xf32>
    %45 = arith.mulf %38, %44 : vector<16x64xf32>
    %46 = vector.extract_strided_slice %0 {offsets = [1, 0], sizes = [1, 64], strides = [1, 1]} : vector<8x64xf32> to vector<1x64xf32>
    %47 = vector.broadcast %46 : vector<1x64xf32> to vector<16x64xf32>
    %48 = arith.mulf %38, %47 : vector<16x64xf32>
    %49 = vector.extract_strided_slice %0 {offsets = [2, 0], sizes = [1, 64], strides = [1, 1]} : vector<8x64xf32> to vector<1x64xf32>
    %50 = vector.broadcast %49 : vector<1x64xf32> to vector<16x64xf32>
    %51 = arith.mulf %38, %50 : vector<16x64xf32>
    %52 = vector.extract_strided_slice %0 {offsets = [3, 0], sizes = [1, 64], strides = [1, 1]} : vector<8x64xf32> to vector<1x64xf32>
    %53 = vector.broadcast %52 : vector<1x64xf32> to vector<16x64xf32>
    %54 = arith.mulf %38, %53 : vector<16x64xf32>
    %55 = vector.extract_strided_slice %0 {offsets = [4, 0], sizes = [1, 64], strides = [1, 1]} : vector<8x64xf32> to vector<1x64xf32>
    %56 = vector.broadcast %55 : vector<1x64xf32> to vector<16x64xf32>
    %57 = arith.mulf %38, %56 : vector<16x64xf32>
    %58 = vector.extract_strided_slice %0 {offsets = [5, 0], sizes = [1, 64], strides = [1, 1]} : vector<8x64xf32> to vector<1x64xf32>
    %59 = vector.broadcast %58 : vector<1x64xf32> to vector<16x64xf32>
    %60 = arith.mulf %38, %59 : vector<16x64xf32>
    %61 = vector.extract_strided_slice %0 {offsets = [6, 0], sizes = [1, 64], strides = [1, 1]} : vector<8x64xf32> to vector<1x64xf32>
    %62 = vector.broadcast %61 : vector<1x64xf32> to vector<16x64xf32>
    %63 = arith.mulf %38, %62 : vector<16x64xf32>
    %64 = vector.extract_strided_slice %0 {offsets = [7, 0], sizes = [1, 64], strides = [1, 1]} : vector<8x64xf32> to vector<1x64xf32>
    %65 = vector.broadcast %64 : vector<1x64xf32> to vector<16x64xf32>
    %66 = arith.mulf %38, %65 : vector<16x64xf32>
    %67 = tpu.concatenate %45, %48, %51, %54, %57, %60, %63, %66 in 0 : vector<16x64xf32>, vector<16x64xf32>, vector<16x64xf32>, vector<16x64xf32>, vector<16x64xf32>, vector<16x64xf32>, vector<16x64xf32>, vector<16x64xf32> -> vector<128x64xf32>
    %68 = arith.truncf %67 : vector<128x64xf32> to vector<128x64xbf16>
    %69 = vector.extract_strided_slice %0 {offsets = [0, 0], sizes = [1, 64], strides = [1, 1]} : vector<8x64xf32> to vector<1x64xf32>
    %70 = vector.broadcast %69 : vector<1x64xf32> to vector<16x64xf32>
    %71 = arith.mulf %42, %70 : vector<16x64xf32>
    %72 = vector.extract_strided_slice %0 {offsets = [1, 0], sizes = [1, 64], strides = [1, 1]} : vector<8x64xf32> to vector<1x64xf32>
    %73 = vector.broadcast %72 : vector<1x64xf32> to vector<16x64xf32>
    %74 = arith.mulf %42, %73 : vector<16x64xf32>
    %75 = vector.extract_strided_slice %0 {offsets = [2, 0], sizes = [1, 64], strides = [1, 1]} : vector<8x64xf32> to vector<1x64xf32>
    %76 = vector.broadcast %75 : vector<1x64xf32> to vector<16x64xf32>
    %77 = arith.mulf %42, %76 : vector<16x64xf32>
    %78 = vector.extract_strided_slice %0 {offsets = [3, 0], sizes = [1, 64], strides = [1, 1]} : vector<8x64xf32> to vector<1x64xf32>
    %79 = vector.broadcast %78 : vector<1x64xf32> to vector<16x64xf32>
    %80 = arith.mulf %42, %79 : vector<16x64xf32>
    %81 = vector.extract_strided_slice %0 {offsets = [4, 0], sizes = [1, 64], strides = [1, 1]} : vector<8x64xf32> to vector<1x64xf32>
    %82 = vector.broadcast %81 : vector<1x64xf32> to vector<16x64xf32>
    %83 = arith.mulf %42, %82 : vector<16x64xf32>
    %84 = vector.extract_strided_slice %0 {offsets = [5, 0], sizes = [1, 64], strides = [1, 1]} : vector<8x64xf32> to vector<1x64xf32>
    %85 = vector.broadcast %84 : vector<1x64xf32> to vector<16x64xf32>
    %86 = arith.mulf %42, %85 : vector<16x64xf32>
    %87 = vector.extract_strided_slice %0 {offsets = [6, 0], sizes = [1, 64], strides = [1, 1]} : vector<8x64xf32> to vector<1x64xf32>
    %88 = vector.broadcast %87 : vector<1x64xf32> to vector<16x64xf32>
    %89 = arith.mulf %42, %88 : vector<16x64xf32>
    %90 = vector.extract_strided_slice %0 {offsets = [7, 0], sizes = [1, 64], strides = [1, 1]} : vector<8x64xf32> to vector<1x64xf32>
    %91 = vector.broadcast %90 : vector<1x64xf32> to vector<16x64xf32>
    %92 = arith.mulf %42, %91 : vector<16x64xf32>
    %93 = tpu.concatenate %71, %74, %77, %80, %83, %86, %89, %92 in 0 : vector<16x64xf32>, vector<16x64xf32>, vector<16x64xf32>, vector<16x64xf32>, vector<16x64xf32>, vector<16x64xf32>, vector<16x64xf32>, vector<16x64xf32> -> vector<128x64xf32>
    %94 = arith.truncf %93 : vector<128x64xf32> to vector<128x64xbf16>
    %95 = arith.truncf %34 : vector<16x64xf32> to vector<16x64xbf16>
    "tpu.trace_start"() <{level = 10 : i32, message = "qd,kd->qk"}> : () -> ()
    %cst_30 = arith.constant dense<0.000000e+00> : vector<16x128xf32>
    %96 = tpu.matmul %95, %68, %cst_30 {dimension_numbers = #tpu.dot_dimension_numbers<[1], [1], [0], [0], [0, 0, 1, 0], [], []>} : vector<16x64xbf16>, vector<128x64xbf16>, vector<16x128xf32> -> vector<16x128xf32>
    "tpu.trace_stop"() : () -> ()
    %cst_31 = arith.constant 0.353553385 : f32
    %97 = vector.broadcast %cst_31 : f32 to vector<16x128xf32>
    %98 = arith.mulf %96, %97 : vector<16x128xf32>
    %99 = vector.extract_strided_slice %98 {offsets = [0, 0], sizes = [16, 16], strides = [1, 1]} : vector<16x128xf32> to vector<16x16xf32>
    %100 = arith.addf %99, %25 : vector<16x16xf32>
    %cst_32 = arith.constant dense<0xFF800000> : vector<16xf32>
    %101 = vector.multi_reduction <maximumf>, %100, %cst_32 [1] : vector<16x16xf32> to vector<16xf32>
    %102 = vector.shape_cast %101 : vector<16xf32> to vector<16x1xf32>
    %103 = vector.broadcast %102 : vector<16x1xf32> to vector<16x16xf32>
    %104 = arith.subf %100, %103 : vector<16x16xf32>
    %105 = math.exp %104 : vector<16x16xf32>
    %cst_33 = arith.constant dense<0.000000e+00> : vector<16xf32>
    %106 = vector.multi_reduction <add>, %105, %cst_33 [1] : vector<16x16xf32> to vector<16xf32>
    %107 = vector.shape_cast %106 : vector<16xf32> to vector<16x1xf32>
    %108 = tpu.reciprocal %107 {approx = true} : vector<16x1xf32> -> vector<16x1xf32>
    %109 = vector.broadcast %108 : vector<16x1xf32> to vector<16x16xf32>
    %110 = arith.mulf %105, %109 : vector<16x16xf32>
    %111 = vector.extract_strided_slice %98 {offsets = [0, 16], sizes = [16, 16], strides = [1, 1]} : vector<16x128xf32> to vector<16x16xf32>
    %112 = arith.addf %111, %25 : vector<16x16xf32>
    %cst_34 = arith.constant dense<0xFF800000> : vector<16xf32>
    %113 = vector.multi_reduction <maximumf>, %112, %cst_34 [1] : vector<16x16xf32> to vector<16xf32>
    %114 = vector.shape_cast %113 : vector<16xf32> to vector<16x1xf32>
    %115 = vector.broadcast %114 : vector<16x1xf32> to vector<16x16xf32>
    %116 = arith.subf %112, %115 : vector<16x16xf32>
    %117 = math.exp %116 : vector<16x16xf32>
    %cst_35 = arith.constant dense<0.000000e+00> : vector<16xf32>
    %118 = vector.multi_reduction <add>, %117, %cst_35 [1] : vector<16x16xf32> to vector<16xf32>
    %119 = vector.shape_cast %118 : vector<16xf32> to vector<16x1xf32>
    %120 = tpu.reciprocal %119 {approx = true} : vector<16x1xf32> -> vector<16x1xf32>
    %121 = vector.broadcast %120 : vector<16x1xf32> to vector<16x16xf32>
    %122 = arith.mulf %117, %121 : vector<16x16xf32>
    %123 = vector.extract_strided_slice %98 {offsets = [0, 32], sizes = [16, 16], strides = [1, 1]} : vector<16x128xf32> to vector<16x16xf32>
    %124 = arith.addf %123, %25 : vector<16x16xf32>
    %cst_36 = arith.constant dense<0xFF800000> : vector<16xf32>
    %125 = vector.multi_reduction <maximumf>, %124, %cst_36 [1] : vector<16x16xf32> to vector<16xf32>
    %126 = vector.shape_cast %125 : vector<16xf32> to vector<16x1xf32>
    %127 = vector.broadcast %126 : vector<16x1xf32> to vector<16x16xf32>
    %128 = arith.subf %124, %127 : vector<16x16xf32>
    %129 = math.exp %128 : vector<16x16xf32>
    %cst_37 = arith.constant dense<0.000000e+00> : vector<16xf32>
    %130 = vector.multi_reduction <add>, %129, %cst_37 [1] : vector<16x16xf32> to vector<16xf32>
    %131 = vector.shape_cast %130 : vector<16xf32> to vector<16x1xf32>
    %132 = tpu.reciprocal %131 {approx = true} : vector<16x1xf32> -> vector<16x1xf32>
    %133 = vector.broadcast %132 : vector<16x1xf32> to vector<16x16xf32>
    %134 = arith.mulf %129, %133 : vector<16x16xf32>
    %135 = vector.extract_strided_slice %98 {offsets = [0, 48], sizes = [16, 16], strides = [1, 1]} : vector<16x128xf32> to vector<16x16xf32>
    %136 = arith.addf %135, %25 : vector<16x16xf32>
    %cst_38 = arith.constant dense<0xFF800000> : vector<16xf32>
    %137 = vector.multi_reduction <maximumf>, %136, %cst_38 [1] : vector<16x16xf32> to vector<16xf32>
    %138 = vector.shape_cast %137 : vector<16xf32> to vector<16x1xf32>
    %139 = vector.broadcast %138 : vector<16x1xf32> to vector<16x16xf32>
    %140 = arith.subf %136, %139 : vector<16x16xf32>
    %141 = math.exp %140 : vector<16x16xf32>
    %cst_39 = arith.constant dense<0.000000e+00> : vector<16xf32>
    %142 = vector.multi_reduction <add>, %141, %cst_39 [1] : vector<16x16xf32> to vector<16xf32>
    %143 = vector.shape_cast %142 : vector<16xf32> to vector<16x1xf32>
    %144 = tpu.reciprocal %143 {approx = true} : vector<16x1xf32> -> vector<16x1xf32>
    %145 = vector.broadcast %144 : vector<16x1xf32> to vector<16x16xf32>
    %146 = arith.mulf %141, %145 : vector<16x16xf32>
    %147 = vector.extract_strided_slice %98 {offsets = [0, 64], sizes = [16, 16], strides = [1, 1]} : vector<16x128xf32> to vector<16x16xf32>
    %148 = arith.addf %147, %25 : vector<16x16xf32>
    %cst_40 = arith.constant dense<0xFF800000> : vector<16xf32>
    %149 = vector.multi_reduction <maximumf>, %148, %cst_40 [1] : vector<16x16xf32> to vector<16xf32>
    %150 = vector.shape_cast %149 : vector<16xf32> to vector<16x1xf32>
    %151 = vector.broadcast %150 : vector<16x1xf32> to vector<16x16xf32>
    %152 = arith.subf %148, %151 : vector<16x16xf32>
    %153 = math.exp %152 : vector<16x16xf32>
    %cst_41 = arith.constant dense<0.000000e+00> : vector<16xf32>
    %154 = vector.multi_reduction <add>, %153, %cst_41 [1] : vector<16x16xf32> to vector<16xf32>
    %155 = vector.shape_cast %154 : vector<16xf32> to vector<16x1xf32>
    %156 = tpu.reciprocal %155 {approx = true} : vector<16x1xf32> -> vector<16x1xf32>
    %157 = vector.broadcast %156 : vector<16x1xf32> to vector<16x16xf32>
    %158 = arith.mulf %153, %157 : vector<16x16xf32>
    %159 = vector.extract_strided_slice %98 {offsets = [0, 80], sizes = [16, 16], strides = [1, 1]} : vector<16x128xf32> to vector<16x16xf32>
    %160 = arith.addf %159, %25 : vector<16x16xf32>
    %cst_42 = arith.constant dense<0xFF800000> : vector<16xf32>
    %161 = vector.multi_reduction <maximumf>, %160, %cst_42 [1] : vector<16x16xf32> to vector<16xf32>
    %162 = vector.shape_cast %161 : vector<16xf32> to vector<16x1xf32>
    %163 = vector.broadcast %162 : vector<16x1xf32> to vector<16x16xf32>
    %164 = arith.subf %160, %163 : vector<16x16xf32>
    %165 = math.exp %164 : vector<16x16xf32>
    %cst_43 = arith.constant dense<0.000000e+00> : vector<16xf32>
    %166 = vector.multi_reduction <add>, %165, %cst_43 [1] : vector<16x16xf32> to vector<16xf32>
    %167 = vector.shape_cast %166 : vector<16xf32> to vector<16x1xf32>
    %168 = tpu.reciprocal %167 {approx = true} : vector<16x1xf32> -> vector<16x1xf32>
    %169 = vector.broadcast %168 : vector<16x1xf32> to vector<16x16xf32>
    %170 = arith.mulf %165, %169 : vector<16x16xf32>
    %171 = vector.extract_strided_slice %98 {offsets = [0, 96], sizes = [16, 16], strides = [1, 1]} : vector<16x128xf32> to vector<16x16xf32>
    %172 = arith.addf %171, %25 : vector<16x16xf32>
    %cst_44 = arith.constant dense<0xFF800000> : vector<16xf32>
    %173 = vector.multi_reduction <maximumf>, %172, %cst_44 [1] : vector<16x16xf32> to vector<16xf32>
    %174 = vector.shape_cast %173 : vector<16xf32> to vector<16x1xf32>
    %175 = vector.broadcast %174 : vector<16x1xf32> to vector<16x16xf32>
    %176 = arith.subf %172, %175 : vector<16x16xf32>
    %177 = math.exp %176 : vector<16x16xf32>
    %cst_45 = arith.constant dense<0.000000e+00> : vector<16xf32>
    %178 = vector.multi_reduction <add>, %177, %cst_45 [1] : vector<16x16xf32> to vector<16xf32>
    %179 = vector.shape_cast %178 : vector<16xf32> to vector<16x1xf32>
    %180 = tpu.reciprocal %179 {approx = true} : vector<16x1xf32> -> vector<16x1xf32>
    %181 = vector.broadcast %180 : vector<16x1xf32> to vector<16x16xf32>
    %182 = arith.mulf %177, %181 : vector<16x16xf32>
    %183 = vector.extract_strided_slice %98 {offsets = [0, 112], sizes = [16, 16], strides = [1, 1]} : vector<16x128xf32> to vector<16x16xf32>
    %184 = arith.addf %183, %25 : vector<16x16xf32>
    %cst_46 = arith.constant dense<0xFF800000> : vector<16xf32>
    %185 = vector.multi_reduction <maximumf>, %184, %cst_46 [1] : vector<16x16xf32> to vector<16xf32>
    %186 = vector.shape_cast %185 : vector<16xf32> to vector<16x1xf32>
    %187 = vector.broadcast %186 : vector<16x1xf32> to vector<16x16xf32>
    %188 = arith.subf %184, %187 : vector<16x16xf32>
    %189 = math.exp %188 : vector<16x16xf32>
    %cst_47 = arith.constant dense<0.000000e+00> : vector<16xf32>
    %190 = vector.multi_reduction <add>, %189, %cst_47 [1] : vector<16x16xf32> to vector<16xf32>
    %191 = vector.shape_cast %190 : vector<16xf32> to vector<16x1xf32>
    %192 = tpu.reciprocal %191 {approx = true} : vector<16x1xf32> -> vector<16x1xf32>
    %193 = vector.broadcast %192 : vector<16x1xf32> to vector<16x16xf32>
    %194 = arith.mulf %189, %193 : vector<16x16xf32>
    %195 = tpu.concatenate %110, %122, %134, %146, %158, %170, %182, %194 in 1 : vector<16x16xf32>, vector<16x16xf32>, vector<16x16xf32>, vector<16x16xf32>, vector<16x16xf32>, vector<16x16xf32>, vector<16x16xf32>, vector<16x16xf32> -> vector<16x128xf32>
    %196 = arith.truncf %195 : vector<16x128xf32> to vector<16x128xbf16>
    %cst_48 = arith.constant dense<0.000000e+00> : vector<16x64xf32>
    %197 = tpu.matmul %196, %94, %cst_48 {dimension_numbers = #tpu.dot_dimension_numbers<[1], [0], [0], [1], [0, 0, 1, 1], [], []>} : vector<16x128xbf16>, vector<128x64xbf16>, vector<16x64xf32> -> vector<16x64xf32>
    %c0_49 = arith.constant 0 : index
    %c384 = arith.constant 384 : index
    %198 = vector.load %arg9[%c0_49, %c384] : memref<64x4352xbf16, #tpu.memory_space<vmem>>, vector<64x64xbf16>
    %199 = arith.truncf %197 : vector<16x64xf32> to vector<16x64xbf16>
    %cst_50 = arith.constant dense<0.000000e+00> : vector<16x64xf32>
    %200 = tpu.matmul %199, %198, %cst_50 {dimension_numbers = #tpu.dot_dimension_numbers<[1], [0], [0], [1], [0, 0, 1, 1], [], []>} : vector<16x64xbf16>, vector<64x64xbf16>, vector<16x64xf32> -> vector<16x64xf32>
    %c0_51 = arith.constant 0 : index
    %c384_52 = arith.constant 384 : index
    %201 = vector.load %arg12[%c0_51, %c384_52] : memref<1x8064xf32, #tpu.memory_space<vmem>>, vector<1x64xf32>
    %202 = vector.broadcast %201 : vector<1x64xf32> to vector<16x64xf32>
    %203 = arith.addf %200, %202 : vector<16x64xf32>
    %204 = arith.addf %20, %203 : vector<16x64xf32>
    %c0_53 = arith.constant 0 : index
    %c512 = arith.constant 512 : index
    %205 = vector.load %arg12[%c0_53, %c512] : memref<1x8064xf32, #tpu.memory_space<vmem>>, vector<1x64xf32>
    %c0_54 = arith.constant 0 : index
    %c640 = arith.constant 640 : index
    %206 = vector.load %arg12[%c0_54, %c640] : memref<1x8064xf32, #tpu.memory_space<vmem>>, vector<1x64xf32>
    %cst_55 = arith.constant dense<0.000000e+00> : vector<16xf32>
    %207 = vector.multi_reduction <add>, %204, %cst_55 [1] : vector<16x64xf32> to vector<16xf32>
    %208 = vector.shape_cast %207 : vector<16xf32> to vector<16x1xf32>
    %cst_56 = arith.constant 6.400000e+01 : f32
    %209 = vector.broadcast %cst_56 : f32 to vector<16x1xf32>
    %210 = arith.divf %208, %209 : vector<16x1xf32>
    %211 = vector.broadcast %210 : vector<16x1xf32> to vector<16x64xf32>
    %212 = arith.subf %204, %211 : vector<16x64xf32>
    %213 = arith.mulf %212, %212 : vector<16x64xf32>
    %cst_57 = arith.constant dense<0.000000e+00> : vector<16xf32>
    %214 = vector.multi_reduction <add>, %213, %cst_57 [1] : vector<16x64xf32> to vector<16xf32>
    %215 = vector.shape_cast %214 : vector<16xf32> to vector<16x1xf32>
    %cst_58 = arith.constant 6.400000e+01 : f32
    %216 = vector.broadcast %cst_58 : f32 to vector<16x1xf32>
    %217 = arith.divf %215, %216 : vector<16x1xf32>
    %218 = vector.broadcast %210 : vector<16x1xf32> to vector<16x64xf32>
    %219 = arith.subf %204, %218 : vector<16x64xf32>
    %cst_59 = arith.constant 9.99999974E-6 : f32
    %220 = vector.broadcast %cst_59 : f32 to vector<16x1xf32>
    %221 = arith.addf %217, %220 : vector<16x1xf32>
    %222 = math.rsqrt %221 : vector<16x1xf32>
    %223 = vector.broadcast %222 : vector<16x1xf32> to vector<16x64xf32>
    %224 = arith.mulf %219, %223 : vector<16x64xf32>
    %225 = vector.broadcast %205 : vector<1x64xf32> to vector<16x64xf32>
    %226 = arith.mulf %224, %225 : vector<16x64xf32>
    %227 = vector.broadcast %206 : vector<1x64xf32> to vector<16x64xf32>
    %228 = arith.addf %226, %227 : vector<16x64xf32>
    %c0_60 = arith.constant 0 : index
    %c512_61 = arith.constant 512 : index
    %229 = vector.load %arg9[%c0_60, %c512_61] : memref<64x4352xbf16, #tpu.memory_space<vmem>>, vector<64x256xbf16>
    %230 = arith.truncf %228 : vector<16x64xf32> to vector<16x64xbf16>
    %cst_62 = arith.constant dense<0.000000e+00> : vector<16x256xf32>
    %231 = tpu.matmul %230, %229, %cst_62 {dimension_numbers = #tpu.dot_dimension_numbers<[1], [0], [0], [1], [0, 0, 1, 1], [], []>} : vector<16x64xbf16>, vector<64x256xbf16>, vector<16x256xf32> -> vector<16x256xf32>
    %c0_63 = arith.constant 0 : index
    %c768 = arith.constant 768 : index
    %232 = vector.load %arg12[%c0_63, %c768] : memref<1x8064xf32, #tpu.memory_space<vmem>>, vector<1x256xf32>
    %233 = vector.broadcast %232 : vector<1x256xf32> to vector<16x256xf32>
    %234 = arith.addf %231, %233 : vector<16x256xf32>
    %cst_64 = arith.constant 0.000000e+00 : f32
    %235 = vector.broadcast %cst_64 : f32 to vector<16x256xf32>
    %236 = arith.maximumf %234, %235 : vector<16x256xf32>
    %c0_65 = arith.constant 0 : index
    %c0_66 = arith.constant 0 : index
    %237 = vector.load %arg10[%c0_65, %c0_66] : memref<256x512xbf16, #tpu.memory_space<vmem>>, vector<256x64xbf16>
    %238 = arith.truncf %236 : vector<16x256xf32> to vector<16x256xbf16>
    %cst_67 = arith.constant dense<0.000000e+00> : vector<16x64xf32>
    %239 = tpu.matmul %238, %237, %cst_67 {dimension_numbers = #tpu.dot_dimension_numbers<[1], [0], [0], [1], [0, 0, 1, 1], [], []>} : vector<16x256xbf16>, vector<256x64xbf16>, vector<16x64xf32> -> vector<16x64xf32>
    %c0_68 = arith.constant 0 : index
    %c1024 = arith.constant 1024 : index
    %240 = vector.load %arg12[%c0_68, %c1024] : memref<1x8064xf32, #tpu.memory_space<vmem>>, vector<1x64xf32>
    %241 = vector.broadcast %240 : vector<1x64xf32> to vector<16x64xf32>
    %242 = arith.addf %239, %241 : vector<16x64xf32>
    %243 = arith.addf %228, %242 : vector<16x64xf32>
    %c0_69 = arith.constant 0 : index
    %c1152 = arith.constant 1152 : index
    %244 = vector.load %arg12[%c0_69, %c1152] : memref<1x8064xf32, #tpu.memory_space<vmem>>, vector<1x64xf32>
    %c0_70 = arith.constant 0 : index
    %c1280 = arith.constant 1280 : index
    %245 = vector.load %arg12[%c0_70, %c1280] : memref<1x8064xf32, #tpu.memory_space<vmem>>, vector<1x64xf32>
    %cst_71 = arith.constant dense<0.000000e+00> : vector<16xf32>
    %246 = vector.multi_reduction <add>, %243, %cst_71 [1] : vector<16x64xf32> to vector<16xf32>
    %247 = vector.shape_cast %246 : vector<16xf32> to vector<16x1xf32>
    %cst_72 = arith.constant 6.400000e+01 : f32
    %248 = vector.broadcast %cst_72 : f32 to vector<16x1xf32>
    %249 = arith.divf %247, %248 : vector<16x1xf32>
    %250 = vector.broadcast %249 : vector<16x1xf32> to vector<16x64xf32>
    %251 = arith.subf %243, %250 : vector<16x64xf32>
    %252 = arith.mulf %251, %251 : vector<16x64xf32>
    %cst_73 = arith.constant dense<0.000000e+00> : vector<16xf32>
    %253 = vector.multi_reduction <add>, %252, %cst_73 [1] : vector<16x64xf32> to vector<16xf32>
    %254 = vector.shape_cast %253 : vector<16xf32> to vector<16x1xf32>
    %cst_74 = arith.constant 6.400000e+01 : f32
    %255 = vector.broadcast %cst_74 : f32 to vector<16x1xf32>
    %256 = arith.divf %254, %255 : vector<16x1xf32>
    %257 = vector.broadcast %249 : vector<16x1xf32> to vector<16x64xf32>
    %258 = arith.subf %243, %257 : vector<16x64xf32>
    %cst_75 = arith.constant 9.99999974E-6 : f32
    %259 = vector.broadcast %cst_75 : f32 to vector<16x1xf32>
    %260 = arith.addf %256, %259 : vector<16x1xf32>
    %261 = math.rsqrt %260 : vector<16x1xf32>
    %262 = vector.broadcast %261 : vector<16x1xf32> to vector<16x64xf32>
    %263 = arith.mulf %258, %262 : vector<16x64xf32>
    %264 = vector.broadcast %244 : vector<1x64xf32> to vector<16x64xf32>
    %265 = arith.mulf %263, %264 : vector<16x64xf32>
    %266 = vector.broadcast %245 : vector<1x64xf32> to vector<16x64xf32>
    %267 = arith.addf %265, %266 : vector<16x64xf32>
    %c0_76 = arith.constant 0 : index
    %c768_77 = arith.constant 768 : index
    %268 = vector.load %arg9[%c0_76, %c768_77] : memref<64x4352xbf16, #tpu.memory_space<vmem>>, vector<64x384xbf16>
    %269 = arith.truncf %267 : vector<16x64xf32> to vector<16x64xbf16>
    %cst_78 = arith.constant dense<0.000000e+00> : vector<16x384xf32>
    %270 = tpu.matmul %269, %268, %cst_78 {dimension_numbers = #tpu.dot_dimension_numbers<[1], [0], [0], [1], [0, 0, 1, 1], [], []>} : vector<16x64xbf16>, vector<64x384xbf16>, vector<16x384xf32> -> vector<16x384xf32>
    %271 = vector.extract_strided_slice %270 {offsets = [0, 0], sizes = [16, 64], strides = [1, 1]} : vector<16x384xf32> to vector<16x64xf32>
    %c0_79 = arith.constant 0 : index
    %c1408 = arith.constant 1408 : index
    %272 = vector.load %arg12[%c0_79, %c1408] : memref<1x8064xf32, #tpu.memory_space<vmem>>, vector<1x64xf32>
    %273 = vector.broadcast %272 : vector<1x64xf32> to vector<16x64xf32>
    %274 = arith.addf %271, %273 : vector<16x64xf32>
    %275 = vector.extract_strided_slice %270 {offsets = [0, 128], sizes = [16, 64], strides = [1, 1]} : vector<16x384xf32> to vector<16x64xf32>
    %c0_80 = arith.constant 0 : index
    %c1536 = arith.constant 1536 : index
    %276 = vector.load %arg12[%c0_80, %c1536] : memref<1x8064xf32, #tpu.memory_space<vmem>>, vector<1x64xf32>
    %277 = vector.broadcast %276 : vector<1x64xf32> to vector<16x64xf32>
    %278 = arith.addf %275, %277 : vector<16x64xf32>
    %279 = vector.extract_strided_slice %270 {offsets = [0, 256], sizes = [16, 64], strides = [1, 1]} : vector<16x384xf32> to vector<16x64xf32>
    %c0_81 = arith.constant 0 : index
    %c1664 = arith.constant 1664 : index
    %280 = vector.load %arg12[%c0_81, %c1664] : memref<1x8064xf32, #tpu.memory_space<vmem>>, vector<1x64xf32>
    %281 = vector.broadcast %280 : vector<1x64xf32> to vector<16x64xf32>
    %282 = arith.addf %279, %281 : vector<16x64xf32>
    %283 = vector.extract_strided_slice %0 {offsets = [0, 0], sizes = [1, 64], strides = [1, 1]} : vector<8x64xf32> to vector<1x64xf32>
    %284 = vector.broadcast %283 : vector<1x64xf32> to vector<16x64xf32>
    %285 = arith.mulf %278, %284 : vector<16x64xf32>
    %286 = vector.extract_strided_slice %0 {offsets = [1, 0], sizes = [1, 64], strides = [1, 1]} : vector<8x64xf32> to vector<1x64xf32>
    %287 = vector.broadcast %286 : vector<1x64xf32> to vector<16x64xf32>
    %288 = arith.mulf %278, %287 : vector<16x64xf32>
    %289 = vector.extract_strided_slice %0 {offsets = [2, 0], sizes = [1, 64], strides = [1, 1]} : vector<8x64xf32> to vector<1x64xf32>
    %290 = vector.broadcast %289 : vector<1x64xf32> to vector<16x64xf32>
    %291 = arith.mulf %278, %290 : vector<16x64xf32>
    %292 = vector.extract_strided_slice %0 {offsets = [3, 0], sizes = [1, 64], strides = [1, 1]} : vector<8x64xf32> to vector<1x64xf32>
    %293 = vector.broadcast %292 : vector<1x64xf32> to vector<16x64xf32>
    %294 = arith.mulf %278, %293 : vector<16x64xf32>
    %295 = vector.extract_strided_slice %0 {offsets = [4, 0], sizes = [1, 64], strides = [1, 1]} : vector<8x64xf32> to vector<1x64xf32>
    %296 = vector.broadcast %295 : vector<1x64xf32> to vector<16x64xf32>
    %297 = arith.mulf %278, %296 : vector<16x64xf32>
    %298 = vector.extract_strided_slice %0 {offsets = [5, 0], sizes = [1, 64], strides = [1, 1]} : vector<8x64xf32> to vector<1x64xf32>
    %299 = vector.broadcast %298 : vector<1x64xf32> to vector<16x64xf32>
    %300 = arith.mulf %278, %299 : vector<16x64xf32>
    %301 = vector.extract_strided_slice %0 {offsets = [6, 0], sizes = [1, 64], strides = [1, 1]} : vector<8x64xf32> to vector<1x64xf32>
    %302 = vector.broadcast %301 : vector<1x64xf32> to vector<16x64xf32>
    %303 = arith.mulf %278, %302 : vector<16x64xf32>
    %304 = vector.extract_strided_slice %0 {offsets = [7, 0], sizes = [1, 64], strides = [1, 1]} : vector<8x64xf32> to vector<1x64xf32>
    %305 = vector.broadcast %304 : vector<1x64xf32> to vector<16x64xf32>
    %306 = arith.mulf %278, %305 : vector<16x64xf32>
    %307 = tpu.concatenate %285, %288, %291, %294, %297, %300, %303, %306 in 0 : vector<16x64xf32>, vector<16x64xf32>, vector<16x64xf32>, vector<16x64xf32>, vector<16x64xf32>, vector<16x64xf32>, vector<16x64xf32>, vector<16x64xf32> -> vector<128x64xf32>
    %308 = arith.truncf %307 : vector<128x64xf32> to vector<128x64xbf16>
    %309 = vector.extract_strided_slice %0 {offsets = [0, 0], sizes = [1, 64], strides = [1, 1]} : vector<8x64xf32> to vector<1x64xf32>
    %310 = vector.broadcast %309 : vector<1x64xf32> to vector<16x64xf32>
    %311 = arith.mulf %282, %310 : vector<16x64xf32>
    %312 = vector.extract_strided_slice %0 {offsets = [1, 0], sizes = [1, 64], strides = [1, 1]} : vector<8x64xf32> to vector<1x64xf32>
    %313 = vector.broadcast %312 : vector<1x64xf32> to vector<16x64xf32>
    %314 = arith.mulf %282, %313 : vector<16x64xf32>
    %315 = vector.extract_strided_slice %0 {offsets = [2, 0], sizes = [1, 64], strides = [1, 1]} : vector<8x64xf32> to vector<1x64xf32>
    %316 = vector.broadcast %315 : vector<1x64xf32> to vector<16x64xf32>
    %317 = arith.mulf %282, %316 : vector<16x64xf32>
    %318 = vector.extract_strided_slice %0 {offsets = [3, 0], sizes = [1, 64], strides = [1, 1]} : vector<8x64xf32> to vector<1x64xf32>
    %319 = vector.broadcast %318 : vector<1x64xf32> to vector<16x64xf32>
    %320 = arith.mulf %282, %319 : vector<16x64xf32>
    %321 = vector.extract_strided_slice %0 {offsets = [4, 0], sizes = [1, 64], strides = [1, 1]} : vector<8x64xf32> to vector<1x64xf32>
    %322 = vector.broadcast %321 : vector<1x64xf32> to vector<16x64xf32>
    %323 = arith.mulf %282, %322 : vector<16x64xf32>
    %324 = vector.extract_strided_slice %0 {offsets = [5, 0], sizes = [1, 64], strides = [1, 1]} : vector<8x64xf32> to vector<1x64xf32>
    %325 = vector.broadcast %324 : vector<1x64xf32> to vector<16x64xf32>
    %326 = arith.mulf %282, %325 : vector<16x64xf32>
    %327 = vector.extract_strided_slice %0 {offsets = [6, 0], sizes = [1, 64], strides = [1, 1]} : vector<8x64xf32> to vector<1x64xf32>
    %328 = vector.broadcast %327 : vector<1x64xf32> to vector<16x64xf32>
    %329 = arith.mulf %282, %328 : vector<16x64xf32>
    %330 = vector.extract_strided_slice %0 {offsets = [7, 0], sizes = [1, 64], strides = [1, 1]} : vector<8x64xf32> to vector<1x64xf32>
    %331 = vector.broadcast %330 : vector<1x64xf32> to vector<16x64xf32>
    %332 = arith.mulf %282, %331 : vector<16x64xf32>
    %333 = tpu.concatenate %311, %314, %317, %320, %323, %326, %329, %332 in 0 : vector<16x64xf32>, vector<16x64xf32>, vector<16x64xf32>, vector<16x64xf32>, vector<16x64xf32>, vector<16x64xf32>, vector<16x64xf32>, vector<16x64xf32> -> vector<128x64xf32>
    %334 = arith.truncf %333 : vector<128x64xf32> to vector<128x64xbf16>
    %335 = arith.truncf %274 : vector<16x64xf32> to vector<16x64xbf16>
    "tpu.trace_start"() <{level = 10 : i32, message = "qd,kd->qk"}> : () -> ()
    %cst_82 = arith.constant dense<0.000000e+00> : vector<16x128xf32>
    %336 = tpu.matmul %335, %308, %cst_82 {dimension_numbers = #tpu.dot_dimension_numbers<[1], [1], [0], [0], [0, 0, 1, 0], [], []>} : vector<16x64xbf16>, vector<128x64xbf16>, vector<16x128xf32> -> vector<16x128xf32>
    "tpu.trace_stop"() : () -> ()
    %cst_83 = arith.constant 0.353553385 : f32
    %337 = vector.broadcast %cst_83 : f32 to vector<16x128xf32>
    %338 = arith.mulf %336, %337 : vector<16x128xf32>
    %339 = vector.extract_strided_slice %338 {offsets = [0, 0], sizes = [16, 16], strides = [1, 1]} : vector<16x128xf32> to vector<16x16xf32>
    %340 = arith.addf %339, %25 : vector<16x16xf32>
    %cst_84 = arith.constant dense<0xFF800000> : vector<16xf32>
    %341 = vector.multi_reduction <maximumf>, %340, %cst_84 [1] : vector<16x16xf32> to vector<16xf32>
    %342 = vector.shape_cast %341 : vector<16xf32> to vector<16x1xf32>
    %343 = vector.broadcast %342 : vector<16x1xf32> to vector<16x16xf32>
    %344 = arith.subf %340, %343 : vector<16x16xf32>
    %345 = math.exp %344 : vector<16x16xf32>
    %cst_85 = arith.constant dense<0.000000e+00> : vector<16xf32>
    %346 = vector.multi_reduction <add>, %345, %cst_85 [1] : vector<16x16xf32> to vector<16xf32>
    %347 = vector.shape_cast %346 : vector<16xf32> to vector<16x1xf32>
    %348 = tpu.reciprocal %347 {approx = true} : vector<16x1xf32> -> vector<16x1xf32>
    %349 = vector.broadcast %348 : vector<16x1xf32> to vector<16x16xf32>
    %350 = arith.mulf %345, %349 : vector<16x16xf32>
    %351 = vector.extract_strided_slice %338 {offsets = [0, 16], sizes = [16, 16], strides = [1, 1]} : vector<16x128xf32> to vector<16x16xf32>
    %352 = arith.addf %351, %25 : vector<16x16xf32>
    %cst_86 = arith.constant dense<0xFF800000> : vector<16xf32>
    %353 = vector.multi_reduction <maximumf>, %352, %cst_86 [1] : vector<16x16xf32> to vector<16xf32>
    %354 = vector.shape_cast %353 : vector<16xf32> to vector<16x1xf32>
    %355 = vector.broadcast %354 : vector<16x1xf32> to vector<16x16xf32>
    %356 = arith.subf %352, %355 : vector<16x16xf32>
    %357 = math.exp %356 : vector<16x16xf32>
    %cst_87 = arith.constant dense<0.000000e+00> : vector<16xf32>
    %358 = vector.multi_reduction <add>, %357, %cst_87 [1] : vector<16x16xf32> to vector<16xf32>
    %359 = vector.shape_cast %358 : vector<16xf32> to vector<16x1xf32>
    %360 = tpu.reciprocal %359 {approx = true} : vector<16x1xf32> -> vector<16x1xf32>
    %361 = vector.broadcast %360 : vector<16x1xf32> to vector<16x16xf32>
    %362 = arith.mulf %357, %361 : vector<16x16xf32>
    %363 = vector.extract_strided_slice %338 {offsets = [0, 32], sizes = [16, 16], strides = [1, 1]} : vector<16x128xf32> to vector<16x16xf32>
    %364 = arith.addf %363, %25 : vector<16x16xf32>
    %cst_88 = arith.constant dense<0xFF800000> : vector<16xf32>
    %365 = vector.multi_reduction <maximumf>, %364, %cst_88 [1] : vector<16x16xf32> to vector<16xf32>
    %366 = vector.shape_cast %365 : vector<16xf32> to vector<16x1xf32>
    %367 = vector.broadcast %366 : vector<16x1xf32> to vector<16x16xf32>
    %368 = arith.subf %364, %367 : vector<16x16xf32>
    %369 = math.exp %368 : vector<16x16xf32>
    %cst_89 = arith.constant dense<0.000000e+00> : vector<16xf32>
    %370 = vector.multi_reduction <add>, %369, %cst_89 [1] : vector<16x16xf32> to vector<16xf32>
    %371 = vector.shape_cast %370 : vector<16xf32> to vector<16x1xf32>
    %372 = tpu.reciprocal %371 {approx = true} : vector<16x1xf32> -> vector<16x1xf32>
    %373 = vector.broadcast %372 : vector<16x1xf32> to vector<16x16xf32>
    %374 = arith.mulf %369, %373 : vector<16x16xf32>
    %375 = vector.extract_strided_slice %338 {offsets = [0, 48], sizes = [16, 16], strides = [1, 1]} : vector<16x128xf32> to vector<16x16xf32>
    %376 = arith.addf %375, %25 : vector<16x16xf32>
    %cst_90 = arith.constant dense<0xFF800000> : vector<16xf32>
    %377 = vector.multi_reduction <maximumf>, %376, %cst_90 [1] : vector<16x16xf32> to vector<16xf32>
    %378 = vector.shape_cast %377 : vector<16xf32> to vector<16x1xf32>
    %379 = vector.broadcast %378 : vector<16x1xf32> to vector<16x16xf32>
    %380 = arith.subf %376, %379 : vector<16x16xf32>
    %381 = math.exp %380 : vector<16x16xf32>
    %cst_91 = arith.constant dense<0.000000e+00> : vector<16xf32>
    %382 = vector.multi_reduction <add>, %381, %cst_91 [1] : vector<16x16xf32> to vector<16xf32>
    %383 = vector.shape_cast %382 : vector<16xf32> to vector<16x1xf32>
    %384 = tpu.reciprocal %383 {approx = true} : vector<16x1xf32> -> vector<16x1xf32>
    %385 = vector.broadcast %384 : vector<16x1xf32> to vector<16x16xf32>
    %386 = arith.mulf %381, %385 : vector<16x16xf32>
    %387 = vector.extract_strided_slice %338 {offsets = [0, 64], sizes = [16, 16], strides = [1, 1]} : vector<16x128xf32> to vector<16x16xf32>
    %388 = arith.addf %387, %25 : vector<16x16xf32>
    %cst_92 = arith.constant dense<0xFF800000> : vector<16xf32>
    %389 = vector.multi_reduction <maximumf>, %388, %cst_92 [1] : vector<16x16xf32> to vector<16xf32>
    %390 = vector.shape_cast %389 : vector<16xf32> to vector<16x1xf32>
    %391 = vector.broadcast %390 : vector<16x1xf32> to vector<16x16xf32>
    %392 = arith.subf %388, %391 : vector<16x16xf32>
    %393 = math.exp %392 : vector<16x16xf32>
    %cst_93 = arith.constant dense<0.000000e+00> : vector<16xf32>
    %394 = vector.multi_reduction <add>, %393, %cst_93 [1] : vector<16x16xf32> to vector<16xf32>
    %395 = vector.shape_cast %394 : vector<16xf32> to vector<16x1xf32>
    %396 = tpu.reciprocal %395 {approx = true} : vector<16x1xf32> -> vector<16x1xf32>
    %397 = vector.broadcast %396 : vector<16x1xf32> to vector<16x16xf32>
    %398 = arith.mulf %393, %397 : vector<16x16xf32>
    %399 = vector.extract_strided_slice %338 {offsets = [0, 80], sizes = [16, 16], strides = [1, 1]} : vector<16x128xf32> to vector<16x16xf32>
    %400 = arith.addf %399, %25 : vector<16x16xf32>
    %cst_94 = arith.constant dense<0xFF800000> : vector<16xf32>
    %401 = vector.multi_reduction <maximumf>, %400, %cst_94 [1] : vector<16x16xf32> to vector<16xf32>
    %402 = vector.shape_cast %401 : vector<16xf32> to vector<16x1xf32>
    %403 = vector.broadcast %402 : vector<16x1xf32> to vector<16x16xf32>
    %404 = arith.subf %400, %403 : vector<16x16xf32>
    %405 = math.exp %404 : vector<16x16xf32>
    %cst_95 = arith.constant dense<0.000000e+00> : vector<16xf32>
    %406 = vector.multi_reduction <add>, %405, %cst_95 [1] : vector<16x16xf32> to vector<16xf32>
    %407 = vector.shape_cast %406 : vector<16xf32> to vector<16x1xf32>
    %408 = tpu.reciprocal %407 {approx = true} : vector<16x1xf32> -> vector<16x1xf32>
    %409 = vector.broadcast %408 : vector<16x1xf32> to vector<16x16xf32>
    %410 = arith.mulf %405, %409 : vector<16x16xf32>
    %411 = vector.extract_strided_slice %338 {offsets = [0, 96], sizes = [16, 16], strides = [1, 1]} : vector<16x128xf32> to vector<16x16xf32>
    %412 = arith.addf %411, %25 : vector<16x16xf32>
    %cst_96 = arith.constant dense<0xFF800000> : vector<16xf32>
    %413 = vector.multi_reduction <maximumf>, %412, %cst_96 [1] : vector<16x16xf32> to vector<16xf32>
    %414 = vector.shape_cast %413 : vector<16xf32> to vector<16x1xf32>
    %415 = vector.broadcast %414 : vector<16x1xf32> to vector<16x16xf32>
    %416 = arith.subf %412, %415 : vector<16x16xf32>
    %417 = math.exp %416 : vector<16x16xf32>
    %cst_97 = arith.constant dense<0.000000e+00> : vector<16xf32>
    %418 = vector.multi_reduction <add>, %417, %cst_97 [1] : vector<16x16xf32> to vector<16xf32>
    %419 = vector.shape_cast %418 : vector<16xf32> to vector<16x1xf32>
    %420 = tpu.reciprocal %419 {approx = true} : vector<16x1xf32> -> vector<16x1xf32>
    %421 = vector.broadcast %420 : vector<16x1xf32> to vector<16x16xf32>
    %422 = arith.mulf %417, %421 : vector<16x16xf32>
    %423 = vector.extract_strided_slice %338 {offsets = [0, 112], sizes = [16, 16], strides = [1, 1]} : vector<16x128xf32> to vector<16x16xf32>
    %424 = arith.addf %423, %25 : vector<16x16xf32>
    %cst_98 = arith.constant dense<0xFF800000> : vector<16xf32>
    %425 = vector.multi_reduction <maximumf>, %424, %cst_98 [1] : vector<16x16xf32> to vector<16xf32>
    %426 = vector.shape_cast %425 : vector<16xf32> to vector<16x1xf32>
    %427 = vector.broadcast %426 : vector<16x1xf32> to vector<16x16xf32>
    %428 = arith.subf %424, %427 : vector<16x16xf32>
    %429 = math.exp %428 : vector<16x16xf32>
    %cst_99 = arith.constant dense<0.000000e+00> : vector<16xf32>
    %430 = vector.multi_reduction <add>, %429, %cst_99 [1] : vector<16x16xf32> to vector<16xf32>
    %431 = vector.shape_cast %430 : vector<16xf32> to vector<16x1xf32>
    %432 = tpu.reciprocal %431 {approx = true} : vector<16x1xf32> -> vector<16x1xf32>
    %433 = vector.broadcast %432 : vector<16x1xf32> to vector<16x16xf32>
    %434 = arith.mulf %429, %433 : vector<16x16xf32>
    %435 = tpu.concatenate %350, %362, %374, %386, %398, %410, %422, %434 in 1 : vector<16x16xf32>, vector<16x16xf32>, vector<16x16xf32>, vector<16x16xf32>, vector<16x16xf32>, vector<16x16xf32>, vector<16x16xf32>, vector<16x16xf32> -> vector<16x128xf32>
    %436 = arith.truncf %435 : vector<16x128xf32> to vector<16x128xbf16>
    %cst_100 = arith.constant dense<0.000000e+00> : vector<16x64xf32>
    %437 = tpu.matmul %436, %334, %cst_100 {dimension_numbers = #tpu.dot_dimension_numbers<[1], [0], [0], [1], [0, 0, 1, 1], [], []>} : vector<16x128xbf16>, vector<128x64xbf16>, vector<16x64xf32> -> vector<16x64xf32>
    %c0_101 = arith.constant 0 : index
    %c1152_102 = arith.constant 1152 : index
    %438 = vector.load %arg9[%c0_101, %c1152_102] : memref<64x4352xbf16, #tpu.memory_space<vmem>>, vector<64x64xbf16>
    %439 = arith.truncf %437 : vector<16x64xf32> to vector<16x64xbf16>
    %cst_103 = arith.constant dense<0.000000e+00> : vector<16x64xf32>
    %440 = tpu.matmul %439, %438, %cst_103 {dimension_numbers = #tpu.dot_dimension_numbers<[1], [0], [0], [1], [0, 0, 1, 1], [], []>} : vector<16x64xbf16>, vector<64x64xbf16>, vector<16x64xf32> -> vector<16x64xf32>
    %c0_104 = arith.constant 0 : index
    %c1792 = arith.constant 1792 : index
    %441 = vector.load %arg12[%c0_104, %c1792] : memref<1x8064xf32, #tpu.memory_space<vmem>>, vector<1x64xf32>
    %442 = vector.broadcast %441 : vector<1x64xf32> to vector<16x64xf32>
    %443 = arith.addf %440, %442 : vector<16x64xf32>
    %444 = arith.addf %267, %443 : vector<16x64xf32>
    %c0_105 = arith.constant 0 : index
    %c1920 = arith.constant 1920 : index
    %445 = vector.load %arg12[%c0_105, %c1920] : memref<1x8064xf32, #tpu.memory_space<vmem>>, vector<1x64xf32>
    %c0_106 = arith.constant 0 : index
    %c2048 = arith.constant 2048 : index
    %446 = vector.load %arg12[%c0_106, %c2048] : memref<1x8064xf32, #tpu.memory_space<vmem>>, vector<1x64xf32>
    %cst_107 = arith.constant dense<0.000000e+00> : vector<16xf32>
    %447 = vector.multi_reduction <add>, %444, %cst_107 [1] : vector<16x64xf32> to vector<16xf32>
    %448 = vector.shape_cast %447 : vector<16xf32> to vector<16x1xf32>
    %cst_108 = arith.constant 6.400000e+01 : f32
    %449 = vector.broadcast %cst_108 : f32 to vector<16x1xf32>
    %450 = arith.divf %448, %449 : vector<16x1xf32>
    %451 = vector.broadcast %450 : vector<16x1xf32> to vector<16x64xf32>
    %452 = arith.subf %444, %451 : vector<16x64xf32>
    %453 = arith.mulf %452, %452 : vector<16x64xf32>
    %cst_109 = arith.constant dense<0.000000e+00> : vector<16xf32>
    %454 = vector.multi_reduction <add>, %453, %cst_109 [1] : vector<16x64xf32> to vector<16xf32>
    %455 = vector.shape_cast %454 : vector<16xf32> to vector<16x1xf32>
    %cst_110 = arith.constant 6.400000e+01 : f32
    %456 = vector.broadcast %cst_110 : f32 to vector<16x1xf32>
    %457 = arith.divf %455, %456 : vector<16x1xf32>
    %458 = vector.broadcast %450 : vector<16x1xf32> to vector<16x64xf32>
    %459 = arith.subf %444, %458 : vector<16x64xf32>
    %cst_111 = arith.constant 9.99999974E-6 : f32
    %460 = vector.broadcast %cst_111 : f32 to vector<16x1xf32>
    %461 = arith.addf %457, %460 : vector<16x1xf32>
    %462 = math.rsqrt %461 : vector<16x1xf32>
    %463 = vector.broadcast %462 : vector<16x1xf32> to vector<16x64xf32>
    %464 = arith.mulf %459, %463 : vector<16x64xf32>
    %465 = vector.broadcast %445 : vector<1x64xf32> to vector<16x64xf32>
    %466 = arith.mulf %464, %465 : vector<16x64xf32>
    %467 = vector.broadcast %446 : vector<1x64xf32> to vector<16x64xf32>
    %468 = arith.addf %466, %467 : vector<16x64xf32>
    %c0_112 = arith.constant 0 : index
    %c1280_113 = arith.constant 1280 : index
    %469 = vector.load %arg9[%c0_112, %c1280_113] : memref<64x4352xbf16, #tpu.memory_space<vmem>>, vector<64x256xbf16>
    %470 = arith.truncf %468 : vector<16x64xf32> to vector<16x64xbf16>
    %cst_114 = arith.constant dense<0.000000e+00> : vector<16x256xf32>
    %471 = tpu.matmul %470, %469, %cst_114 {dimension_numbers = #tpu.dot_dimension_numbers<[1], [0], [0], [1], [0, 0, 1, 1], [], []>} : vector<16x64xbf16>, vector<64x256xbf16>, vector<16x256xf32> -> vector<16x256xf32>
    %c0_115 = arith.constant 0 : index
    %c2176 = arith.constant 2176 : index
    %472 = vector.load %arg12[%c0_115, %c2176] : memref<1x8064xf32, #tpu.memory_space<vmem>>, vector<1x256xf32>
    %473 = vector.broadcast %472 : vector<1x256xf32> to vector<16x256xf32>
    %474 = arith.addf %471, %473 : vector<16x256xf32>
    %cst_116 = arith.constant 0.000000e+00 : f32
    %475 = vector.broadcast %cst_116 : f32 to vector<16x256xf32>
    %476 = arith.maximumf %474, %475 : vector<16x256xf32>
    %c0_117 = arith.constant 0 : index
    %c128_118 = arith.constant 128 : index
    %477 = vector.load %arg10[%c0_117, %c128_118] : memref<256x512xbf16, #tpu.memory_space<vmem>>, vector<256x64xbf16>
    %478 = arith.truncf %476 : vector<16x256xf32> to vector<16x256xbf16>
    %cst_119 = arith.constant dense<0.000000e+00> : vector<16x64xf32>
    %479 = tpu.matmul %478, %477, %cst_119 {dimension_numbers = #tpu.dot_dimension_numbers<[1], [0], [0], [1], [0, 0, 1, 1], [], []>} : vector<16x256xbf16>, vector<256x64xbf16>, vector<16x64xf32> -> vector<16x64xf32>
    %c0_120 = arith.constant 0 : index
    %c2432 = arith.constant 2432 : index
    %480 = vector.load %arg12[%c0_120, %c2432] : memref<1x8064xf32, #tpu.memory_space<vmem>>, vector<1x64xf32>
    %481 = vector.broadcast %480 : vector<1x64xf32> to vector<16x64xf32>
    %482 = arith.addf %479, %481 : vector<16x64xf32>
    %483 = arith.addf %468, %482 : vector<16x64xf32>
    %c0_121 = arith.constant 0 : index
    %c2560 = arith.constant 2560 : index
    %484 = vector.load %arg12[%c0_121, %c2560] : memref<1x8064xf32, #tpu.memory_space<vmem>>, vector<1x64xf32>
    %c0_122 = arith.constant 0 : index
    %c2688 = arith.constant 2688 : index
    %485 = vector.load %arg12[%c0_122, %c2688] : memref<1x8064xf32, #tpu.memory_space<vmem>>, vector<1x64xf32>
    %cst_123 = arith.constant dense<0.000000e+00> : vector<16xf32>
    %486 = vector.multi_reduction <add>, %483, %cst_123 [1] : vector<16x64xf32> to vector<16xf32>
    %487 = vector.shape_cast %486 : vector<16xf32> to vector<16x1xf32>
    %cst_124 = arith.constant 6.400000e+01 : f32
    %488 = vector.broadcast %cst_124 : f32 to vector<16x1xf32>
    %489 = arith.divf %487, %488 : vector<16x1xf32>
    %490 = vector.broadcast %489 : vector<16x1xf32> to vector<16x64xf32>
    %491 = arith.subf %483, %490 : vector<16x64xf32>
    %492 = arith.mulf %491, %491 : vector<16x64xf32>
    %cst_125 = arith.constant dense<0.000000e+00> : vector<16xf32>
    %493 = vector.multi_reduction <add>, %492, %cst_125 [1] : vector<16x64xf32> to vector<16xf32>
    %494 = vector.shape_cast %493 : vector<16xf32> to vector<16x1xf32>
    %cst_126 = arith.constant 6.400000e+01 : f32
    %495 = vector.broadcast %cst_126 : f32 to vector<16x1xf32>
    %496 = arith.divf %494, %495 : vector<16x1xf32>
    %497 = vector.broadcast %489 : vector<16x1xf32> to vector<16x64xf32>
    %498 = arith.subf %483, %497 : vector<16x64xf32>
    %cst_127 = arith.constant 9.99999974E-6 : f32
    %499 = vector.broadcast %cst_127 : f32 to vector<16x1xf32>
    %500 = arith.addf %496, %499 : vector<16x1xf32>
    %501 = math.rsqrt %500 : vector<16x1xf32>
    %502 = vector.broadcast %501 : vector<16x1xf32> to vector<16x64xf32>
    %503 = arith.mulf %498, %502 : vector<16x64xf32>
    %504 = vector.broadcast %484 : vector<1x64xf32> to vector<16x64xf32>
    %505 = arith.mulf %503, %504 : vector<16x64xf32>
    %506 = vector.broadcast %485 : vector<1x64xf32> to vector<16x64xf32>
    %507 = arith.addf %505, %506 : vector<16x64xf32>
    %c0_128 = arith.constant 0 : index
    %c7168 = arith.constant 7168 : index
    %508 = vector.load %arg12[%c0_128, %c7168] : memref<1x8064xf32, #tpu.memory_space<vmem>>, vector<1x64xf32>
    %c0_129 = arith.constant 0 : index
    %c7296 = arith.constant 7296 : index
    %509 = vector.load %arg12[%c0_129, %c7296] : memref<1x8064xf32, #tpu.memory_space<vmem>>, vector<1x64xf32>
    %cst_130 = arith.constant dense<0.000000e+00> : vector<16xf32>
    %510 = vector.multi_reduction <add>, %507, %cst_130 [1] : vector<16x64xf32> to vector<16xf32>
    %511 = vector.shape_cast %510 : vector<16xf32> to vector<16x1xf32>
    %cst_131 = arith.constant 6.400000e+01 : f32
    %512 = vector.broadcast %cst_131 : f32 to vector<16x1xf32>
    %513 = arith.divf %511, %512 : vector<16x1xf32>
    %514 = vector.broadcast %513 : vector<16x1xf32> to vector<16x64xf32>
    %515 = arith.subf %507, %514 : vector<16x64xf32>
    %516 = arith.mulf %515, %515 : vector<16x64xf32>
    %cst_132 = arith.constant dense<0.000000e+00> : vector<16xf32>
    %517 = vector.multi_reduction <add>, %516, %cst_132 [1] : vector<16x64xf32> to vector<16xf32>
    %518 = vector.shape_cast %517 : vector<16xf32> to vector<16x1xf32>
    %cst_133 = arith.constant 6.400000e+01 : f32
    %519 = vector.broadcast %cst_133 : f32 to vector<16x1xf32>
    %520 = arith.divf %518, %519 : vector<16x1xf32>
    %521 = vector.broadcast %513 : vector<16x1xf32> to vector<16x64xf32>
    %522 = arith.subf %507, %521 : vector<16x64xf32>
    %cst_134 = arith.constant 9.99999974E-6 : f32
    %523 = vector.broadcast %cst_134 : f32 to vector<16x1xf32>
    %524 = arith.addf %520, %523 : vector<16x1xf32>
    %525 = math.rsqrt %524 : vector<16x1xf32>
    %526 = vector.broadcast %525 : vector<16x1xf32> to vector<16x64xf32>
    %527 = arith.mulf %522, %526 : vector<16x64xf32>
    %528 = vector.broadcast %508 : vector<1x64xf32> to vector<16x64xf32>
    %529 = arith.mulf %527, %528 : vector<16x64xf32>
    %530 = vector.broadcast %509 : vector<1x64xf32> to vector<16x64xf32>
    %531 = arith.addf %529, %530 : vector<16x64xf32>
    %c0_135 = arith.constant 0 : index
    %c1536_136 = arith.constant 1536 : index
    %532 = vector.load %arg9[%c0_135, %c1536_136] : memref<64x4352xbf16, #tpu.memory_space<vmem>>, vector<64x384xbf16>
    %533 = arith.truncf %24 : vector<16x64xf32> to vector<16x64xbf16>
    %cst_137 = arith.constant dense<0.000000e+00> : vector<16x384xf32>
    %534 = tpu.matmul %533, %532, %cst_137 {dimension_numbers = #tpu.dot_dimension_numbers<[1], [0], [0], [1], [0, 0, 1, 1], [], []>} : vector<16x64xbf16>, vector<64x384xbf16>, vector<16x384xf32> -> vector<16x384xf32>
    %535 = vector.extract_strided_slice %534 {offsets = [0, 0], sizes = [16, 64], strides = [1, 1]} : vector<16x384xf32> to vector<16x64xf32>
    %c0_138 = arith.constant 0 : index
    %c2816 = arith.constant 2816 : index
    %536 = vector.load %arg12[%c0_138, %c2816] : memref<1x8064xf32, #tpu.memory_space<vmem>>, vector<1x64xf32>
    %537 = vector.broadcast %536 : vector<1x64xf32> to vector<16x64xf32>
    %538 = arith.addf %535, %537 : vector<16x64xf32>
    %539 = vector.extract_strided_slice %534 {offsets = [0, 128], sizes = [16, 64], strides = [1, 1]} : vector<16x384xf32> to vector<16x64xf32>
    %c0_139 = arith.constant 0 : index
    %c2944 = arith.constant 2944 : index
    %540 = vector.load %arg12[%c0_139, %c2944] : memref<1x8064xf32, #tpu.memory_space<vmem>>, vector<1x64xf32>
    %541 = vector.broadcast %540 : vector<1x64xf32> to vector<16x64xf32>
    %542 = arith.addf %539, %541 : vector<16x64xf32>
    %543 = vector.extract_strided_slice %534 {offsets = [0, 256], sizes = [16, 64], strides = [1, 1]} : vector<16x384xf32> to vector<16x64xf32>
    %c0_140 = arith.constant 0 : index
    %c3072 = arith.constant 3072 : index
    %544 = vector.load %arg12[%c0_140, %c3072] : memref<1x8064xf32, #tpu.memory_space<vmem>>, vector<1x64xf32>
    %545 = vector.broadcast %544 : vector<1x64xf32> to vector<16x64xf32>
    %546 = arith.addf %543, %545 : vector<16x64xf32>
    %547 = vector.extract_strided_slice %0 {offsets = [0, 0], sizes = [1, 64], strides = [1, 1]} : vector<8x64xf32> to vector<1x64xf32>
    %548 = vector.broadcast %547 : vector<1x64xf32> to vector<16x64xf32>
    %549 = arith.mulf %542, %548 : vector<16x64xf32>
    %550 = vector.extract_strided_slice %0 {offsets = [1, 0], sizes = [1, 64], strides = [1, 1]} : vector<8x64xf32> to vector<1x64xf32>
    %551 = vector.broadcast %550 : vector<1x64xf32> to vector<16x64xf32>
    %552 = arith.mulf %542, %551 : vector<16x64xf32>
    %553 = vector.extract_strided_slice %0 {offsets = [2, 0], sizes = [1, 64], strides = [1, 1]} : vector<8x64xf32> to vector<1x64xf32>
    %554 = vector.broadcast %553 : vector<1x64xf32> to vector<16x64xf32>
    %555 = arith.mulf %542, %554 : vector<16x64xf32>
    %556 = vector.extract_strided_slice %0 {offsets = [3, 0], sizes = [1, 64], strides = [1, 1]} : vector<8x64xf32> to vector<1x64xf32>
    %557 = vector.broadcast %556 : vector<1x64xf32> to vector<16x64xf32>
    %558 = arith.mulf %542, %557 : vector<16x64xf32>
    %559 = vector.extract_strided_slice %0 {offsets = [4, 0], sizes = [1, 64], strides = [1, 1]} : vector<8x64xf32> to vector<1x64xf32>
    %560 = vector.broadcast %559 : vector<1x64xf32> to vector<16x64xf32>
    %561 = arith.mulf %542, %560 : vector<16x64xf32>
    %562 = vector.extract_strided_slice %0 {offsets = [5, 0], sizes = [1, 64], strides = [1, 1]} : vector<8x64xf32> to vector<1x64xf32>
    %563 = vector.broadcast %562 : vector<1x64xf32> to vector<16x64xf32>
    %564 = arith.mulf %542, %563 : vector<16x64xf32>
    %565 = vector.extract_strided_slice %0 {offsets = [6, 0], sizes = [1, 64], strides = [1, 1]} : vector<8x64xf32> to vector<1x64xf32>
    %566 = vector.broadcast %565 : vector<1x64xf32> to vector<16x64xf32>
    %567 = arith.mulf %542, %566 : vector<16x64xf32>
    %568 = vector.extract_strided_slice %0 {offsets = [7, 0], sizes = [1, 64], strides = [1, 1]} : vector<8x64xf32> to vector<1x64xf32>
    %569 = vector.broadcast %568 : vector<1x64xf32> to vector<16x64xf32>
    %570 = arith.mulf %542, %569 : vector<16x64xf32>
    %571 = tpu.concatenate %549, %552, %555, %558, %561, %564, %567, %570 in 0 : vector<16x64xf32>, vector<16x64xf32>, vector<16x64xf32>, vector<16x64xf32>, vector<16x64xf32>, vector<16x64xf32>, vector<16x64xf32>, vector<16x64xf32> -> vector<128x64xf32>
    %572 = arith.truncf %571 : vector<128x64xf32> to vector<128x64xbf16>
    %573 = vector.extract_strided_slice %0 {offsets = [0, 0], sizes = [1, 64], strides = [1, 1]} : vector<8x64xf32> to vector<1x64xf32>
    %574 = vector.broadcast %573 : vector<1x64xf32> to vector<16x64xf32>
    %575 = arith.mulf %546, %574 : vector<16x64xf32>
    %576 = vector.extract_strided_slice %0 {offsets = [1, 0], sizes = [1, 64], strides = [1, 1]} : vector<8x64xf32> to vector<1x64xf32>
    %577 = vector.broadcast %576 : vector<1x64xf32> to vector<16x64xf32>
    %578 = arith.mulf %546, %577 : vector<16x64xf32>
    %579 = vector.extract_strided_slice %0 {offsets = [2, 0], sizes = [1, 64], strides = [1, 1]} : vector<8x64xf32> to vector<1x64xf32>
    %580 = vector.broadcast %579 : vector<1x64xf32> to vector<16x64xf32>
    %581 = arith.mulf %546, %580 : vector<16x64xf32>
    %582 = vector.extract_strided_slice %0 {offsets = [3, 0], sizes = [1, 64], strides = [1, 1]} : vector<8x64xf32> to vector<1x64xf32>
    %583 = vector.broadcast %582 : vector<1x64xf32> to vector<16x64xf32>
    %584 = arith.mulf %546, %583 : vector<16x64xf32>
    %585 = vector.extract_strided_slice %0 {offsets = [4, 0], sizes = [1, 64], strides = [1, 1]} : vector<8x64xf32> to vector<1x64xf32>
    %586 = vector.broadcast %585 : vector<1x64xf32> to vector<16x64xf32>
    %587 = arith.mulf %546, %586 : vector<16x64xf32>
    %588 = vector.extract_strided_slice %0 {offsets = [5, 0], sizes = [1, 64], strides = [1, 1]} : vector<8x64xf32> to vector<1x64xf32>
    %589 = vector.broadcast %588 : vector<1x64xf32> to vector<16x64xf32>
    %590 = arith.mulf %546, %589 : vector<16x64xf32>
    %591 = vector.extract_strided_slice %0 {offsets = [6, 0], sizes = [1, 64], strides = [1, 1]} : vector<8x64xf32> to vector<1x64xf32>
    %592 = vector.broadcast %591 : vector<1x64xf32> to vector<16x64xf32>
    %593 = arith.mulf %546, %592 : vector<16x64xf32>
    %594 = vector.extract_strided_slice %0 {offsets = [7, 0], sizes = [1, 64], strides = [1, 1]} : vector<8x64xf32> to vector<1x64xf32>
    %595 = vector.broadcast %594 : vector<1x64xf32> to vector<16x64xf32>
    %596 = arith.mulf %546, %595 : vector<16x64xf32>
    %597 = tpu.concatenate %575, %578, %581, %584, %587, %590, %593, %596 in 0 : vector<16x64xf32>, vector<16x64xf32>, vector<16x64xf32>, vector<16x64xf32>, vector<16x64xf32>, vector<16x64xf32>, vector<16x64xf32>, vector<16x64xf32> -> vector<128x64xf32>
    %598 = arith.truncf %597 : vector<128x64xf32> to vector<128x64xbf16>
    %599 = arith.truncf %538 : vector<16x64xf32> to vector<16x64xbf16>
    "tpu.trace_start"() <{level = 10 : i32, message = "qd,kd->qk"}> : () -> ()
    %cst_141 = arith.constant dense<0.000000e+00> : vector<16x128xf32>
    %600 = tpu.matmul %599, %572, %cst_141 {dimension_numbers = #tpu.dot_dimension_numbers<[1], [1], [0], [0], [0, 0, 1, 0], [], []>} : vector<16x64xbf16>, vector<128x64xbf16>, vector<16x128xf32> -> vector<16x128xf32>
    "tpu.trace_stop"() : () -> ()
    %cst_142 = arith.constant 0.353553385 : f32
    %601 = vector.broadcast %cst_142 : f32 to vector<16x128xf32>
    %602 = arith.mulf %600, %601 : vector<16x128xf32>
    %603 = vector.extract_strided_slice %602 {offsets = [0, 0], sizes = [16, 16], strides = [1, 1]} : vector<16x128xf32> to vector<16x16xf32>
    %604 = arith.addf %603, %26 : vector<16x16xf32>
    %cst_143 = arith.constant dense<0xFF800000> : vector<16xf32>
    %605 = vector.multi_reduction <maximumf>, %604, %cst_143 [1] : vector<16x16xf32> to vector<16xf32>
    %606 = vector.shape_cast %605 : vector<16xf32> to vector<16x1xf32>
    %607 = vector.broadcast %606 : vector<16x1xf32> to vector<16x16xf32>
    %608 = arith.subf %604, %607 : vector<16x16xf32>
    %609 = math.exp %608 : vector<16x16xf32>
    %cst_144 = arith.constant dense<0.000000e+00> : vector<16xf32>
    %610 = vector.multi_reduction <add>, %609, %cst_144 [1] : vector<16x16xf32> to vector<16xf32>
    %611 = vector.shape_cast %610 : vector<16xf32> to vector<16x1xf32>
    %612 = tpu.reciprocal %611 {approx = true} : vector<16x1xf32> -> vector<16x1xf32>
    %613 = vector.broadcast %612 : vector<16x1xf32> to vector<16x16xf32>
    %614 = arith.mulf %609, %613 : vector<16x16xf32>
    %615 = vector.extract_strided_slice %602 {offsets = [0, 16], sizes = [16, 16], strides = [1, 1]} : vector<16x128xf32> to vector<16x16xf32>
    %616 = arith.addf %615, %26 : vector<16x16xf32>
    %cst_145 = arith.constant dense<0xFF800000> : vector<16xf32>
    %617 = vector.multi_reduction <maximumf>, %616, %cst_145 [1] : vector<16x16xf32> to vector<16xf32>
    %618 = vector.shape_cast %617 : vector<16xf32> to vector<16x1xf32>
    %619 = vector.broadcast %618 : vector<16x1xf32> to vector<16x16xf32>
    %620 = arith.subf %616, %619 : vector<16x16xf32>
    %621 = math.exp %620 : vector<16x16xf32>
    %cst_146 = arith.constant dense<0.000000e+00> : vector<16xf32>
    %622 = vector.multi_reduction <add>, %621, %cst_146 [1] : vector<16x16xf32> to vector<16xf32>
    %623 = vector.shape_cast %622 : vector<16xf32> to vector<16x1xf32>
    %624 = tpu.reciprocal %623 {approx = true} : vector<16x1xf32> -> vector<16x1xf32>
    %625 = vector.broadcast %624 : vector<16x1xf32> to vector<16x16xf32>
    %626 = arith.mulf %621, %625 : vector<16x16xf32>
    %627 = vector.extract_strided_slice %602 {offsets = [0, 32], sizes = [16, 16], strides = [1, 1]} : vector<16x128xf32> to vector<16x16xf32>
    %628 = arith.addf %627, %26 : vector<16x16xf32>
    %cst_147 = arith.constant dense<0xFF800000> : vector<16xf32>
    %629 = vector.multi_reduction <maximumf>, %628, %cst_147 [1] : vector<16x16xf32> to vector<16xf32>
    %630 = vector.shape_cast %629 : vector<16xf32> to vector<16x1xf32>
    %631 = vector.broadcast %630 : vector<16x1xf32> to vector<16x16xf32>
    %632 = arith.subf %628, %631 : vector<16x16xf32>
    %633 = math.exp %632 : vector<16x16xf32>
    %cst_148 = arith.constant dense<0.000000e+00> : vector<16xf32>
    %634 = vector.multi_reduction <add>, %633, %cst_148 [1] : vector<16x16xf32> to vector<16xf32>
    %635 = vector.shape_cast %634 : vector<16xf32> to vector<16x1xf32>
    %636 = tpu.reciprocal %635 {approx = true} : vector<16x1xf32> -> vector<16x1xf32>
    %637 = vector.broadcast %636 : vector<16x1xf32> to vector<16x16xf32>
    %638 = arith.mulf %633, %637 : vector<16x16xf32>
    %639 = vector.extract_strided_slice %602 {offsets = [0, 48], sizes = [16, 16], strides = [1, 1]} : vector<16x128xf32> to vector<16x16xf32>
    %640 = arith.addf %639, %26 : vector<16x16xf32>
    %cst_149 = arith.constant dense<0xFF800000> : vector<16xf32>
    %641 = vector.multi_reduction <maximumf>, %640, %cst_149 [1] : vector<16x16xf32> to vector<16xf32>
    %642 = vector.shape_cast %641 : vector<16xf32> to vector<16x1xf32>
    %643 = vector.broadcast %642 : vector<16x1xf32> to vector<16x16xf32>
    %644 = arith.subf %640, %643 : vector<16x16xf32>
    %645 = math.exp %644 : vector<16x16xf32>
    %cst_150 = arith.constant dense<0.000000e+00> : vector<16xf32>
    %646 = vector.multi_reduction <add>, %645, %cst_150 [1] : vector<16x16xf32> to vector<16xf32>
    %647 = vector.shape_cast %646 : vector<16xf32> to vector<16x1xf32>
    %648 = tpu.reciprocal %647 {approx = true} : vector<16x1xf32> -> vector<16x1xf32>
    %649 = vector.broadcast %648 : vector<16x1xf32> to vector<16x16xf32>
    %650 = arith.mulf %645, %649 : vector<16x16xf32>
    %651 = vector.extract_strided_slice %602 {offsets = [0, 64], sizes = [16, 16], strides = [1, 1]} : vector<16x128xf32> to vector<16x16xf32>
    %652 = arith.addf %651, %26 : vector<16x16xf32>
    %cst_151 = arith.constant dense<0xFF800000> : vector<16xf32>
    %653 = vector.multi_reduction <maximumf>, %652, %cst_151 [1] : vector<16x16xf32> to vector<16xf32>
    %654 = vector.shape_cast %653 : vector<16xf32> to vector<16x1xf32>
    %655 = vector.broadcast %654 : vector<16x1xf32> to vector<16x16xf32>
    %656 = arith.subf %652, %655 : vector<16x16xf32>
    %657 = math.exp %656 : vector<16x16xf32>
    %cst_152 = arith.constant dense<0.000000e+00> : vector<16xf32>
    %658 = vector.multi_reduction <add>, %657, %cst_152 [1] : vector<16x16xf32> to vector<16xf32>
    %659 = vector.shape_cast %658 : vector<16xf32> to vector<16x1xf32>
    %660 = tpu.reciprocal %659 {approx = true} : vector<16x1xf32> -> vector<16x1xf32>
    %661 = vector.broadcast %660 : vector<16x1xf32> to vector<16x16xf32>
    %662 = arith.mulf %657, %661 : vector<16x16xf32>
    %663 = vector.extract_strided_slice %602 {offsets = [0, 80], sizes = [16, 16], strides = [1, 1]} : vector<16x128xf32> to vector<16x16xf32>
    %664 = arith.addf %663, %26 : vector<16x16xf32>
    %cst_153 = arith.constant dense<0xFF800000> : vector<16xf32>
    %665 = vector.multi_reduction <maximumf>, %664, %cst_153 [1] : vector<16x16xf32> to vector<16xf32>
    %666 = vector.shape_cast %665 : vector<16xf32> to vector<16x1xf32>
    %667 = vector.broadcast %666 : vector<16x1xf32> to vector<16x16xf32>
    %668 = arith.subf %664, %667 : vector<16x16xf32>
    %669 = math.exp %668 : vector<16x16xf32>
    %cst_154 = arith.constant dense<0.000000e+00> : vector<16xf32>
    %670 = vector.multi_reduction <add>, %669, %cst_154 [1] : vector<16x16xf32> to vector<16xf32>
    %671 = vector.shape_cast %670 : vector<16xf32> to vector<16x1xf32>
    %672 = tpu.reciprocal %671 {approx = true} : vector<16x1xf32> -> vector<16x1xf32>
    %673 = vector.broadcast %672 : vector<16x1xf32> to vector<16x16xf32>
    %674 = arith.mulf %669, %673 : vector<16x16xf32>
    %675 = vector.extract_strided_slice %602 {offsets = [0, 96], sizes = [16, 16], strides = [1, 1]} : vector<16x128xf32> to vector<16x16xf32>
    %676 = arith.addf %675, %26 : vector<16x16xf32>
    %cst_155 = arith.constant dense<0xFF800000> : vector<16xf32>
    %677 = vector.multi_reduction <maximumf>, %676, %cst_155 [1] : vector<16x16xf32> to vector<16xf32>
    %678 = vector.shape_cast %677 : vector<16xf32> to vector<16x1xf32>
    %679 = vector.broadcast %678 : vector<16x1xf32> to vector<16x16xf32>
    %680 = arith.subf %676, %679 : vector<16x16xf32>
    %681 = math.exp %680 : vector<16x16xf32>
    %cst_156 = arith.constant dense<0.000000e+00> : vector<16xf32>
    %682 = vector.multi_reduction <add>, %681, %cst_156 [1] : vector<16x16xf32> to vector<16xf32>
    %683 = vector.shape_cast %682 : vector<16xf32> to vector<16x1xf32>
    %684 = tpu.reciprocal %683 {approx = true} : vector<16x1xf32> -> vector<16x1xf32>
    %685 = vector.broadcast %684 : vector<16x1xf32> to vector<16x16xf32>
    %686 = arith.mulf %681, %685 : vector<16x16xf32>
    %687 = vector.extract_strided_slice %602 {offsets = [0, 112], sizes = [16, 16], strides = [1, 1]} : vector<16x128xf32> to vector<16x16xf32>
    %688 = arith.addf %687, %26 : vector<16x16xf32>
    %cst_157 = arith.constant dense<0xFF800000> : vector<16xf32>
    %689 = vector.multi_reduction <maximumf>, %688, %cst_157 [1] : vector<16x16xf32> to vector<16xf32>
    %690 = vector.shape_cast %689 : vector<16xf32> to vector<16x1xf32>
    %691 = vector.broadcast %690 : vector<16x1xf32> to vector<16x16xf32>
    %692 = arith.subf %688, %691 : vector<16x16xf32>
    %693 = math.exp %692 : vector<16x16xf32>
    %cst_158 = arith.constant dense<0.000000e+00> : vector<16xf32>
    %694 = vector.multi_reduction <add>, %693, %cst_158 [1] : vector<16x16xf32> to vector<16xf32>
    %695 = vector.shape_cast %694 : vector<16xf32> to vector<16x1xf32>
    %696 = tpu.reciprocal %695 {approx = true} : vector<16x1xf32> -> vector<16x1xf32>
    %697 = vector.broadcast %696 : vector<16x1xf32> to vector<16x16xf32>
    %698 = arith.mulf %693, %697 : vector<16x16xf32>
    %699 = tpu.concatenate %614, %626, %638, %650, %662, %674, %686, %698 in 1 : vector<16x16xf32>, vector<16x16xf32>, vector<16x16xf32>, vector<16x16xf32>, vector<16x16xf32>, vector<16x16xf32>, vector<16x16xf32>, vector<16x16xf32> -> vector<16x128xf32>
    %700 = arith.truncf %699 : vector<16x128xf32> to vector<16x128xbf16>
    %cst_159 = arith.constant dense<0.000000e+00> : vector<16x64xf32>
    %701 = tpu.matmul %700, %598, %cst_159 {dimension_numbers = #tpu.dot_dimension_numbers<[1], [0], [0], [1], [0, 0, 1, 1], [], []>} : vector<16x128xbf16>, vector<128x64xbf16>, vector<16x64xf32> -> vector<16x64xf32>
    %c0_160 = arith.constant 0 : index
    %c1920_161 = arith.constant 1920 : index
    %702 = vector.load %arg9[%c0_160, %c1920_161] : memref<64x4352xbf16, #tpu.memory_space<vmem>>, vector<64x64xbf16>
    %703 = arith.truncf %701 : vector<16x64xf32> to vector<16x64xbf16>
    %cst_162 = arith.constant dense<0.000000e+00> : vector<16x64xf32>
    %704 = tpu.matmul %703, %702, %cst_162 {dimension_numbers = #tpu.dot_dimension_numbers<[1], [0], [0], [1], [0, 0, 1, 1], [], []>} : vector<16x64xbf16>, vector<64x64xbf16>, vector<16x64xf32> -> vector<16x64xf32>
    %c0_163 = arith.constant 0 : index
    %c3200 = arith.constant 3200 : index
    %705 = vector.load %arg12[%c0_163, %c3200] : memref<1x8064xf32, #tpu.memory_space<vmem>>, vector<1x64xf32>
    %706 = vector.broadcast %705 : vector<1x64xf32> to vector<16x64xf32>
    %707 = arith.addf %704, %706 : vector<16x64xf32>
    %708 = arith.addf %24, %707 : vector<16x64xf32>
    %c0_164 = arith.constant 0 : index
    %c3328 = arith.constant 3328 : index
    %709 = vector.load %arg12[%c0_164, %c3328] : memref<1x8064xf32, #tpu.memory_space<vmem>>, vector<1x64xf32>
    %c0_165 = arith.constant 0 : index
    %c3456 = arith.constant 3456 : index
    %710 = vector.load %arg12[%c0_165, %c3456] : memref<1x8064xf32, #tpu.memory_space<vmem>>, vector<1x64xf32>
    %cst_166 = arith.constant dense<0.000000e+00> : vector<16xf32>
    %711 = vector.multi_reduction <add>, %708, %cst_166 [1] : vector<16x64xf32> to vector<16xf32>
    %712 = vector.shape_cast %711 : vector<16xf32> to vector<16x1xf32>
    %cst_167 = arith.constant 6.400000e+01 : f32
    %713 = vector.broadcast %cst_167 : f32 to vector<16x1xf32>
    %714 = arith.divf %712, %713 : vector<16x1xf32>
    %715 = vector.broadcast %714 : vector<16x1xf32> to vector<16x64xf32>
    %716 = arith.subf %708, %715 : vector<16x64xf32>
    %717 = arith.mulf %716, %716 : vector<16x64xf32>
    %cst_168 = arith.constant dense<0.000000e+00> : vector<16xf32>
    %718 = vector.multi_reduction <add>, %717, %cst_168 [1] : vector<16x64xf32> to vector<16xf32>
    %719 = vector.shape_cast %718 : vector<16xf32> to vector<16x1xf32>
    %cst_169 = arith.constant 6.400000e+01 : f32
    %720 = vector.broadcast %cst_169 : f32 to vector<16x1xf32>
    %721 = arith.divf %719, %720 : vector<16x1xf32>
    %722 = vector.broadcast %714 : vector<16x1xf32> to vector<16x64xf32>
    %723 = arith.subf %708, %722 : vector<16x64xf32>
    %cst_170 = arith.constant 9.99999974E-6 : f32
    %724 = vector.broadcast %cst_170 : f32 to vector<16x1xf32>
    %725 = arith.addf %721, %724 : vector<16x1xf32>
    %726 = math.rsqrt %725 : vector<16x1xf32>
    %727 = vector.broadcast %726 : vector<16x1xf32> to vector<16x64xf32>
    %728 = arith.mulf %723, %727 : vector<16x64xf32>
    %729 = vector.broadcast %709 : vector<1x64xf32> to vector<16x64xf32>
    %730 = arith.mulf %728, %729 : vector<16x64xf32>
    %731 = vector.broadcast %710 : vector<1x64xf32> to vector<16x64xf32>
    %732 = arith.addf %730, %731 : vector<16x64xf32>
    %c0_171 = arith.constant 0 : index
    %c2048_172 = arith.constant 2048 : index
    %733 = vector.load %arg9[%c0_171, %c2048_172] : memref<64x4352xbf16, #tpu.memory_space<vmem>>, vector<64x64xbf16>
    %734 = arith.truncf %732 : vector<16x64xf32> to vector<16x64xbf16>
    %cst_173 = arith.constant dense<0.000000e+00> : vector<16x64xf32>
    %735 = tpu.matmul %734, %733, %cst_173 {dimension_numbers = #tpu.dot_dimension_numbers<[1], [0], [0], [1], [0, 0, 1, 1], [], []>} : vector<16x64xbf16>, vector<64x64xbf16>, vector<16x64xf32> -> vector<16x64xf32>
    %c0_174 = arith.constant 0 : index
    %c3584 = arith.constant 3584 : index
    %736 = vector.load %arg12[%c0_174, %c3584] : memref<1x8064xf32, #tpu.memory_space<vmem>>, vector<1x64xf32>
    %737 = vector.broadcast %736 : vector<1x64xf32> to vector<16x64xf32>
    %738 = arith.addf %735, %737 : vector<16x64xf32>
    %c0_175 = arith.constant 0 : index
    %c2176_176 = arith.constant 2176 : index
    %739 = vector.load %arg9[%c0_175, %c2176_176] : memref<64x4352xbf16, #tpu.memory_space<vmem>>, vector<64x256xbf16>
    %740 = arith.truncf %531 : vector<16x64xf32> to vector<16x64xbf16>
    %cst_177 = arith.constant dense<0.000000e+00> : vector<16x256xf32>
    %741 = tpu.matmul %740, %739, %cst_177 {dimension_numbers = #tpu.dot_dimension_numbers<[1], [0], [0], [1], [0, 0, 1, 1], [], []>} : vector<16x64xbf16>, vector<64x256xbf16>, vector<16x256xf32> -> vector<16x256xf32>
    %742 = vector.extract_strided_slice %741 {offsets = [0, 0], sizes = [16, 64], strides = [1, 1]} : vector<16x256xf32> to vector<16x64xf32>
    %c0_178 = arith.constant 0 : index
    %c3712 = arith.constant 3712 : index
    %743 = vector.load %arg12[%c0_178, %c3712] : memref<1x8064xf32, #tpu.memory_space<vmem>>, vector<1x64xf32>
    %744 = vector.broadcast %743 : vector<1x64xf32> to vector<16x64xf32>
    %745 = arith.addf %742, %744 : vector<16x64xf32>
    %746 = vector.extract_strided_slice %741 {offsets = [0, 128], sizes = [16, 64], strides = [1, 1]} : vector<16x256xf32> to vector<16x64xf32>
    %c0_179 = arith.constant 0 : index
    %c3840 = arith.constant 3840 : index
    %747 = vector.load %arg12[%c0_179, %c3840] : memref<1x8064xf32, #tpu.memory_space<vmem>>, vector<1x64xf32>
    %748 = vector.broadcast %747 : vector<1x64xf32> to vector<16x64xf32>
    %749 = arith.addf %746, %748 : vector<16x64xf32>
    %750 = vector.extract_strided_slice %0 {offsets = [0, 0], sizes = [1, 64], strides = [1, 1]} : vector<8x64xf32> to vector<1x64xf32>
    %751 = vector.broadcast %750 : vector<1x64xf32> to vector<16x64xf32>
    %752 = arith.mulf %745, %751 : vector<16x64xf32>
    %753 = vector.extract_strided_slice %0 {offsets = [1, 0], sizes = [1, 64], strides = [1, 1]} : vector<8x64xf32> to vector<1x64xf32>
    %754 = vector.broadcast %753 : vector<1x64xf32> to vector<16x64xf32>
    %755 = arith.mulf %745, %754 : vector<16x64xf32>
    %756 = vector.extract_strided_slice %0 {offsets = [2, 0], sizes = [1, 64], strides = [1, 1]} : vector<8x64xf32> to vector<1x64xf32>
    %757 = vector.broadcast %756 : vector<1x64xf32> to vector<16x64xf32>
    %758 = arith.mulf %745, %757 : vector<16x64xf32>
    %759 = vector.extract_strided_slice %0 {offsets = [3, 0], sizes = [1, 64], strides = [1, 1]} : vector<8x64xf32> to vector<1x64xf32>
    %760 = vector.broadcast %759 : vector<1x64xf32> to vector<16x64xf32>
    %761 = arith.mulf %745, %760 : vector<16x64xf32>
    %762 = vector.extract_strided_slice %0 {offsets = [4, 0], sizes = [1, 64], strides = [1, 1]} : vector<8x64xf32> to vector<1x64xf32>
    %763 = vector.broadcast %762 : vector<1x64xf32> to vector<16x64xf32>
    %764 = arith.mulf %745, %763 : vector<16x64xf32>
    %765 = vector.extract_strided_slice %0 {offsets = [5, 0], sizes = [1, 64], strides = [1, 1]} : vector<8x64xf32> to vector<1x64xf32>
    %766 = vector.broadcast %765 : vector<1x64xf32> to vector<16x64xf32>
    %767 = arith.mulf %745, %766 : vector<16x64xf32>
    %768 = vector.extract_strided_slice %0 {offsets = [6, 0], sizes = [1, 64], strides = [1, 1]} : vector<8x64xf32> to vector<1x64xf32>
    %769 = vector.broadcast %768 : vector<1x64xf32> to vector<16x64xf32>
    %770 = arith.mulf %745, %769 : vector<16x64xf32>
    %771 = vector.extract_strided_slice %0 {offsets = [7, 0], sizes = [1, 64], strides = [1, 1]} : vector<8x64xf32> to vector<1x64xf32>
    %772 = vector.broadcast %771 : vector<1x64xf32> to vector<16x64xf32>
    %773 = arith.mulf %745, %772 : vector<16x64xf32>
    %774 = tpu.concatenate %752, %755, %758, %761, %764, %767, %770, %773 in 0 : vector<16x64xf32>, vector<16x64xf32>, vector<16x64xf32>, vector<16x64xf32>, vector<16x64xf32>, vector<16x64xf32>, vector<16x64xf32>, vector<16x64xf32> -> vector<128x64xf32>
    %775 = arith.truncf %774 : vector<128x64xf32> to vector<128x64xbf16>
    %776 = vector.extract_strided_slice %0 {offsets = [0, 0], sizes = [1, 64], strides = [1, 1]} : vector<8x64xf32> to vector<1x64xf32>
    %777 = vector.broadcast %776 : vector<1x64xf32> to vector<16x64xf32>
    %778 = arith.mulf %749, %777 : vector<16x64xf32>
    %779 = vector.extract_strided_slice %0 {offsets = [1, 0], sizes = [1, 64], strides = [1, 1]} : vector<8x64xf32> to vector<1x64xf32>
    %780 = vector.broadcast %779 : vector<1x64xf32> to vector<16x64xf32>
    %781 = arith.mulf %749, %780 : vector<16x64xf32>
    %782 = vector.extract_strided_slice %0 {offsets = [2, 0], sizes = [1, 64], strides = [1, 1]} : vector<8x64xf32> to vector<1x64xf32>
    %783 = vector.broadcast %782 : vector<1x64xf32> to vector<16x64xf32>
    %784 = arith.mulf %749, %783 : vector<16x64xf32>
    %785 = vector.extract_strided_slice %0 {offsets = [3, 0], sizes = [1, 64], strides = [1, 1]} : vector<8x64xf32> to vector<1x64xf32>
    %786 = vector.broadcast %785 : vector<1x64xf32> to vector<16x64xf32>
    %787 = arith.mulf %749, %786 : vector<16x64xf32>
    %788 = vector.extract_strided_slice %0 {offsets = [4, 0], sizes = [1, 64], strides = [1, 1]} : vector<8x64xf32> to vector<1x64xf32>
    %789 = vector.broadcast %788 : vector<1x64xf32> to vector<16x64xf32>
    %790 = arith.mulf %749, %789 : vector<16x64xf32>
    %791 = vector.extract_strided_slice %0 {offsets = [5, 0], sizes = [1, 64], strides = [1, 1]} : vector<8x64xf32> to vector<1x64xf32>
    %792 = vector.broadcast %791 : vector<1x64xf32> to vector<16x64xf32>
    %793 = arith.mulf %749, %792 : vector<16x64xf32>
    %794 = vector.extract_strided_slice %0 {offsets = [6, 0], sizes = [1, 64], strides = [1, 1]} : vector<8x64xf32> to vector<1x64xf32>
    %795 = vector.broadcast %794 : vector<1x64xf32> to vector<16x64xf32>
    %796 = arith.mulf %749, %795 : vector<16x64xf32>
    %797 = vector.extract_strided_slice %0 {offsets = [7, 0], sizes = [1, 64], strides = [1, 1]} : vector<8x64xf32> to vector<1x64xf32>
    %798 = vector.broadcast %797 : vector<1x64xf32> to vector<16x64xf32>
    %799 = arith.mulf %749, %798 : vector<16x64xf32>
    %800 = tpu.concatenate %778, %781, %784, %787, %790, %793, %796, %799 in 0 : vector<16x64xf32>, vector<16x64xf32>, vector<16x64xf32>, vector<16x64xf32>, vector<16x64xf32>, vector<16x64xf32>, vector<16x64xf32>, vector<16x64xf32> -> vector<128x64xf32>
    %801 = arith.truncf %800 : vector<128x64xf32> to vector<128x64xbf16>
    %802 = arith.truncf %738 : vector<16x64xf32> to vector<16x64xbf16>
    "tpu.trace_start"() <{level = 10 : i32, message = "qd,kd->qk"}> : () -> ()
    %cst_180 = arith.constant dense<0.000000e+00> : vector<16x128xf32>
    %803 = tpu.matmul %802, %775, %cst_180 {dimension_numbers = #tpu.dot_dimension_numbers<[1], [1], [0], [0], [0, 0, 1, 0], [], []>} : vector<16x64xbf16>, vector<128x64xbf16>, vector<16x128xf32> -> vector<16x128xf32>
    "tpu.trace_stop"() : () -> ()
    %cst_181 = arith.constant 0.353553385 : f32
    %804 = vector.broadcast %cst_181 : f32 to vector<16x128xf32>
    %805 = arith.mulf %803, %804 : vector<16x128xf32>
    %806 = vector.extract_strided_slice %805 {offsets = [0, 0], sizes = [16, 16], strides = [1, 1]} : vector<16x128xf32> to vector<16x16xf32>
    %807 = arith.addf %806, %27 : vector<16x16xf32>
    %cst_182 = arith.constant dense<0xFF800000> : vector<16xf32>
    %808 = vector.multi_reduction <maximumf>, %807, %cst_182 [1] : vector<16x16xf32> to vector<16xf32>
    %809 = vector.shape_cast %808 : vector<16xf32> to vector<16x1xf32>
    %810 = vector.broadcast %809 : vector<16x1xf32> to vector<16x16xf32>
    %811 = arith.subf %807, %810 : vector<16x16xf32>
    %812 = math.exp %811 : vector<16x16xf32>
    %cst_183 = arith.constant dense<0.000000e+00> : vector<16xf32>
    %813 = vector.multi_reduction <add>, %812, %cst_183 [1] : vector<16x16xf32> to vector<16xf32>
    %814 = vector.shape_cast %813 : vector<16xf32> to vector<16x1xf32>
    %815 = tpu.reciprocal %814 {approx = true} : vector<16x1xf32> -> vector<16x1xf32>
    %816 = vector.broadcast %815 : vector<16x1xf32> to vector<16x16xf32>
    %817 = arith.mulf %812, %816 : vector<16x16xf32>
    %818 = vector.extract_strided_slice %805 {offsets = [0, 16], sizes = [16, 16], strides = [1, 1]} : vector<16x128xf32> to vector<16x16xf32>
    %819 = arith.addf %818, %27 : vector<16x16xf32>
    %cst_184 = arith.constant dense<0xFF800000> : vector<16xf32>
    %820 = vector.multi_reduction <maximumf>, %819, %cst_184 [1] : vector<16x16xf32> to vector<16xf32>
    %821 = vector.shape_cast %820 : vector<16xf32> to vector<16x1xf32>
    %822 = vector.broadcast %821 : vector<16x1xf32> to vector<16x16xf32>
    %823 = arith.subf %819, %822 : vector<16x16xf32>
    %824 = math.exp %823 : vector<16x16xf32>
    %cst_185 = arith.constant dense<0.000000e+00> : vector<16xf32>
    %825 = vector.multi_reduction <add>, %824, %cst_185 [1] : vector<16x16xf32> to vector<16xf32>
    %826 = vector.shape_cast %825 : vector<16xf32> to vector<16x1xf32>
    %827 = tpu.reciprocal %826 {approx = true} : vector<16x1xf32> -> vector<16x1xf32>
    %828 = vector.broadcast %827 : vector<16x1xf32> to vector<16x16xf32>
    %829 = arith.mulf %824, %828 : vector<16x16xf32>
    %830 = vector.extract_strided_slice %805 {offsets = [0, 32], sizes = [16, 16], strides = [1, 1]} : vector<16x128xf32> to vector<16x16xf32>
    %831 = arith.addf %830, %27 : vector<16x16xf32>
    %cst_186 = arith.constant dense<0xFF800000> : vector<16xf32>
    %832 = vector.multi_reduction <maximumf>, %831, %cst_186 [1] : vector<16x16xf32> to vector<16xf32>
    %833 = vector.shape_cast %832 : vector<16xf32> to vector<16x1xf32>
    %834 = vector.broadcast %833 : vector<16x1xf32> to vector<16x16xf32>
    %835 = arith.subf %831, %834 : vector<16x16xf32>
    %836 = math.exp %835 : vector<16x16xf32>
    %cst_187 = arith.constant dense<0.000000e+00> : vector<16xf32>
    %837 = vector.multi_reduction <add>, %836, %cst_187 [1] : vector<16x16xf32> to vector<16xf32>
    %838 = vector.shape_cast %837 : vector<16xf32> to vector<16x1xf32>
    %839 = tpu.reciprocal %838 {approx = true} : vector<16x1xf32> -> vector<16x1xf32>
    %840 = vector.broadcast %839 : vector<16x1xf32> to vector<16x16xf32>
    %841 = arith.mulf %836, %840 : vector<16x16xf32>
    %842 = vector.extract_strided_slice %805 {offsets = [0, 48], sizes = [16, 16], strides = [1, 1]} : vector<16x128xf32> to vector<16x16xf32>
    %843 = arith.addf %842, %27 : vector<16x16xf32>
    %cst_188 = arith.constant dense<0xFF800000> : vector<16xf32>
    %844 = vector.multi_reduction <maximumf>, %843, %cst_188 [1] : vector<16x16xf32> to vector<16xf32>
    %845 = vector.shape_cast %844 : vector<16xf32> to vector<16x1xf32>
    %846 = vector.broadcast %845 : vector<16x1xf32> to vector<16x16xf32>
    %847 = arith.subf %843, %846 : vector<16x16xf32>
    %848 = math.exp %847 : vector<16x16xf32>
    %cst_189 = arith.constant dense<0.000000e+00> : vector<16xf32>
    %849 = vector.multi_reduction <add>, %848, %cst_189 [1] : vector<16x16xf32> to vector<16xf32>
    %850 = vector.shape_cast %849 : vector<16xf32> to vector<16x1xf32>
    %851 = tpu.reciprocal %850 {approx = true} : vector<16x1xf32> -> vector<16x1xf32>
    %852 = vector.broadcast %851 : vector<16x1xf32> to vector<16x16xf32>
    %853 = arith.mulf %848, %852 : vector<16x16xf32>
    %854 = vector.extract_strided_slice %805 {offsets = [0, 64], sizes = [16, 16], strides = [1, 1]} : vector<16x128xf32> to vector<16x16xf32>
    %855 = arith.addf %854, %27 : vector<16x16xf32>
    %cst_190 = arith.constant dense<0xFF800000> : vector<16xf32>
    %856 = vector.multi_reduction <maximumf>, %855, %cst_190 [1] : vector<16x16xf32> to vector<16xf32>
    %857 = vector.shape_cast %856 : vector<16xf32> to vector<16x1xf32>
    %858 = vector.broadcast %857 : vector<16x1xf32> to vector<16x16xf32>
    %859 = arith.subf %855, %858 : vector<16x16xf32>
    %860 = math.exp %859 : vector<16x16xf32>
    %cst_191 = arith.constant dense<0.000000e+00> : vector<16xf32>
    %861 = vector.multi_reduction <add>, %860, %cst_191 [1] : vector<16x16xf32> to vector<16xf32>
    %862 = vector.shape_cast %861 : vector<16xf32> to vector<16x1xf32>
    %863 = tpu.reciprocal %862 {approx = true} : vector<16x1xf32> -> vector<16x1xf32>
    %864 = vector.broadcast %863 : vector<16x1xf32> to vector<16x16xf32>
    %865 = arith.mulf %860, %864 : vector<16x16xf32>
    %866 = vector.extract_strided_slice %805 {offsets = [0, 80], sizes = [16, 16], strides = [1, 1]} : vector<16x128xf32> to vector<16x16xf32>
    %867 = arith.addf %866, %27 : vector<16x16xf32>
    %cst_192 = arith.constant dense<0xFF800000> : vector<16xf32>
    %868 = vector.multi_reduction <maximumf>, %867, %cst_192 [1] : vector<16x16xf32> to vector<16xf32>
    %869 = vector.shape_cast %868 : vector<16xf32> to vector<16x1xf32>
    %870 = vector.broadcast %869 : vector<16x1xf32> to vector<16x16xf32>
    %871 = arith.subf %867, %870 : vector<16x16xf32>
    %872 = math.exp %871 : vector<16x16xf32>
    %cst_193 = arith.constant dense<0.000000e+00> : vector<16xf32>
    %873 = vector.multi_reduction <add>, %872, %cst_193 [1] : vector<16x16xf32> to vector<16xf32>
    %874 = vector.shape_cast %873 : vector<16xf32> to vector<16x1xf32>
    %875 = tpu.reciprocal %874 {approx = true} : vector<16x1xf32> -> vector<16x1xf32>
    %876 = vector.broadcast %875 : vector<16x1xf32> to vector<16x16xf32>
    %877 = arith.mulf %872, %876 : vector<16x16xf32>
    %878 = vector.extract_strided_slice %805 {offsets = [0, 96], sizes = [16, 16], strides = [1, 1]} : vector<16x128xf32> to vector<16x16xf32>
    %879 = arith.addf %878, %27 : vector<16x16xf32>
    %cst_194 = arith.constant dense<0xFF800000> : vector<16xf32>
    %880 = vector.multi_reduction <maximumf>, %879, %cst_194 [1] : vector<16x16xf32> to vector<16xf32>
    %881 = vector.shape_cast %880 : vector<16xf32> to vector<16x1xf32>
    %882 = vector.broadcast %881 : vector<16x1xf32> to vector<16x16xf32>
    %883 = arith.subf %879, %882 : vector<16x16xf32>
    %884 = math.exp %883 : vector<16x16xf32>
    %cst_195 = arith.constant dense<0.000000e+00> : vector<16xf32>
    %885 = vector.multi_reduction <add>, %884, %cst_195 [1] : vector<16x16xf32> to vector<16xf32>
    %886 = vector.shape_cast %885 : vector<16xf32> to vector<16x1xf32>
    %887 = tpu.reciprocal %886 {approx = true} : vector<16x1xf32> -> vector<16x1xf32>
    %888 = vector.broadcast %887 : vector<16x1xf32> to vector<16x16xf32>
    %889 = arith.mulf %884, %888 : vector<16x16xf32>
    %890 = vector.extract_strided_slice %805 {offsets = [0, 112], sizes = [16, 16], strides = [1, 1]} : vector<16x128xf32> to vector<16x16xf32>
    %891 = arith.addf %890, %27 : vector<16x16xf32>
    %cst_196 = arith.constant dense<0xFF800000> : vector<16xf32>
    %892 = vector.multi_reduction <maximumf>, %891, %cst_196 [1] : vector<16x16xf32> to vector<16xf32>
    %893 = vector.shape_cast %892 : vector<16xf32> to vector<16x1xf32>
    %894 = vector.broadcast %893 : vector<16x1xf32> to vector<16x16xf32>
    %895 = arith.subf %891, %894 : vector<16x16xf32>
    %896 = math.exp %895 : vector<16x16xf32>
    %cst_197 = arith.constant dense<0.000000e+00> : vector<16xf32>
    %897 = vector.multi_reduction <add>, %896, %cst_197 [1] : vector<16x16xf32> to vector<16xf32>
    %898 = vector.shape_cast %897 : vector<16xf32> to vector<16x1xf32>
    %899 = tpu.reciprocal %898 {approx = true} : vector<16x1xf32> -> vector<16x1xf32>
    %900 = vector.broadcast %899 : vector<16x1xf32> to vector<16x16xf32>
    %901 = arith.mulf %896, %900 : vector<16x16xf32>
    %902 = tpu.concatenate %817, %829, %841, %853, %865, %877, %889, %901 in 1 : vector<16x16xf32>, vector<16x16xf32>, vector<16x16xf32>, vector<16x16xf32>, vector<16x16xf32>, vector<16x16xf32>, vector<16x16xf32>, vector<16x16xf32> -> vector<16x128xf32>
    %903 = arith.truncf %902 : vector<16x128xf32> to vector<16x128xbf16>
    %cst_198 = arith.constant dense<0.000000e+00> : vector<16x64xf32>
    %904 = tpu.matmul %903, %801, %cst_198 {dimension_numbers = #tpu.dot_dimension_numbers<[1], [0], [0], [1], [0, 0, 1, 1], [], []>} : vector<16x128xbf16>, vector<128x64xbf16>, vector<16x64xf32> -> vector<16x64xf32>
    %c0_199 = arith.constant 0 : index
    %c2432_200 = arith.constant 2432 : index
    %905 = vector.load %arg9[%c0_199, %c2432_200] : memref<64x4352xbf16, #tpu.memory_space<vmem>>, vector<64x64xbf16>
    %906 = arith.truncf %904 : vector<16x64xf32> to vector<16x64xbf16>
    %cst_201 = arith.constant dense<0.000000e+00> : vector<16x64xf32>
    %907 = tpu.matmul %906, %905, %cst_201 {dimension_numbers = #tpu.dot_dimension_numbers<[1], [0], [0], [1], [0, 0, 1, 1], [], []>} : vector<16x64xbf16>, vector<64x64xbf16>, vector<16x64xf32> -> vector<16x64xf32>
    %c0_202 = arith.constant 0 : index
    %c3968 = arith.constant 3968 : index
    %908 = vector.load %arg12[%c0_202, %c3968] : memref<1x8064xf32, #tpu.memory_space<vmem>>, vector<1x64xf32>
    %909 = vector.broadcast %908 : vector<1x64xf32> to vector<16x64xf32>
    %910 = arith.addf %907, %909 : vector<16x64xf32>
    %911 = arith.addf %732, %910 : vector<16x64xf32>
    %c0_203 = arith.constant 0 : index
    %c4096 = arith.constant 4096 : index
    %912 = vector.load %arg12[%c0_203, %c4096] : memref<1x8064xf32, #tpu.memory_space<vmem>>, vector<1x64xf32>
    %c0_204 = arith.constant 0 : index
    %c4224 = arith.constant 4224 : index
    %913 = vector.load %arg12[%c0_204, %c4224] : memref<1x8064xf32, #tpu.memory_space<vmem>>, vector<1x64xf32>
    %cst_205 = arith.constant dense<0.000000e+00> : vector<16xf32>
    %914 = vector.multi_reduction <add>, %911, %cst_205 [1] : vector<16x64xf32> to vector<16xf32>
    %915 = vector.shape_cast %914 : vector<16xf32> to vector<16x1xf32>
    %cst_206 = arith.constant 6.400000e+01 : f32
    %916 = vector.broadcast %cst_206 : f32 to vector<16x1xf32>
    %917 = arith.divf %915, %916 : vector<16x1xf32>
    %918 = vector.broadcast %917 : vector<16x1xf32> to vector<16x64xf32>
    %919 = arith.subf %911, %918 : vector<16x64xf32>
    %920 = arith.mulf %919, %919 : vector<16x64xf32>
    %cst_207 = arith.constant dense<0.000000e+00> : vector<16xf32>
    %921 = vector.multi_reduction <add>, %920, %cst_207 [1] : vector<16x64xf32> to vector<16xf32>
    %922 = vector.shape_cast %921 : vector<16xf32> to vector<16x1xf32>
    %cst_208 = arith.constant 6.400000e+01 : f32
    %923 = vector.broadcast %cst_208 : f32 to vector<16x1xf32>
    %924 = arith.divf %922, %923 : vector<16x1xf32>
    %925 = vector.broadcast %917 : vector<16x1xf32> to vector<16x64xf32>
    %926 = arith.subf %911, %925 : vector<16x64xf32>
    %cst_209 = arith.constant 9.99999974E-6 : f32
    %927 = vector.broadcast %cst_209 : f32 to vector<16x1xf32>
    %928 = arith.addf %924, %927 : vector<16x1xf32>
    %929 = math.rsqrt %928 : vector<16x1xf32>
    %930 = vector.broadcast %929 : vector<16x1xf32> to vector<16x64xf32>
    %931 = arith.mulf %926, %930 : vector<16x64xf32>
    %932 = vector.broadcast %912 : vector<1x64xf32> to vector<16x64xf32>
    %933 = arith.mulf %931, %932 : vector<16x64xf32>
    %934 = vector.broadcast %913 : vector<1x64xf32> to vector<16x64xf32>
    %935 = arith.addf %933, %934 : vector<16x64xf32>
    %c0_210 = arith.constant 0 : index
    %c2560_211 = arith.constant 2560 : index
    %936 = vector.load %arg9[%c0_210, %c2560_211] : memref<64x4352xbf16, #tpu.memory_space<vmem>>, vector<64x256xbf16>
    %937 = arith.truncf %935 : vector<16x64xf32> to vector<16x64xbf16>
    %cst_212 = arith.constant dense<0.000000e+00> : vector<16x256xf32>
    %938 = tpu.matmul %937, %936, %cst_212 {dimension_numbers = #tpu.dot_dimension_numbers<[1], [0], [0], [1], [0, 0, 1, 1], [], []>} : vector<16x64xbf16>, vector<64x256xbf16>, vector<16x256xf32> -> vector<16x256xf32>
    %c0_213 = arith.constant 0 : index
    %c4352 = arith.constant 4352 : index
    %939 = vector.load %arg12[%c0_213, %c4352] : memref<1x8064xf32, #tpu.memory_space<vmem>>, vector<1x256xf32>
    %940 = vector.broadcast %939 : vector<1x256xf32> to vector<16x256xf32>
    %941 = arith.addf %938, %940 : vector<16x256xf32>
    %cst_214 = arith.constant 0.000000e+00 : f32
    %942 = vector.broadcast %cst_214 : f32 to vector<16x256xf32>
    %943 = arith.maximumf %941, %942 : vector<16x256xf32>
    %c0_215 = arith.constant 0 : index
    %c256_216 = arith.constant 256 : index
    %944 = vector.load %arg10[%c0_215, %c256_216] : memref<256x512xbf16, #tpu.memory_space<vmem>>, vector<256x64xbf16>
    %945 = arith.truncf %943 : vector<16x256xf32> to vector<16x256xbf16>
    %cst_217 = arith.constant dense<0.000000e+00> : vector<16x64xf32>
    %946 = tpu.matmul %945, %944, %cst_217 {dimension_numbers = #tpu.dot_dimension_numbers<[1], [0], [0], [1], [0, 0, 1, 1], [], []>} : vector<16x256xbf16>, vector<256x64xbf16>, vector<16x64xf32> -> vector<16x64xf32>
    %c0_218 = arith.constant 0 : index
    %c4608 = arith.constant 4608 : index
    %947 = vector.load %arg12[%c0_218, %c4608] : memref<1x8064xf32, #tpu.memory_space<vmem>>, vector<1x64xf32>
    %948 = vector.broadcast %947 : vector<1x64xf32> to vector<16x64xf32>
    %949 = arith.addf %946, %948 : vector<16x64xf32>
    %950 = arith.addf %935, %949 : vector<16x64xf32>
    %c0_219 = arith.constant 0 : index
    %c4736 = arith.constant 4736 : index
    %951 = vector.load %arg12[%c0_219, %c4736] : memref<1x8064xf32, #tpu.memory_space<vmem>>, vector<1x64xf32>
    %c0_220 = arith.constant 0 : index
    %c4864 = arith.constant 4864 : index
    %952 = vector.load %arg12[%c0_220, %c4864] : memref<1x8064xf32, #tpu.memory_space<vmem>>, vector<1x64xf32>
    %cst_221 = arith.constant dense<0.000000e+00> : vector<16xf32>
    %953 = vector.multi_reduction <add>, %950, %cst_221 [1] : vector<16x64xf32> to vector<16xf32>
    %954 = vector.shape_cast %953 : vector<16xf32> to vector<16x1xf32>
    %cst_222 = arith.constant 6.400000e+01 : f32
    %955 = vector.broadcast %cst_222 : f32 to vector<16x1xf32>
    %956 = arith.divf %954, %955 : vector<16x1xf32>
    %957 = vector.broadcast %956 : vector<16x1xf32> to vector<16x64xf32>
    %958 = arith.subf %950, %957 : vector<16x64xf32>
    %959 = arith.mulf %958, %958 : vector<16x64xf32>
    %cst_223 = arith.constant dense<0.000000e+00> : vector<16xf32>
    %960 = vector.multi_reduction <add>, %959, %cst_223 [1] : vector<16x64xf32> to vector<16xf32>
    %961 = vector.shape_cast %960 : vector<16xf32> to vector<16x1xf32>
    %cst_224 = arith.constant 6.400000e+01 : f32
    %962 = vector.broadcast %cst_224 : f32 to vector<16x1xf32>
    %963 = arith.divf %961, %962 : vector<16x1xf32>
    %964 = vector.broadcast %956 : vector<16x1xf32> to vector<16x64xf32>
    %965 = arith.subf %950, %964 : vector<16x64xf32>
    %cst_225 = arith.constant 9.99999974E-6 : f32
    %966 = vector.broadcast %cst_225 : f32 to vector<16x1xf32>
    %967 = arith.addf %963, %966 : vector<16x1xf32>
    %968 = math.rsqrt %967 : vector<16x1xf32>
    %969 = vector.broadcast %968 : vector<16x1xf32> to vector<16x64xf32>
    %970 = arith.mulf %965, %969 : vector<16x64xf32>
    %971 = vector.broadcast %951 : vector<1x64xf32> to vector<16x64xf32>
    %972 = arith.mulf %970, %971 : vector<16x64xf32>
    %973 = vector.broadcast %952 : vector<1x64xf32> to vector<16x64xf32>
    %974 = arith.addf %972, %973 : vector<16x64xf32>
    %c0_226 = arith.constant 0 : index
    %c2816_227 = arith.constant 2816 : index
    %975 = vector.load %arg9[%c0_226, %c2816_227] : memref<64x4352xbf16, #tpu.memory_space<vmem>>, vector<64x384xbf16>
    %976 = arith.truncf %974 : vector<16x64xf32> to vector<16x64xbf16>
    %cst_228 = arith.constant dense<0.000000e+00> : vector<16x384xf32>
    %977 = tpu.matmul %976, %975, %cst_228 {dimension_numbers = #tpu.dot_dimension_numbers<[1], [0], [0], [1], [0, 0, 1, 1], [], []>} : vector<16x64xbf16>, vector<64x384xbf16>, vector<16x384xf32> -> vector<16x384xf32>
    %978 = vector.extract_strided_slice %977 {offsets = [0, 0], sizes = [16, 64], strides = [1, 1]} : vector<16x384xf32> to vector<16x64xf32>
    %c0_229 = arith.constant 0 : index
    %c4992 = arith.constant 4992 : index
    %979 = vector.load %arg12[%c0_229, %c4992] : memref<1x8064xf32, #tpu.memory_space<vmem>>, vector<1x64xf32>
    %980 = vector.broadcast %979 : vector<1x64xf32> to vector<16x64xf32>
    %981 = arith.addf %978, %980 : vector<16x64xf32>
    %982 = vector.extract_strided_slice %977 {offsets = [0, 128], sizes = [16, 64], strides = [1, 1]} : vector<16x384xf32> to vector<16x64xf32>
    %c0_230 = arith.constant 0 : index
    %c5120 = arith.constant 5120 : index
    %983 = vector.load %arg12[%c0_230, %c5120] : memref<1x8064xf32, #tpu.memory_space<vmem>>, vector<1x64xf32>
    %984 = vector.broadcast %983 : vector<1x64xf32> to vector<16x64xf32>
    %985 = arith.addf %982, %984 : vector<16x64xf32>
    %986 = vector.extract_strided_slice %977 {offsets = [0, 256], sizes = [16, 64], strides = [1, 1]} : vector<16x384xf32> to vector<16x64xf32>
    %c0_231 = arith.constant 0 : index
    %c5248 = arith.constant 5248 : index
    %987 = vector.load %arg12[%c0_231, %c5248] : memref<1x8064xf32, #tpu.memory_space<vmem>>, vector<1x64xf32>
    %988 = vector.broadcast %987 : vector<1x64xf32> to vector<16x64xf32>
    %989 = arith.addf %986, %988 : vector<16x64xf32>
    %990 = vector.extract_strided_slice %0 {offsets = [0, 0], sizes = [1, 64], strides = [1, 1]} : vector<8x64xf32> to vector<1x64xf32>
    %991 = vector.broadcast %990 : vector<1x64xf32> to vector<16x64xf32>
    %992 = arith.mulf %985, %991 : vector<16x64xf32>
    %993 = vector.extract_strided_slice %0 {offsets = [1, 0], sizes = [1, 64], strides = [1, 1]} : vector<8x64xf32> to vector<1x64xf32>
    %994 = vector.broadcast %993 : vector<1x64xf32> to vector<16x64xf32>
    %995 = arith.mulf %985, %994 : vector<16x64xf32>
    %996 = vector.extract_strided_slice %0 {offsets = [2, 0], sizes = [1, 64], strides = [1, 1]} : vector<8x64xf32> to vector<1x64xf32>
    %997 = vector.broadcast %996 : vector<1x64xf32> to vector<16x64xf32>
    %998 = arith.mulf %985, %997 : vector<16x64xf32>
    %999 = vector.extract_strided_slice %0 {offsets = [3, 0], sizes = [1, 64], strides = [1, 1]} : vector<8x64xf32> to vector<1x64xf32>
    %1000 = vector.broadcast %999 : vector<1x64xf32> to vector<16x64xf32>
    %1001 = arith.mulf %985, %1000 : vector<16x64xf32>
    %1002 = vector.extract_strided_slice %0 {offsets = [4, 0], sizes = [1, 64], strides = [1, 1]} : vector<8x64xf32> to vector<1x64xf32>
    %1003 = vector.broadcast %1002 : vector<1x64xf32> to vector<16x64xf32>
    %1004 = arith.mulf %985, %1003 : vector<16x64xf32>
    %1005 = vector.extract_strided_slice %0 {offsets = [5, 0], sizes = [1, 64], strides = [1, 1]} : vector<8x64xf32> to vector<1x64xf32>
    %1006 = vector.broadcast %1005 : vector<1x64xf32> to vector<16x64xf32>
    %1007 = arith.mulf %985, %1006 : vector<16x64xf32>
    %1008 = vector.extract_strided_slice %0 {offsets = [6, 0], sizes = [1, 64], strides = [1, 1]} : vector<8x64xf32> to vector<1x64xf32>
    %1009 = vector.broadcast %1008 : vector<1x64xf32> to vector<16x64xf32>
    %1010 = arith.mulf %985, %1009 : vector<16x64xf32>
    %1011 = vector.extract_strided_slice %0 {offsets = [7, 0], sizes = [1, 64], strides = [1, 1]} : vector<8x64xf32> to vector<1x64xf32>
    %1012 = vector.broadcast %1011 : vector<1x64xf32> to vector<16x64xf32>
    %1013 = arith.mulf %985, %1012 : vector<16x64xf32>
    %1014 = tpu.concatenate %992, %995, %998, %1001, %1004, %1007, %1010, %1013 in 0 : vector<16x64xf32>, vector<16x64xf32>, vector<16x64xf32>, vector<16x64xf32>, vector<16x64xf32>, vector<16x64xf32>, vector<16x64xf32>, vector<16x64xf32> -> vector<128x64xf32>
    %1015 = arith.truncf %1014 : vector<128x64xf32> to vector<128x64xbf16>
    %1016 = vector.extract_strided_slice %0 {offsets = [0, 0], sizes = [1, 64], strides = [1, 1]} : vector<8x64xf32> to vector<1x64xf32>
    %1017 = vector.broadcast %1016 : vector<1x64xf32> to vector<16x64xf32>
    %1018 = arith.mulf %989, %1017 : vector<16x64xf32>
    %1019 = vector.extract_strided_slice %0 {offsets = [1, 0], sizes = [1, 64], strides = [1, 1]} : vector<8x64xf32> to vector<1x64xf32>
    %1020 = vector.broadcast %1019 : vector<1x64xf32> to vector<16x64xf32>
    %1021 = arith.mulf %989, %1020 : vector<16x64xf32>
    %1022 = vector.extract_strided_slice %0 {offsets = [2, 0], sizes = [1, 64], strides = [1, 1]} : vector<8x64xf32> to vector<1x64xf32>
    %1023 = vector.broadcast %1022 : vector<1x64xf32> to vector<16x64xf32>
    %1024 = arith.mulf %989, %1023 : vector<16x64xf32>
    %1025 = vector.extract_strided_slice %0 {offsets = [3, 0], sizes = [1, 64], strides = [1, 1]} : vector<8x64xf32> to vector<1x64xf32>
    %1026 = vector.broadcast %1025 : vector<1x64xf32> to vector<16x64xf32>
    %1027 = arith.mulf %989, %1026 : vector<16x64xf32>
    %1028 = vector.extract_strided_slice %0 {offsets = [4, 0], sizes = [1, 64], strides = [1, 1]} : vector<8x64xf32> to vector<1x64xf32>
    %1029 = vector.broadcast %1028 : vector<1x64xf32> to vector<16x64xf32>
    %1030 = arith.mulf %989, %1029 : vector<16x64xf32>
    %1031 = vector.extract_strided_slice %0 {offsets = [5, 0], sizes = [1, 64], strides = [1, 1]} : vector<8x64xf32> to vector<1x64xf32>
    %1032 = vector.broadcast %1031 : vector<1x64xf32> to vector<16x64xf32>
    %1033 = arith.mulf %989, %1032 : vector<16x64xf32>
    %1034 = vector.extract_strided_slice %0 {offsets = [6, 0], sizes = [1, 64], strides = [1, 1]} : vector<8x64xf32> to vector<1x64xf32>
    %1035 = vector.broadcast %1034 : vector<1x64xf32> to vector<16x64xf32>
    %1036 = arith.mulf %989, %1035 : vector<16x64xf32>
    %1037 = vector.extract_strided_slice %0 {offsets = [7, 0], sizes = [1, 64], strides = [1, 1]} : vector<8x64xf32> to vector<1x64xf32>
    %1038 = vector.broadcast %1037 : vector<1x64xf32> to vector<16x64xf32>
    %1039 = arith.mulf %989, %1038 : vector<16x64xf32>
    %1040 = tpu.concatenate %1018, %1021, %1024, %1027, %1030, %1033, %1036, %1039 in 0 : vector<16x64xf32>, vector<16x64xf32>, vector<16x64xf32>, vector<16x64xf32>, vector<16x64xf32>, vector<16x64xf32>, vector<16x64xf32>, vector<16x64xf32> -> vector<128x64xf32>
    %1041 = arith.truncf %1040 : vector<128x64xf32> to vector<128x64xbf16>
    %1042 = arith.truncf %981 : vector<16x64xf32> to vector<16x64xbf16>
    "tpu.trace_start"() <{level = 10 : i32, message = "qd,kd->qk"}> : () -> ()
    %cst_232 = arith.constant dense<0.000000e+00> : vector<16x128xf32>
    %1043 = tpu.matmul %1042, %1015, %cst_232 {dimension_numbers = #tpu.dot_dimension_numbers<[1], [1], [0], [0], [0, 0, 1, 0], [], []>} : vector<16x64xbf16>, vector<128x64xbf16>, vector<16x128xf32> -> vector<16x128xf32>
    "tpu.trace_stop"() : () -> ()
    %cst_233 = arith.constant 0.353553385 : f32
    %1044 = vector.broadcast %cst_233 : f32 to vector<16x128xf32>
    %1045 = arith.mulf %1043, %1044 : vector<16x128xf32>
    %1046 = vector.extract_strided_slice %1045 {offsets = [0, 0], sizes = [16, 16], strides = [1, 1]} : vector<16x128xf32> to vector<16x16xf32>
    %1047 = arith.addf %1046, %26 : vector<16x16xf32>
    %cst_234 = arith.constant dense<0xFF800000> : vector<16xf32>
    %1048 = vector.multi_reduction <maximumf>, %1047, %cst_234 [1] : vector<16x16xf32> to vector<16xf32>
    %1049 = vector.shape_cast %1048 : vector<16xf32> to vector<16x1xf32>
    %1050 = vector.broadcast %1049 : vector<16x1xf32> to vector<16x16xf32>
    %1051 = arith.subf %1047, %1050 : vector<16x16xf32>
    %1052 = math.exp %1051 : vector<16x16xf32>
    %cst_235 = arith.constant dense<0.000000e+00> : vector<16xf32>
    %1053 = vector.multi_reduction <add>, %1052, %cst_235 [1] : vector<16x16xf32> to vector<16xf32>
    %1054 = vector.shape_cast %1053 : vector<16xf32> to vector<16x1xf32>
    %1055 = tpu.reciprocal %1054 {approx = true} : vector<16x1xf32> -> vector<16x1xf32>
    %1056 = vector.broadcast %1055 : vector<16x1xf32> to vector<16x16xf32>
    %1057 = arith.mulf %1052, %1056 : vector<16x16xf32>
    %1058 = vector.extract_strided_slice %1045 {offsets = [0, 16], sizes = [16, 16], strides = [1, 1]} : vector<16x128xf32> to vector<16x16xf32>
    %1059 = arith.addf %1058, %26 : vector<16x16xf32>
    %cst_236 = arith.constant dense<0xFF800000> : vector<16xf32>
    %1060 = vector.multi_reduction <maximumf>, %1059, %cst_236 [1] : vector<16x16xf32> to vector<16xf32>
    %1061 = vector.shape_cast %1060 : vector<16xf32> to vector<16x1xf32>
    %1062 = vector.broadcast %1061 : vector<16x1xf32> to vector<16x16xf32>
    %1063 = arith.subf %1059, %1062 : vector<16x16xf32>
    %1064 = math.exp %1063 : vector<16x16xf32>
    %cst_237 = arith.constant dense<0.000000e+00> : vector<16xf32>
    %1065 = vector.multi_reduction <add>, %1064, %cst_237 [1] : vector<16x16xf32> to vector<16xf32>
    %1066 = vector.shape_cast %1065 : vector<16xf32> to vector<16x1xf32>
    %1067 = tpu.reciprocal %1066 {approx = true} : vector<16x1xf32> -> vector<16x1xf32>
    %1068 = vector.broadcast %1067 : vector<16x1xf32> to vector<16x16xf32>
    %1069 = arith.mulf %1064, %1068 : vector<16x16xf32>
    %1070 = vector.extract_strided_slice %1045 {offsets = [0, 32], sizes = [16, 16], strides = [1, 1]} : vector<16x128xf32> to vector<16x16xf32>
    %1071 = arith.addf %1070, %26 : vector<16x16xf32>
    %cst_238 = arith.constant dense<0xFF800000> : vector<16xf32>
    %1072 = vector.multi_reduction <maximumf>, %1071, %cst_238 [1] : vector<16x16xf32> to vector<16xf32>
    %1073 = vector.shape_cast %1072 : vector<16xf32> to vector<16x1xf32>
    %1074 = vector.broadcast %1073 : vector<16x1xf32> to vector<16x16xf32>
    %1075 = arith.subf %1071, %1074 : vector<16x16xf32>
    %1076 = math.exp %1075 : vector<16x16xf32>
    %cst_239 = arith.constant dense<0.000000e+00> : vector<16xf32>
    %1077 = vector.multi_reduction <add>, %1076, %cst_239 [1] : vector<16x16xf32> to vector<16xf32>
    %1078 = vector.shape_cast %1077 : vector<16xf32> to vector<16x1xf32>
    %1079 = tpu.reciprocal %1078 {approx = true} : vector<16x1xf32> -> vector<16x1xf32>
    %1080 = vector.broadcast %1079 : vector<16x1xf32> to vector<16x16xf32>
    %1081 = arith.mulf %1076, %1080 : vector<16x16xf32>
    %1082 = vector.extract_strided_slice %1045 {offsets = [0, 48], sizes = [16, 16], strides = [1, 1]} : vector<16x128xf32> to vector<16x16xf32>
    %1083 = arith.addf %1082, %26 : vector<16x16xf32>
    %cst_240 = arith.constant dense<0xFF800000> : vector<16xf32>
    %1084 = vector.multi_reduction <maximumf>, %1083, %cst_240 [1] : vector<16x16xf32> to vector<16xf32>
    %1085 = vector.shape_cast %1084 : vector<16xf32> to vector<16x1xf32>
    %1086 = vector.broadcast %1085 : vector<16x1xf32> to vector<16x16xf32>
    %1087 = arith.subf %1083, %1086 : vector<16x16xf32>
    %1088 = math.exp %1087 : vector<16x16xf32>
    %cst_241 = arith.constant dense<0.000000e+00> : vector<16xf32>
    %1089 = vector.multi_reduction <add>, %1088, %cst_241 [1] : vector<16x16xf32> to vector<16xf32>
    %1090 = vector.shape_cast %1089 : vector<16xf32> to vector<16x1xf32>
    %1091 = tpu.reciprocal %1090 {approx = true} : vector<16x1xf32> -> vector<16x1xf32>
    %1092 = vector.broadcast %1091 : vector<16x1xf32> to vector<16x16xf32>
    %1093 = arith.mulf %1088, %1092 : vector<16x16xf32>
    %1094 = vector.extract_strided_slice %1045 {offsets = [0, 64], sizes = [16, 16], strides = [1, 1]} : vector<16x128xf32> to vector<16x16xf32>
    %1095 = arith.addf %1094, %26 : vector<16x16xf32>
    %cst_242 = arith.constant dense<0xFF800000> : vector<16xf32>
    %1096 = vector.multi_reduction <maximumf>, %1095, %cst_242 [1] : vector<16x16xf32> to vector<16xf32>
    %1097 = vector.shape_cast %1096 : vector<16xf32> to vector<16x1xf32>
    %1098 = vector.broadcast %1097 : vector<16x1xf32> to vector<16x16xf32>
    %1099 = arith.subf %1095, %1098 : vector<16x16xf32>
    %1100 = math.exp %1099 : vector<16x16xf32>
    %cst_243 = arith.constant dense<0.000000e+00> : vector<16xf32>
    %1101 = vector.multi_reduction <add>, %1100, %cst_243 [1] : vector<16x16xf32> to vector<16xf32>
    %1102 = vector.shape_cast %1101 : vector<16xf32> to vector<16x1xf32>
    %1103 = tpu.reciprocal %1102 {approx = true} : vector<16x1xf32> -> vector<16x1xf32>
    %1104 = vector.broadcast %1103 : vector<16x1xf32> to vector<16x16xf32>
    %1105 = arith.mulf %1100, %1104 : vector<16x16xf32>
    %1106 = vector.extract_strided_slice %1045 {offsets = [0, 80], sizes = [16, 16], strides = [1, 1]} : vector<16x128xf32> to vector<16x16xf32>
    %1107 = arith.addf %1106, %26 : vector<16x16xf32>
    %cst_244 = arith.constant dense<0xFF800000> : vector<16xf32>
    %1108 = vector.multi_reduction <maximumf>, %1107, %cst_244 [1] : vector<16x16xf32> to vector<16xf32>
    %1109 = vector.shape_cast %1108 : vector<16xf32> to vector<16x1xf32>
    %1110 = vector.broadcast %1109 : vector<16x1xf32> to vector<16x16xf32>
    %1111 = arith.subf %1107, %1110 : vector<16x16xf32>
    %1112 = math.exp %1111 : vector<16x16xf32>
    %cst_245 = arith.constant dense<0.000000e+00> : vector<16xf32>
    %1113 = vector.multi_reduction <add>, %1112, %cst_245 [1] : vector<16x16xf32> to vector<16xf32>
    %1114 = vector.shape_cast %1113 : vector<16xf32> to vector<16x1xf32>
    %1115 = tpu.reciprocal %1114 {approx = true} : vector<16x1xf32> -> vector<16x1xf32>
    %1116 = vector.broadcast %1115 : vector<16x1xf32> to vector<16x16xf32>
    %1117 = arith.mulf %1112, %1116 : vector<16x16xf32>
    %1118 = vector.extract_strided_slice %1045 {offsets = [0, 96], sizes = [16, 16], strides = [1, 1]} : vector<16x128xf32> to vector<16x16xf32>
    %1119 = arith.addf %1118, %26 : vector<16x16xf32>
    %cst_246 = arith.constant dense<0xFF800000> : vector<16xf32>
    %1120 = vector.multi_reduction <maximumf>, %1119, %cst_246 [1] : vector<16x16xf32> to vector<16xf32>
    %1121 = vector.shape_cast %1120 : vector<16xf32> to vector<16x1xf32>
    %1122 = vector.broadcast %1121 : vector<16x1xf32> to vector<16x16xf32>
    %1123 = arith.subf %1119, %1122 : vector<16x16xf32>
    %1124 = math.exp %1123 : vector<16x16xf32>
    %cst_247 = arith.constant dense<0.000000e+00> : vector<16xf32>
    %1125 = vector.multi_reduction <add>, %1124, %cst_247 [1] : vector<16x16xf32> to vector<16xf32>
    %1126 = vector.shape_cast %1125 : vector<16xf32> to vector<16x1xf32>
    %1127 = tpu.reciprocal %1126 {approx = true} : vector<16x1xf32> -> vector<16x1xf32>
    %1128 = vector.broadcast %1127 : vector<16x1xf32> to vector<16x16xf32>
    %1129 = arith.mulf %1124, %1128 : vector<16x16xf32>
    %1130 = vector.extract_strided_slice %1045 {offsets = [0, 112], sizes = [16, 16], strides = [1, 1]} : vector<16x128xf32> to vector<16x16xf32>
    %1131 = arith.addf %1130, %26 : vector<16x16xf32>
    %cst_248 = arith.constant dense<0xFF800000> : vector<16xf32>
    %1132 = vector.multi_reduction <maximumf>, %1131, %cst_248 [1] : vector<16x16xf32> to vector<16xf32>
    %1133 = vector.shape_cast %1132 : vector<16xf32> to vector<16x1xf32>
    %1134 = vector.broadcast %1133 : vector<16x1xf32> to vector<16x16xf32>
    %1135 = arith.subf %1131, %1134 : vector<16x16xf32>
    %1136 = math.exp %1135 : vector<16x16xf32>
    %cst_249 = arith.constant dense<0.000000e+00> : vector<16xf32>
    %1137 = vector.multi_reduction <add>, %1136, %cst_249 [1] : vector<16x16xf32> to vector<16xf32>
    %1138 = vector.shape_cast %1137 : vector<16xf32> to vector<16x1xf32>
    %1139 = tpu.reciprocal %1138 {approx = true} : vector<16x1xf32> -> vector<16x1xf32>
    %1140 = vector.broadcast %1139 : vector<16x1xf32> to vector<16x16xf32>
    %1141 = arith.mulf %1136, %1140 : vector<16x16xf32>
    %1142 = tpu.concatenate %1057, %1069, %1081, %1093, %1105, %1117, %1129, %1141 in 1 : vector<16x16xf32>, vector<16x16xf32>, vector<16x16xf32>, vector<16x16xf32>, vector<16x16xf32>, vector<16x16xf32>, vector<16x16xf32>, vector<16x16xf32> -> vector<16x128xf32>
    %1143 = arith.truncf %1142 : vector<16x128xf32> to vector<16x128xbf16>
    %cst_250 = arith.constant dense<0.000000e+00> : vector<16x64xf32>
    %1144 = tpu.matmul %1143, %1041, %cst_250 {dimension_numbers = #tpu.dot_dimension_numbers<[1], [0], [0], [1], [0, 0, 1, 1], [], []>} : vector<16x128xbf16>, vector<128x64xbf16>, vector<16x64xf32> -> vector<16x64xf32>
    %c0_251 = arith.constant 0 : index
    %c3200_252 = arith.constant 3200 : index
    %1145 = vector.load %arg9[%c0_251, %c3200_252] : memref<64x4352xbf16, #tpu.memory_space<vmem>>, vector<64x64xbf16>
    %1146 = arith.truncf %1144 : vector<16x64xf32> to vector<16x64xbf16>
    %cst_253 = arith.constant dense<0.000000e+00> : vector<16x64xf32>
    %1147 = tpu.matmul %1146, %1145, %cst_253 {dimension_numbers = #tpu.dot_dimension_numbers<[1], [0], [0], [1], [0, 0, 1, 1], [], []>} : vector<16x64xbf16>, vector<64x64xbf16>, vector<16x64xf32> -> vector<16x64xf32>
    %c0_254 = arith.constant 0 : index
    %c5376 = arith.constant 5376 : index
    %1148 = vector.load %arg12[%c0_254, %c5376] : memref<1x8064xf32, #tpu.memory_space<vmem>>, vector<1x64xf32>
    %1149 = vector.broadcast %1148 : vector<1x64xf32> to vector<16x64xf32>
    %1150 = arith.addf %1147, %1149 : vector<16x64xf32>
    %1151 = arith.addf %974, %1150 : vector<16x64xf32>
    %c0_255 = arith.constant 0 : index
    %c5504 = arith.constant 5504 : index
    %1152 = vector.load %arg12[%c0_255, %c5504] : memref<1x8064xf32, #tpu.memory_space<vmem>>, vector<1x64xf32>
    %c0_256 = arith.constant 0 : index
    %c5632 = arith.constant 5632 : index
    %1153 = vector.load %arg12[%c0_256, %c5632] : memref<1x8064xf32, #tpu.memory_space<vmem>>, vector<1x64xf32>
    %cst_257 = arith.constant dense<0.000000e+00> : vector<16xf32>
    %1154 = vector.multi_reduction <add>, %1151, %cst_257 [1] : vector<16x64xf32> to vector<16xf32>
    %1155 = vector.shape_cast %1154 : vector<16xf32> to vector<16x1xf32>
    %cst_258 = arith.constant 6.400000e+01 : f32
    %1156 = vector.broadcast %cst_258 : f32 to vector<16x1xf32>
    %1157 = arith.divf %1155, %1156 : vector<16x1xf32>
    %1158 = vector.broadcast %1157 : vector<16x1xf32> to vector<16x64xf32>
    %1159 = arith.subf %1151, %1158 : vector<16x64xf32>
    %1160 = arith.mulf %1159, %1159 : vector<16x64xf32>
    %cst_259 = arith.constant dense<0.000000e+00> : vector<16xf32>
    %1161 = vector.multi_reduction <add>, %1160, %cst_259 [1] : vector<16x64xf32> to vector<16xf32>
    %1162 = vector.shape_cast %1161 : vector<16xf32> to vector<16x1xf32>
    %cst_260 = arith.constant 6.400000e+01 : f32
    %1163 = vector.broadcast %cst_260 : f32 to vector<16x1xf32>
    %1164 = arith.divf %1162, %1163 : vector<16x1xf32>
    %1165 = vector.broadcast %1157 : vector<16x1xf32> to vector<16x64xf32>
    %1166 = arith.subf %1151, %1165 : vector<16x64xf32>
    %cst_261 = arith.constant 9.99999974E-6 : f32
    %1167 = vector.broadcast %cst_261 : f32 to vector<16x1xf32>
    %1168 = arith.addf %1164, %1167 : vector<16x1xf32>
    %1169 = math.rsqrt %1168 : vector<16x1xf32>
    %1170 = vector.broadcast %1169 : vector<16x1xf32> to vector<16x64xf32>
    %1171 = arith.mulf %1166, %1170 : vector<16x64xf32>
    %1172 = vector.broadcast %1152 : vector<1x64xf32> to vector<16x64xf32>
    %1173 = arith.mulf %1171, %1172 : vector<16x64xf32>
    %1174 = vector.broadcast %1153 : vector<1x64xf32> to vector<16x64xf32>
    %1175 = arith.addf %1173, %1174 : vector<16x64xf32>
    %c0_262 = arith.constant 0 : index
    %c3328_263 = arith.constant 3328 : index
    %1176 = vector.load %arg9[%c0_262, %c3328_263] : memref<64x4352xbf16, #tpu.memory_space<vmem>>, vector<64x64xbf16>
    %1177 = arith.truncf %1175 : vector<16x64xf32> to vector<16x64xbf16>
    %cst_264 = arith.constant dense<0.000000e+00> : vector<16x64xf32>
    %1178 = tpu.matmul %1177, %1176, %cst_264 {dimension_numbers = #tpu.dot_dimension_numbers<[1], [0], [0], [1], [0, 0, 1, 1], [], []>} : vector<16x64xbf16>, vector<64x64xbf16>, vector<16x64xf32> -> vector<16x64xf32>
    %c0_265 = arith.constant 0 : index
    %c5760 = arith.constant 5760 : index
    %1179 = vector.load %arg12[%c0_265, %c5760] : memref<1x8064xf32, #tpu.memory_space<vmem>>, vector<1x64xf32>
    %1180 = vector.broadcast %1179 : vector<1x64xf32> to vector<16x64xf32>
    %1181 = arith.addf %1178, %1180 : vector<16x64xf32>
    %c0_266 = arith.constant 0 : index
    %c3456_267 = arith.constant 3456 : index
    %1182 = vector.load %arg9[%c0_266, %c3456_267] : memref<64x4352xbf16, #tpu.memory_space<vmem>>, vector<64x256xbf16>
    %1183 = arith.truncf %531 : vector<16x64xf32> to vector<16x64xbf16>
    %cst_268 = arith.constant dense<0.000000e+00> : vector<16x256xf32>
    %1184 = tpu.matmul %1183, %1182, %cst_268 {dimension_numbers = #tpu.dot_dimension_numbers<[1], [0], [0], [1], [0, 0, 1, 1], [], []>} : vector<16x64xbf16>, vector<64x256xbf16>, vector<16x256xf32> -> vector<16x256xf32>
    %1185 = vector.extract_strided_slice %1184 {offsets = [0, 0], sizes = [16, 64], strides = [1, 1]} : vector<16x256xf32> to vector<16x64xf32>
    %c0_269 = arith.constant 0 : index
    %c5888 = arith.constant 5888 : index
    %1186 = vector.load %arg12[%c0_269, %c5888] : memref<1x8064xf32, #tpu.memory_space<vmem>>, vector<1x64xf32>
    %1187 = vector.broadcast %1186 : vector<1x64xf32> to vector<16x64xf32>
    %1188 = arith.addf %1185, %1187 : vector<16x64xf32>
    %1189 = vector.extract_strided_slice %1184 {offsets = [0, 128], sizes = [16, 64], strides = [1, 1]} : vector<16x256xf32> to vector<16x64xf32>
    %c0_270 = arith.constant 0 : index
    %c6016 = arith.constant 6016 : index
    %1190 = vector.load %arg12[%c0_270, %c6016] : memref<1x8064xf32, #tpu.memory_space<vmem>>, vector<1x64xf32>
    %1191 = vector.broadcast %1190 : vector<1x64xf32> to vector<16x64xf32>
    %1192 = arith.addf %1189, %1191 : vector<16x64xf32>
    %1193 = vector.extract_strided_slice %0 {offsets = [0, 0], sizes = [1, 64], strides = [1, 1]} : vector<8x64xf32> to vector<1x64xf32>
    %1194 = vector.broadcast %1193 : vector<1x64xf32> to vector<16x64xf32>
    %1195 = arith.mulf %1188, %1194 : vector<16x64xf32>
    %1196 = vector.extract_strided_slice %0 {offsets = [1, 0], sizes = [1, 64], strides = [1, 1]} : vector<8x64xf32> to vector<1x64xf32>
    %1197 = vector.broadcast %1196 : vector<1x64xf32> to vector<16x64xf32>
    %1198 = arith.mulf %1188, %1197 : vector<16x64xf32>
    %1199 = vector.extract_strided_slice %0 {offsets = [2, 0], sizes = [1, 64], strides = [1, 1]} : vector<8x64xf32> to vector<1x64xf32>
    %1200 = vector.broadcast %1199 : vector<1x64xf32> to vector<16x64xf32>
    %1201 = arith.mulf %1188, %1200 : vector<16x64xf32>
    %1202 = vector.extract_strided_slice %0 {offsets = [3, 0], sizes = [1, 64], strides = [1, 1]} : vector<8x64xf32> to vector<1x64xf32>
    %1203 = vector.broadcast %1202 : vector<1x64xf32> to vector<16x64xf32>
    %1204 = arith.mulf %1188, %1203 : vector<16x64xf32>
    %1205 = vector.extract_strided_slice %0 {offsets = [4, 0], sizes = [1, 64], strides = [1, 1]} : vector<8x64xf32> to vector<1x64xf32>
    %1206 = vector.broadcast %1205 : vector<1x64xf32> to vector<16x64xf32>
    %1207 = arith.mulf %1188, %1206 : vector<16x64xf32>
    %1208 = vector.extract_strided_slice %0 {offsets = [5, 0], sizes = [1, 64], strides = [1, 1]} : vector<8x64xf32> to vector<1x64xf32>
    %1209 = vector.broadcast %1208 : vector<1x64xf32> to vector<16x64xf32>
    %1210 = arith.mulf %1188, %1209 : vector<16x64xf32>
    %1211 = vector.extract_strided_slice %0 {offsets = [6, 0], sizes = [1, 64], strides = [1, 1]} : vector<8x64xf32> to vector<1x64xf32>
    %1212 = vector.broadcast %1211 : vector<1x64xf32> to vector<16x64xf32>
    %1213 = arith.mulf %1188, %1212 : vector<16x64xf32>
    %1214 = vector.extract_strided_slice %0 {offsets = [7, 0], sizes = [1, 64], strides = [1, 1]} : vector<8x64xf32> to vector<1x64xf32>
    %1215 = vector.broadcast %1214 : vector<1x64xf32> to vector<16x64xf32>
    %1216 = arith.mulf %1188, %1215 : vector<16x64xf32>
    %1217 = tpu.concatenate %1195, %1198, %1201, %1204, %1207, %1210, %1213, %1216 in 0 : vector<16x64xf32>, vector<16x64xf32>, vector<16x64xf32>, vector<16x64xf32>, vector<16x64xf32>, vector<16x64xf32>, vector<16x64xf32>, vector<16x64xf32> -> vector<128x64xf32>
    %1218 = arith.truncf %1217 : vector<128x64xf32> to vector<128x64xbf16>
    %1219 = vector.extract_strided_slice %0 {offsets = [0, 0], sizes = [1, 64], strides = [1, 1]} : vector<8x64xf32> to vector<1x64xf32>
    %1220 = vector.broadcast %1219 : vector<1x64xf32> to vector<16x64xf32>
    %1221 = arith.mulf %1192, %1220 : vector<16x64xf32>
    %1222 = vector.extract_strided_slice %0 {offsets = [1, 0], sizes = [1, 64], strides = [1, 1]} : vector<8x64xf32> to vector<1x64xf32>
    %1223 = vector.broadcast %1222 : vector<1x64xf32> to vector<16x64xf32>
    %1224 = arith.mulf %1192, %1223 : vector<16x64xf32>
    %1225 = vector.extract_strided_slice %0 {offsets = [2, 0], sizes = [1, 64], strides = [1, 1]} : vector<8x64xf32> to vector<1x64xf32>
    %1226 = vector.broadcast %1225 : vector<1x64xf32> to vector<16x64xf32>
    %1227 = arith.mulf %1192, %1226 : vector<16x64xf32>
    %1228 = vector.extract_strided_slice %0 {offsets = [3, 0], sizes = [1, 64], strides = [1, 1]} : vector<8x64xf32> to vector<1x64xf32>
    %1229 = vector.broadcast %1228 : vector<1x64xf32> to vector<16x64xf32>
    %1230 = arith.mulf %1192, %1229 : vector<16x64xf32>
    %1231 = vector.extract_strided_slice %0 {offsets = [4, 0], sizes = [1, 64], strides = [1, 1]} : vector<8x64xf32> to vector<1x64xf32>
    %1232 = vector.broadcast %1231 : vector<1x64xf32> to vector<16x64xf32>
    %1233 = arith.mulf %1192, %1232 : vector<16x64xf32>
    %1234 = vector.extract_strided_slice %0 {offsets = [5, 0], sizes = [1, 64], strides = [1, 1]} : vector<8x64xf32> to vector<1x64xf32>
    %1235 = vector.broadcast %1234 : vector<1x64xf32> to vector<16x64xf32>
    %1236 = arith.mulf %1192, %1235 : vector<16x64xf32>
    %1237 = vector.extract_strided_slice %0 {offsets = [6, 0], sizes = [1, 64], strides = [1, 1]} : vector<8x64xf32> to vector<1x64xf32>
    %1238 = vector.broadcast %1237 : vector<1x64xf32> to vector<16x64xf32>
    %1239 = arith.mulf %1192, %1238 : vector<16x64xf32>
    %1240 = vector.extract_strided_slice %0 {offsets = [7, 0], sizes = [1, 64], strides = [1, 1]} : vector<8x64xf32> to vector<1x64xf32>
    %1241 = vector.broadcast %1240 : vector<1x64xf32> to vector<16x64xf32>
    %1242 = arith.mulf %1192, %1241 : vector<16x64xf32>
    %1243 = tpu.concatenate %1221, %1224, %1227, %1230, %1233, %1236, %1239, %1242 in 0 : vector<16x64xf32>, vector<16x64xf32>, vector<16x64xf32>, vector<16x64xf32>, vector<16x64xf32>, vector<16x64xf32>, vector<16x64xf32>, vector<16x64xf32> -> vector<128x64xf32>
    %1244 = arith.truncf %1243 : vector<128x64xf32> to vector<128x64xbf16>
    %1245 = arith.truncf %1181 : vector<16x64xf32> to vector<16x64xbf16>
    "tpu.trace_start"() <{level = 10 : i32, message = "qd,kd->qk"}> : () -> ()
    %cst_271 = arith.constant dense<0.000000e+00> : vector<16x128xf32>
    %1246 = tpu.matmul %1245, %1218, %cst_271 {dimension_numbers = #tpu.dot_dimension_numbers<[1], [1], [0], [0], [0, 0, 1, 0], [], []>} : vector<16x64xbf16>, vector<128x64xbf16>, vector<16x128xf32> -> vector<16x128xf32>
    "tpu.trace_stop"() : () -> ()
    %cst_272 = arith.constant 0.353553385 : f32
    %1247 = vector.broadcast %cst_272 : f32 to vector<16x128xf32>
    %1248 = arith.mulf %1246, %1247 : vector<16x128xf32>
    %1249 = vector.extract_strided_slice %1248 {offsets = [0, 0], sizes = [16, 16], strides = [1, 1]} : vector<16x128xf32> to vector<16x16xf32>
    %1250 = arith.addf %1249, %27 : vector<16x16xf32>
    %cst_273 = arith.constant dense<0xFF800000> : vector<16xf32>
    %1251 = vector.multi_reduction <maximumf>, %1250, %cst_273 [1] : vector<16x16xf32> to vector<16xf32>
    %1252 = vector.shape_cast %1251 : vector<16xf32> to vector<16x1xf32>
    %1253 = vector.broadcast %1252 : vector<16x1xf32> to vector<16x16xf32>
    %1254 = arith.subf %1250, %1253 : vector<16x16xf32>
    %1255 = math.exp %1254 : vector<16x16xf32>
    %cst_274 = arith.constant dense<0.000000e+00> : vector<16xf32>
    %1256 = vector.multi_reduction <add>, %1255, %cst_274 [1] : vector<16x16xf32> to vector<16xf32>
    %1257 = vector.shape_cast %1256 : vector<16xf32> to vector<16x1xf32>
    %1258 = tpu.reciprocal %1257 {approx = true} : vector<16x1xf32> -> vector<16x1xf32>
    %1259 = vector.broadcast %1258 : vector<16x1xf32> to vector<16x16xf32>
    %1260 = arith.mulf %1255, %1259 : vector<16x16xf32>
    %1261 = vector.extract_strided_slice %1248 {offsets = [0, 16], sizes = [16, 16], strides = [1, 1]} : vector<16x128xf32> to vector<16x16xf32>
    %1262 = arith.addf %1261, %27 : vector<16x16xf32>
    %cst_275 = arith.constant dense<0xFF800000> : vector<16xf32>
    %1263 = vector.multi_reduction <maximumf>, %1262, %cst_275 [1] : vector<16x16xf32> to vector<16xf32>
    %1264 = vector.shape_cast %1263 : vector<16xf32> to vector<16x1xf32>
    %1265 = vector.broadcast %1264 : vector<16x1xf32> to vector<16x16xf32>
    %1266 = arith.subf %1262, %1265 : vector<16x16xf32>
    %1267 = math.exp %1266 : vector<16x16xf32>
    %cst_276 = arith.constant dense<0.000000e+00> : vector<16xf32>
    %1268 = vector.multi_reduction <add>, %1267, %cst_276 [1] : vector<16x16xf32> to vector<16xf32>
    %1269 = vector.shape_cast %1268 : vector<16xf32> to vector<16x1xf32>
    %1270 = tpu.reciprocal %1269 {approx = true} : vector<16x1xf32> -> vector<16x1xf32>
    %1271 = vector.broadcast %1270 : vector<16x1xf32> to vector<16x16xf32>
    %1272 = arith.mulf %1267, %1271 : vector<16x16xf32>
    %1273 = vector.extract_strided_slice %1248 {offsets = [0, 32], sizes = [16, 16], strides = [1, 1]} : vector<16x128xf32> to vector<16x16xf32>
    %1274 = arith.addf %1273, %27 : vector<16x16xf32>
    %cst_277 = arith.constant dense<0xFF800000> : vector<16xf32>
    %1275 = vector.multi_reduction <maximumf>, %1274, %cst_277 [1] : vector<16x16xf32> to vector<16xf32>
    %1276 = vector.shape_cast %1275 : vector<16xf32> to vector<16x1xf32>
    %1277 = vector.broadcast %1276 : vector<16x1xf32> to vector<16x16xf32>
    %1278 = arith.subf %1274, %1277 : vector<16x16xf32>
    %1279 = math.exp %1278 : vector<16x16xf32>
    %cst_278 = arith.constant dense<0.000000e+00> : vector<16xf32>
    %1280 = vector.multi_reduction <add>, %1279, %cst_278 [1] : vector<16x16xf32> to vector<16xf32>
    %1281 = vector.shape_cast %1280 : vector<16xf32> to vector<16x1xf32>
    %1282 = tpu.reciprocal %1281 {approx = true} : vector<16x1xf32> -> vector<16x1xf32>
    %1283 = vector.broadcast %1282 : vector<16x1xf32> to vector<16x16xf32>
    %1284 = arith.mulf %1279, %1283 : vector<16x16xf32>
    %1285 = vector.extract_strided_slice %1248 {offsets = [0, 48], sizes = [16, 16], strides = [1, 1]} : vector<16x128xf32> to vector<16x16xf32>
    %1286 = arith.addf %1285, %27 : vector<16x16xf32>
    %cst_279 = arith.constant dense<0xFF800000> : vector<16xf32>
    %1287 = vector.multi_reduction <maximumf>, %1286, %cst_279 [1] : vector<16x16xf32> to vector<16xf32>
    %1288 = vector.shape_cast %1287 : vector<16xf32> to vector<16x1xf32>
    %1289 = vector.broadcast %1288 : vector<16x1xf32> to vector<16x16xf32>
    %1290 = arith.subf %1286, %1289 : vector<16x16xf32>
    %1291 = math.exp %1290 : vector<16x16xf32>
    %cst_280 = arith.constant dense<0.000000e+00> : vector<16xf32>
    %1292 = vector.multi_reduction <add>, %1291, %cst_280 [1] : vector<16x16xf32> to vector<16xf32>
    %1293 = vector.shape_cast %1292 : vector<16xf32> to vector<16x1xf32>
    %1294 = tpu.reciprocal %1293 {approx = true} : vector<16x1xf32> -> vector<16x1xf32>
    %1295 = vector.broadcast %1294 : vector<16x1xf32> to vector<16x16xf32>
    %1296 = arith.mulf %1291, %1295 : vector<16x16xf32>
    %1297 = vector.extract_strided_slice %1248 {offsets = [0, 64], sizes = [16, 16], strides = [1, 1]} : vector<16x128xf32> to vector<16x16xf32>
    %1298 = arith.addf %1297, %27 : vector<16x16xf32>
    %cst_281 = arith.constant dense<0xFF800000> : vector<16xf32>
    %1299 = vector.multi_reduction <maximumf>, %1298, %cst_281 [1] : vector<16x16xf32> to vector<16xf32>
    %1300 = vector.shape_cast %1299 : vector<16xf32> to vector<16x1xf32>
    %1301 = vector.broadcast %1300 : vector<16x1xf32> to vector<16x16xf32>
    %1302 = arith.subf %1298, %1301 : vector<16x16xf32>
    %1303 = math.exp %1302 : vector<16x16xf32>
    %cst_282 = arith.constant dense<0.000000e+00> : vector<16xf32>
    %1304 = vector.multi_reduction <add>, %1303, %cst_282 [1] : vector<16x16xf32> to vector<16xf32>
    %1305 = vector.shape_cast %1304 : vector<16xf32> to vector<16x1xf32>
    %1306 = tpu.reciprocal %1305 {approx = true} : vector<16x1xf32> -> vector<16x1xf32>
    %1307 = vector.broadcast %1306 : vector<16x1xf32> to vector<16x16xf32>
    %1308 = arith.mulf %1303, %1307 : vector<16x16xf32>
    %1309 = vector.extract_strided_slice %1248 {offsets = [0, 80], sizes = [16, 16], strides = [1, 1]} : vector<16x128xf32> to vector<16x16xf32>
    %1310 = arith.addf %1309, %27 : vector<16x16xf32>
    %cst_283 = arith.constant dense<0xFF800000> : vector<16xf32>
    %1311 = vector.multi_reduction <maximumf>, %1310, %cst_283 [1] : vector<16x16xf32> to vector<16xf32>
    %1312 = vector.shape_cast %1311 : vector<16xf32> to vector<16x1xf32>
    %1313 = vector.broadcast %1312 : vector<16x1xf32> to vector<16x16xf32>
    %1314 = arith.subf %1310, %1313 : vector<16x16xf32>
    %1315 = math.exp %1314 : vector<16x16xf32>
    %cst_284 = arith.constant dense<0.000000e+00> : vector<16xf32>
    %1316 = vector.multi_reduction <add>, %1315, %cst_284 [1] : vector<16x16xf32> to vector<16xf32>
    %1317 = vector.shape_cast %1316 : vector<16xf32> to vector<16x1xf32>
    %1318 = tpu.reciprocal %1317 {approx = true} : vector<16x1xf32> -> vector<16x1xf32>
    %1319 = vector.broadcast %1318 : vector<16x1xf32> to vector<16x16xf32>
    %1320 = arith.mulf %1315, %1319 : vector<16x16xf32>
    %1321 = vector.extract_strided_slice %1248 {offsets = [0, 96], sizes = [16, 16], strides = [1, 1]} : vector<16x128xf32> to vector<16x16xf32>
    %1322 = arith.addf %1321, %27 : vector<16x16xf32>
    %cst_285 = arith.constant dense<0xFF800000> : vector<16xf32>
    %1323 = vector.multi_reduction <maximumf>, %1322, %cst_285 [1] : vector<16x16xf32> to vector<16xf32>
    %1324 = vector.shape_cast %1323 : vector<16xf32> to vector<16x1xf32>
    %1325 = vector.broadcast %1324 : vector<16x1xf32> to vector<16x16xf32>
    %1326 = arith.subf %1322, %1325 : vector<16x16xf32>
    %1327 = math.exp %1326 : vector<16x16xf32>
    %cst_286 = arith.constant dense<0.000000e+00> : vector<16xf32>
    %1328 = vector.multi_reduction <add>, %1327, %cst_286 [1] : vector<16x16xf32> to vector<16xf32>
    %1329 = vector.shape_cast %1328 : vector<16xf32> to vector<16x1xf32>
    %1330 = tpu.reciprocal %1329 {approx = true} : vector<16x1xf32> -> vector<16x1xf32>
    %1331 = vector.broadcast %1330 : vector<16x1xf32> to vector<16x16xf32>
    %1332 = arith.mulf %1327, %1331 : vector<16x16xf32>
    %1333 = vector.extract_strided_slice %1248 {offsets = [0, 112], sizes = [16, 16], strides = [1, 1]} : vector<16x128xf32> to vector<16x16xf32>
    %1334 = arith.addf %1333, %27 : vector<16x16xf32>
    %cst_287 = arith.constant dense<0xFF800000> : vector<16xf32>
    %1335 = vector.multi_reduction <maximumf>, %1334, %cst_287 [1] : vector<16x16xf32> to vector<16xf32>
    %1336 = vector.shape_cast %1335 : vector<16xf32> to vector<16x1xf32>
    %1337 = vector.broadcast %1336 : vector<16x1xf32> to vector<16x16xf32>
    %1338 = arith.subf %1334, %1337 : vector<16x16xf32>
    %1339 = math.exp %1338 : vector<16x16xf32>
    %cst_288 = arith.constant dense<0.000000e+00> : vector<16xf32>
    %1340 = vector.multi_reduction <add>, %1339, %cst_288 [1] : vector<16x16xf32> to vector<16xf32>
    %1341 = vector.shape_cast %1340 : vector<16xf32> to vector<16x1xf32>
    %1342 = tpu.reciprocal %1341 {approx = true} : vector<16x1xf32> -> vector<16x1xf32>
    %1343 = vector.broadcast %1342 : vector<16x1xf32> to vector<16x16xf32>
    %1344 = arith.mulf %1339, %1343 : vector<16x16xf32>
    %1345 = tpu.concatenate %1260, %1272, %1284, %1296, %1308, %1320, %1332, %1344 in 1 : vector<16x16xf32>, vector<16x16xf32>, vector<16x16xf32>, vector<16x16xf32>, vector<16x16xf32>, vector<16x16xf32>, vector<16x16xf32>, vector<16x16xf32> -> vector<16x128xf32>
    %1346 = arith.truncf %1345 : vector<16x128xf32> to vector<16x128xbf16>
    %cst_289 = arith.constant dense<0.000000e+00> : vector<16x64xf32>
    %1347 = tpu.matmul %1346, %1244, %cst_289 {dimension_numbers = #tpu.dot_dimension_numbers<[1], [0], [0], [1], [0, 0, 1, 1], [], []>} : vector<16x128xbf16>, vector<128x64xbf16>, vector<16x64xf32> -> vector<16x64xf32>
    %c0_290 = arith.constant 0 : index
    %c3712_291 = arith.constant 3712 : index
    %1348 = vector.load %arg9[%c0_290, %c3712_291] : memref<64x4352xbf16, #tpu.memory_space<vmem>>, vector<64x64xbf16>
    %1349 = arith.truncf %1347 : vector<16x64xf32> to vector<16x64xbf16>
    %cst_292 = arith.constant dense<0.000000e+00> : vector<16x64xf32>
    %1350 = tpu.matmul %1349, %1348, %cst_292 {dimension_numbers = #tpu.dot_dimension_numbers<[1], [0], [0], [1], [0, 0, 1, 1], [], []>} : vector<16x64xbf16>, vector<64x64xbf16>, vector<16x64xf32> -> vector<16x64xf32>
    %c0_293 = arith.constant 0 : index
    %c6144 = arith.constant 6144 : index
    %1351 = vector.load %arg12[%c0_293, %c6144] : memref<1x8064xf32, #tpu.memory_space<vmem>>, vector<1x64xf32>
    %1352 = vector.broadcast %1351 : vector<1x64xf32> to vector<16x64xf32>
    %1353 = arith.addf %1350, %1352 : vector<16x64xf32>
    %1354 = arith.addf %1175, %1353 : vector<16x64xf32>
    %c0_294 = arith.constant 0 : index
    %c6272 = arith.constant 6272 : index
    %1355 = vector.load %arg12[%c0_294, %c6272] : memref<1x8064xf32, #tpu.memory_space<vmem>>, vector<1x64xf32>
    %c0_295 = arith.constant 0 : index
    %c6400 = arith.constant 6400 : index
    %1356 = vector.load %arg12[%c0_295, %c6400] : memref<1x8064xf32, #tpu.memory_space<vmem>>, vector<1x64xf32>
    %cst_296 = arith.constant dense<0.000000e+00> : vector<16xf32>
    %1357 = vector.multi_reduction <add>, %1354, %cst_296 [1] : vector<16x64xf32> to vector<16xf32>
    %1358 = vector.shape_cast %1357 : vector<16xf32> to vector<16x1xf32>
    %cst_297 = arith.constant 6.400000e+01 : f32
    %1359 = vector.broadcast %cst_297 : f32 to vector<16x1xf32>
    %1360 = arith.divf %1358, %1359 : vector<16x1xf32>
    %1361 = vector.broadcast %1360 : vector<16x1xf32> to vector<16x64xf32>
    %1362 = arith.subf %1354, %1361 : vector<16x64xf32>
    %1363 = arith.mulf %1362, %1362 : vector<16x64xf32>
    %cst_298 = arith.constant dense<0.000000e+00> : vector<16xf32>
    %1364 = vector.multi_reduction <add>, %1363, %cst_298 [1] : vector<16x64xf32> to vector<16xf32>
    %1365 = vector.shape_cast %1364 : vector<16xf32> to vector<16x1xf32>
    %cst_299 = arith.constant 6.400000e+01 : f32
    %1366 = vector.broadcast %cst_299 : f32 to vector<16x1xf32>
    %1367 = arith.divf %1365, %1366 : vector<16x1xf32>
    %1368 = vector.broadcast %1360 : vector<16x1xf32> to vector<16x64xf32>
    %1369 = arith.subf %1354, %1368 : vector<16x64xf32>
    %cst_300 = arith.constant 9.99999974E-6 : f32
    %1370 = vector.broadcast %cst_300 : f32 to vector<16x1xf32>
    %1371 = arith.addf %1367, %1370 : vector<16x1xf32>
    %1372 = math.rsqrt %1371 : vector<16x1xf32>
    %1373 = vector.broadcast %1372 : vector<16x1xf32> to vector<16x64xf32>
    %1374 = arith.mulf %1369, %1373 : vector<16x64xf32>
    %1375 = vector.broadcast %1355 : vector<1x64xf32> to vector<16x64xf32>
    %1376 = arith.mulf %1374, %1375 : vector<16x64xf32>
    %1377 = vector.broadcast %1356 : vector<1x64xf32> to vector<16x64xf32>
    %1378 = arith.addf %1376, %1377 : vector<16x64xf32>
    %c0_301 = arith.constant 0 : index
    %c3840_302 = arith.constant 3840 : index
    %1379 = vector.load %arg9[%c0_301, %c3840_302] : memref<64x4352xbf16, #tpu.memory_space<vmem>>, vector<64x256xbf16>
    %1380 = arith.truncf %1378 : vector<16x64xf32> to vector<16x64xbf16>
    %cst_303 = arith.constant dense<0.000000e+00> : vector<16x256xf32>
    %1381 = tpu.matmul %1380, %1379, %cst_303 {dimension_numbers = #tpu.dot_dimension_numbers<[1], [0], [0], [1], [0, 0, 1, 1], [], []>} : vector<16x64xbf16>, vector<64x256xbf16>, vector<16x256xf32> -> vector<16x256xf32>
    %c0_304 = arith.constant 0 : index
    %c6528 = arith.constant 6528 : index
    %1382 = vector.load %arg12[%c0_304, %c6528] : memref<1x8064xf32, #tpu.memory_space<vmem>>, vector<1x256xf32>
    %1383 = vector.broadcast %1382 : vector<1x256xf32> to vector<16x256xf32>
    %1384 = arith.addf %1381, %1383 : vector<16x256xf32>
    %cst_305 = arith.constant 0.000000e+00 : f32
    %1385 = vector.broadcast %cst_305 : f32 to vector<16x256xf32>
    %1386 = arith.maximumf %1384, %1385 : vector<16x256xf32>
    %c0_306 = arith.constant 0 : index
    %c384_307 = arith.constant 384 : index
    %1387 = vector.load %arg10[%c0_306, %c384_307] : memref<256x512xbf16, #tpu.memory_space<vmem>>, vector<256x64xbf16>
    %1388 = arith.truncf %1386 : vector<16x256xf32> to vector<16x256xbf16>
    %cst_308 = arith.constant dense<0.000000e+00> : vector<16x64xf32>
    %1389 = tpu.matmul %1388, %1387, %cst_308 {dimension_numbers = #tpu.dot_dimension_numbers<[1], [0], [0], [1], [0, 0, 1, 1], [], []>} : vector<16x256xbf16>, vector<256x64xbf16>, vector<16x64xf32> -> vector<16x64xf32>
    %c0_309 = arith.constant 0 : index
    %c6784 = arith.constant 6784 : index
    %1390 = vector.load %arg12[%c0_309, %c6784] : memref<1x8064xf32, #tpu.memory_space<vmem>>, vector<1x64xf32>
    %1391 = vector.broadcast %1390 : vector<1x64xf32> to vector<16x64xf32>
    %1392 = arith.addf %1389, %1391 : vector<16x64xf32>
    %1393 = arith.addf %1378, %1392 : vector<16x64xf32>
    %c0_310 = arith.constant 0 : index
    %c6912 = arith.constant 6912 : index
    %1394 = vector.load %arg12[%c0_310, %c6912] : memref<1x8064xf32, #tpu.memory_space<vmem>>, vector<1x64xf32>
    %c0_311 = arith.constant 0 : index
    %c7040 = arith.constant 7040 : index
    %1395 = vector.load %arg12[%c0_311, %c7040] : memref<1x8064xf32, #tpu.memory_space<vmem>>, vector<1x64xf32>
    %cst_312 = arith.constant dense<0.000000e+00> : vector<16xf32>
    %1396 = vector.multi_reduction <add>, %1393, %cst_312 [1] : vector<16x64xf32> to vector<16xf32>
    %1397 = vector.shape_cast %1396 : vector<16xf32> to vector<16x1xf32>
    %cst_313 = arith.constant 6.400000e+01 : f32
    %1398 = vector.broadcast %cst_313 : f32 to vector<16x1xf32>
    %1399 = arith.divf %1397, %1398 : vector<16x1xf32>
    %1400 = vector.broadcast %1399 : vector<16x1xf32> to vector<16x64xf32>
    %1401 = arith.subf %1393, %1400 : vector<16x64xf32>
    %1402 = arith.mulf %1401, %1401 : vector<16x64xf32>
    %cst_314 = arith.constant dense<0.000000e+00> : vector<16xf32>
    %1403 = vector.multi_reduction <add>, %1402, %cst_314 [1] : vector<16x64xf32> to vector<16xf32>
    %1404 = vector.shape_cast %1403 : vector<16xf32> to vector<16x1xf32>
    %cst_315 = arith.constant 6.400000e+01 : f32
    %1405 = vector.broadcast %cst_315 : f32 to vector<16x1xf32>
    %1406 = arith.divf %1404, %1405 : vector<16x1xf32>
    %1407 = vector.broadcast %1399 : vector<16x1xf32> to vector<16x64xf32>
    %1408 = arith.subf %1393, %1407 : vector<16x64xf32>
    %cst_316 = arith.constant 9.99999974E-6 : f32
    %1409 = vector.broadcast %cst_316 : f32 to vector<16x1xf32>
    %1410 = arith.addf %1406, %1409 : vector<16x1xf32>
    %1411 = math.rsqrt %1410 : vector<16x1xf32>
    %1412 = vector.broadcast %1411 : vector<16x1xf32> to vector<16x64xf32>
    %1413 = arith.mulf %1408, %1412 : vector<16x64xf32>
    %1414 = vector.broadcast %1394 : vector<1x64xf32> to vector<16x64xf32>
    %1415 = arith.mulf %1413, %1414 : vector<16x64xf32>
    %1416 = vector.broadcast %1395 : vector<1x64xf32> to vector<16x64xf32>
    %1417 = arith.addf %1415, %1416 : vector<16x64xf32>
    %c0_317 = arith.constant 0 : index
    %c7424 = arith.constant 7424 : index
    %1418 = vector.load %arg12[%c0_317, %c7424] : memref<1x8064xf32, #tpu.memory_space<vmem>>, vector<1x64xf32>
    %c0_318 = arith.constant 0 : index
    %c7552 = arith.constant 7552 : index
    %1419 = vector.load %arg12[%c0_318, %c7552] : memref<1x8064xf32, #tpu.memory_space<vmem>>, vector<1x64xf32>
    %cst_319 = arith.constant dense<0.000000e+00> : vector<16xf32>
    %1420 = vector.multi_reduction <add>, %1417, %cst_319 [1] : vector<16x64xf32> to vector<16xf32>
    %1421 = vector.shape_cast %1420 : vector<16xf32> to vector<16x1xf32>
    %cst_320 = arith.constant 6.400000e+01 : f32
    %1422 = vector.broadcast %cst_320 : f32 to vector<16x1xf32>
    %1423 = arith.divf %1421, %1422 : vector<16x1xf32>
    %1424 = vector.broadcast %1423 : vector<16x1xf32> to vector<16x64xf32>
    %1425 = arith.subf %1417, %1424 : vector<16x64xf32>
    %1426 = arith.mulf %1425, %1425 : vector<16x64xf32>
    %cst_321 = arith.constant dense<0.000000e+00> : vector<16xf32>
    %1427 = vector.multi_reduction <add>, %1426, %cst_321 [1] : vector<16x64xf32> to vector<16xf32>
    %1428 = vector.shape_cast %1427 : vector<16xf32> to vector<16x1xf32>
    %cst_322 = arith.constant 6.400000e+01 : f32
    %1429 = vector.broadcast %cst_322 : f32 to vector<16x1xf32>
    %1430 = arith.divf %1428, %1429 : vector<16x1xf32>
    %1431 = vector.broadcast %1423 : vector<16x1xf32> to vector<16x64xf32>
    %1432 = arith.subf %1417, %1431 : vector<16x64xf32>
    %cst_323 = arith.constant 9.99999974E-6 : f32
    %1433 = vector.broadcast %cst_323 : f32 to vector<16x1xf32>
    %1434 = arith.addf %1430, %1433 : vector<16x1xf32>
    %1435 = math.rsqrt %1434 : vector<16x1xf32>
    %1436 = vector.broadcast %1435 : vector<16x1xf32> to vector<16x64xf32>
    %1437 = arith.mulf %1432, %1436 : vector<16x64xf32>
    %1438 = vector.broadcast %1418 : vector<1x64xf32> to vector<16x64xf32>
    %1439 = arith.mulf %1437, %1438 : vector<16x64xf32>
    %1440 = vector.broadcast %1419 : vector<1x64xf32> to vector<16x64xf32>
    %1441 = arith.addf %1439, %1440 : vector<16x64xf32>
    %c0_324 = arith.constant 0 : index
    %c4096_325 = arith.constant 4096 : index
    %1442 = vector.load %arg9[%c0_324, %c4096_325] : memref<64x4352xbf16, #tpu.memory_space<vmem>>, vector<64x256xbf16>
    %1443 = arith.truncf %1441 : vector<16x64xf32> to vector<16x64xbf16>
    %cst_326 = arith.constant dense<0.000000e+00> : vector<16x256xf32>
    %1444 = tpu.matmul %1443, %1442, %cst_326 {dimension_numbers = #tpu.dot_dimension_numbers<[1], [0], [0], [1], [0, 0, 1, 1], [], []>} : vector<16x64xbf16>, vector<64x256xbf16>, vector<16x256xf32> -> vector<16x256xf32>
    %c0_327 = arith.constant 0 : index
    %c7680 = arith.constant 7680 : index
    %1445 = vector.load %arg12[%c0_327, %c7680] : memref<1x8064xf32, #tpu.memory_space<vmem>>, vector<1x256xf32>
    %1446 = vector.broadcast %1445 : vector<1x256xf32> to vector<16x256xf32>
    %1447 = arith.addf %1444, %1446 : vector<16x256xf32>
    %cst_328 = arith.constant 0.000000e+00 : f32
    %1448 = vector.broadcast %cst_328 : f32 to vector<16x256xf32>
    %1449 = arith.maximumf %1447, %1448 : vector<16x256xf32>
    %1450 = arith.truncf %1449 : vector<16x256xf32> to vector<16x256xbf16>
    %c0_329 = arith.constant 0 : index
    %c0_330 = arith.constant 0 : index
    %1451 = vector.load %arg11[%c0_329, %c0_330] : memref<256x128xbf16, #tpu.memory_space<vmem>>, vector<256x128xbf16>
    %cst_331 = arith.constant dense<0.000000e+00> : vector<16x128xf32>
    %1452 = tpu.matmul %1450, %1451, %cst_331 {dimension_numbers = #tpu.dot_dimension_numbers<[1], [0], [0], [1], [0, 0, 1, 1], [], []>} : vector<16x256xbf16>, vector<256x128xbf16>, vector<16x128xf32> -> vector<16x128xf32>
    %c0_332 = arith.constant 0 : index
    %c7936 = arith.constant 7936 : index
    %1453 = vector.load %arg12[%c0_332, %c7936] : memref<1x8064xf32, #tpu.memory_space<vmem>>, vector<1x128xf32>
    %1454 = vector.broadcast %1453 : vector<1x128xf32> to vector<16x128xf32>
    %1455 = arith.addf %1452, %1454 : vector<16x128xf32>
    %c0_333 = arith.constant 0 : index
    %c0_334 = arith.constant 0 : index
    %1456 = vector.load %arg13[%c0_333, %c0_334] : memref<16x128xf32, #tpu.memory_space<vmem>>, vector<16x128xf32>
    tpu.vector_store %arg13[%c0_333, %c0_334], %1455 {strides = array<i32>} : memref<16x128xf32, #tpu.memory_space<vmem>>, vector<16x128xf32>,
    return
  }
  func.func @transform_0(%arg0: i32) -> (i32, i32) {
    %c0_i32 = arith.constant 0 : i32
    %c0_i32_0 = arith.constant 0 : i32
    %c0_i32_1 = arith.constant 0 : i32
    return %c0_i32, %c0_i32_0 : i32, i32
  }
  func.func @transform_1(%arg0: i32) -> (i32, i32) {
    %c0_i32 = arith.constant 0 : i32
    %c0_i32_0 = arith.constant 0 : i32
    %c0_i32_1 = arith.constant 0 : i32
    return %c0_i32, %c0_i32_0 : i32, i32
  }
  func.func @transform_2(%arg0: i32) -> (i32, i32) {
    %c0_i32 = arith.constant 0 : i32
    %c0_i32_0 = arith.constant 0 : i32
    %c0_i32_1 = arith.constant 0 : i32
    return %c0_i32, %c0_i32_0 : i32, i32
  }
  func.func @transform_3(%arg0: i32) -> (i32, i32) {
    %c0_i32 = arith.constant 0 : i32
    %c0_i32_0 = arith.constant 0 : i32
    %c0_i32_1 = arith.constant 0 : i32
    return %c0_i32, %c0_i32_0 : i32, i32
  }
  func.func @transform_4(%arg0: i32) -> (i32, i32) {
    %c0_i32 = arith.constant 0 : i32
    %c0_i32_0 = arith.constant 0 : i32
    %c0_i32_1 = arith.constant 0 : i32
    return %c0_i32, %c0_i32_0 : i32, i32
  }
  func.func @transform_5(%arg0: i32) -> (i32, i32) {
    %c0_i32 = arith.constant 0 : i32
    %c0_i32_0 = arith.constant 0 : i32
    %c0_i32_1 = arith.constant 0 : i32
    return %c0_i32, %c0_i32_0 : i32, i32
  }
  func.func @transform_6(%arg0: i32) -> (i32, i32) {
    %c0_i32 = arith.constant 0 : i32
    %c0_i32_0 = arith.constant 0 : i32
    %c0_i32_1 = arith.constant 0 : i32
    return %c0_i32, %c0_i32_0 : i32, i32
  }
  func.func @transform_7(%arg0: i32) -> (i32, i32) {
    %c0_i32 = arith.constant 0 : i32
    %c0_i32_0 = arith.constant 0 : i32
    %c0_i32_1 = arith.constant 0 : i32
    return %c0_i32, %c0_i32_0 : i32, i32
  }
  func.func @transform_8(%arg0: i32) -> (i32, i32) {
    %c0_i32 = arith.constant 0 : i32
    %c0_i32_0 = arith.constant 0 : i32
    %c0_i32_1 = arith.constant 0 : i32
    return %c0_i32, %c0_i32_0 : i32, i32
  }
  func.func @transform_9(%arg0: i32) -> (i32, i32) {
    %c0_i32 = arith.constant 0 : i32
    %c0_i32_0 = arith.constant 0 : i32
    %c0_i32_1 = arith.constant 0 : i32
    return %c0_i32, %c0_i32_0 : i32, i32
  }
  func.func @transform_10(%arg0: i32) -> (i32, i32) {
    %c0_i32 = arith.constant 0 : i32
    %c0_i32_0 = arith.constant 0 : i32
    %c0_i32_1 = arith.constant 0 : i32
    return %c0_i32, %c0_i32_0 : i32, i32
  }
  func.func @transform_11(%arg0: i32) -> (i32, i32) {
    %c0_i32 = arith.constant 0 : i32
    %c0_i32_0 = arith.constant 0 : i32
    %c0_i32_1 = arith.constant 0 : i32
    return %c0_i32, %c0_i32_0 : i32, i32
  }
  func.func @transform_12(%arg0: i32) -> (i32, i32) {
    %c0_i32 = arith.constant 0 : i32
    %c0_i32_0 = arith.constant 0 : i32
    %c0_i32_1 = arith.constant 0 : i32
    return %c0_i32, %c0_i32_0 : i32, i32
  }
}

</mosaic_0001>

<bundles_post_ra>
// kernel: fwd.1
= control target key start
LH: loop header
LB: loop body
LE: loop exit
PB: predicated region body
PF: predicated region fallthrough
CT: control target
= control target key end

     0   :  { %17 = vsyncpa [#allocation3], 0  ;;  %s11015_s0 = inlined_call_operand.vmem [shape: s32[16,1], index: 0, kind: input, shape index: {}]   ;;  %s11016_s1 = inlined_call_operand.vmem [shape: s32[16,1], index: 1, kind: input, shape index: {}]   ;;  %s11017_s2 = inlined_call_operand.vmem [shape: bf16[32,64], index: 2, kind: input, shape index: {}]   ;;  %s11018_s3 = inlined_call_operand.vmem [shape: f32[32,64], index: 3, kind: input, shape index: {}]   ;;  %s11019_s4 = inlined_call_operand.hbm [shape: f32[16,16], index: 4, kind: input, shape index: {}]   ;;  %s11020_s5 = inlined_call_operand.hbm [shape: f32[16,16], index: 5, kind: input, shape index: {}]   ;;  %s11021_s6 = inlined_call_operand.hbm [shape: f32[16,16], index: 6, kind: input, shape index: {}]   ;;  %s11022_s7 = inlined_call_operand.vmem [shape: f32[8,64], index: 7, kind: input, shape index: {}]   ;;  %s11023_s8 = inlined_call_operand.hbm [shape: bf16[64,4352], index: 8, kind: input, shape index: {}]   ;;  %s11024_s9 = inlined_call_operand.hbm [shape: bf16[256,512], index: 9, kind: input, shape index: {}]   ;;  %s11025_s10 = inlined_call_operand.hbm [shape: bf16[256,128], index: 10, kind: input, shape index: {}]   ;;  %s11026_s11 = inlined_call_operand.hbm [shape: f32[1,8064], index: 11, kind: input, shape index: {}]   ;;  %s11027_s12 = inlined_call_operand.vmem [shape: f32[16,128], index: 12, kind: output, shape index: {}]  }
   0x1   :  { %18 = vsyncpa [#allocation5], 0 }
   0x2   :  { %19 = vsyncpa [#allocation8], 0 }
   0x3   :  { %20 = vsyncpa [#allocation11], 0  ;;  %s8539_s21 = smov [#allocation4]   ;;  %s8540_s23 = smov [#allocation7]  }
   0x4   :  { %s46_s22 = sshll.u32 %s8539_s21, 4  ;;  %s72_s24 = sshll.u32 %s8540_s23, 4  ;;  %s47_s22 = int_to_ptr.vmem [resolvable:$true] %s46_s22  ;;  %s8627_s24 = int_to_ptr.vmem [resolvable:$true] %s72_s24 }
   0x5   :  { %s8377_s27 = scalar_lea.hbm %s11020_s5, 256 }
   0x6   :  { %p8378_p0 = scmp.ne.s32.totalorder %s11020_s5, %s8377_s27  ;;  %p8381_p1 = scmp.lt.u32.totalorder %s8377_s27, %s11020_s5 }
   0x8   :  { %p8383_p2 = pnand %p8381_p1, %p8378_p0 }
   0xa   :  { %8386 = shalt.err (!%p8383_p2)
}
   0xb   :  { %s8387_s14 = scalar_lea.vmem %s47_s22, 256  ;;  %p8392_p4 = scmp.lt.s32.totalorder %s47_s22, %s47_s22 }
   0xc   :  { %p8388_p3 = scmp.ne.s32.totalorder %s47_s22, %s8387_s14  ;;  %p8393_p5 = scmp.lt.s32.totalorder %s8387_s14, %s8387_s14 }
   0xe   :  { %p8394_p6 = por %p8393_p5, %p8392_p4 }
  0x10   :  { %p8395_p7 = pnand %p8394_p6, %p8388_p3 }
  0x12   :  { %8398 = shalt.err (!%p8395_p7)
}
  0x13   :  { %s8541_s15 = smov 128   ;;  %s8542_s16 = smov 8  }
  0x14   :  { %52 = dma.hbm_to_vmem [thread:$0]  %s11020_s5, 256, %s47_s22, [#allocation5], %s8541_s15, %s8541_s15, %s8542_s16  }
  0x15   :  { %s8399_s21 = scalar_lea.hbm %s11023_s8, 17408 }
  0x16   :  { %p8400_p8 = scmp.ne.s32.totalorder %s11023_s8, %s8399_s21  ;;  %p8403_p9 = scmp.lt.u32.totalorder %s8399_s21, %s11023_s8 }
  0x18   :  { %p8405_p10 = pnand %p8403_p9, %p8400_p8 }
  0x1a   :  { %8408 = shalt.err (!%p8405_p10)
}
  0x1b   :  { %s8409_s28 = scalar_lea.vmem %s8627_s24, 17408  ;;  %p8414_p12 = scmp.lt.s32.totalorder %s8627_s24, %s8627_s24 }
  0x1c   :  { %p8410_p11 = scmp.ne.s32.totalorder %s8627_s24, %s8409_s28  ;;  %p8415_p13 = scmp.lt.s32.totalorder %s8409_s28, %s8409_s28 }
  0x1e   :  { %p8416_p0 = por %p8415_p13, %p8414_p12 }
  0x20   :  { %p8417_p1 = pnand %p8416_p0, %p8410_p11 }
  0x22   :  { %8420 = shalt.err (!%p8417_p1)
}
  0x23   :  { %s8543_s5 = smov 2176   ;;  %s8544_s22 = smov 136  }
  0x24   :  { %78 = dma.hbm_to_vmem [thread:$0]  %s11023_s8, 17408, %s8627_s24, [#allocation8], %s8543_s5, %s8543_s5, %s8544_s22  }
  0x25   :  { %s8545_s13 = smov [#allocation10]   ;;  %s8421_s19 = scalar_lea.hbm %s11025_s10, 2048 }
  0x26   :  { %s96_s14 = sshll.u32 %s8545_s13, 4  ;;  %p8422_p2 = scmp.ne.s32.totalorder %s11025_s10, %s8421_s19  ;;  %s97_s14 = int_to_ptr.vmem [resolvable:$true] %s96_s14 }
  0x27   :  { %p8425_p3 = scmp.lt.u32.totalorder %s8421_s19, %s11025_s10 }
  0x29   :  { %p8427_p4 = pnand %p8425_p3, %p8422_p2 }
  0x2b   :  { %8430 = shalt.err (!%p8427_p4)
}
  0x2c   :  { %s8431_s26 = scalar_lea.vmem %s97_s14, 2048  ;;  %p8436_p6 = scmp.lt.s32.totalorder %s97_s14, %s97_s14 }
  0x2d   :  { %p8432_p5 = scmp.ne.s32.totalorder %s97_s14, %s8431_s26  ;;  %p8437_p7 = scmp.lt.s32.totalorder %s8431_s26, %s8431_s26 }
  0x2f   :  { %p8438_p8 = por %p8437_p7, %p8436_p6 }
  0x31   :  { %p8439_p9 = pnand %p8438_p8, %p8432_p5 }
  0x33   :  { %8442 = shalt.err (!%p8439_p9)
}
  0x34   :  { %s8546_s8 = smov 64   ;;  %s8547_s24 = smov 4  }
  0x35   :  { %102 = dma.hbm_to_vmem [thread:$0]  %s11025_s10, 2048, %s97_s14, [#allocation11], %s8546_s8, %s8546_s8, %s8547_s24  }
  0x36   :  { %s8548_s5 = smov [#allocation2]   ;;  %s8549_s29 = smov [#allocation6]  }
  0x37   :  { %s34_s22 = sshll.u32 %s8548_s5, 4  ;;  %s58_s30 = sshll.u32 %s8549_s29, 4  ;;  %s35_s22 = int_to_ptr.vmem [resolvable:$true] %s34_s22  ;;  %s59_s30 = int_to_ptr.vmem [resolvable:$true] %s58_s30 }
  0x38   :  { %s8443_s18 = scalar_lea.hbm %s11019_s4, 256 }
  0x39   :  { %p8444_p10 = scmp.ne.s32.totalorder %s11019_s4, %s8443_s18  ;;  %p8447_p11 = scmp.lt.u32.totalorder %s8443_s18, %s11019_s4 }
  0x3b   :  { %p8449_p12 = pnand %p8447_p11, %p8444_p10 }
  0x3d   :  { %8452 = shalt.err (!%p8449_p12)
}
  0x3e   :  { %s8453_s10 = scalar_lea.vmem %s35_s22, 256  ;;  %p8458_p0 = scmp.lt.s32.totalorder %s35_s22, %s35_s22 }
  0x3f   :  { %p8454_p13 = scmp.ne.s32.totalorder %s35_s22, %s8453_s10  ;;  %p8459_p1 = scmp.lt.s32.totalorder %s8453_s10, %s8453_s10 }
  0x41   :  { %p8460_p2 = por %p8459_p1, %p8458_p0 }
  0x43   :  { %p8461_p3 = pnand %p8460_p2, %p8454_p13 }
  0x45   :  { %8464 = shalt.err (!%p8461_p3)
}
  0x46   :  { %40 = dma.hbm_to_vmem [thread:$0]  %s11019_s4, 256, %s35_s22, [#allocation3], %s8541_s15, %s8541_s15, %s8542_s16  }
  0x47   :  { %s8465_s27 = scalar_lea.hbm %s11021_s6, 256 }
  0x48   :  { %p8466_p4 = scmp.ne.s32.totalorder %s11021_s6, %s8465_s27  ;;  %p8469_p5 = scmp.lt.u32.totalorder %s8465_s27, %s11021_s6 }
  0x4a   :  { %p8471_p6 = pnand %p8469_p5, %p8466_p4 }
  0x4c   :  { %8474 = shalt.err (!%p8471_p6)
}
  0x4d   :  { %s8475_s17 = scalar_lea.vmem %s59_s30, 256  ;;  %p8480_p8 = scmp.lt.s32.totalorder %s59_s30, %s59_s30 }
  0x4e   :  { %p8476_p7 = scmp.ne.s32.totalorder %s59_s30, %s8475_s17  ;;  %p8481_p9 = scmp.lt.s32.totalorder %s8475_s17, %s8475_s17 }
  0x50   :  { %p8482_p10 = por %p8481_p9, %p8480_p8 }
  0x52   :  { %p8483_p11 = pnand %p8482_p10, %p8476_p7 }
  0x54   :  { %8486 = shalt.err (!%p8483_p11)
}
  0x55   :  { %64 = dma.hbm_to_vmem [thread:$0]  %s11021_s6, 256, %s59_s30, [#allocation5], %s8541_s15, %s8541_s15, %s8542_s16  }
  0x56   :  { %s8550_s18 = smov [#allocation9]   ;;  %s8487_s23 = scalar_lea.hbm %s11024_s9, 8192 }
  0x57   :  { %s84_s19 = sshll.u32 %s8550_s18, 4  ;;  %p8488_p12 = scmp.ne.s32.totalorder %s11024_s9, %s8487_s23  ;;  %s85_s19 = int_to_ptr.vmem [resolvable:$true] %s84_s19 }
  0x58   :  { %p8491_p13 = scmp.lt.u32.totalorder %s8487_s23, %s11024_s9 }
  0x5a   :  { %p8493_p0 = pnand %p8491_p13, %p8488_p12 }
  0x5c   :  { %8496 = shalt.err (!%p8493_p0)
}
  0x5d   :  { %s8497_s24 = scalar_lea.vmem %s85_s19, 8192  ;;  %p8502_p2 = scmp.lt.s32.totalorder %s85_s19, %s85_s19 }
  0x5e   :  { %p8498_p1 = scmp.ne.s32.totalorder %s85_s19, %s8497_s24  ;;  %p8503_p3 = scmp.lt.s32.totalorder %s8497_s24, %s8497_s24 }
  0x60   :  { %p8504_p4 = por %p8503_p3, %p8502_p2 }
  0x62   :  { %p8505_p5 = pnand %p8504_p4, %p8498_p1 }
  0x64   :  { %8508 = shalt.err (!%p8505_p5)
}
  0x65   :  { %s8551_s6 = smov 256   ;;  %s8552_s15 = smov 16  }
  0x66   :  { %90 = dma.hbm_to_vmem [thread:$0]  %s11024_s9, 8192, %s85_s19, [#allocation8], %s8551_s6, %s8551_s6, %s8552_s15  }
  0x67   :  { %s8553_s27 = smov [#allocation12]   ;;  %s8509_s13 = scalar_lea.hbm %s11026_s11, 1008 }
  0x68   :  { %s109_s28 = sshll.u32 %s8553_s27, 4  ;;  %p8510_p6 = scmp.ne.s32.totalorder %s11026_s11, %s8509_s13  ;;  %s110_s28 = int_to_ptr.vmem [resolvable:$true] %s109_s28 }
  0x69   :  { %p8513_p7 = scmp.lt.u32.totalorder %s8509_s13, %s11026_s11 }
  0x6b   :  { %p8515_p8 = pnand %p8513_p7, %p8510_p6 }
  0x6d   :  { %8518 = shalt.err (!%p8515_p8)
}
  0x6e   :  { %s8519_s20 = scalar_lea.vmem %s110_s28, 1008  ;;  %s8523_s9 = scalar_lea.vmem %s110_s28, 1024 }
  0x6f   :  { %p8520_p9 = scmp.ne.s32.totalorder %s110_s28, %s8519_s20  ;;  %p8524_p10 = scmp.lt.s32.totalorder %s110_s28, %s110_s28 }
  0x70   :  { %p8525_p11 = scmp.lt.s32.totalorder %s8523_s9, %s8519_s20 }
  0x72   :  { %p8526_p12 = por %p8525_p11, %p8524_p10 }
  0x74   :  { %p8527_p13 = pnand %p8526_p12, %p8520_p9 }
  0x76   :  { %8530 = shalt.err (!%p8527_p13)
}
  0x77   :  { %112 = dma.hbm_to_vmem [thread:$0]  %s11026_s11, 1008, %s110_s28, [#allocation11]  }
  0x78   :  { %8531 = dma.done.wait [#allocation3], 256  }
  0x79   :  { %8532 = vsyncadd [#allocation3], 4294967040 }
  0x7a   :  { %8533 = dma.done.wait [#allocation5], 512  }
  0x7b   :  { %8534 = vsyncadd [#allocation5], 4294966784 }
  0x7c   :  { %8535 = dma.done.wait [#allocation8], 25600  }
  0x7d   :  { %8536 = vsyncadd [#allocation8], 4294941696 }
  0x7e   :  { %8537 = dma.done.wait [#allocation11], 3056  }
  0x7f   :  { %8538 = vsyncadd [#allocation11], 4294964240  ;;  %v11028_v0 = vmov 0   ;;  %v11030_v1 = vmov 0.0   ;;  %v138_v2 = vld [vmem:[%s11015_s0] sm:$0xff]  ;;  %v139_v3 = vld [vmem:[%s11015_s0 + $0x8] sm:$0xff]  ;;  %v136_v9 = vlaneseq }
  0x80   :  { %7675 = vset.pattern.permute.xlu0 %v11028_v0  ;;  %7256 = vmatprep.subr.bf16.mxu0 %v11030_v1  ;;  %v7677_v4 = vld [vmem:[%s11017_s2] sm:$0xff]   ;;  %vm8556_vm0 = vmmov 0   ;;  %v152_v6 = vld [vmem:[%s11016_s1 + $0x8] sm:$0xff]  ;;  %vm174_vm3 = vcmask 130048   ;;  %v7681_v17 = vld [vmem:[#allocation7 + $0x4] ss:$136 sps:$4 sm:$0xff]  }
  0x81   :  { %7676 = vset.pattern.permute.xlu1 %v11028_v0  ;;  %7268 = vmatprep.subr.bf16.mxu1 %v11030_v1  ;;  %v151_v5 = vld [vmem:[%s11016_s1] sm:$0xff]  ;;  %v7686_v8 = vld [vmem:[#allocation7 + $0x118] ss:$136 sps:$4 sm:$0xff]   ;;  %v137_v10 = vand.u32 127, %v136_v9  ;;  %v7689_v26 = vld [vmem:[#allocation7 + $0x224] ss:$136 sps:$4 sm:$0xff]  }
  0x82   :  { %141 = vperm.xlu0 %7675, %v138_v2   ;;  %7257 = vmatpush3.bf16.msra.mxu0 %v7677_v4  ;;  %v7682_v7 = vld [vmem:[#allocation7 + $0x8] ss:$136 sps:$4 sm:$0xff]   ;;  %v7678_v15 = vld [vmem:[%s11017_s2 + $0x8] sm:$0xff]   ;;  %vm360_vm6 = vcmask 523264   ;;  %s8557_s29 = smov 32   ;;  %s8558_s13 = smov 48  }
  0x83   :  { %7262 = vmatprep.subr.bf16.mxu0 %v11030_v1  ;;  %7258 = vmatprep.mubr.msk.bf16.mxu0 %vm8556_vm0, %v11030_v1  ;;  %v7679_v22 = vld [vmem:[#allocation7] ss:$136 sps:$4 sm:$0xff]   ;;  %v7685_v24 = vld [vmem:[#allocation7 + $0x114] ss:$136 sps:$4 sm:$0xff]   ;;  %v7683_v25 = vld [vmem:[#allocation7 + $0x110] ss:$136 sps:$4 sm:$0xff]  }
  0x84   :  { %7276 = vmatprep.mubr.msk.bf16.mxu1 %vm8556_vm0, %v11030_v1  ;;  %154 = vperm.xlu1 %7676, %v151_v5   ;;  %v7687_v27 = vld [vmem:[#allocation7 + $0x220] ss:$136 sps:$4 sm:$0xff]   ;;  %v7693_v29 = vld [vmem:[#allocation7 + $0x334] ss:$136 sps:$4 sm:$0xff]   ;;  %v7691_v30 = vld [vmem:[#allocation7 + $0x330] ss:$136 sps:$4 sm:$0xff]  }
  0x85   :  { %7269 = vmatpush3.bf16.msra.mxu1 %v7682_v7  ;;  %v7690_v28 = vld [vmem:[#allocation7 + $0x228] ss:$136 sps:$4 sm:$0xff]   ;;  %v7694_v31 = vld [vmem:[#allocation7 + $0x338] ss:$136 sps:$4 sm:$0xff]   ;;  %s8559_s17 = smov 80   ;;  %s8560_s4 = smov 96  }
  0x86   :  { %144 = vperm.xlu0 %7675, %v139_v3   ;;  %7270 = vmatprep.subr.bf16.mxu1 %v11030_v1  ;;  %v166_v32 = vld [vmem:[%s11018_s3] sm:$0xff]  ;;  %v167_v34 = vld [vmem:[%s11018_s3 + $0x8] sm:$0xff]  ;;  %s8561_s22 = smov 112   ;;  %v476_v47 = vshrl.u32 %v136_v9, 7  ;;  %v6692_v57 = vld [vmem:[#allocation12 + $0x2] ss:$0 sm:$0xff] }
  0x87   :  { %v8794_v45 = vld [vmem:[#allocation2] sm:$0xff]  ;;  %v8796_v46 = vld [vmem:[#allocation2 + $0x8] sm:$0xff]  ;;  %v6690_v60 = vld [vmem:[#allocation12] ss:$0 sm:$0xff]  ;;  %vm738_vm7 = vcmask 523648   ;;  %vm660_vm8 = vcmask 261248  }
  0x88   :  { %157 = vperm.xlu1 %7676, %v152_v6   ;;  %v8827_v48 = vsub.s32 0, %v476_v47  ;;  %v8829_v49 = vsub.s32 1, %v476_v47  ;;  %v489_v50 = vsub.s32 2, %v476_v47  ;;  %v135_v51 = vld [vmem:[%s11022_s7] sm:$0xff]  ;;  %v495_v52 = vsub.s32 3, %v476_v47 }
  0x89   :  { %7271 = vmatpush3.bf16.msra.mxu1 %v7686_v8  ;;  %v501_v53 = vsub.s32 4, %v476_v47  ;;  %v507_v54 = vsub.s32 5, %v476_v47  ;;  %v513_v55 = vsub.s32 6, %v476_v47  ;;  %v519_v56 = vsub.s32 7, %v476_v47  ;;  %v6691_v61 = vld [vmem:[#allocation12 + $0x1] ss:$0 sm:$0xff] }
  0x8a   :  { %7272 = vmatprep.subr.bf16.mxu1 %v11030_v1  ;;  %652 = vrot.lane.b32.xlu0 %v8794_v45, %s8552_s15  ;;  %11058 = vst [vmem:[#allocation19_spill] sm:$0xff] %v8829_v49  ;;  %v8835_v58 = vrot.slane %v135_v51, %v8827_v48  ;;  %v8838_v59 = vrot.slane %v135_v51, %v8829_v49  ;;  %vm777_vm9 = vcmask 654848   ;;  %vm699_vm10 = vcmask 392448  }
  0x8b   :  { %v8840_v62 = vrot.slane %v135_v51, %v489_v50  ;;  %v8842_v3 = vrot.slane %v135_v51, %v495_v52  ;;  %v8844_v4 = vrot.slane %v135_v51, %v501_v53  ;;  %v8846_v5 = vrot.slane %v135_v51, %v507_v54 }
  0x8c   :  { %654 = vrot.lane.b32.xlu1 %v8796_v46, %s8552_s15  ;;  %v8848_v9 = vrot.slane %v135_v51, %v513_v55  ;;  %vm816_vm11 = vcmask 786048   ;;  %vm855_vm12 = vcmask 917248   ;;  %vm894_vm13 = vcmask 1048448  }
  0x8d   :  { %7273 = vmatpush3.bf16.msra.mxu1 %v7690_v28  ;;  %11059 = vst [vmem:[#allocation20_spill] sm:$0xff] %v8844_v4  ;;  %vm927_vm14 = vcmask 261120   ;;  %vm930_vm15 = vcmask 392192  }
  0x8e   :  { %7274 = vmatprep.subr.bf16.mxu1 %v11030_v1  ;;  %691 = vrot.lane.b32.xlu0 %v8794_v45, %s8557_s29 }
  0x90   :  { %693 = vrot.lane.b32.xlu1 %v8796_v46, %s8557_s29 }
  0x91   :  { %7275 = vmatpush3.bf16.msra.mxu1 %v7694_v31 }
  0x92   :  { %7300 = vmatprep.subr.bf16.mxu1 %v11030_v1  ;;  %730 = vrot.lane.b32.xlu0 %v8794_v45, %s8558_s13 }
  0x94   :  { %732 = vrot.lane.b32.xlu1 %v8796_v46, %s8558_s13 }
  0x96   :  { %769 = vrot.lane.b32.xlu0 %v8794_v45, %s8546_s8 }
  0x98   :  { %771 = vrot.lane.b32.xlu1 %v8796_v46, %s8546_s8 }
  0x9a   :  { %808 = vrot.lane.b32.xlu0 %v8794_v45, %s8559_s17 }
  0x9c   :  { %810 = vrot.lane.b32.xlu1 %v8796_v46, %s8559_s17 }
  0x9e   :  { %847 = vrot.lane.b32.xlu0 %v8794_v45, %s8560_s4 }
  0xa0   :  { %849 = vrot.lane.b32.xlu1 %v8796_v46, %s8560_s4 }
  0xa2   :  { %886 = vrot.lane.b32.xlu0 %v8794_v45, %s8561_s22 }
  0xa4   :  { %888 = vrot.lane.b32.xlu1 %v8796_v46, %s8561_s22 }
 0x101   :  { %v142_v11 = vpop.permute.xlu0 %141 }
 0x102   :  { %vm146_vm1 = vcmp.eq.s32.totalorder %v142_v11, %v137_v10 }
 0x103   :  { %v148_v13 = vsel %vm146_vm1, 1.0, %v11030_v1  ;;  %v155_v18 = vpop.permute.xlu1 %154  ;;  %vm935_vm1 = vcmask 654336  }
 0x104   :  { %vm159_vm4 = vcmp.eq.s32.totalorder %v155_v18, %v137_v10 }
 0x105   :  { %v145_v12 = vpop.permute.xlu0 %144  ;;  %v161_v19 = vsel %vm159_vm4, 1.0, %v11030_v1  ;;  %vm941_vm4 = vcmask 916480  }
 0x106   :  { %vm147_vm2 = vcmp.eq.s32.totalorder %v145_v12, %v137_v10 }
 0x107   :  { %v149_v14 = vsel %vm147_vm2, 1.0, %v11030_v1  ;;  %v158_v20 = vpop.permute.xlu1 %157  ;;  %vm938_vm2 = vcmask 785408  }
 0x108   :  { %v150_v16 = vpack.c.bf16 %v149_v14, %v148_v13  ;;  %vm160_vm5 = vcmp.eq.s32.totalorder %v158_v20, %v137_v10  ;;  %v8850_v10 = vrot.slane %v135_v51, %v519_v56 }
 0x109   :  { %v162_v21 = vsel %vm160_vm5, 1.0, %v11030_v1 }
 0x10a   :  { %7259 = vmatmul.mubr.msk.bf16.vlgmr.msra.gmra.mrb[0].mxu0 %vm174_vm3, %v150_v16  ;;  %v163_v23 = vpack.c.bf16 %v162_v21, %v161_v19 }
 0x10b   :  { %7263 = vmatpush3.bf16.msra.mxu0 %v7678_v15  ;;  %7264 = vmatprep.mubr.msk.bf16.mxu0 %vm8556_vm0, %v11030_v1 }
 0x10c   :  { %364 = vmatprep.subr.bf16.mxu0 %v7681_v17 }
 0x112   :  { %7265 = vmatmul.mubr.msk.bf16.vlgmr.msra.gmra.mrb[4].mxu0 %vm174_vm3, %v163_v23 }
 0x113   :  { %365 = vmatpush1.bf16.msra.mxu0 %v7679_v22  ;;  %396 = vmatprep.mubr.bf16.mxu0 %v11028_v0 }
 0x114   :  { %366 = vmatprep.subr.bf16.mxu0 %v7685_v24 }
 0x117   :  { %367 = vmatpush1.bf16.msra.mxu0 %v7683_v25 }
 0x118   :  { %368 = vmatprep.subr.bf16.mxu0 %v7689_v26 }
 0x11b   :  { %369 = vmatpush1.bf16.msra.mxu0 %v7687_v27 }
 0x11c   :  { %370 = vmatprep.subr.bf16.mxu0 %v7693_v29 }
 0x11f   :  { %371 = vmatpush1.bf16.msra.mxu0 %v7691_v30 }
 0x120   :  { %7280 = vmatprep.subr.bf16.mxu0 %v11030_v1 }
 0x1dd   :  { %v212_v33 = vpop.f32.mrb[0].mxu0 }
 0x1de   :  { %v7260_v35 = vpop.f32.mrb[1].mxu0  ;;  %v8778_v37 = vadd.f32 %v212_v33, %v166_v32 }
 0x1df   :  { %v215_v36 = vpop.f32.mrb[2].mxu0 }
 0x1e0   :  { %v8780_v38 = vadd.f32 %v215_v36, %v167_v34  ;;  %v7261_v39 = vpop.f32.mrb[3].mxu0 }
 0x1e2   :  { %v295_v40 = vpack.c.bf16 %v8780_v38, %v8778_v37 }
 0x1e4   :  { %6688 = vmatmul.mubr.msk.bf16.vlgmr.msra.gmra.mrb[8].mxu0 %vm360_vm6, %v295_v40  ;;  %7277 = vmatmul.mubr.msk.bf16.vlgmr.msra.gmra.mrb[0].mxu1 %vm360_vm6, %v295_v40 }
 0x1e5   :  { %7296 = vmatprep.mubr.msk.bf16.mxu0 %vm8556_vm0, %v11030_v1  ;;  %7316 = vmatprep.mubr.msk.bf16.mxu1 %vm8556_vm0, %v11030_v1  ;;  %v8790_v41 = vpop.f32.mrb[4].mxu0 }
 0x1e6   :  { %11056 = vst [vmem:[#allocation17_spill] sm:$0xff] %v8790_v41  ;;  %v7266_v42 = vpop.f32.mrb[5].mxu0 }
 0x1e7   :  { %v8792_v43 = vpop.f32.mrb[6].mxu0 }
 0x1e8   :  { %11057 = vst [vmem:[#allocation18_spill] sm:$0xff] %v8792_v43  ;;  %v7267_v44 = vpop.f32.mrb[7].mxu0 }
 0x2b7   :  { %v398_v63 = vpop.f32.mrb[8].mxu0  ;;  %v441_v2 = vpop.f32.mrb[0].mxu1 }
 0x2b8   :  { %v473_v6 = vadd.f32 %v6692_v57, %v441_v2  ;;  %v400_v7 = vpop.f32.mrb[9].mxu0  ;;  %v7278_v8 = vpop.f32.mrb[1].mxu1  ;;  %v8852_v11 = vadd.f32 %v6690_v60, %v398_v63 }
 0x2b9   :  { %v464_v12 = vadd.f32 %v6691_v61, %v400_v7  ;;  %v402_v13 = vpop.f32.mrb[10].mxu0  ;;  %v444_v14 = vpop.f32.mrb[2].mxu1 }
 0x2ba   :  { %v8854_v15 = vadd.f32 %v6690_v60, %v402_v13  ;;  %v474_v16 = vadd.f32 %v6692_v57, %v444_v14  ;;  %v404_v17 = vpop.f32.mrb[11].mxu0  ;;  %v7279_v18 = vpop.f32.mrb[3].mxu1  ;;  %v531_v19 = vmul.f32 %v8835_v58, %v473_v6  ;;  %v533_v20 = vmul.f32 %v8838_v59, %v473_v6 }
 0x2bb   :  { %v465_v21 = vadd.f32 %v6691_v61, %v404_v17  ;;  %v479_v22 = vmul.f32 %v8835_v58, %v464_v12  ;;  %v535_v23 = vmul.f32 %v8840_v62, %v473_v6  ;;  %v485_v24 = vmul.f32 %v8838_v59, %v464_v12 }
 0x2bc   :  { %v555_v25 = vpack.c.bf16 %v8854_v15, %v8852_v11  ;;  %v532_v26 = vmul.f32 %v8835_v58, %v474_v16  ;;  %v534_v27 = vmul.f32 %v8838_v59, %v474_v16  ;;  %v536_v28 = vmul.f32 %v8840_v62, %v474_v16 }
 0x2bd   :  { %v480_v29 = vmul.f32 %v8835_v58, %v465_v21  ;;  %v486_v30 = vmul.f32 %v8838_v59, %v465_v21  ;;  %v537_v31 = vmul.f32 %v8842_v3, %v473_v6  ;;  %v538_v32 = vmul.f32 %v8842_v3, %v474_v16 }
 0x2be   :  { %v547_v33 = vpack.c.bf16 %v532_v26, %v531_v19  ;;  %v548_v34 = vpack.c.bf16 %v534_v27, %v533_v20  ;;  %v549_v35 = vpack.c.bf16 %v536_v28, %v535_v23  ;;  %v539_v36 = vmul.f32 %v8844_v4, %v473_v6 }
 0x2bf   :  { %v523_v39 = vpack.c.bf16 %v480_v29, %v479_v22  ;;  %v524_v40 = vpack.c.bf16 %v486_v30, %v485_v24  ;;  %v550_v42 = vpack.c.bf16 %v538_v32, %v537_v31  ;;  %v540_v44 = vmul.f32 %v8844_v4, %v474_v16 }
 0x2c0   :  { %7301 = vmatpush3.bf16.msra.mxu1 %v547_v33  ;;  %v491_v47 = vmul.f32 %v8840_v62, %v464_v12  ;;  %v492_v50 = vmul.f32 %v8840_v62, %v465_v21  ;;  %v541_v51 = vmul.f32 %v8846_v5, %v473_v6  ;;  %v542_v52 = vmul.f32 %v8846_v5, %v474_v16 }
 0x2c1   :  { %v560_v53 = vsel %vm360_vm6, %v523_v39, 0  ;;  %7302 = vmatprep.subr.bf16.mxu1 %v11030_v1  ;;  %v551_v54 = vpack.c.bf16 %v540_v44, %v539_v36  ;;  %v543_v57 = vmul.f32 %v8848_v9, %v473_v6  ;;  %v544_v60 = vmul.f32 %v8848_v9, %v474_v16  ;;  %v8921_v36 = vpop.permute.xlu1 %654 }
 0x2c2   :  { %7281 = vmatpush3.bf16.xpose.msra.mxu0 %v560_v53  ;;  %v525_v55 = vpack.c.bf16 %v492_v50, %v491_v47  ;;  %v552_v56 = vpack.c.bf16 %v542_v52, %v541_v51  ;;  %v497_v61 = vmul.f32 %v8842_v3, %v464_v12  ;;  %v498_v63 = vmul.f32 %v8842_v3, %v465_v21 }
 0x2c3   :  { %7282 = vmatprep.subr.bf16.mxu0 %v11030_v1  ;;  %v545_v2 = vmul.f32 %v8850_v10, %v473_v6  ;;  %v546_v7 = vmul.f32 %v8850_v10, %v474_v16  ;;  %v553_v8 = vpack.c.bf16 %v544_v60, %v543_v57  ;;  %v503_v13 = vmul.f32 %v8844_v4, %v464_v12 }
 0x2c4   :  { %7303 = vmatpush3.bf16.msra.mxu1 %v548_v34  ;;  %v504_v14 = vmul.f32 %v8844_v4, %v465_v21  ;;  %v509_v17 = vmul.f32 %v8846_v5, %v464_v12  ;;  %v526_v18 = vpack.c.bf16 %v498_v63, %v497_v61  ;;  %v510_v20 = vmul.f32 %v8846_v5, %v465_v21  ;;  %v8917_v34 = vpop.permute.xlu0 %652 }
 0x2c5   :  { %7304 = vmatprep.subr.bf16.mxu1 %v11030_v1  ;;  %v554_v19 = vpack.c.bf16 %v546_v7, %v545_v2  ;;  %v515_v22 = vmul.f32 %v8848_v9, %v464_v12  ;;  %v516_v6 = vmul.f32 %v8848_v9, %v465_v21  ;;  %v521_v16 = vmul.f32 %v8850_v10, %v464_v12 }
 0x2c6   :  { %v527_v23 = vpack.c.bf16 %v504_v14, %v503_v13  ;;  %v522_v24 = vmul.f32 %v8850_v10, %v465_v21  ;;  %v528_v26 = vpack.c.bf16 %v510_v20, %v509_v17  ;;  %v563_v29 = vsel %vm360_vm6, %v524_v40, 0  ;;  %v8925_v40 = vpop.permute.xlu1 %693 }
 0x2c7   :  { %v529_v27 = vpack.c.bf16 %v516_v6, %v515_v22  ;;  %v566_v30 = vsel %vm360_vm6, %v525_v55, 0  ;;  %v569_v12 = vsel %vm360_vm6, %v526_v18, 0 }
 0x2c8   :  { %7305 = vmatpush3.bf16.msra.mxu1 %v549_v35  ;;  %v530_v28 = vpack.c.bf16 %v522_v24, %v521_v16  ;;  %v572_v21 = vsel %vm360_vm6, %v527_v23, 0  ;;  %v575_v31 = vsel %vm360_vm6, %v528_v26, 0  ;;  %v8919_v35 = vpop.permute.xlu0 %691 }
 0x2c9   :  { %7306 = vmatprep.subr.bf16.mxu1 %v11030_v1  ;;  %v578_v32 = vsel %vm360_vm6, %v529_v27, 0 }
 0x2ca   :  { %7283 = vmatpush3.bf16.xpose.msra.mxu0 %v563_v29  ;;  %v581_v33 = vsel %vm360_vm6, %v530_v28, 0  ;;  %v8929_v51 = vpop.permute.xlu1 %732 }
 0x2cb   :  { %7284 = vmatprep.subr.bf16.mxu0 %v11030_v1 }
 0x2cc   :  { %7307 = vmatpush3.bf16.msra.mxu1 %v550_v42  ;;  %v8923_v39 = vpop.permute.xlu0 %730 }
 0x2cd   :  { %7308 = vmatprep.subr.bf16.mxu1 %v11030_v1 }
 0x2ce   :  { %v8949_v61 = vpop.permute.xlu1 %771 }
 0x2d0   :  { %7309 = vmatpush3.bf16.msra.mxu1 %v551_v54  ;;  %v8927_v42 = vpop.permute.xlu0 %769 }
 0x2d1   :  { %7310 = vmatprep.subr.bf16.mxu1 %v11030_v1 }
 0x2d2   :  { %7285 = vmatpush3.bf16.xpose.msra.mxu0 %v566_v30  ;;  %v8973_v20 = vpop.permute.xlu1 %810 }
 0x2d3   :  { %7286 = vmatprep.subr.bf16.mxu0 %v11030_v1 }
 0x2d4   :  { %7311 = vmatpush3.bf16.msra.mxu1 %v552_v56  ;;  %v8947_v60 = vpop.permute.xlu0 %808 }
 0x2d5   :  { %7312 = vmatprep.subr.bf16.mxu1 %v11030_v1 }
 0x2d6   :  { %v8987_v26 = vpop.permute.xlu1 %849 }
 0x2d8   :  { %7313 = vmatpush3.bf16.msra.mxu1 %v553_v8  ;;  %v8961_v13 = vpop.permute.xlu0 %847 }
 0x2d9   :  { %7314 = vmatprep.subr.bf16.mxu1 %v11030_v1 }
 0x2da   :  { %7287 = vmatpush3.bf16.xpose.msra.mxu0 %v569_v12 }
 0x2db   :  { %7288 = vmatprep.subr.bf16.mxu0 %v11030_v1 }
 0x2dc   :  { %7315 = vmatpush3.bf16.msra.mxu1 %v554_v19  ;;  %v8985_v24 = vpop.permute.xlu0 %886 }
 0x2dd   :  { %7320 = vmatprep.subr.bf16.mxu1 %v11030_v1 }
 0x2e2   :  { %7289 = vmatpush3.bf16.xpose.msra.mxu0 %v572_v21 }
 0x2e3   :  { %7290 = vmatprep.subr.bf16.mxu0 %v11030_v1 }
 0x2ea   :  { %7291 = vmatpush3.bf16.xpose.msra.mxu0 %v575_v31 }
 0x2eb   :  { %7292 = vmatprep.subr.bf16.mxu0 %v11030_v1 }
 0x2f2   :  { %7293 = vmatpush3.bf16.xpose.msra.mxu0 %v578_v32 }
 0x2f3   :  { %7294 = vmatprep.subr.bf16.mxu0 %v11030_v1 }
 0x2fa   :  { %7295 = vmatpush3.bf16.xpose.msra.mxu0 %v581_v33  ;;  %v9009_v33 = vpop.permute.xlu1 %888 }
 0x2fb   :  { %11060 = vst [vmem:[#allocation21_spill] sm:$0xff] %v9009_v33 }
 0x301   :  { %7297 = vmatmul.mubr.msk.bf16.vlgmr.msra.gmra.mrb[12].mxu0 %vm360_vm6, %v555_v25 }
 0x3d4   :  { %v617_v44 = vpop.f32.mrb[12].mxu0 }
 0x3d5   :  { %v624_v47 = vmul.f32 0.35355338, %v617_v44  ;;  %v7298_v50 = vpop.f32.mrb[13].mxu0 }
 0x3d6   :  { %v620_v11 = vpop.f32.mrb[14].mxu0 }
 0x3d7   :  { %v7299_v15 = vpop.f32.mrb[15].mxu0  ;;  %v8932_v25 = vadd.f32 %v8923_v39, %v624_v47  ;;  %v8935_v52 = vadd.f32 %v8917_v34, %v624_v47  ;;  %v625_v53 = vmul.f32 0.35355338, %v620_v11  ;;  %v8942_v56 = vadd.f32 %v8927_v42, %v624_v47 }
 0x3d8   :  { %v8945_v57 = vadd.f32 %v8919_v35, %v624_v47  ;;  %v8956_v7 = vadd.f32 %v8947_v60, %v624_v47  ;;  %v8983_v16 = vadd.f32 %v8961_v13, %v624_v47  ;;  %v8997_v30 = vadd.f32 %v8985_v24, %v624_v47 }
 0x3d9   :  { %v739_v54 = vsel %vm738_vm7, %v8932_v25, -inf  ;;  %v661_v55 = vsel %vm660_vm8, %v8935_v52, -inf  ;;  %v778_v63 = vsel %vm777_vm9, %v8942_v56, -inf  ;;  %v8959_v8 = vadd.f32 %v8925_v40, %v625_v53 }
 0x3da   :  { %740 = vmax.xlane.f32.xlu1 %v739_v54  ;;  %662 = vmax.xlane.f32.xlu0 %v661_v55  ;;  %v700_v2 = vsel %vm699_vm10, %v8945_v57, -inf  ;;  %v817_v14 = vsel %vm816_vm11, %v8956_v7, -inf  ;;  %v8968_v18 = vadd.f32 %v8929_v51, %v625_v53  ;;  %v8971_v19 = vadd.f32 %v8921_v36, %v625_v53 }
 0x3db   :  { %v703_v17 = vsel %vm699_vm10, %v8959_v8, -inf  ;;  %v8980_v6 = vadd.f32 %v8949_v61, %v625_v53  ;;  %v856_v28 = vsel %vm855_vm12, %v8983_v16, -inf  ;;  %v8994_v29 = vadd.f32 %v8973_v20, %v625_v53 }
 0x3dc   :  { %v742_v22 = vsel %vm738_vm7, %v8968_v18, -inf  ;;  %v664_v23 = vsel %vm660_vm8, %v8971_v19, -inf  ;;  %v895_v21 = vsel %vm894_vm13, %v8997_v30, -inf  ;;  %v9004_v31 = vadd.f32 %v8987_v26, %v625_v53 }
 0x3dd   :  { %v781_v27 = vsel %vm777_vm9, %v8980_v6, -inf  ;;  %v820_v12 = vsel %vm816_vm11, %v8994_v29, -inf  ;;  %v9007_v32 = vadd.f32 %v624_v47, %v8794_v45  ;;  %v9016_v11 = vadd.f32 %v9009_v33, %v625_v53 }
 0x3de   :  { %779 = vmax.xlane.f32.xlu1 %v778_v63  ;;  %701 = vmax.xlane.f32.xlu0 %v700_v2  ;;  %v859_v44 = vsel %vm855_vm12, %v9004_v31, -inf  ;;  %v9021_v45 = vadd.f32 %v625_v53, %v8796_v46 }
 0x3df   :  { %v628_v50 = vsel %vm174_vm3, %v9007_v32, -inf  ;;  %v898_v15 = vsel %vm894_vm13, %v9016_v11, -inf }
 0x3e0   :  { %v631_v47 = vsel %vm174_vm3, %v9021_v45, -inf }
 0x3e2   :  { %818 = vmax.xlane.f32.xlu1 %v817_v14  ;;  %704 = vmax.xlane.f32.xlu0 %v703_v17 }
 0x3e6   :  { %743 = vmax.xlane.f32.xlu0 %v742_v22  ;;  %665 = vmax.xlane.f32.xlu1 %v664_v23 }
 0x3ea   :  { %782 = vmax.xlane.f32.xlu0 %v781_v27  ;;  %857 = vmax.xlane.f32.xlu1 %v856_v28 }
 0x3ee   :  { %821 = vmax.xlane.f32.xlu0 %v820_v12  ;;  %896 = vmax.xlane.f32.xlu1 %v895_v21 }
 0x3f2   :  { %860 = vmax.xlane.f32.xlu0 %v859_v44  ;;  %629 = vmax.xlane.f32.xlu1 %v628_v50 }
 0x3f6   :  { %899 = vmax.xlane.f32.xlu0 %v898_v15 }
 0x3fa   :  { %632 = vmax.xlane.f32.xlu0 %v631_v47 }
 0x467   :  { %v741_v54 = vpop.xlane.xlu1 %740  ;;  %v663_v55 = vpop.xlane.xlu0 %662 }
 0x468   :  { %v745_v63 = vsub.f32 %v8932_v25, %v741_v54  ;;  %v667_v2 = vsub.f32 %v8935_v52, %v663_v55 }
 0x46a   :  { %v747_v14 = vmul.f32 1.442695, %v745_v63  ;;  %v669_v17 = vmul.f32 1.442695, %v667_v2 }
 0x46b   :  { %v780_v22 = vpop.xlane.xlu1 %779  ;;  %v702_v23 = vpop.xlane.xlu0 %701 }
 0x46c   :  { %7939 = vpow2.f32 %v747_v14  ;;  %v784_v27 = vsub.f32 %v8942_v56, %v780_v22  ;;  %v706_v46 = vsub.f32 %v8945_v57, %v702_v23 }
 0x46d   :  { %7941 = vpow2.f32 %v669_v17 }
 0x46e   :  { %v786_v53 = vmul.f32 1.442695, %v784_v27  ;;  %v708_v28 = vmul.f32 1.442695, %v706_v46 }
 0x46f   :  { %v819_v12 = vpop.xlane.xlu1 %818  ;;  %v705_v21 = vpop.xlane.xlu0 %704 }
 0x470   :  { %7943 = vpow2.f32 %v786_v53  ;;  %v823_v44 = vsub.f32 %v8956_v7, %v819_v12  ;;  %v707_v25 = vsub.f32 %v8959_v8, %v705_v21 }
 0x471   :  { %7945 = vpow2.f32 %v708_v28 }
 0x472   :  { %v825_v52 = vmul.f32 1.442695, %v823_v44  ;;  %v710_v50 = vmul.f32 1.442695, %v707_v25 }
 0x473   :  { %v744_v15 = vpop.xlane.xlu0 %743  ;;  %v666_v47 = vpop.xlane.xlu1 %665 }
 0x474   :  { %7947 = vpow2.f32 %v825_v52  ;;  %v746_v56 = vsub.f32 %v8968_v18, %v744_v15  ;;  %v668_v57 = vsub.f32 %v8971_v19, %v666_v47 }
 0x475   :  { %7949 = vpow2.f32 %v710_v50 }
 0x476   :  { %v9033_v54 = vpop.eup %7939  ;;  %v749_v55 = vmul.f32 1.442695, %v746_v56  ;;  %v671_v63 = vmul.f32 1.442695, %v668_v57 }
 0x477   :  { %v9035_v2 = vpop.eup %7941  ;;  %v783_v7 = vpop.xlane.xlu0 %782  ;;  %753 = vrot.lane.b32.xlu0 %v9033_v54, %s8559_s17 }
 0x478   :  { %v858_v14 = vpop.xlane.xlu1 %857  ;;  %7951 = vpow2.f32 %v749_v55  ;;  %v785_v8 = vsub.f32 %v8980_v6, %v783_v7  ;;  %675 = vrot.lane.b32.xlu1 %v9035_v2, %s8561_s22 }
 0x479   :  { %v862_v18 = vsub.f32 %v8983_v16, %v858_v14  ;;  %7953 = vpow2.f32 %v671_v63 }
 0x47a   :  { %v9043_v19 = vpop.eup %7943  ;;  %v788_v17 = vmul.f32 1.442695, %v785_v8 }
 0x47b   :  { %v864_v22 = vmul.f32 1.442695, %v862_v18  ;;  %v9045_v23 = vpop.eup %7945  ;;  %v822_v27 = vpop.xlane.xlu0 %821  ;;  %792 = vrot.lane.b32.xlu0 %v9043_v19, %s8546_s8 }
 0x47c   :  { %v897_v46 = vpop.xlane.xlu1 %896  ;;  %7955 = vpow2.f32 %v788_v17  ;;  %v824_v6 = vsub.f32 %v8994_v29, %v822_v27  ;;  %714 = vrot.lane.b32.xlu1 %v9045_v23, %s8560_s4 }
 0x47d   :  { %v901_v16 = vsub.f32 %v8997_v30, %v897_v46  ;;  %7957 = vpow2.f32 %v864_v22 }
 0x47e   :  { %v9053_v53 = vpop.eup %7947  ;;  %v827_v28 = vmul.f32 1.442695, %v824_v6 }
 0x47f   :  { %v903_v12 = vmul.f32 1.442695, %v901_v16  ;;  %v9055_v21 = vpop.eup %7949  ;;  %v861_v44 = vpop.xlane.xlu0 %860  ;;  %831 = vrot.lane.b32.xlu0 %v9053_v53, %s8558_s13 }
 0x480   :  { %7959 = vpow2.f32 %v827_v28  ;;  %v863_v25 = vsub.f32 %v9004_v31, %v861_v44  ;;  %716 = vrot.lane.b32.xlu1 %v9055_v21, %s8560_s4  ;;  %v630_v7 = vpop.xlane.xlu1 %629 }
 0x481   :  { %7961 = vpow2.f32 %v903_v12  ;;  %v634_v14 = vsub.f32 %v9007_v32, %v630_v7 }
 0x482   :  { %v9062_v29 = vpop.eup %7951  ;;  %v866_v30 = vmul.f32 1.442695, %v863_v25 }
 0x483   :  { %v9064_v52 = vpop.eup %7953  ;;  %v900_v50 = vpop.xlane.xlu0 %899  ;;  %v636_v8 = vmul.f32 1.442695, %v634_v14 }
 0x484   :  { %7963 = vpow2.f32 %v866_v30  ;;  %v902_v15 = vsub.f32 %v9016_v11, %v900_v50  ;;  %755 = vrot.lane.b32.xlu1 %v9062_v29, %s8559_s17  ;;  %677 = vrot.lane.b32.xlu0 %v9064_v52, %s8561_s22 }
 0x486   :  { %v9071_v31 = vpop.eup %7955  ;;  %v905_v47 = vmul.f32 1.442695, %v902_v15 }
 0x487   :  { %v9073_v56 = vpop.eup %7957  ;;  %v633_v18 = vpop.xlane.xlu0 %632 }
 0x488   :  { %7965 = vpow2.f32 %v905_v47  ;;  %794 = vrot.lane.b32.xlu1 %v9071_v31, %s8546_s8  ;;  %870 = vrot.lane.b32.xlu0 %v9073_v56, %s8557_s29  ;;  %v635_v17 = vsub.f32 %v9021_v45, %v633_v18 }
 0x489   :  { %7967 = vpow2.f32 %v636_v8 }
 0x48a   :  { %v9079_v57 = vpop.eup %7959  ;;  %v638_v22 = vmul.f32 1.442695, %v635_v17 }
 0x48b   :  { %v9081_v11 = vpop.eup %7961 }
 0x48c   :  { %833 = vrot.lane.b32.xlu1 %v9079_v57, %s8558_s13  ;;  %909 = vrot.lane.b32.xlu0 %v9081_v11, %s8552_s15  ;;  %7969 = vpow2.f32 %v638_v22 }
 0x48e   :  { %v9087_v55 = vpop.eup %7963 }
 0x490   :  { %872 = vrot.lane.b32.xlu1 %v9087_v55, %s8557_s29 }
 0x492   :  { %v9091_v63 = vpop.eup %7965 }
 0x493   :  { %v9097_v27 = vpop.eup %7967 }
 0x494   :  { %911 = vrot.lane.b32.xlu1 %v9091_v63, %s8552_s15  ;;  %v640_v46 = vsel %vm174_vm3, %v9097_v27, 0.0 }
 0x496   :  { %v9101_v6 = vpop.eup %7969 }
 0x497   :  { %v643_v16 = vsel %vm174_vm3, %v9101_v6, 0.0 }
 0x4ab   :  { %641 = vadd.xlane.f32.xlu0 %v640_v46 }
 0x4b8   :  { %644 = vadd.xlane.f32.xlu1 %v643_v16 }
 0x4e9   :  { %v754_v32 = vpop.permute.xlu0 %753 }
 0x4ea   :  { %v676_v28 = vpop.permute.xlu1 %675  ;;  %v759_v15 = vsel %vm174_vm3, %v754_v32, 0.0 }
 0x4eb   :  { %v681_v12 = vsel %vm174_vm3, %v676_v28, 0.0 }
 0x4ec   :  { %682 = vadd.xlane.f32.xlu0 %v681_v12 }
 0x4ed   :  { %v793_v45 = vpop.permute.xlu0 %792 }
 0x4ee   :  { %v715_v44 = vpop.permute.xlu1 %714  ;;  %v798_v14 = vsel %vm174_vm3, %v793_v45, 0.0 }
 0x4ef   :  { %v720_v25 = vsel %vm174_vm3, %v715_v44, 0.0 }
 0x4f0   :  { %721 = vadd.xlane.f32.xlu1 %v720_v25 }
 0x4f1   :  { %v832_v30 = vpop.permute.xlu0 %831 }
 0x4f2   :  { %v717_v50 = vpop.permute.xlu1 %716  ;;  %v837_v22 = vsel %vm174_vm3, %v832_v30, 0.0 }
 0x4f3   :  { %v723_v46 = vsel %vm174_vm3, %v717_v50, 0.0 }
 0x4f4   :  { %760 = vadd.xlane.f32.xlu1 %v759_v15 }
 0x4f6   :  { %v756_v47 = vpop.permute.xlu1 %755  ;;  %v678_v7 = vpop.permute.xlu0 %677 }
 0x4f7   :  { %v684_v8 = vsel %vm174_vm3, %v678_v7, 0.0  ;;  %v762_v16 = vsel %vm174_vm3, %v756_v47, 0.0 }
 0x4f8   :  { %799 = vadd.xlane.f32.xlu1 %v798_v14  ;;  %685 = vadd.xlane.f32.xlu0 %v684_v8 }
 0x4fa   :  { %v795_v18 = vpop.permute.xlu1 %794  ;;  %v871_v17 = vpop.permute.xlu0 %870 }
 0x4fb   :  { %v876_v32 = vsel %vm174_vm3, %v871_v17, 0.0  ;;  %v801_v45 = vsel %vm174_vm3, %v795_v18, 0.0 }
 0x4fc   :  { %838 = vadd.xlane.f32.xlu1 %v837_v22  ;;  %724 = vadd.xlane.f32.xlu0 %v723_v46 }
 0x4fe   :  { %v834_v28 = vpop.permute.xlu1 %833  ;;  %v910_v12 = vpop.permute.xlu0 %909 }
 0x4ff   :  { %v915_v44 = vsel %vm174_vm3, %v910_v12, 0.0  ;;  %v840_v30 = vsel %vm174_vm3, %v834_v28, 0.0 }
 0x500   :  { %763 = vadd.xlane.f32.xlu0 %v762_v16  ;;  %877 = vadd.xlane.f32.xlu1 %v876_v32 }
 0x502   :  { %v873_v25 = vpop.permute.xlu1 %872 }
 0x503   :  { %v879_v50 = vsel %vm174_vm3, %v873_v25, 0.0 }
 0x504   :  { %802 = vadd.xlane.f32.xlu0 %v801_v45  ;;  %916 = vadd.xlane.f32.xlu1 %v915_v44 }
 0x506   :  { %v912_v15 = vpop.permute.xlu1 %911 }
 0x507   :  { %v918_v47 = vsel %vm174_vm3, %v912_v15, 0.0 }
 0x508   :  { %841 = vadd.xlane.f32.xlu0 %v840_v30 }
 0x50c   :  { %880 = vadd.xlane.f32.xlu0 %v879_v50 }
 0x510   :  { %919 = vadd.xlane.f32.xlu0 %v918_v47 }
 0x538   :  { %v642_v14 = vpop.xlane.xlu0 %641 }
 0x539   :  { %7971 = vrcp.f32 %v642_v14 }
 0x543   :  { %v7972_v25 = vpop.eup %7971 }
 0x544   :  { %v648_v1 = vmul.f32 %v7972_v25, %v9097_v27 }
 0x545   :  { %v645_v7 = vpop.xlane.xlu1 %644 }
 0x546   :  { %7973 = vrcp.f32 %v645_v7 }
 0x550   :  { %v7974_v50 = vpop.eup %7973 }
 0x551   :  { %v649_v43 = vmul.f32 %v7974_v50, %v9101_v6 }
 0x579   :  { %v683_v17 = vpop.xlane.xlu0 %682 }
 0x57a   :  { %7975 = vrcp.f32 %v683_v17 }
 0x57d   :  { %v722_v8 = vpop.xlane.xlu1 %721 }
 0x57e   :  { %7977 = vrcp.f32 %v722_v8 }
 0x581   :  { %v761_v18 = vpop.xlane.xlu1 %760 }
 0x582   :  { %7979 = vrcp.f32 %v761_v18 }
 0x584   :  { %v7976_v15 = vpop.eup %7975 }
 0x585   :  { %v800_v22 = vpop.xlane.xlu1 %799  ;;  %v686_v46 = vpop.xlane.xlu0 %685 }
 0x586   :  { %7981 = vrcp.f32 %v800_v22 }
 0x587   :  { %7983 = vrcp.f32 %v686_v46 }
 0x588   :  { %v7978_v47 = vpop.eup %7977 }
 0x589   :  { %v725_v16 = vpop.xlane.xlu0 %724  ;;  %v839_v32 = vpop.xlane.xlu1 %838 }
 0x58a   :  { %7985 = vrcp.f32 %v839_v32 }
 0x58b   :  { %7987 = vrcp.f32 %v725_v16 }
 0x58c   :  { %v7980_v14 = vpop.eup %7979 }
 0x58d   :  { %v764_v28 = vpop.xlane.xlu0 %763  ;;  %v878_v12 = vpop.xlane.xlu1 %877 }
 0x58e   :  { %7989 = vrcp.f32 %v878_v12 }
 0x58f   :  { %7991 = vrcp.f32 %v764_v28  ;;  %v689_v28 = vmul.f32 %v7976_v15, %v9035_v2 }
 0x590   :  { %v7982_v8 = vpop.eup %7981 }
 0x591   :  { %v803_v45 = vpop.xlane.xlu0 %802  ;;  %v917_v30 = vpop.xlane.xlu1 %916  ;;  %v806_v2 = vmul.f32 %v7982_v8, %v9043_v19  ;;  %v7696_v8 = vld [vmem:[#allocation7 + $0x11c] ss:$136 sps:$4 sm:$0xff]  }
 0x592   :  { %7993 = vrcp.f32 %v803_v45  ;;  %v7984_v17 = vpop.eup %7983 }
 0x593   :  { %v690_v45 = vmul.f32 %v7984_v17, %v9064_v52  ;;  %v11061_v17 = vmov 0.0  }
 0x594   :  { %v7986_v18 = vpop.eup %7985 }
 0x595   :  { %v842_v44 = vpop.xlane.xlu0 %841  ;;  %v7988_v46 = vpop.eup %7987  ;;  %v845_v15 = vmul.f32 %v7986_v18, %v9053_v53  ;;  %v7698_v18 = vld [vmem:[#allocation7 + $0x33c] ss:$136 sps:$4 sm:$0xff]  }
 0x596   :  { %7995 = vrcp.f32 %v842_v44  ;;  %v728_v44 = vmul.f32 %v7978_v47, %v9045_v23  ;;  %v925_v23 = vsel %vm174_vm3, %v648_v1, %v689_v28  ;;  %v7695_v47 = vld [vmem:[#allocation7 + $0xc] ss:$136 sps:$4 sm:$0xff]  }
 0x597   :  { %7997 = vrcp.f32 %v917_v30  ;;  %v729_v30 = vmul.f32 %v7988_v46, %v9055_v21  ;;  %v926_v21 = vsel %vm174_vm3, %v649_v43, %v690_v45  ;;  %v11062_v45 = vmov 0  }
 0x598   :  { %v7990_v16 = vpop.eup %7989  ;;  %v928_v6 = vsel %vm927_vm14, %v925_v23, %v728_v44  ;;  %v6694_v44 = vld [vmem:[#allocation12 + $0x3] ss:$0 sm:$0xff] }
 0x599   :  { %v881_v7 = vpop.xlane.xlu0 %880  ;;  %v7992_v32 = vpop.eup %7991 }
 0x59a   :  { %7999 = vrcp.f32 %v881_v7  ;;  %v768_v41 = vmul.f32 %v7992_v32, %v9062_v29  ;;  %v884_v29 = vmul.f32 %v7990_v16, %v9073_v56 }
 0x59c   :  { %v7994_v12 = vpop.eup %7993 }
 0x59d   :  { %v920_v22 = vpop.xlane.xlu0 %919  ;;  %v807_v52 = vmul.f32 %v7994_v12, %v9071_v31 }
 0x59e   :  { %8001 = vrcp.f32 %v920_v22  ;;  %v767_v22 = vmul.f32 %v7980_v14, %v9033_v54  ;;  %v929_v54 = vsel %vm927_vm14, %v926_v21, %v729_v30 }
 0x59f   :  { %v932_v31 = vsel %vm930_vm15, %v929_v54, %v768_v41 }
 0x5a0   :  { %v7996_v0 = vpop.eup %7995  ;;  %v931_v19 = vsel %vm930_vm15, %v928_v6, %v767_v22 }
 0x5a1   :  { %v7998_v7 = vpop.eup %7997  ;;  %v846_v27 = vmul.f32 %v7996_v0, %v9079_v57  ;;  %v933_v53 = vsel %vm360_vm6, %v931_v19, %v806_v2  ;;  %v934_v0 = vsel %vm360_vm6, %v932_v31, %v807_v52 }
 0x5a2   :  { %v923_v1 = vmul.f32 %v7998_v7, %v9081_v11  ;;  %v936_v50 = vsel %vm935_vm1, %v933_v53, %v845_v15 }
 0x5a3   :  { %v937_v56 = vsel %vm935_vm1, %v934_v0, %v846_v27 }
 0x5a4   :  { %v8000_v33 = vpop.eup %7999 }
 0x5a5   :  { %v885_v25 = vmul.f32 %v8000_v33, %v9087_v55  ;;  %v939_v33 = vsel %vm938_vm2, %v936_v50, %v884_v29  ;;  %v7704_v50 = vld [vmem:[#allocation7 + $0x124] ss:$136 sps:$4 sm:$0xff]  }
 0x5a6   :  { %v942_v41 = vsel %vm941_vm4, %v939_v33, %v923_v1  ;;  %v7707_v33 = vld [vmem:[#allocation7 + $0x234] ss:$136 sps:$4 sm:$0xff]  }
 0x5a7   :  { %v940_v55 = vsel %vm938_vm2, %v937_v56, %v885_v25  ;;  %v7702_v56 = vld [vmem:[#allocation7 + $0x120] ss:$136 sps:$4 sm:$0xff]  }
 0x5a8   :  { %v8002_v43 = vpop.eup %8001 }
 0x5a9   :  { %v924_v57 = vmul.f32 %v8002_v43, %v9091_v63  ;;  %v7697_v63 = vld [vmem:[#allocation7 + $0x22c] ss:$136 sps:$4 sm:$0xff]  }
 0x5ab   :  { %v943_v11 = vsel %vm941_vm4, %v940_v55, %v924_v57  ;;  %v7701_v57 = vld [vmem:[#allocation7 + $0x14] ss:$136 sps:$4 sm:$0xff]   ;;  %v7705_v55 = vld [vmem:[#allocation7 + $0x230] ss:$136 sps:$4 sm:$0xff]  }
 0x5ac   :  { %v944_v14 = vpack.c.bf16 %v943_v11, %v942_v41  ;;  %v7710_v41 = vld [vmem:[#allocation7 + $0x344] ss:$136 sps:$4 sm:$0xff]   ;;  %v7711_v11 = vld [vmem:[#allocation9 + $0x100] ss:$16 sps:$4 sm:$0xff]  }
 0x5ad   :  { %7006 = vmatprep.subr.bf16.mxu0 %v7711_v11 }
 0x5ae   :  { %7317 = vmatmul.mubr.bf16.vlgmr.msra.gmra.mrb[4].mxu1 %v944_v14  ;;  %v7713_v14 = vld [vmem:[#allocation9 + $0x120] ss:$16 sps:$4 sm:$0xff]  }
 0x5af   :  { %7321 = vmatpush3.bf16.msra.mxu1 %v7695_v47  ;;  %7328 = vmatprep.mubr.msk.bf16.mxu1 %vm8556_vm0, %v11061_v17  ;;  %v7712_v47 = vld [vmem:[#allocation9] ss:$16 sps:$4 sm:$0xff]  }
 0x5b0   :  { %7322 = vmatprep.subr.bf16.mxu1 %v11061_v17  ;;  %7007 = vmatpush3.bf16.msra.mxu0 %v7712_v47 }
 0x5b1   :  { %7008 = vmatprep.subr.bf16.mxu0 %v7713_v14 }
 0x5b3   :  { %7323 = vmatpush3.bf16.msra.mxu1 %v7696_v8  ;;  %v7708_v8 = vld [vmem:[#allocation7 + $0x340] ss:$136 sps:$4 sm:$0xff]  }
 0x5b4   :  { %7324 = vmatprep.subr.bf16.mxu1 %v11061_v17 }
 0x5b7   :  { %7325 = vmatpush3.bf16.msra.mxu1 %v7697_v63  ;;  %v7714_v63 = vld [vmem:[#allocation9 + $0x20] ss:$16 sps:$4 sm:$0xff]  }
 0x5b8   :  { %7326 = vmatprep.subr.bf16.mxu1 %v11061_v17  ;;  %7009 = vmatpush3.bf16.msra.mxu0 %v7714_v63 }
 0x5bb   :  { %7327 = vmatpush3.bf16.msra.mxu1 %v7698_v18  ;;  %v7715_v18 = vld [vmem:[#allocation9 + $0x140] ss:$16 sps:$4 sm:$0xff]  }
 0x5bc   :  { %1181 = vmatprep.subr.bf16.mxu1 %v7701_v57  ;;  %7010 = vmatprep.subr.bf16.mxu0 %v7715_v18  ;;  %v7723_v57 = vld [vmem:[#allocation9 + $0x1c0] ss:$16 sps:$4 sm:$0xff]  }
 0x681   :  { %v979_v46 = vpop.f32.mrb[4].mxu1 }
 0x682   :  { %v7318_v16 = vpop.f32.mrb[5].mxu1 }
 0x683   :  { %v982_v32 = vpop.f32.mrb[6].mxu1  ;;  %v7717_v16 = vld [vmem:[#allocation9 + $0x160] ss:$16 sps:$4 sm:$0xff]  }
 0x684   :  { %v994_v12 = vpack.c.bf16 %v982_v32, %v979_v46  ;;  %v7319_v28 = vpop.f32.mrb[7].mxu1  ;;  %v7716_v46 = vld [vmem:[#allocation9 + $0x40] ss:$16 sps:$4 sm:$0xff]  }
 0x685   :  { %7011 = vmatpush3.bf16.msra.mxu0 %v7716_v46  ;;  %v7718_v32 = vld [vmem:[#allocation9 + $0x60] ss:$16 sps:$4 sm:$0xff]  }
 0x686   :  { %7329 = vmatmul.mubr.msk.bf16.vlgmr.msra.gmra.mrb[8].mxu1 %vm360_vm6, %v994_v12  ;;  %7012 = vmatprep.subr.bf16.mxu0 %v7717_v16  ;;  %v7719_v12 = vld [vmem:[#allocation9 + $0x180] ss:$16 sps:$4 sm:$0xff]  }
 0x687   :  { %1213 = vmatprep.mubr.bf16.mxu1 %v11062_v45  ;;  %v7720_v28 = vld [vmem:[#allocation9 + $0x80] ss:$16 sps:$4 sm:$0xff]  }
 0x689   :  { %7013 = vmatpush3.bf16.msra.mxu0 %v7718_v32 }
 0x68a   :  { %7014 = vmatprep.subr.bf16.mxu0 %v7719_v12 }
 0x68d   :  { %7015 = vmatpush3.bf16.msra.mxu0 %v7720_v28 }
 0x759   :  { %v1063_v30 = vpop.f32.mrb[8].mxu1 }
 0x75a   :  { %v1064_v7 = vadd.f32 %v6694_v44, %v1063_v30  ;;  %v7330_v22 = vpop.f32.mrb[9].mxu1 }
 0x75b   :  { %v1066_v2 = vpop.f32.mrb[10].mxu1 }
 0x75c   :  { %v1067_v52 = vadd.f32 %v6694_v44, %v1066_v2  ;;  %v7331_v23 = vpop.f32.mrb[11].mxu1  ;;  %v1070_v21 = vadd.f32 %v1064_v7, %v8778_v37  ;;  %v7721_v44 = vld [vmem:[#allocation9 + $0x1a0] ss:$16 sps:$4 sm:$0xff]  }
 0x75d   :  { %7016 = vmatprep.subr.bf16.mxu0 %v7721_v44 }
 0x75e   :  { %v1074_v15 = vsel %vm360_vm6, %v1070_v21, 0.0  ;;  %v1071_v27 = vadd.f32 %v1067_v52, %v8780_v38  ;;  %v7699_v38 = vld [vmem:[#allocation7 + $0x10] ss:$136 sps:$4 sm:$0xff]  }
 0x75f   :  { %1075 = vadd.xlane.f32.xlu1 %v1074_v15  ;;  %1182 = vmatpush1.bf16.msra.mxu1 %v7699_v38  ;;  %v6700_v15 = vld [vmem:[#allocation12 + $0x4] ss:$0 sm:$0xff]  ;;  %v7724_v38 = vld [vmem:[#allocation9 + $0xc0] ss:$16 sps:$4 sm:$0xff]  }
 0x760   :  { %v1077_v6 = vsel %vm360_vm6, %v1071_v27, 0.0  ;;  %1183 = vmatprep.subr.bf16.mxu1 %v7704_v50  ;;  %v7725_v50 = vld [vmem:[#allocation9 + $0x1e0] ss:$16 sps:$4 sm:$0xff]  }
 0x761   :  { %1078 = vadd.xlane.f32.xlu0 %v1077_v6 }
 0x763   :  { %1184 = vmatpush1.bf16.msra.mxu1 %v7702_v56 }
 0x764   :  { %1185 = vmatprep.subr.bf16.mxu1 %v7707_v33 }
 0x767   :  { %1186 = vmatpush1.bf16.msra.mxu1 %v7705_v55 }
 0x768   :  { %1187 = vmatprep.subr.bf16.mxu1 %v7710_v41 }
 0x76b   :  { %1188 = vmatpush1.bf16.msra.mxu1 %v7708_v8 }
 0x7ec   :  { %v1076_v54 = vpop.xlane.xlu1 %1075 }
 0x7ed   :  { %v1081_v29 = vmul.f32 0.015625, %v1076_v54 }
 0x7ee   :  { %v1079_v25 = vpop.xlane.xlu0 %1078 }
 0x7ef   :  { %v1083_v19 = vsub.f32 %v1070_v21, %v1081_v29  ;;  %v1082_v31 = vmul.f32 0.015625, %v1079_v25  ;;  %v6701_v25 = vld [vmem:[#allocation12 + $0x5] ss:$0 sm:$0xff] }
 0x7f1   :  { %v1084_v1 = vsub.f32 %v1071_v27, %v1082_v31  ;;  %v1085_v43 = vmul.f32 %v1083_v19, %v1083_v19 }
 0x7f3   :  { %v1087_v53 = vsel %vm360_vm6, %v1085_v43, 0.0  ;;  %v1086_v0 = vmul.f32 %v1084_v1, %v1084_v1 }
 0x7f4   :  { %1088 = vadd.xlane.f32.xlu1 %v1087_v53 }
 0x7f5   :  { %v1090_v37 = vsel %vm360_vm6, %v1086_v0, 0.0 }
 0x7f6   :  { %1091 = vadd.xlane.f32.xlu0 %v1090_v37  ;;  %v7722_v37 = vld [vmem:[#allocation9 + $0xa0] ss:$16 sps:$4 sm:$0xff]  }
 0x7f7   :  { %7017 = vmatpush3.bf16.msra.mxu0 %v7722_v37 }
 0x7f8   :  { %7018 = vmatprep.subr.bf16.mxu0 %v7723_v57 }
 0x7fb   :  { %7019 = vmatpush3.bf16.msra.mxu0 %v7724_v38 }
 0x7fc   :  { %7020 = vmatprep.subr.bf16.mxu0 %v7725_v50 }
 0x881   :  { %v1089_v30 = vpop.xlane.xlu1 %1088 }
 0x882   :  { %v1093_v7 = vmul.f32 0.015625, %v1089_v30 }
 0x883   :  { %v1092_v22 = vpop.xlane.xlu0 %1091 }
 0x884   :  { %v1095_v2 = vadd.f32 1e-05, %v1093_v7  ;;  %v1094_v52 = vmul.f32 0.015625, %v1092_v22  ;;  %v6711_v7 = vld [vmem:[#allocation12 + $0x8] ss:$0 sm:$0xff] }
 0x886   :  { %8003 = vrsqrt.f32 %v1095_v2  ;;  %v1096_v23 = vadd.f32 1e-05, %v1094_v52 }
 0x888   :  { %8005 = vrsqrt.f32 %v1096_v23 }
 0x890   :  { %v8004_v21 = vpop.eup %8003 }
 0x891   :  { %v1099_v27 = vmul.f32 %v8004_v21, %v1083_v19  ;;  %v7726_v19 = vld [vmem:[#allocation9 + $0xe0] ss:$16 sps:$4 sm:$0xff]  }
 0x892   :  { %v8006_v6 = vpop.eup %8005  ;;  %7021 = vmatpush3.bf16.msra.mxu0 %v7726_v19 }
 0x893   :  { %v1107_v54 = vmul.f32 %v6700_v15, %v1099_v27  ;;  %v1100_v29 = vmul.f32 %v8006_v6, %v1084_v1  ;;  %7344 = vmatprep.subr.bf16.mxu0 %v11061_v17  ;;  %v1126_v1 = vld [vmem:[#allocation12 + $0x6] sm:$0x3] }
 0x894   :  { %v1131_v56 = vrot.slane %v1126_v1, %v8827_v48  ;;  %v1135_v33 = vrot.slane %v1126_v1, %v8829_v49 }
 0x895   :  { %v1108_v31 = vmul.f32 %v6700_v15, %v1100_v29  ;;  %v1115_v43 = vadd.f32 %v6701_v25, %v1107_v54 }
 0x897   :  { %v1116_v53 = vadd.f32 %v6701_v25, %v1108_v31 }
 0x899   :  { %v1125_v0 = vpack.c.bf16 %v1116_v53, %v1115_v43 }
 0x89b   :  { %6710 = vmatmul.mubr.msk.bf16.vlgmr.msra.gmra.mrb[12].mxu1 %vm360_vm6, %v1125_v0 }
 0x89c   :  { %1568 = vmatprep.mubr.bf16.mxu1 %v11062_v45 }
 0x96e   :  { %v1215_v55 = vpop.f32.mrb[12].mxu1 }
 0x96f   :  { %v1216_v41 = vadd.f32 %v1215_v55, %v1131_v56  ;;  %v1217_v11 = vpop.f32.mrb[13].mxu1  ;;  %v7730_v55 = vld [vmem:[#allocation7 + $0x128] ss:$136 sps:$4 sm:$0xff]  }
 0x970   :  { %v1218_v47 = vadd.f32 %v1217_v11, %v1135_v33  ;;  %v1219_v14 = vpop.f32.mrb[14].mxu1  ;;  %v7735_v11 = vld [vmem:[#allocation7 + $0x23c] ss:$136 sps:$4 sm:$0xff]  }
 0x971   :  { %v1220_v8 = vadd.f32 %v1219_v14, %v1131_v56  ;;  %v1221_v63 = vpop.f32.mrb[15].mxu1  ;;  %v1224_v46 = vmax.f32 %v1216_v41, 0.0  ;;  %v7732_v41 = vld [vmem:[#allocation7 + $0x12c] ss:$136 sps:$4 sm:$0xff]  }
 0x972   :  { %v1222_v18 = vadd.f32 %v1221_v63, %v1135_v33  ;;  %v1225_v32 = vmax.f32 %v1218_v47, 0.0  ;;  %v7729_v33 = vld [vmem:[#allocation7 + $0x1c] ss:$136 sps:$4 sm:$0xff]   ;;  %v7733_v47 = vld [vmem:[#allocation7 + $0x238] ss:$136 sps:$4 sm:$0xff]  }
 0x973   :  { %v1226_v16 = vmax.f32 %v1220_v8, 0.0  ;;  %1536 = vmatprep.subr.bf16.mxu1 %v7729_v33  ;;  %v7738_v14 = vld [vmem:[#allocation7 + $0x34c] ss:$136 sps:$4 sm:$0xff]   ;;  %v7736_v8 = vld [vmem:[#allocation7 + $0x348] ss:$136 sps:$4 sm:$0xff]  }
 0x974   :  { %v1227_v12 = vmax.f32 %v1222_v18, 0.0 }
 0x975   :  { %v1260_v28 = vpack.c.bf16 %v1226_v16, %v1224_v46 }
 0x976   :  { %v1261_v44 = vpack.c.bf16 %v1227_v12, %v1225_v32 }
 0x978   :  { %1397 = vmatprep.mubr.bf16.mxu0 %v1261_v44  ;;  %v6728_v44 = vld [vmem:[#allocation12 + $0x9] ss:$0 sm:$0xff] }
 0x979   :  { %1398 = vmatmul.mubr.bf16.vlgmr.msra.gmra.mrb[16].mxu0 %v1260_v28 }
 0x97a   :  { %7360 = vmatprep.mubr.msk.bf16.mxu0 %vm8556_vm0, %v11061_v17 }
 0xa4c   :  { %v7022_v30 = vpop.f32.mrb[16].mxu0 }
 0xa4d   :  { %v7023_v22 = vpop.f32.mrb[17].mxu0 }
 0xa4e   :  { %v7024_v2 = vadd.f32 %v7023_v22, %v7022_v30  ;;  %v7025_v52 = vpop.f32.mrb[18].mxu0 }
 0xa4f   :  { %v7026_v23 = vpop.f32.mrb[19].mxu0 }
 0xa50   :  { %v1400_v21 = vadd.f32 %v7024_v2, %v6711_v7  ;;  %v7027_v15 = vadd.f32 %v7026_v23, %v7025_v52  ;;  %v6729_v52 = vld [vmem:[#allocation12 + $0xa] ss:$0 sm:$0xff] }
 0xa52   :  { %v1403_v27 = vadd.f32 %v7027_v15, %v6711_v7  ;;  %v1406_v6 = vadd.f32 %v1400_v21, %v1115_v43 }
 0xa54   :  { %v1410_v54 = vsel %vm360_vm6, %v1406_v6, 0.0  ;;  %v1407_v29 = vadd.f32 %v1403_v27, %v1116_v53  ;;  %v7727_v53 = vld [vmem:[#allocation7 + $0x18] ss:$136 sps:$4 sm:$0xff]  }
 0xa55   :  { %1411 = vadd.xlane.f32.xlu1 %v1410_v54  ;;  %1537 = vmatpush1.bf16.msra.mxu1 %v7727_v53  ;;  %v7739_v27 = vld [vmem:[#allocation7 + $0x20] ss:$136 sps:$4 sm:$0xff]   ;;  %v7740_v54 = vld [vmem:[#allocation7 + $0x130] ss:$136 sps:$4 sm:$0xff]  }
 0xa56   :  { %v1413_v25 = vsel %vm360_vm6, %v1407_v29, 0.0  ;;  %1538 = vmatprep.subr.bf16.mxu1 %v7732_v41 }
 0xa57   :  { %1414 = vadd.xlane.f32.xlu0 %v1413_v25  ;;  %v7742_v25 = vld [vmem:[#allocation7 + $0x350] ss:$136 sps:$4 sm:$0xff]  }
 0xa59   :  { %1539 = vmatpush1.bf16.msra.mxu1 %v7730_v55 }
 0xa5a   :  { %1540 = vmatprep.subr.bf16.mxu1 %v7735_v11 }
 0xa5d   :  { %1541 = vmatpush1.bf16.msra.mxu1 %v7733_v47 }
 0xa5e   :  { %1542 = vmatprep.subr.bf16.mxu1 %v7738_v14 }
 0xa61   :  { %1543 = vmatpush1.bf16.msra.mxu1 %v7736_v8 }
 0xa62   :  { %7332 = vmatprep.subr.bf16.mxu1 %v11061_v17 }
 0xae2   :  { %v1412_v31 = vpop.xlane.xlu1 %1411 }
 0xae3   :  { %v1416_v0 = vmul.f32 0.015625, %v1412_v31  ;;  %v6745_v31 = vld [vmem:[#allocation12 + $0xc] ss:$0 sm:$0xff] }
 0xae4   :  { %v1415_v37 = vpop.xlane.xlu0 %1414 }
 0xae5   :  { %v1418_v57 = vsub.f32 %v1406_v6, %v1416_v0  ;;  %v1417_v38 = vmul.f32 0.015625, %v1415_v37  ;;  %v6744_v37 = vld [vmem:[#allocation12 + $0xb] ss:$0 sm:$0xff] }
 0xae7   :  { %v1419_v50 = vsub.f32 %v1407_v29, %v1417_v38  ;;  %v1420_v19 = vmul.f32 %v1418_v57, %v1418_v57  ;;  %v7741_v29 = vld [vmem:[#allocation7 + $0x240] ss:$136 sps:$4 sm:$0xff]  }
 0xae9   :  { %v1422_v1 = vsel %vm360_vm6, %v1420_v19, 0.0  ;;  %v1421_v56 = vmul.f32 %v1419_v50, %v1419_v50 }
 0xaea   :  { %1423 = vadd.xlane.f32.xlu1 %v1422_v1 }
 0xaeb   :  { %v1425_v43 = vsel %vm360_vm6, %v1421_v56, 0.0 }
 0xaec   :  { %1426 = vadd.xlane.f32.xlu0 %v1425_v43 }
 0xb77   :  { %v1424_v63 = vpop.xlane.xlu1 %1423 }
 0xb78   :  { %v1428_v18 = vmul.f32 0.015625, %v1424_v63 }
 0xb79   :  { %v1427_v46 = vpop.xlane.xlu0 %1426 }
 0xb7a   :  { %v1430_v16 = vadd.f32 1e-05, %v1428_v18  ;;  %v1429_v32 = vmul.f32 0.015625, %v1427_v46 }
 0xb7c   :  { %8007 = vrsqrt.f32 %v1430_v16  ;;  %v1431_v12 = vadd.f32 1e-05, %v1429_v32 }
 0xb7e   :  { %8009 = vrsqrt.f32 %v1431_v12 }
 0xb86   :  { %v8008_v28 = vpop.eup %8007 }
 0xb87   :  { %v1434_v30 = vmul.f32 %v8008_v28, %v1418_v57 }
 0xb88   :  { %v8010_v7 = vpop.eup %8009 }
 0xb89   :  { %v1442_v22 = vmul.f32 %v6728_v44, %v1434_v30  ;;  %v1435_v2 = vmul.f32 %v8010_v7, %v1419_v50 }
 0xb8b   :  { %v1443_v23 = vmul.f32 %v6728_v44, %v1435_v2  ;;  %v9174_v21 = vadd.f32 %v6729_v52, %v1442_v22 }
 0xb8d   :  { %v9176_v15 = vadd.f32 %v6729_v52, %v1443_v23 }
 0xb8f   :  { %v1468_v6 = vpack.c.bf16 %v9176_v15, %v9174_v21 }
 0xb91   :  { %6742 = vmatmul.mubr.msk.bf16.vlgmr.msra.gmra.mrb[16].mxu1 %vm360_vm6, %v1468_v6 }
 0xb92   :  { %7333 = vmatpush3.bf16.msra.mxu1 %v7739_v27  ;;  %7340 = vmatprep.mubr.msk.bf16.mxu1 %vm8556_vm0, %v11061_v17 }
 0xb93   :  { %7334 = vmatprep.subr.bf16.mxu1 %v11061_v17 }
 0xb96   :  { %7335 = vmatpush3.bf16.msra.mxu1 %v7740_v54 }
 0xb97   :  { %7336 = vmatprep.subr.bf16.mxu1 %v11061_v17 }
 0xb9a   :  { %7337 = vmatpush3.bf16.msra.mxu1 %v7741_v29 }
 0xb9b   :  { %7338 = vmatprep.subr.bf16.mxu1 %v11061_v17 }
 0xb9e   :  { %7339 = vmatpush3.bf16.msra.mxu1 %v7742_v25  ;;  %v6746_v25 = vld [vmem:[#allocation12 + $0xd] ss:$0 sm:$0xff] }
 0xb9f   :  { %7364 = vmatprep.subr.bf16.mxu1 %v11061_v17 }
 0xba1   :  { %7341 = vmatmul.mubr.msk.bf16.vlgmr.msra.gmra.mrb[20].mxu1 %vm360_vm6, %v1468_v6 }
 0xba2   :  { %7380 = vmatprep.mubr.msk.bf16.mxu1 %vm8556_vm0, %v11061_v17 }
 0xc64   :  { %v1570_v0 = vpop.f32.mrb[16].mxu1 }
 0xc65   :  { %v1572_v57 = vpop.f32.mrb[17].mxu1  ;;  %v9190_v19 = vadd.f32 %v6744_v37, %v1570_v0 }
 0xc66   :  { %v1636_v38 = vadd.f32 %v6745_v31, %v1572_v57  ;;  %v1574_v50 = vpop.f32.mrb[18].mxu1 }
 0xc67   :  { %v9192_v1 = vadd.f32 %v6744_v37, %v1574_v50  ;;  %v1576_v56 = vpop.f32.mrb[19].mxu1 }
 0xc68   :  { %v1637_v43 = vadd.f32 %v6745_v31, %v1576_v56  ;;  %v1647_v33 = vmul.f32 %v1636_v38, %v8835_v58  ;;  %v1649_v53 = vmul.f32 %v1636_v38, %v8838_v59  ;;  %v1651_v55 = vmul.f32 %v1636_v38, %v8840_v62 }
 0xc69   :  { %v9200_v11 = vmul.f32 %v1636_v38, %v8842_v3  ;;  %v9203_v47 = vmul.f32 %v1636_v38, %v8844_v4  ;;  %v9206_v14 = vmul.f32 %v1636_v38, %v8846_v5  ;;  %v9219_v12 = vmul.f32 %v1636_v38, %v8848_v9 }
 0xc6a   :  { %v1648_v8 = vmul.f32 %v1637_v43, %v8835_v58  ;;  %v1650_v63 = vmul.f32 %v1637_v43, %v8838_v59  ;;  %v1652_v18 = vmul.f32 %v1637_v43, %v8840_v62  ;;  %v1654_v46 = vmul.f32 %v1637_v43, %v8842_v3 }
 0xc6b   :  { %v9213_v16 = vmul.f32 %v1637_v43, %v8844_v4  ;;  %v9216_v32 = vmul.f32 %v1637_v43, %v8846_v5  ;;  %v9222_v28 = vmul.f32 %v1637_v43, %v8848_v9  ;;  %v9233_v6 = vmul.f32 %v1636_v38, %v8850_v10 }
 0xc6c   :  { %v1663_v44 = vpack.c.bf16 %v1648_v8, %v1647_v33  ;;  %v1664_v30 = vpack.c.bf16 %v1650_v63, %v1649_v53  ;;  %v1665_v7 = vpack.c.bf16 %v1652_v18, %v1651_v55  ;;  %v1666_v22 = vpack.c.bf16 %v1654_v46, %v9200_v11 }
 0xc6d   :  { %v1667_v2 = vpack.c.bf16 %v9213_v16, %v9203_v47  ;;  %v9236_v54 = vmul.f32 %v1637_v43, %v8850_v10 }
 0xc6e   :  { %v1700_v27 = vsel %vm360_vm6, %v1663_v44, 0  ;;  %v1703_v50 = vsel %vm360_vm6, %v1664_v30, 0  ;;  %v1706_v52 = vsel %vm360_vm6, %v1665_v7, 0 }
 0xc6f   :  { %7345 = vmatpush3.bf16.xpose.msra.mxu0 %v1700_v27  ;;  %v1712_v7 = vsel %vm360_vm6, %v1667_v2, 0  ;;  %v11064_v2 = vpack.c.bf16 %v9222_v28, %v9219_v12 }
 0xc70   :  { %7346 = vmatprep.subr.bf16.mxu0 %v11061_v17 }
 0xc74   :  { %v1613_v31 = vpop.f32.mrb[20].mxu1 }
 0xc75   :  { %v1645_v0 = vadd.f32 %v6746_v25, %v1613_v31  ;;  %v7342_v37 = vpop.f32.mrb[21].mxu1 }
 0xc76   :  { %v1616_v57 = vpop.f32.mrb[22].mxu1 }
 0xc77   :  { %v1646_v56 = vadd.f32 %v6746_v25, %v1616_v57  ;;  %v7343_v33 = vpop.f32.mrb[23].mxu1  ;;  %7347 = vmatpush3.bf16.xpose.msra.mxu0 %v1703_v50  ;;  %v1671_v38 = vmul.f32 %v1645_v0, %v8835_v58  ;;  %v1673_v43 = vmul.f32 %v1645_v0, %v8838_v59  ;;  %v1675_v53 = vmul.f32 %v1645_v0, %v8840_v62 }
 0xc78   :  { %7348 = vmatprep.subr.bf16.mxu0 %v11061_v17  ;;  %v1677_v55 = vmul.f32 %v1645_v0, %v8842_v3  ;;  %v1679_v11 = vmul.f32 %v1645_v0, %v8844_v4  ;;  %v1681_v47 = vmul.f32 %v1645_v0, %v8846_v5  ;;  %v1683_v8 = vmul.f32 %v1645_v0, %v8848_v9 }
 0xc79   :  { %v1672_v63 = vmul.f32 %v1646_v56, %v8835_v58  ;;  %v1674_v18 = vmul.f32 %v1646_v56, %v8838_v59  ;;  %v1676_v46 = vmul.f32 %v1646_v56, %v8840_v62  ;;  %v1678_v16 = vmul.f32 %v1646_v56, %v8842_v3 }
 0xc7a   :  { %v1680_v44 = vmul.f32 %v1646_v56, %v8844_v4  ;;  %v1682_v30 = vmul.f32 %v1646_v56, %v8846_v5  ;;  %v1684_v27 = vmul.f32 %v1646_v56, %v8848_v9  ;;  %v1685_v25 = vmul.f32 %v1645_v0, %v8850_v10 }
 0xc7b   :  { %v1687_v31 = vpack.c.bf16 %v1672_v63, %v1671_v38  ;;  %v1688_v37 = vpack.c.bf16 %v1674_v18, %v1673_v43  ;;  %v1689_v57 = vpack.c.bf16 %v1676_v46, %v1675_v53  ;;  %v1690_v50 = vpack.c.bf16 %v1678_v16, %v1677_v55 }
 0xc7c   :  { %v1691_v33 = vpack.c.bf16 %v1680_v44, %v1679_v11  ;;  %v1692_v41 = vpack.c.bf16 %v1682_v30, %v1681_v47  ;;  %v1693_v29 = vpack.c.bf16 %v1684_v27, %v1683_v8  ;;  %v1686_v23 = vmul.f32 %v1646_v56, %v8850_v10 }
 0xc7d   :  { %7365 = vmatpush3.bf16.msra.mxu1 %v1687_v31  ;;  %v1709_v0 = vsel %vm360_vm6, %v1666_v22, 0  ;;  %v11063_v22 = vpack.c.bf16 %v9216_v32, %v9206_v14  ;;  %v11065_v14 = vpack.c.bf16 %v9236_v54, %v9233_v6 }
 0xc7e   :  { %7366 = vmatprep.subr.bf16.mxu1 %v11061_v17  ;;  %v1694_v4 = vpack.c.bf16 %v1686_v23, %v1685_v25  ;;  %v11066_v23 = vpack.c.bf16 %v9192_v1, %v9190_v19 }
 0xc7f   :  { %7349 = vmatpush3.bf16.xpose.msra.mxu0 %v1706_v52  ;;  %v1715_v52 = vsel %vm360_vm6, %v11063_v22, 0  ;;  %v1721_v32 = vsel %vm360_vm6, %v11065_v14, 0 }
 0xc80   :  { %7350 = vmatprep.subr.bf16.mxu0 %v11061_v17 }
 0xc81   :  { %7367 = vmatpush3.bf16.msra.mxu1 %v1688_v37 }
 0xc82   :  { %7368 = vmatprep.subr.bf16.mxu1 %v11061_v17 }
 0xc85   :  { %7369 = vmatpush3.bf16.msra.mxu1 %v1689_v57 }
 0xc86   :  { %7370 = vmatprep.subr.bf16.mxu1 %v11061_v17 }
 0xc87   :  { %7351 = vmatpush3.bf16.xpose.msra.mxu0 %v1709_v0 }
 0xc88   :  { %7352 = vmatprep.subr.bf16.mxu0 %v11061_v17 }
 0xc89   :  { %7371 = vmatpush3.bf16.msra.mxu1 %v1690_v50 }
 0xc8a   :  { %7372 = vmatprep.subr.bf16.mxu1 %v11061_v17 }
 0xc8d   :  { %7373 = vmatpush3.bf16.msra.mxu1 %v1691_v33 }
 0xc8e   :  { %7374 = vmatprep.subr.bf16.mxu1 %v11061_v17 }
 0xc8f   :  { %7353 = vmatpush3.bf16.xpose.msra.mxu0 %v1712_v7 }
 0xc90   :  { %7354 = vmatprep.subr.bf16.mxu0 %v11061_v17 }
 0xc91   :  { %7375 = vmatpush3.bf16.msra.mxu1 %v1692_v41  ;;  %v1718_v41 = vsel %vm360_vm6, %v11064_v2, 0 }
 0xc92   :  { %7376 = vmatprep.subr.bf16.mxu1 %v11061_v17 }
 0xc95   :  { %7377 = vmatpush3.bf16.msra.mxu1 %v1693_v29 }
 0xc96   :  { %7378 = vmatprep.subr.bf16.mxu1 %v11061_v17 }
 0xc97   :  { %7355 = vmatpush3.bf16.xpose.msra.mxu0 %v1715_v52 }
 0xc98   :  { %7356 = vmatprep.subr.bf16.mxu0 %v11061_v17 }
 0xc99   :  { %7379 = vmatpush3.bf16.msra.mxu1 %v1694_v4 }
 0xc9a   :  { %7384 = vmatprep.subr.bf16.mxu1 %v11061_v17 }
 0xc9f   :  { %7357 = vmatpush3.bf16.xpose.msra.mxu0 %v1718_v41 }
 0xca0   :  { %7358 = vmatprep.subr.bf16.mxu0 %v11061_v17 }
 0xca7   :  { %7359 = vmatpush3.bf16.xpose.msra.mxu0 %v1721_v32 }
 0xcae   :  { %7361 = vmatmul.mubr.msk.bf16.vlgmr.msra.gmra.mrb[20].mxu0 %vm360_vm6, %v11066_v23 }
 0xd81   :  { %v1757_v4 = vpop.f32.mrb[20].mxu0 }
 0xd82   :  { %v1764_v29 = vmul.f32 0.35355338, %v1757_v4  ;;  %v7362_v56 = vpop.f32.mrb[21].mxu0 }
 0xd83   :  { %v1760_v12 = vpop.f32.mrb[22].mxu0 }
 0xd84   :  { %v1765_v28 = vmul.f32 0.35355338, %v1760_v12  ;;  %v7363_v38 = vpop.f32.mrb[23].mxu0  ;;  %v1790_v43 = vadd.f32 %v1764_v29, %v8917_v34  ;;  %v1822_v54 = vadd.f32 %v1764_v29, %v8919_v35  ;;  %v1854_v11 = vadd.f32 %v1764_v29, %v8923_v39 }
 0xd85   :  { %v1886_v35 = vadd.f32 %v1764_v29, %v8927_v42  ;;  %v9312_v39 = vadd.f32 %v1764_v29, %v8947_v60 }
 0xd86   :  { %v1792_v53 = vsel %vm660_vm8, %v1790_v43, -inf  ;;  %v9294_v6 = vadd.f32 %v1765_v28, %v8921_v36  ;;  %v1823_v1 = vadd.f32 %v1765_v28, %v8925_v40  ;;  %v1824_v55 = vsel %vm699_vm10, %v1822_v54, -inf }
 0xd87   :  { %1793 = vmax.xlane.f32.xlu1 %v1792_v53  ;;  %v1855_v47 = vadd.f32 %v1765_v28, %v8929_v51  ;;  %v1856_v36 = vsel %vm738_vm7, %v1854_v11, -inf  ;;  %v9308_v40 = vadd.f32 %v1765_v28, %v8949_v61  ;;  %v1888_v63 = vsel %vm777_vm9, %v1886_v35, -inf }
 0xd88   :  { %v1795_v19 = vsel %vm660_vm8, %v9294_v6, -inf  ;;  %v1827_v34 = vsel %vm699_vm10, %v1823_v1, -inf  ;;  %v9317_v18 = vadd.f32 %v1765_v28, %v8973_v20  ;;  %v1920_v42 = vsel %vm816_vm11, %v9312_v39, -inf }
 0xd89   :  { %1796 = vmax.xlane.f32.xlu0 %v1795_v19  ;;  %v1859_v8 = vsel %vm738_vm7, %v1855_v47, -inf  ;;  %v1891_v51 = vsel %vm777_vm9, %v9308_v40, -inf  ;;  %v9322_v61 = vadd.f32 %v1764_v29, %v8961_v13  ;;  %v9327_v60 = vadd.f32 %v1765_v28, %v8987_v26  ;;  %v11067_v13 = vld [vmem:[#allocation21_spill] sm:$0xff]  ;;  %v8371_v26 = vld [vmem:[#allocation2] sm:$0xff] }
 0xd8a   :  { %v1923_v46 = vsel %vm816_vm11, %v9317_v18, -inf  ;;  %v9332_v20 = vadd.f32 %v1764_v29, %v8985_v24  ;;  %v9337_v30 = vadd.f32 %v1765_v28, %v11067_v13  ;;  %v9341_v25 = vadd.f32 %v8371_v26, %v1764_v29  ;;  %v8372_v24 = vld [vmem:[#allocation2 + $0x8] sm:$0xff] }
 0xd8b   :  { %1825 = vmax.xlane.f32.xlu1 %v1824_v55  ;;  %v1952_v16 = vsel %vm855_vm12, %v9322_v61, -inf  ;;  %v1955_v44 = vsel %vm855_vm12, %v9327_v60, -inf  ;;  %v9345_v37 = vadd.f32 %v8372_v24, %v1765_v28 }
 0xd8c   :  { %v1984_v27 = vsel %vm894_vm13, %v9332_v20, -inf  ;;  %v1987_v31 = vsel %vm894_vm13, %v9337_v30, -inf  ;;  %v1768_v57 = vsel %vm174_vm3, %v9341_v25, -inf }
 0xd8d   :  { %1828 = vmax.xlane.f32.xlu0 %v1827_v34  ;;  %v1771_v50 = vsel %vm174_vm3, %v9345_v37, -inf }
 0xd8f   :  { %1857 = vmax.xlane.f32.xlu1 %v1856_v36 }
 0xd91   :  { %1860 = vmax.xlane.f32.xlu0 %v1859_v8 }
 0xd93   :  { %1889 = vmax.xlane.f32.xlu1 %v1888_v63 }
 0xd95   :  { %1892 = vmax.xlane.f32.xlu0 %v1891_v51 }
 0xd97   :  { %1921 = vmax.xlane.f32.xlu1 %v1920_v42 }
 0xd99   :  { %1924 = vmax.xlane.f32.xlu0 %v1923_v46 }
 0xd9b   :  { %1953 = vmax.xlane.f32.xlu1 %v1952_v16 }
 0xd9d   :  { %1956 = vmax.xlane.f32.xlu0 %v1955_v44 }
 0xd9f   :  { %1985 = vmax.xlane.f32.xlu1 %v1984_v27 }
 0xda1   :  { %1988 = vmax.xlane.f32.xlu0 %v1987_v31 }
 0xda3   :  { %1769 = vmax.xlane.f32.xlu1 %v1768_v57 }
 0xda5   :  { %1772 = vmax.xlane.f32.xlu0 %v1771_v50 }
 0xe14   :  { %v1794_v33 = vpop.xlane.xlu1 %1793 }
 0xe15   :  { %v1798_v0 = vsub.f32 %v1790_v43, %v1794_v33 }
 0xe16   :  { %v1797_v7 = vpop.xlane.xlu0 %1796 }
 0xe17   :  { %v1800_v22 = vmul.f32 1.442695, %v1798_v0 }
 0xe18   :  { %v1826_v52 = vpop.xlane.xlu1 %1825 }
 0xe19   :  { %8011 = vpow2.f32 %v1800_v22  ;;  %v1830_v2 = vsub.f32 %v1822_v54, %v1826_v52 }
 0xe1a   :  { %v1829_v41 = vpop.xlane.xlu0 %1828 }
 0xe1b   :  { %v1832_v14 = vmul.f32 1.442695, %v1830_v2  ;;  %v1831_v32 = vsub.f32 %v1823_v1, %v1829_v41  ;;  %v1799_v1 = vsub.f32 %v9294_v6, %v1797_v7 }
 0xe1c   :  { %v1858_v23 = vpop.xlane.xlu1 %1857 }
 0xe1d   :  { %8013 = vpow2.f32 %v1832_v14  ;;  %v1834_v4 = vmul.f32 1.442695, %v1831_v32  ;;  %v1862_v29 = vsub.f32 %v1854_v11, %v1858_v23  ;;  %v1802_v42 = vmul.f32 1.442695, %v1799_v1 }
 0xe1e   :  { %v1861_v56 = vpop.xlane.xlu0 %1860 }
 0xe1f   :  { %v1864_v12 = vmul.f32 1.442695, %v1862_v29  ;;  %v1863_v28 = vsub.f32 %v1855_v47, %v1861_v56  ;;  %8015 = vpow2.f32 %v1834_v4 }
 0xe20   :  { %v1890_v38 = vpop.xlane.xlu1 %1889 }
 0xe21   :  { %8017 = vpow2.f32 %v1864_v12  ;;  %v1866_v53 = vmul.f32 1.442695, %v1863_v28  ;;  %v1894_v43 = vsub.f32 %v1886_v35, %v1890_v38 }
 0xe22   :  { %v1893_v19 = vpop.xlane.xlu0 %1892 }
 0xe23   :  { %v9351_v55 = vpop.eup %8011  ;;  %v1896_v34 = vmul.f32 1.442695, %v1894_v43  ;;  %v1895_v54 = vsub.f32 %v9308_v40, %v1893_v19  ;;  %8019 = vpow2.f32 %v1866_v53 }
 0xe24   :  { %v1922_v36 = vpop.xlane.xlu1 %1921  ;;  %1806 = vrot.lane.b32.xlu1 %v9351_v55, %s8561_s22 }
 0xe25   :  { %8021 = vpow2.f32 %v1896_v34  ;;  %v1898_v11 = vmul.f32 1.442695, %v1895_v54  ;;  %v1926_v47 = vsub.f32 %v9312_v39, %v1922_v36 }
 0xe26   :  { %v1925_v8 = vpop.xlane.xlu0 %1924 }
 0xe27   :  { %v9358_v63 = vpop.eup %8013  ;;  %v1928_v35 = vmul.f32 1.442695, %v1926_v47  ;;  %v1927_v51 = vsub.f32 %v9317_v18, %v1925_v8  ;;  %8023 = vpow2.f32 %v1898_v11 }
 0xe28   :  { %v1954_v40 = vpop.xlane.xlu1 %1953  ;;  %1838 = vrot.lane.b32.xlu1 %v9358_v63, %s8560_s4 }
 0xe29   :  { %8025 = vpow2.f32 %v1928_v35  ;;  %v1930_v6 = vmul.f32 1.442695, %v1927_v51  ;;  %v1958_v46 = vsub.f32 %v9322_v61, %v1954_v40  ;;  %v9364_v16 = vpop.eup %8015 }
 0xe2a   :  { %v1957_v44 = vpop.xlane.xlu0 %1956  ;;  %8027 = vpow2.f32 %v1802_v42 }
 0xe2b   :  { %v9366_v39 = vpop.eup %8017  ;;  %v1959_v13 = vsub.f32 %v9327_v60, %v1957_v44  ;;  %v1960_v27 = vmul.f32 1.442695, %v1958_v46  ;;  %8029 = vpow2.f32 %v1930_v6 }
 0xe2c   :  { %v1986_v18 = vpop.xlane.xlu1 %1985  ;;  %1840 = vrot.lane.b32.xlu1 %v9364_v16, %s8560_s4  ;;  %1870 = vrot.lane.b32.xlu0 %v9366_v39, %s8559_s17 }
 0xe2d   :  { %v1962_v26 = vmul.f32 1.442695, %v1959_v13  ;;  %v1990_v61 = vsub.f32 %v9332_v20, %v1986_v18  ;;  %v9374_v31 = vpop.eup %8019  ;;  %8031 = vpow2.f32 %v1960_v27 }
 0xe2e   :  { %v1989_v24 = vpop.xlane.xlu0 %1988 }
 0xe2f   :  { %v9376_v57 = vpop.eup %8021  ;;  %v1991_v60 = vsub.f32 %v9337_v30, %v1989_v24  ;;  %v1992_v50 = vmul.f32 1.442695, %v1990_v61  ;;  %8033 = vpow2.f32 %v1962_v26 }
 0xe30   :  { %1872 = vrot.lane.b32.xlu1 %v9374_v31, %s8559_s17  ;;  %1902 = vrot.lane.b32.xlu0 %v9376_v57, %s8546_s8  ;;  %v1770_v14 = vpop.xlane.xlu1 %1769 }
 0xe31   :  { %v1994_v33 = vmul.f32 1.442695, %v1991_v60  ;;  %v9383_v0 = vpop.eup %8023  ;;  %8035 = vpow2.f32 %v1992_v50  ;;  %v1774_v32 = vsub.f32 %v9341_v25, %v1770_v14 }
 0xe32   :  { %v1773_v23 = vpop.xlane.xlu0 %1772 }
 0xe33   :  { %v9385_v20 = vpop.eup %8025  ;;  %8037 = vpow2.f32 %v1994_v33  ;;  %v1776_v4 = vmul.f32 1.442695, %v1774_v32  ;;  %v1775_v29 = vsub.f32 %v9345_v37, %v1773_v23 }
 0xe34   :  { %1904 = vrot.lane.b32.xlu1 %v9383_v0, %s8546_s8  ;;  %1934 = vrot.lane.b32.xlu0 %v9385_v20, %s8558_s13  ;;  %v9391_v30 = vpop.eup %8027 }
 0xe35   :  { %v9393_v7 = vpop.eup %8029  ;;  %8039 = vpow2.f32 %v1776_v4  ;;  %v1778_v56 = vmul.f32 1.442695, %v1775_v29 }
 0xe37   :  { %v9399_v22 = vpop.eup %8031  ;;  %8041 = vpow2.f32 %v1778_v56 }
 0xe38   :  { %1936 = vrot.lane.b32.xlu1 %v9393_v7, %s8558_s13  ;;  %1808 = vrot.lane.b32.xlu0 %v9391_v30, %s8561_s22 }
 0xe39   :  { %v9401_v52 = vpop.eup %8033 }
 0xe3b   :  { %v9407_v2 = vpop.eup %8035 }
 0xe3c   :  { %1968 = vrot.lane.b32.xlu1 %v9401_v52, %s8557_s29  ;;  %1966 = vrot.lane.b32.xlu0 %v9399_v22, %s8557_s29 }
 0xe3d   :  { %v9409_v41 = vpop.eup %8037 }
 0xe3f   :  { %v9417_v12 = vpop.eup %8039 }
 0xe40   :  { %2000 = vrot.lane.b32.xlu1 %v9409_v41, %s8552_s15  ;;  %1998 = vrot.lane.b32.xlu0 %v9407_v2, %s8552_s15  ;;  %v1780_v28 = vsel %vm174_vm3, %v9417_v12, 0.0 }
 0xe41   :  { %v9421_v38 = vpop.eup %8041 }
 0xe42   :  { %v1783_v53 = vsel %vm174_vm3, %v9421_v38, 0.0 }
 0xe5f   :  { %1781 = vadd.xlane.f32.xlu0 %v1780_v28 }
 0xe64   :  { %1784 = vadd.xlane.f32.xlu1 %v1783_v53 }
 0xe96   :  { %v1807_v25 = vpop.permute.xlu1 %1806 }
 0xe97   :  { %v1812_v43 = vsel %vm174_vm3, %v1807_v25, 0.0 }
 0xe98   :  { %1813 = vadd.xlane.f32.xlu0 %v1812_v43 }
 0xe9a   :  { %v1839_v37 = vpop.permute.xlu1 %1838 }
 0xe9b   :  { %v1844_v19 = vsel %vm174_vm3, %v1839_v37, 0.0 }
 0xe9c   :  { %1845 = vadd.xlane.f32.xlu1 %v1844_v19 }
 0xe9e   :  { %v1871_v34 = vpop.permute.xlu0 %1870  ;;  %v1841_v1 = vpop.permute.xlu1 %1840 }
 0xe9f   :  { %v1876_v54 = vsel %vm174_vm3, %v1871_v34, 0.0  ;;  %v1847_v46 = vsel %vm174_vm3, %v1841_v1, 0.0 }
 0xea0   :  { %1877 = vadd.xlane.f32.xlu1 %v1876_v54 }
 0xea2   :  { %v1903_v36 = vpop.permute.xlu0 %1902  ;;  %v1873_v35 = vpop.permute.xlu1 %1872 }
 0xea3   :  { %v1908_v11 = vsel %vm174_vm3, %v1903_v36, 0.0  ;;  %v1879_v27 = vsel %vm174_vm3, %v1873_v35, 0.0 }
 0xea4   :  { %1909 = vadd.xlane.f32.xlu1 %v1908_v11 }
 0xea6   :  { %v1935_v47 = vpop.permute.xlu0 %1934  ;;  %v1905_v40 = vpop.permute.xlu1 %1904 }
 0xea7   :  { %v1940_v8 = vsel %vm174_vm3, %v1935_v47, 0.0  ;;  %v1911_v61 = vsel %vm174_vm3, %v1905_v40, 0.0 }
 0xea8   :  { %1941 = vadd.xlane.f32.xlu1 %v1940_v8 }
 0xeaa   :  { %v1809_v51 = vpop.permute.xlu0 %1808  ;;  %v1937_v26 = vpop.permute.xlu1 %1936 }
 0xeab   :  { %v1815_v42 = vsel %vm174_vm3, %v1809_v51, 0.0  ;;  %v1943_v60 = vsel %vm174_vm3, %v1937_v26, 0.0 }
 0xeac   :  { %1816 = vadd.xlane.f32.xlu0 %v1815_v42 }
 0xeae   :  { %v1967_v6 = vpop.permute.xlu0 %1966  ;;  %v1969_v24 = vpop.permute.xlu1 %1968 }
 0xeaf   :  { %v1972_v44 = vsel %vm174_vm3, %v1967_v6, 0.0  ;;  %v1975_v50 = vsel %vm174_vm3, %v1969_v24, 0.0 }
 0xeb0   :  { %1848 = vadd.xlane.f32.xlu0 %v1847_v46  ;;  %1973 = vadd.xlane.f32.xlu1 %v1972_v44 }
 0xeb2   :  { %v1999_v13 = vpop.permute.xlu0 %1998  ;;  %v2001_v33 = vpop.permute.xlu1 %2000 }
 0xeb3   :  { %v2004_v18 = vsel %vm174_vm3, %v1999_v13, 0.0  ;;  %v2007_v14 = vsel %vm174_vm3, %v2001_v33, 0.0 }
 0xeb4   :  { %1880 = vadd.xlane.f32.xlu0 %v1879_v27  ;;  %2005 = vadd.xlane.f32.xlu1 %v2004_v18 }
 0xeb8   :  { %1912 = vadd.xlane.f32.xlu0 %v1911_v61 }
 0xebc   :  { %1944 = vadd.xlane.f32.xlu0 %v1943_v60 }
 0xec0   :  { %1976 = vadd.xlane.f32.xlu0 %v1975_v50 }
 0xec4   :  { %2008 = vadd.xlane.f32.xlu0 %v2007_v14 }
 0xeec   :  { %v1782_v4 = vpop.xlane.xlu0 %1781 }
 0xeed   :  { %8043 = vrcp.f32 %v1782_v4 }
 0xef1   :  { %v1785_v32 = vpop.xlane.xlu1 %1784 }
 0xef2   :  { %8045 = vrcp.f32 %v1785_v32 }
 0xef7   :  { %v8044_v1 = vpop.eup %8043 }
 0xef8   :  { %v1788_v14 = vmul.f32 %v8044_v1, %v9417_v12 }
 0xefc   :  { %v8046_v11 = vpop.eup %8045 }
 0xefd   :  { %v1789_v32 = vmul.f32 %v8046_v11, %v9421_v38  ;;  %v7746_v11 = vld [vmem:[#allocation7 + $0x354] ss:$136 sps:$4 sm:$0xff]  }
 0xf25   :  { %v1814_v56 = vpop.xlane.xlu0 %1813 }
 0xf26   :  { %8047 = vrcp.f32 %v1814_v56 }
 0xf29   :  { %v1846_v23 = vpop.xlane.xlu1 %1845 }
 0xf2a   :  { %8049 = vrcp.f32 %v1846_v23 }
 0xf2d   :  { %v1878_v29 = vpop.xlane.xlu1 %1877 }
 0xf2e   :  { %8051 = vrcp.f32 %v1878_v29 }
 0xf30   :  { %v8048_v47 = vpop.eup %8047 }
 0xf31   :  { %v1910_v53 = vpop.xlane.xlu1 %1909  ;;  %v1820_v26 = vmul.f32 %v8048_v47, %v9351_v55 }
 0xf32   :  { %8053 = vrcp.f32 %v1910_v53 }
 0xf34   :  { %v8050_v8 = vpop.eup %8049 }
 0xf35   :  { %v1942_v43 = vpop.xlane.xlu1 %1941  ;;  %v1852_v60 = vmul.f32 %v8050_v8, %v9358_v63 }
 0xf36   :  { %8055 = vrcp.f32 %v1942_v43 }
 0xf38   :  { %v8052_v51 = vpop.eup %8051 }
 0xf39   :  { %v1817_v28 = vpop.xlane.xlu0 %1816  ;;  %v1884_v23 = vmul.f32 %v8052_v51, %v9366_v39 }
 0xf3a   :  { %8057 = vrcp.f32 %v1817_v28 }
 0xf3c   :  { %v8054_v42 = vpop.eup %8053 }
 0xf3d   :  { %v1849_v25 = vpop.xlane.xlu0 %1848  ;;  %v1974_v19 = vpop.xlane.xlu1 %1973  ;;  %v1916_v56 = vmul.f32 %v8054_v42, %v9376_v57 }
 0xf3e   :  { %8059 = vrcp.f32 %v1974_v19 }
 0xf3f   :  { %8061 = vrcp.f32 %v1849_v25 }
 0xf40   :  { %v8056_v40 = vpop.eup %8055 }
 0xf41   :  { %v1881_v37 = vpop.xlane.xlu0 %1880  ;;  %v2006_v36 = vpop.xlane.xlu1 %2005  ;;  %v1948_v63 = vmul.f32 %v8056_v40, %v9385_v20  ;;  %v6748_v40 = vld [vmem:[#allocation12 + $0xe] ss:$0 sm:$0xff] }
 0xf42   :  { %8063 = vrcp.f32 %v1881_v37 }
 0xf44   :  { %v8058_v6 = vpop.eup %8057 }
 0xf45   :  { %v1913_v34 = vpop.xlane.xlu0 %1912  ;;  %v1821_v61 = vmul.f32 %v8058_v6, %v9391_v30  ;;  %v2014_v30 = vsel %vm174_vm3, %v1788_v14, %v1820_v26 }
 0xf46   :  { %8065 = vrcp.f32 %v1913_v34  ;;  %v2016_v12 = vsel %vm927_vm14, %v2014_v30, %v1852_v60  ;;  %v7747_v30 = vld [vmem:[#allocation7 + $0x28] ss:$136 sps:$4 sm:$0xff]  }
 0xf47   :  { %v2018_v57 = vsel %vm930_vm15, %v2016_v12, %v1884_v23  ;;  %v7753_v12 = vld [vmem:[#allocation7 + $0x248] ss:$136 sps:$4 sm:$0xff]  }
 0xf48   :  { %v8060_v44 = vpop.eup %8059  ;;  %v2020_v20 = vsel %vm360_vm6, %v2018_v57, %v1916_v56  ;;  %v7775_v57 = vld [vmem:[#allocation9 + $0x104] ss:$16 sps:$4 sm:$0xff]  }
 0xf49   :  { %v1945_v54 = vpop.xlane.xlu0 %1944  ;;  %v8062_v13 = vpop.eup %8061  ;;  %v1980_v38 = vmul.f32 %v8060_v44, %v9399_v22  ;;  %v2022_v37 = vsel %vm935_vm1, %v2020_v20, %v1948_v63  ;;  %v7750_v63 = vld [vmem:[#allocation7 + $0x138] ss:$136 sps:$4 sm:$0xff]   ;;  %7056 = vmatprep.subr.bf16.mxu0 %v7775_v57  ;;  %v7779_v20 = vld [vmem:[#allocation9 + $0x144] ss:$16 sps:$4 sm:$0xff]   ;;  %v2209_v57 = vld [vmem:[#allocation12 + $0x11] sm:$0x3] }
 0xf4a   :  { %8067 = vrcp.f32 %v1945_v54  ;;  %v1853_v50 = vmul.f32 %v8062_v13, %v9364_v16  ;;  %v2015_v16 = vsel %vm174_vm3, %v1789_v32, %v1821_v61  ;;  %v7743_v54 = vld [vmem:[#allocation7 + $0x24] ss:$136 sps:$4 sm:$0xff]  }
 0xf4b   :  { %8069 = vrcp.f32 %v2006_v36  ;;  %v2024_v19 = vsel %vm938_vm2, %v2022_v37, %v1980_v38  ;;  %v7744_v36 = vld [vmem:[#allocation7 + $0x134] ss:$136 sps:$4 sm:$0xff]  }
 0xf4c   :  { %v8064_v27 = vpop.eup %8063  ;;  %v2017_v39 = vsel %vm927_vm14, %v2015_v16, %v1853_v50  ;;  %v7752_v16 = vld [vmem:[#allocation7 + $0x13c] ss:$136 sps:$4 sm:$0xff]  }
 0xf4d   :  { %v1977_v35 = vpop.xlane.xlu0 %1976  ;;  %v1885_v4 = vmul.f32 %v8064_v27, %v9374_v31  ;;  %v7758_v38 = vld [vmem:[#allocation7 + $0x35c] ss:$136 sps:$4 sm:$0xff]  }
 0xf4e   :  { %8071 = vrcp.f32 %v1977_v35  ;;  %v7782_v37 = vld [vmem:[#allocation9 + $0x64] ss:$16 sps:$4 sm:$0xff]  }
 0xf4f   :  { %v2019_v53 = vsel %vm930_vm15, %v2017_v39, %v1885_v4  ;;  %v7756_v39 = vld [vmem:[#allocation7 + $0x358] ss:$136 sps:$4 sm:$0xff]  }
 0xf50   :  { %v8066_v18 = vpop.eup %8065 }
 0xf51   :  { %v2009_v46 = vpop.xlane.xlu0 %2008  ;;  %v1917_v55 = vmul.f32 %v8066_v18, %v9383_v0 }
 0xf52   :  { %8073 = vrcp.f32 %v2009_v46 }
 0xf53   :  { %v2021_v43 = vsel %vm360_vm6, %v2019_v53, %v1917_v55  ;;  %v7777_v53 = vld [vmem:[#allocation9 + $0x124] ss:$16 sps:$4 sm:$0xff]  }
 0xf54   :  { %v8068_v24 = vpop.eup %8067 }
 0xf55   :  { %v8070_v33 = vpop.eup %8069  ;;  %v1949_v28 = vmul.f32 %v8068_v24, %v9393_v7 }
 0xf56   :  { %v2012_v0 = vmul.f32 %v8070_v33, %v9407_v2 }
 0xf57   :  { %v2023_v22 = vsel %vm935_vm1, %v2021_v43, %v1949_v28  ;;  %v7755_v28 = vld [vmem:[#allocation7 + $0x24c] ss:$136 sps:$4 sm:$0xff]  }
 0xf58   :  { %v8072_v29 = vpop.eup %8071  ;;  %v2026_v34 = vsel %vm941_vm4, %v2024_v19, %v2012_v0  ;;  %v7776_v0 = vld [vmem:[#allocation9 + $0x4] ss:$16 sps:$4 sm:$0xff]  }
 0xf59   :  { %v1981_v31 = vmul.f32 %v8072_v29, %v9401_v52  ;;  %7057 = vmatpush3.bf16.msra.mxu0 %v7776_v0  ;;  %v7780_v43 = vld [vmem:[#allocation9 + $0x44] ss:$16 sps:$4 sm:$0xff]   ;;  %v2214_v0 = vrot.slane %v2209_v57, %v8827_v48 }
 0xf5a   :  { %7058 = vmatprep.subr.bf16.mxu0 %v7777_v53  ;;  %v7784_v19 = vld [vmem:[#allocation9 + $0x84] ss:$16 sps:$4 sm:$0xff]   ;;  %v2218_v53 = vrot.slane %v2209_v57, %v8829_v49 }
 0xf5b   :  { %v2025_v52 = vsel %vm938_vm2, %v2023_v22, %v1981_v31  ;;  %v7761_v31 = vld [vmem:[#allocation7 + $0x34] ss:$136 sps:$4 sm:$0xff]  }
 0xf5c   :  { %v8074_v25 = vpop.eup %8073  ;;  %v7783_v22 = vld [vmem:[#allocation9 + $0x184] ss:$16 sps:$4 sm:$0xff]  }
 0xf5d   :  { %v2013_v7 = vmul.f32 %v8074_v25, %v9409_v41  ;;  %v7745_v41 = vld [vmem:[#allocation7 + $0x244] ss:$136 sps:$4 sm:$0xff]  }
 0xf5e   :  { %v7778_v25 = vld [vmem:[#allocation9 + $0x24] ss:$16 sps:$4 sm:$0xff]  }
 0xf5f   :  { %v2027_v2 = vsel %vm941_vm4, %v2025_v52, %v2013_v7  ;;  %7059 = vmatpush3.bf16.msra.mxu0 %v7778_v25  ;;  %v7781_v7 = vld [vmem:[#allocation9 + $0x164] ss:$16 sps:$4 sm:$0xff]  }
 0xf60   :  { %v2028_v1 = vpack.c.bf16 %v2027_v2, %v2026_v34  ;;  %7060 = vmatprep.subr.bf16.mxu0 %v7779_v20  ;;  %v7785_v52 = vld [vmem:[#allocation9 + $0x1a4] ss:$16 sps:$4 sm:$0xff]  }
 0xf62   :  { %7381 = vmatmul.mubr.bf16.vlgmr.msra.gmra.mrb[24].mxu1 %v2028_v1 }
 0xf63   :  { %7385 = vmatpush3.bf16.msra.mxu1 %v7743_v54  ;;  %7392 = vmatprep.mubr.msk.bf16.mxu1 %vm8556_vm0, %v11061_v17 }
 0xf64   :  { %7386 = vmatprep.subr.bf16.mxu1 %v11061_v17  ;;  %7061 = vmatpush3.bf16.msra.mxu0 %v7780_v43 }
 0xf65   :  { %7062 = vmatprep.subr.bf16.mxu0 %v7781_v7 }
 0xf67   :  { %7387 = vmatpush3.bf16.msra.mxu1 %v7744_v36 }
 0xf68   :  { %7388 = vmatprep.subr.bf16.mxu1 %v11061_v17  ;;  %7063 = vmatpush3.bf16.msra.mxu0 %v7782_v37 }
 0xf69   :  { %7064 = vmatprep.subr.bf16.mxu0 %v7783_v22 }
 0xf6b   :  { %7389 = vmatpush3.bf16.msra.mxu1 %v7745_v41 }
 0xf6c   :  { %7390 = vmatprep.subr.bf16.mxu1 %v11061_v17  ;;  %7065 = vmatpush3.bf16.msra.mxu0 %v7784_v19 }
 0xf6d   :  { %7066 = vmatprep.subr.bf16.mxu0 %v7785_v52 }
 0xf6f   :  { %7391 = vmatpush3.bf16.msra.mxu1 %v7746_v11 }
0x1035   :  { %v2063_v47 = vpop.f32.mrb[24].mxu1 }
0x1036   :  { %v7382_v8 = vpop.f32.mrb[25].mxu1 }
0x1037   :  { %v2066_v35 = vpop.f32.mrb[26].mxu1 }
0x1038   :  { %v2078_v51 = vpack.c.bf16 %v2066_v35, %v2063_v47  ;;  %v7383_v42 = vpop.f32.mrb[27].mxu1  ;;  %v6754_v47 = vld [vmem:[#allocation12 + $0xf] ss:$0 sm:$0xff] }
0x103a   :  { %7393 = vmatmul.mubr.msk.bf16.vlgmr.msra.gmra.mrb[28].mxu1 %vm360_vm6, %v2078_v51 }
0x103b   :  { %2296 = vmatprep.mubr.bf16.mxu1 %v11062_v45 }
0x110d   :  { %v2147_v6 = vpop.f32.mrb[28].mxu1 }
0x110e   :  { %v2148_v46 = vadd.f32 %v6748_v40, %v2147_v6  ;;  %v7394_v44 = vpop.f32.mrb[29].mxu1 }
0x110f   :  { %v2150_v13 = vpop.f32.mrb[30].mxu1 }
0x1110   :  { %v2154_v27 = vadd.f32 %v2148_v46, %v9174_v21  ;;  %v2151_v18 = vadd.f32 %v6748_v40, %v2150_v13  ;;  %v7395_v26 = vpop.f32.mrb[31].mxu1  ;;  %v6755_v40 = vld [vmem:[#allocation12 + $0x10] ss:$0 sm:$0xff] }
0x1111   :  { %v7759_v13 = vld [vmem:[#allocation7 + $0x30] ss:$136 sps:$4 sm:$0xff]   ;;  %v7762_v26 = vld [vmem:[#allocation7 + $0x140] ss:$136 sps:$4 sm:$0xff]  }
0x1112   :  { %v2155_v61 = vadd.f32 %v2151_v18, %v9176_v15  ;;  %v2158_v24 = vsel %vm360_vm6, %v2154_v27, 0.0  ;;  %v7749_v15 = vld [vmem:[#allocation7 + $0x2c] ss:$136 sps:$4 sm:$0xff]  }
0x1113   :  { %2159 = vadd.xlane.f32.xlu1 %v2158_v24  ;;  %2264 = vmatprep.subr.bf16.mxu1 %v7749_v15  ;;  %v7764_v18 = vld [vmem:[#allocation7 + $0x144] ss:$136 sps:$4 sm:$0xff]   ;;  %v7765_v24 = vld [vmem:[#allocation7 + $0x250] ss:$136 sps:$4 sm:$0xff]  }
0x1114   :  { %v2161_v60 = vsel %vm360_vm6, %v2155_v61, 0.0  ;;  %2265 = vmatpush1.bf16.msra.mxu1 %v7747_v30  ;;  %v7773_v15 = vld [vmem:[#allocation7 + $0x258] ss:$136 sps:$4 sm:$0xff]   ;;  %v7774_v30 = vld [vmem:[#allocation7 + $0x368] ss:$136 sps:$4 sm:$0xff]  }
0x1115   :  { %2162 = vadd.xlane.f32.xlu0 %v2161_v60  ;;  %2266 = vmatprep.subr.bf16.mxu1 %v7752_v16  ;;  %v7770_v60 = vld [vmem:[#allocation7 + $0x364] ss:$136 sps:$4 sm:$0xff]  }
0x1116   :  { %v7787_v16 = vld [vmem:[#allocation9 + $0x1c4] ss:$16 sps:$4 sm:$0xff]  }
0x1118   :  { %2267 = vmatpush1.bf16.msra.mxu1 %v7750_v63  ;;  %v7786_v63 = vld [vmem:[#allocation9 + $0xa4] ss:$16 sps:$4 sm:$0xff]  }
0x1119   :  { %2268 = vmatprep.subr.bf16.mxu1 %v7755_v28  ;;  %7067 = vmatpush3.bf16.msra.mxu0 %v7786_v63  ;;  %v7788_v28 = vld [vmem:[#allocation9 + $0xc4] ss:$16 sps:$4 sm:$0xff]  }
0x111a   :  { %7068 = vmatprep.subr.bf16.mxu0 %v7787_v16 }
0x111c   :  { %2269 = vmatpush1.bf16.msra.mxu1 %v7753_v12  ;;  %v7789_v12 = vld [vmem:[#allocation9 + $0x1e4] ss:$16 sps:$4 sm:$0xff]  }
0x111d   :  { %2270 = vmatprep.subr.bf16.mxu1 %v7758_v38  ;;  %7069 = vmatpush3.bf16.msra.mxu0 %v7788_v28  ;;  %v7790_v38 = vld [vmem:[#allocation9 + $0xe4] ss:$16 sps:$4 sm:$0xff]  }
0x111e   :  { %7070 = vmatprep.subr.bf16.mxu0 %v7789_v12 }
0x1120   :  { %2271 = vmatpush1.bf16.msra.mxu1 %v7756_v39  ;;  %v9516_v39 = vld [vmem:[#allocation4] sm:$0xff] }
0x1121   :  { %2663 = vmatprep.subr.bf16.mxu1 %v7761_v31  ;;  %7071 = vmatpush3.bf16.msra.mxu0 %v7790_v38  ;;  %v9518_v31 = vld [vmem:[#allocation4 + $0x8] sm:$0xff] }
0x1122   :  { %7408 = vmatprep.subr.bf16.mxu0 %v11061_v17 }
0x11a0   :  { %v2160_v50 = vpop.xlane.xlu1 %2159 }
0x11a1   :  { %v2164_v33 = vmul.f32 0.015625, %v2160_v50  ;;  %v221_v50 = vld [vmem:[%s11018_s3 + $0x10] sm:$0xff] }
0x11a2   :  { %v2163_v14 = vpop.xlane.xlu0 %2162 }
0x11a3   :  { %v2166_v32 = vsub.f32 %v2154_v27, %v2164_v33  ;;  %v2165_v23 = vmul.f32 0.015625, %v2163_v14  ;;  %v222_v33 = vld [vmem:[%s11018_s3 + $0x18] sm:$0xff] }
0x11a4   :  { %v7768_v14 = vld [vmem:[#allocation7 + $0x360] ss:$136 sps:$4 sm:$0xff]  }
0x11a5   :  { %v2167_v4 = vsub.f32 %v2155_v61, %v2165_v23  ;;  %v2168_v29 = vmul.f32 %v2166_v32, %v2166_v32  ;;  %v7767_v61 = vld [vmem:[#allocation7 + $0x254] ss:$136 sps:$4 sm:$0xff]  }
0x11a7   :  { %v2170_v56 = vsel %vm360_vm6, %v2168_v29, 0.0  ;;  %v2169_v21 = vmul.f32 %v2167_v4, %v2167_v4 }
0x11a8   :  { %2171 = vadd.xlane.f32.xlu1 %v2170_v56  ;;  %v7771_v56 = vld [vmem:[#allocation7 + $0x38] ss:$136 sps:$4 sm:$0xff]  }
0x11a9   :  { %v2173_v55 = vsel %vm360_vm6, %v2169_v21, 0.0 }
0x11aa   :  { %2174 = vadd.xlane.f32.xlu0 %v2173_v55  ;;  %v7772_v55 = vld [vmem:[#allocation7 + $0x148] ss:$136 sps:$4 sm:$0xff]  }
0x11b9   :  { %2919 = vrot.lane.b32.xlu1 %v9516_v39, %s8552_s15 }
0x11bd   :  { %2957 = vrot.lane.b32.xlu1 %v9516_v39, %s8557_s29 }
0x11c0   :  { %2921 = vrot.lane.b32.xlu0 %v9518_v31, %s8552_s15 }
0x11c1   :  { %2959 = vrot.lane.b32.xlu1 %v9518_v31, %s8557_s29 }
0x11c4   :  { %2995 = vrot.lane.b32.xlu0 %v9516_v39, %s8558_s13 }
0x11c5   :  { %2997 = vrot.lane.b32.xlu1 %v9518_v31, %s8558_s13 }
0x11c8   :  { %3033 = vrot.lane.b32.xlu0 %v9516_v39, %s8546_s8 }
0x11c9   :  { %3035 = vrot.lane.b32.xlu1 %v9518_v31, %s8546_s8 }
0x11cc   :  { %3071 = vrot.lane.b32.xlu0 %v9516_v39, %s8559_s17 }
0x11cd   :  { %3073 = vrot.lane.b32.xlu1 %v9518_v31, %s8559_s17 }
0x11d0   :  { %3109 = vrot.lane.b32.xlu0 %v9516_v39, %s8560_s4 }
0x11d1   :  { %3111 = vrot.lane.b32.xlu1 %v9518_v31, %s8560_s4 }
0x11d4   :  { %3147 = vrot.lane.b32.xlu0 %v9516_v39, %s8561_s22 }
0x11d5   :  { %3149 = vrot.lane.b32.xlu1 %v9518_v31, %s8561_s22 }
0x1235   :  { %v2172_v34 = vpop.xlane.xlu1 %2171 }
0x1236   :  { %v2176_v2 = vmul.f32 0.015625, %v2172_v34 }
0x1237   :  { %v2175_v54 = vpop.xlane.xlu0 %2174 }
0x1238   :  { %v2178_v1 = vadd.f32 1e-05, %v2176_v2  ;;  %v2177_v36 = vmul.f32 0.015625, %v2175_v54 }
0x123a   :  { %8075 = vrsqrt.f32 %v2178_v1  ;;  %v2179_v41 = vadd.f32 1e-05, %v2177_v36 }
0x123c   :  { %8077 = vrsqrt.f32 %v2179_v41 }
0x1244   :  { %v8076_v11 = vpop.eup %8075 }
0x1245   :  { %v2182_v8 = vmul.f32 %v8076_v11, %v2166_v32  ;;  %v11068_v32 = vld [vmem:[#allocation17_spill] sm:$0xff]  ;;  %v6801_v11 = vld [vmem:[#allocation12 + $0x17] ss:$0 sm:$0xff] }
0x1246   :  { %v8078_v35 = vpop.eup %8077  ;;  %v9497_v23 = vadd.f32 %v11068_v32, %v221_v50  ;;  %v11070_v50 = vld [vmem:[#allocation20_spill] sm:$0xff] }
0x1247   :  { %v2190_v51 = vmul.f32 %v6754_v47, %v2182_v8  ;;  %v2183_v42 = vmul.f32 %v8078_v35, %v2167_v4  ;;  %v11069_v4 = vld [vmem:[#allocation18_spill] sm:$0xff]  ;;  %v6800_v8 = vld [vmem:[#allocation12 + $0x16] ss:$0 sm:$0xff] }
0x1248   :  { %v9500_v29 = vadd.f32 %v11069_v4, %v222_v33 }
0x1249   :  { %v2191_v6 = vmul.f32 %v6754_v47, %v2183_v42  ;;  %v9482_v46 = vadd.f32 %v6755_v40, %v2190_v51 }
0x124a   :  { %v2595_v21 = vpack.c.bf16 %v9500_v29, %v9497_v23 }
0x124b   :  { %v9484_v44 = vadd.f32 %v6755_v40, %v2191_v6 }
0x124d   :  { %v2208_v27 = vpack.c.bf16 %v9484_v44, %v9482_v46 }
0x124f   :  { %6764 = vmatmul.mubr.msk.bf16.vlgmr.msra.gmra.mrb[32].mxu1 %vm360_vm6, %v2208_v27 }
0x1250   :  { %2664 = vmatpush1.bf16.msra.mxu1 %v7759_v13  ;;  %2695 = vmatprep.mubr.bf16.mxu1 %v11062_v45 }
0x1251   :  { %2665 = vmatprep.subr.bf16.mxu1 %v7764_v18 }
0x1254   :  { %2666 = vmatpush1.bf16.msra.mxu1 %v7762_v26 }
0x1255   :  { %2667 = vmatprep.subr.bf16.mxu1 %v7767_v61 }
0x1258   :  { %2668 = vmatpush1.bf16.msra.mxu1 %v7765_v24 }
0x1259   :  { %2669 = vmatprep.subr.bf16.mxu1 %v7770_v60 }
0x125c   :  { %2670 = vmatpush1.bf16.msra.mxu1 %v7768_v14 }
0x125d   :  { %7396 = vmatprep.subr.bf16.mxu1 %v11061_v17 }
0x125f   :  { %6798 = vmatmul.mubr.msk.bf16.vlgmr.msra.gmra.mrb[36].mxu1 %vm360_vm6, %v2595_v21 }
0x1260   :  { %7397 = vmatpush3.bf16.msra.mxu1 %v7771_v56  ;;  %7404 = vmatprep.mubr.msk.bf16.mxu1 %vm8556_vm0, %v11061_v17 }
0x1261   :  { %7398 = vmatprep.subr.bf16.mxu1 %v11061_v17 }
0x1264   :  { %7399 = vmatpush3.bf16.msra.mxu1 %v7772_v55 }
0x1265   :  { %7400 = vmatprep.subr.bf16.mxu1 %v11061_v17 }
0x1268   :  { %7401 = vmatpush3.bf16.msra.mxu1 %v7773_v15 }
0x1269   :  { %7402 = vmatprep.subr.bf16.mxu1 %v11061_v17 }
0x126c   :  { %7403 = vmatpush3.bf16.msra.mxu1 %v7774_v30 }
0x126d   :  { %7428 = vmatprep.subr.bf16.mxu1 %v11061_v17 }
0x126f   :  { %7405 = vmatmul.mubr.msk.bf16.vlgmr.msra.gmra.mrb[40].mxu1 %vm360_vm6, %v2595_v21 }
0x1270   :  { %7444 = vmatprep.mubr.msk.bf16.mxu1 %vm8556_vm0, %v11061_v17 }
0x1322   :  { %v2298_v25 = vpop.f32.mrb[32].mxu1 }
0x1323   :  { %v2299_v20 = vadd.f32 %v2298_v25, %v2214_v0  ;;  %v2300_v43 = vpop.f32.mrb[33].mxu1 }
0x1324   :  { %v2301_v7 = vadd.f32 %v2300_v43, %v2218_v53  ;;  %v2302_v37 = vpop.f32.mrb[34].mxu1 }
0x1325   :  { %v2303_v22 = vadd.f32 %v2302_v37, %v2214_v0  ;;  %v2304_v19 = vpop.f32.mrb[35].mxu1  ;;  %v2307_v34 = vmax.f32 %v2299_v20, 0.0  ;;  %v6802_v37 = vld [vmem:[#allocation12 + $0x18] ss:$0 sm:$0xff] }
0x1326   :  { %v2305_v52 = vadd.f32 %v2304_v19, %v2218_v53  ;;  %v2308_v54 = vmax.f32 %v2301_v7, 0.0 }
0x1327   :  { %v2309_v2 = vmax.f32 %v2303_v22, 0.0 }
0x1328   :  { %v2310_v1 = vmax.f32 %v2305_v52, 0.0 }
0x1329   :  { %v2343_v36 = vpack.c.bf16 %v2309_v2, %v2307_v34 }
0x132a   :  { %v2344_v41 = vpack.c.bf16 %v2310_v1, %v2308_v54 }
0x132c   :  { %2480 = vmatprep.mubr.bf16.mxu0 %v2344_v41 }
0x132d   :  { %2481 = vmatmul.mubr.bf16.vlgmr.msra.gmra.mrb[24].mxu0 %v2343_v36 }
0x132e   :  { %7424 = vmatprep.mubr.msk.bf16.mxu0 %vm8556_vm0, %v11061_v17 }
0x1332   :  { %v2697_v47 = vpop.f32.mrb[36].mxu1 }
0x1333   :  { %v2699_v35 = vpop.f32.mrb[37].mxu1  ;;  %v9552_v40 = vadd.f32 %v6800_v8, %v2697_v47 }
0x1334   :  { %v2763_v51 = vadd.f32 %v6801_v11, %v2699_v35  ;;  %v2701_v42 = vpop.f32.mrb[38].mxu1 }
0x1335   :  { %v9554_v6 = vadd.f32 %v6800_v8, %v2701_v42  ;;  %v2703_v13 = vpop.f32.mrb[39].mxu1 }
0x1336   :  { %v2764_v27 = vadd.f32 %v6801_v11, %v2703_v13  ;;  %v2774_v18 = vmul.f32 %v2763_v51, %v8835_v58  ;;  %v2776_v26 = vmul.f32 %v2763_v51, %v8838_v59  ;;  %v2778_v61 = vmul.f32 %v2763_v51, %v8840_v62 }
0x1337   :  { %v2822_v24 = vpack.c.bf16 %v9554_v6, %v9552_v40  ;;  %v9562_v60 = vmul.f32 %v2763_v51, %v8842_v3  ;;  %v9565_v33 = vmul.f32 %v2763_v51, %v11070_v50  ;;  %v9568_v14 = vmul.f32 %v2763_v51, %v8846_v5 }
0x1338   :  { %v2775_v32 = vmul.f32 %v2764_v27, %v8835_v58  ;;  %v2777_v4 = vmul.f32 %v2764_v27, %v8838_v59  ;;  %v2779_v56 = vmul.f32 %v2764_v27, %v8840_v62  ;;  %v2781_v21 = vmul.f32 %v2764_v27, %v8842_v3 }
0x1339   :  { %v9575_v55 = vmul.f32 %v2764_v27, %v11070_v50  ;;  %v9578_v15 = vmul.f32 %v2764_v27, %v8846_v5  ;;  %v9581_v30 = vmul.f32 %v2763_v51, %v8848_v9  ;;  %v9584_v63 = vmul.f32 %v2764_v27, %v8848_v9 }
0x133a   :  { %v2790_v16 = vpack.c.bf16 %v2775_v32, %v2774_v18  ;;  %v2791_v28 = vpack.c.bf16 %v2777_v4, %v2776_v26  ;;  %v2792_v12 = vpack.c.bf16 %v2779_v56, %v2778_v61  ;;  %v2793_v38 = vpack.c.bf16 %v2781_v21, %v9562_v60 }
0x133b   :  { %v2794_v57 = vpack.c.bf16 %v9575_v55, %v9565_v33  ;;  %v2795_v0 = vpack.c.bf16 %v9578_v15, %v9568_v14  ;;  %v2796_v53 = vpack.c.bf16 %v9584_v63, %v9581_v30  ;;  %v9595_v20 = vmul.f32 %v2763_v51, %v8850_v10 }
0x133c   :  { %v2827_v25 = vsel %vm360_vm6, %v2790_v16, 0  ;;  %v9598_v43 = vmul.f32 %v2764_v27, %v8850_v10  ;;  %v2830_v2 = vsel %vm360_vm6, %v2791_v28, 0 }
0x133d   :  { %7409 = vmatpush3.bf16.xpose.msra.mxu0 %v2827_v25 }
0x133e   :  { %7410 = vmatprep.subr.bf16.mxu0 %v11061_v17  ;;  %v2797_v7 = vpack.c.bf16 %v9598_v43, %v9595_v20  ;;  %v9660_v20 = vpop.permute.xlu0 %2921 }
0x1340   :  { %v2848_v14 = vsel %vm360_vm6, %v2797_v7, 0 }
0x1342   :  { %v2740_v22 = vpop.f32.mrb[40].mxu1  ;;  %v9664_v7 = vpop.permute.xlu0 %2995 }
0x1343   :  { %v2772_v19 = vadd.f32 %v6802_v37, %v2740_v22  ;;  %v7406_v52 = vpop.f32.mrb[41].mxu1 }
0x1344   :  { %v2743_v34 = vpop.f32.mrb[42].mxu1 }
0x1345   :  { %v2773_v54 = vadd.f32 %v6802_v37, %v2743_v34  ;;  %v7407_v1 = vpop.f32.mrb[43].mxu1  ;;  %7411 = vmatpush3.bf16.xpose.msra.mxu0 %v2830_v2  ;;  %v2798_v36 = vmul.f32 %v2772_v19, %v8835_v58  ;;  %v2800_v41 = vmul.f32 %v2772_v19, %v8838_v59  ;;  %v2802_v11 = vmul.f32 %v2772_v19, %v8840_v62  ;;  %v9658_v34 = vpop.permute.xlu1 %2919 }
0x1346   :  { %7412 = vmatprep.subr.bf16.mxu0 %v11061_v17  ;;  %v2804_v47 = vmul.f32 %v2772_v19, %v8842_v3  ;;  %v2806_v8 = vmul.f32 %v2772_v19, %v11070_v50  ;;  %v2808_v35 = vmul.f32 %v2772_v19, %v8846_v5  ;;  %v2810_v51 = vmul.f32 %v2772_v19, %v8848_v9  ;;  %v9668_v6 = vpop.permute.xlu0 %3033 }
0x1347   :  { %v2799_v42 = vmul.f32 %v2773_v54, %v8835_v58  ;;  %v2801_v13 = vmul.f32 %v2773_v54, %v8838_v59  ;;  %v2803_v27 = vmul.f32 %v2773_v54, %v8840_v62  ;;  %v2805_v18 = vmul.f32 %v2773_v54, %v8842_v3 }
0x1348   :  { %v2807_v26 = vmul.f32 %v2773_v54, %v11070_v50  ;;  %v2809_v61 = vmul.f32 %v2773_v54, %v8846_v5  ;;  %v2811_v60 = vmul.f32 %v2773_v54, %v8848_v9  ;;  %v2812_v33 = vmul.f32 %v2772_v19, %v8850_v10 }
0x1349   :  { %v2814_v32 = vpack.c.bf16 %v2799_v42, %v2798_v36  ;;  %v2815_v4 = vpack.c.bf16 %v2801_v13, %v2800_v41  ;;  %v2816_v56 = vpack.c.bf16 %v2803_v27, %v2802_v11  ;;  %v2817_v21 = vpack.c.bf16 %v2805_v18, %v2804_v47  ;;  %v9662_v43 = vpop.permute.xlu1 %2957 }
0x134a   :  { %v2818_v55 = vpack.c.bf16 %v2807_v26, %v2806_v8  ;;  %v2819_v16 = vpack.c.bf16 %v2809_v61, %v2808_v35  ;;  %v2820_v28 = vpack.c.bf16 %v2811_v60, %v2810_v51  ;;  %v2813_v25 = vmul.f32 %v2773_v54, %v8850_v10  ;;  %v9682_v27 = vpop.permute.xlu0 %3071 }
0x134b   :  { %7429 = vmatpush3.bf16.msra.mxu1 %v2814_v32  ;;  %v2833_v37 = vsel %vm360_vm6, %v2792_v12, 0  ;;  %v2836_v19 = vsel %vm360_vm6, %v2793_v38, 0  ;;  %v2839_v12 = vsel %vm360_vm6, %v2794_v57, 0  ;;  %v2842_v38 = vsel %vm360_vm6, %v2795_v0, 0 }
0x134c   :  { %7430 = vmatprep.subr.bf16.mxu1 %v11061_v17  ;;  %v2821_v22 = vpack.c.bf16 %v2813_v25, %v2812_v33  ;;  %v2845_v57 = vsel %vm360_vm6, %v2796_v53, 0 }
0x134d   :  { %7413 = vmatpush3.bf16.xpose.msra.mxu0 %v2833_v37  ;;  %v9666_v40 = vpop.permute.xlu1 %2959 }
0x134e   :  { %7414 = vmatprep.subr.bf16.mxu0 %v11061_v17  ;;  %v9696_v32 = vpop.permute.xlu0 %3109 }
0x134f   :  { %7431 = vmatpush3.bf16.msra.mxu1 %v2815_v4  ;;  %11072 = vst [vmem:[#allocation17_spill] sm:$0xff] %v9696_v32 }
0x1350   :  { %7432 = vmatprep.subr.bf16.mxu1 %v11061_v17 }
0x1351   :  { %v9670_v1 = vpop.permute.xlu1 %2997 }
0x1353   :  { %7433 = vmatpush3.bf16.msra.mxu1 %v2816_v56 }
0x1354   :  { %7434 = vmatprep.subr.bf16.mxu1 %v11061_v17 }
0x1355   :  { %7415 = vmatpush3.bf16.xpose.msra.mxu0 %v2836_v19  ;;  %v9684_v18 = vpop.permute.xlu1 %3035  ;;  %v9720_v19 = vpop.permute.xlu0 %3147 }
0x1356   :  { %7416 = vmatprep.subr.bf16.mxu0 %v11061_v17  ;;  %11071 = vst [vmem:[#allocation21_spill] sm:$0xff] %v9684_v18  ;;  %11074 = vst [vmem:[#allocation20_spill] sm:$0xff] %v9720_v19 }
0x1357   :  { %7435 = vmatpush3.bf16.msra.mxu1 %v2817_v21 }
0x1358   :  { %7436 = vmatprep.subr.bf16.mxu1 %v11061_v17 }
0x135b   :  { %7437 = vmatpush3.bf16.msra.mxu1 %v2818_v55 }
0x135c   :  { %7438 = vmatprep.subr.bf16.mxu1 %v11061_v17 }
0x135d   :  { %7417 = vmatpush3.bf16.xpose.msra.mxu0 %v2839_v12 }
0x135e   :  { %7418 = vmatprep.subr.bf16.mxu0 %v11061_v17 }
0x135f   :  { %7439 = vmatpush3.bf16.msra.mxu1 %v2819_v16  ;;  %v9708_v16 = vpop.permute.xlu1 %3073 }
0x1360   :  { %7440 = vmatprep.subr.bf16.mxu1 %v11061_v17  ;;  %11073 = vst [vmem:[#allocation18_spill] sm:$0xff] %v9708_v16 }
0x1363   :  { %7441 = vmatpush3.bf16.msra.mxu1 %v2820_v28  ;;  %v9722_v12 = vpop.permute.xlu1 %3111 }
0x1364   :  { %7442 = vmatprep.subr.bf16.mxu1 %v11061_v17  ;;  %11075 = vst [vmem:[#allocation22_spill] sm:$0xff] %v9722_v12 }
0x1365   :  { %7419 = vmatpush3.bf16.xpose.msra.mxu0 %v2842_v38 }
0x1366   :  { %7420 = vmatprep.subr.bf16.mxu0 %v11061_v17 }
0x1367   :  { %7443 = vmatpush3.bf16.msra.mxu1 %v2821_v22 }
0x1368   :  { %7448 = vmatprep.subr.bf16.mxu1 %v11061_v17 }
0x136d   :  { %7421 = vmatpush3.bf16.xpose.msra.mxu0 %v2845_v57 }
0x136e   :  { %7422 = vmatprep.subr.bf16.mxu0 %v11061_v17 }
0x1375   :  { %7423 = vmatpush3.bf16.xpose.msra.mxu0 %v2848_v14 }
0x137c   :  { %7425 = vmatmul.mubr.msk.bf16.vlgmr.msra.gmra.mrb[28].mxu0 %vm360_vm6, %v2822_v24 }
0x137d   :  { %3539 = vmatprep.mubr.bf16.mxu0 %v11062_v45 }
0x1400   :  { %v7072_v15 = vpop.f32.mrb[24].mxu0 }
0x1401   :  { %v7073_v30 = vpop.f32.mrb[25].mxu0 }
0x1402   :  { %v9654_v63 = vadd.f32 %v7073_v30, %v7072_v15  ;;  %v7075_v0 = vpop.f32.mrb[26].mxu0 }
0x1403   :  { %v7076_v53 = vpop.f32.mrb[27].mxu0 }
0x1404   :  { %v9656_v52 = vadd.f32 %v7076_v53, %v7075_v0 }
0x144f   :  { %v2884_v24 = vpop.f32.mrb[28].mxu0 }
0x1450   :  { %v2891_v2 = vmul.f32 0.35355338, %v2884_v24  ;;  %v7426_v54 = vpop.f32.mrb[29].mxu0 }
0x1451   :  { %v2887_v36 = vpop.f32.mrb[30].mxu0  ;;  %v9744_v54 = vpop.permute.xlu1 %3149 }
0x1452   :  { %v7427_v41 = vpop.f32.mrb[31].mxu0  ;;  %v3001_v11 = vadd.f32 %v9664_v7, %v2891_v2  ;;  %v2925_v47 = vadd.f32 %v9658_v34, %v2891_v2  ;;  %v2892_v8 = vmul.f32 0.35355338, %v2887_v36  ;;  %v9677_v42 = vadd.f32 %v9668_v6, %v2891_v2  ;;  %11076 = vst [vmem:[#allocation23_spill] sm:$0xff] %v9744_v54 }
0x1453   :  { %v9680_v13 = vadd.f32 %v9662_v43, %v2891_v2  ;;  %v9691_v60 = vadd.f32 %v9682_v27, %v2891_v2  ;;  %v9718_v22 = vadd.f32 %v9696_v32, %v2891_v2  ;;  %v9725_v38 = vadd.f32 %v9720_v19, %v2891_v2 }
0x1454   :  { %v3003_v35 = vsel %vm738_vm7, %v3001_v11, -inf  ;;  %v2927_v51 = vsel %vm660_vm8, %v2925_v47, -inf  ;;  %v3041_v26 = vsel %vm777_vm9, %v9677_v42, -inf  ;;  %v9694_v33 = vadd.f32 %v9666_v40, %v2892_v8 }
0x1455   :  { %3004 = vmax.xlane.f32.xlu1 %v3003_v35  ;;  %2928 = vmax.xlane.f32.xlu0 %v2927_v51  ;;  %v2965_v61 = vsel %vm699_vm10, %v9680_v13, -inf  ;;  %v3079_v4 = vsel %vm816_vm11, %v9691_v60, -inf  ;;  %v9703_v21 = vadd.f32 %v9670_v1, %v2892_v8  ;;  %v9706_v55 = vadd.f32 %v9660_v20, %v2892_v8 }
0x1456   :  { %v2968_v56 = vsel %vm699_vm10, %v9694_v33, -inf  ;;  %v9715_v37 = vadd.f32 %v9684_v18, %v2892_v8  ;;  %v3117_v14 = vsel %vm855_vm12, %v9718_v22, -inf  ;;  %v9732_v15 = vadd.f32 %v9708_v16, %v2892_v8 }
0x1457   :  { %v3006_v28 = vsel %vm738_vm7, %v9703_v21, -inf  ;;  %v2930_v25 = vsel %vm660_vm8, %v9706_v55, -inf  ;;  %v3155_v0 = vsel %vm894_vm13, %v9725_v38, -inf  ;;  %v9739_v53 = vadd.f32 %v9722_v12, %v2892_v8 }
0x1458   :  { %v3044_v57 = vsel %vm777_vm9, %v9715_v37, -inf  ;;  %v3082_v30 = vsel %vm816_vm11, %v9732_v15, -inf  ;;  %v9742_v24 = vadd.f32 %v2891_v2, %v9516_v39  ;;  %v9747_v36 = vadd.f32 %v9744_v54, %v2892_v8 }
0x1459   :  { %3042 = vmax.xlane.f32.xlu1 %v3041_v26  ;;  %2966 = vmax.xlane.f32.xlu0 %v2965_v61  ;;  %v3120_v41 = vsel %vm855_vm12, %v9739_v53, -inf  ;;  %v9756_v39 = vadd.f32 %v2892_v8, %v9518_v31 }
0x145a   :  { %v2895_v35 = vsel %vm174_vm3, %v9742_v24, -inf  ;;  %v3158_v51 = vsel %vm894_vm13, %v9747_v36, -inf }
0x145b   :  { %v2898_v2 = vsel %vm174_vm3, %v9756_v39, -inf }
0x145d   :  { %3080 = vmax.xlane.f32.xlu1 %v3079_v4  ;;  %2969 = vmax.xlane.f32.xlu0 %v2968_v56 }
0x1461   :  { %3007 = vmax.xlane.f32.xlu0 %v3006_v28  ;;  %2931 = vmax.xlane.f32.xlu1 %v2930_v25 }
0x1465   :  { %3045 = vmax.xlane.f32.xlu0 %v3044_v57  ;;  %3118 = vmax.xlane.f32.xlu1 %v3117_v14 }
0x1469   :  { %3083 = vmax.xlane.f32.xlu0 %v3082_v30  ;;  %3156 = vmax.xlane.f32.xlu1 %v3155_v0 }
0x146d   :  { %3121 = vmax.xlane.f32.xlu0 %v3120_v41  ;;  %2896 = vmax.xlane.f32.xlu1 %v2895_v35 }
0x1471   :  { %3159 = vmax.xlane.f32.xlu0 %v3158_v51 }
0x1475   :  { %2899 = vmax.xlane.f32.xlu0 %v2898_v2 }
0x14e2   :  { %v3005_v26 = vpop.xlane.xlu1 %3004  ;;  %v2929_v61 = vpop.xlane.xlu0 %2928 }
0x14e3   :  { %v3009_v4 = vsub.f32 %v3001_v11, %v3005_v26  ;;  %v2933_v56 = vsub.f32 %v2925_v47, %v2929_v61 }
0x14e5   :  { %v3011_v28 = vmul.f32 1.442695, %v3009_v4  ;;  %v2935_v25 = vmul.f32 1.442695, %v2933_v56 }
0x14e6   :  { %v3043_v57 = vpop.xlane.xlu1 %3042  ;;  %v2967_v14 = vpop.xlane.xlu0 %2966 }
0x14e7   :  { %8079 = vpow2.f32 %v3011_v28  ;;  %v3047_v30 = vsub.f32 %v9677_v42, %v3043_v57  ;;  %v2971_v0 = vsub.f32 %v9680_v13, %v2967_v14 }
0x14e8   :  { %8081 = vpow2.f32 %v2935_v25 }
0x14e9   :  { %v3049_v31 = vmul.f32 1.442695, %v3047_v30  ;;  %v2973_v8 = vmul.f32 1.442695, %v2971_v0 }
0x14ea   :  { %v3081_v41 = vpop.xlane.xlu1 %3080  ;;  %v2970_v35 = vpop.xlane.xlu0 %2969 }
0x14eb   :  { %8083 = vpow2.f32 %v3049_v31  ;;  %v3085_v51 = vsub.f32 %v9691_v60, %v3081_v41  ;;  %v2972_v11 = vsub.f32 %v9694_v33, %v2970_v35 }
0x14ec   :  { %8085 = vpow2.f32 %v2973_v8 }
0x14ed   :  { %v3087_v47 = vmul.f32 1.442695, %v3085_v51  ;;  %v2975_v2 = vmul.f32 1.442695, %v2972_v11 }
0x14ee   :  { %v3008_v26 = vpop.xlane.xlu0 %3007  ;;  %v2932_v61 = vpop.xlane.xlu1 %2931 }
0x14ef   :  { %8087 = vpow2.f32 %v3087_v47  ;;  %v3010_v42 = vsub.f32 %v9703_v21, %v3008_v26  ;;  %v2934_v13 = vsub.f32 %v9706_v55, %v2932_v61 }
0x14f0   :  { %8089 = vpow2.f32 %v2975_v2 }
0x14f1   :  { %v9766_v4 = vpop.eup %8079  ;;  %v3013_v56 = vmul.f32 1.442695, %v3010_v42  ;;  %v2937_v28 = vmul.f32 1.442695, %v2934_v13 }
0x14f2   :  { %v9768_v25 = vpop.eup %8081  ;;  %v3046_v60 = vpop.xlane.xlu0 %3045  ;;  %3017 = vrot.lane.b32.xlu0 %v9766_v4, %s8559_s17 }
0x14f3   :  { %v3119_v57 = vpop.xlane.xlu1 %3118  ;;  %8091 = vpow2.f32 %v3013_v56  ;;  %v3048_v33 = vsub.f32 %v9715_v37, %v3046_v60  ;;  %2941 = vrot.lane.b32.xlu1 %v9768_v25, %s8561_s22 }
0x14f4   :  { %v3123_v21 = vsub.f32 %v9718_v22, %v3119_v57  ;;  %8093 = vpow2.f32 %v2937_v28 }
0x14f5   :  { %v9776_v55 = vpop.eup %8083  ;;  %v3051_v14 = vmul.f32 1.442695, %v3048_v33 }
0x14f6   :  { %v3125_v30 = vmul.f32 1.442695, %v3123_v21  ;;  %v9778_v0 = vpop.eup %8085  ;;  %v3084_v31 = vpop.xlane.xlu0 %3083  ;;  %3055 = vrot.lane.b32.xlu0 %v9776_v55, %s8546_s8 }
0x14f7   :  { %v3157_v8 = vpop.xlane.xlu1 %3156  ;;  %8095 = vpow2.f32 %v3051_v14  ;;  %v3086_v37 = vsub.f32 %v9732_v15, %v3084_v31  ;;  %2979 = vrot.lane.b32.xlu1 %v9778_v0, %s8560_s4 }
0x14f8   :  { %v3161_v22 = vsub.f32 %v9725_v38, %v3157_v8  ;;  %8097 = vpow2.f32 %v3125_v30 }
0x14f9   :  { %v9786_v41 = vpop.eup %8087  ;;  %v3089_v35 = vmul.f32 1.442695, %v3086_v37 }
0x14fa   :  { %v3163_v51 = vmul.f32 1.442695, %v3161_v22  ;;  %v9788_v11 = vpop.eup %8089  ;;  %v3122_v47 = vpop.xlane.xlu0 %3121  ;;  %3093 = vrot.lane.b32.xlu0 %v9786_v41, %s8558_s13 }
0x14fb   :  { %8099 = vpow2.f32 %v3089_v35  ;;  %v3124_v2 = vsub.f32 %v9739_v53, %v3122_v47  ;;  %2981 = vrot.lane.b32.xlu1 %v9788_v11, %s8560_s4  ;;  %v2897_v33 = vpop.xlane.xlu1 %2896 }
0x14fc   :  { %8101 = vpow2.f32 %v3163_v51  ;;  %v2901_v21 = vsub.f32 %v9742_v24, %v2897_v33 }
0x14fd   :  { %v9795_v15 = vpop.eup %8091  ;;  %v3127_v38 = vmul.f32 1.442695, %v3124_v2 }
0x14fe   :  { %v9797_v26 = vpop.eup %8093  ;;  %v3160_v61 = vpop.xlane.xlu0 %3159  ;;  %v2903_v14 = vmul.f32 1.442695, %v2901_v21 }
0x14ff   :  { %8103 = vpow2.f32 %v3127_v38  ;;  %v3162_v42 = vsub.f32 %v9747_v36, %v3160_v61  ;;  %3019 = vrot.lane.b32.xlu1 %v9795_v15, %s8559_s17  ;;  %2943 = vrot.lane.b32.xlu0 %v9797_v26, %s8561_s22 }
0x1501   :  { %v9804_v53 = vpop.eup %8095  ;;  %v3165_v13 = vmul.f32 1.442695, %v3162_v42 }
0x1502   :  { %v9806_v56 = vpop.eup %8097  ;;  %v2900_v30 = vpop.xlane.xlu0 %2899 }
0x1503   :  { %8105 = vpow2.f32 %v3165_v13  ;;  %3057 = vrot.lane.b32.xlu1 %v9804_v53, %s8546_s8  ;;  %3131 = vrot.lane.b32.xlu0 %v9806_v56, %s8557_s29  ;;  %v2902_v31 = vsub.f32 %v9756_v39, %v2900_v30 }
0x1504   :  { %8107 = vpow2.f32 %v2903_v14 }
0x1505   :  { %v9812_v28 = vpop.eup %8099  ;;  %v2905_v8 = vmul.f32 1.442695, %v2902_v31 }
0x1506   :  { %v9814_v36 = vpop.eup %8101 }
0x1507   :  { %3095 = vrot.lane.b32.xlu1 %v9812_v28, %s8558_s13  ;;  %3169 = vrot.lane.b32.xlu0 %v9814_v36, %s8552_s15  ;;  %8109 = vpow2.f32 %v2905_v8 }
0x1509   :  { %v9820_v60 = vpop.eup %8103 }
0x150b   :  { %3133 = vrot.lane.b32.xlu1 %v9820_v60, %s8557_s29 }
0x150d   :  { %v9824_v57 = vpop.eup %8105 }
0x150e   :  { %v9830_v37 = vpop.eup %8107 }
0x150f   :  { %3171 = vrot.lane.b32.xlu1 %v9824_v57, %s8552_s15  ;;  %v2907_v22 = vsel %vm174_vm3, %v9830_v37, 0.0 }
0x1511   :  { %v9834_v35 = vpop.eup %8109 }
0x1512   :  { %v2910_v51 = vsel %vm174_vm3, %v9834_v35, 0.0 }
0x1526   :  { %2908 = vadd.xlane.f32.xlu0 %v2907_v22 }
0x1533   :  { %2911 = vadd.xlane.f32.xlu1 %v2910_v51 }
0x1564   :  { %v3018_v24 = vpop.permute.xlu0 %3017 }
0x1565   :  { %v2942_v47 = vpop.permute.xlu1 %2941  ;;  %v3023_v33 = vsel %vm174_vm3, %v3018_v24, 0.0 }
0x1566   :  { %v2947_v2 = vsel %vm174_vm3, %v2942_v47, 0.0 }
0x1567   :  { %2948 = vadd.xlane.f32.xlu0 %v2947_v2  ;;  %v6765_v2 = vld [vmem:[#allocation12 + $0x13] ss:$0 sm:$0xff] }
0x1568   :  { %v3056_v39 = vpop.permute.xlu0 %3055  ;;  %v2483_v24 = vadd.f32 %v9654_v63, %v6765_v2 }
0x1569   :  { %v2980_v38 = vpop.permute.xlu1 %2979  ;;  %v3061_v30 = vsel %vm174_vm3, %v3056_v39, 0.0 }
0x156a   :  { %v2985_v61 = vsel %vm174_vm3, %v2980_v38, 0.0 }
0x156b   :  { %2986 = vadd.xlane.f32.xlu1 %v2985_v61 }
0x156c   :  { %v3094_v42 = vpop.permute.xlu0 %3093 }
0x156d   :  { %v2982_v13 = vpop.permute.xlu1 %2981  ;;  %v3099_v51 = vsel %vm174_vm3, %v3094_v42, 0.0  ;;  %v2489_v42 = vadd.f32 %v2483_v24, %v9482_v46 }
0x156e   :  { %v2988_v47 = vsel %vm174_vm3, %v2982_v13, 0.0 }
0x156f   :  { %3024 = vadd.xlane.f32.xlu1 %v3023_v33  ;;  %v2493_v63 = vsel %vm360_vm6, %v2489_v42, 0.0 }
0x1571   :  { %v3020_v21 = vpop.permute.xlu1 %3019  ;;  %v2944_v14 = vpop.permute.xlu0 %2943 }
0x1572   :  { %v2950_v31 = vsel %vm174_vm3, %v2944_v14, 0.0  ;;  %v3026_v38 = vsel %vm174_vm3, %v3020_v21, 0.0  ;;  %v2486_v21 = vadd.f32 %v9656_v52, %v6765_v2 }
0x1573   :  { %3062 = vadd.xlane.f32.xlu1 %v3061_v30  ;;  %2951 = vadd.xlane.f32.xlu0 %v2950_v31 }
0x1575   :  { %v3058_v8 = vpop.permute.xlu1 %3057  ;;  %v3132_v22 = vpop.permute.xlu0 %3131 }
0x1576   :  { %v3137_v61 = vsel %vm174_vm3, %v3132_v22, 0.0  ;;  %v3064_v14 = vsel %vm174_vm3, %v3058_v8, 0.0 }
0x1577   :  { %3100 = vadd.xlane.f32.xlu1 %v3099_v51  ;;  %2989 = vadd.xlane.f32.xlu0 %v2988_v47  ;;  %v9857_v47 = vadd.f32 %v2486_v21, %v9484_v44 }
0x1579   :  { %v3096_v39 = vpop.permute.xlu1 %3095  ;;  %v3170_v33 = vpop.permute.xlu0 %3169  ;;  %v2496_v46 = vsel %vm360_vm6, %v9857_v47, 0.0 }
0x157a   :  { %v3175_v30 = vsel %vm174_vm3, %v3170_v33, 0.0  ;;  %v3102_v31 = vsel %vm174_vm3, %v3096_v39, 0.0 }
0x157b   :  { %3027 = vadd.xlane.f32.xlu0 %v3026_v38  ;;  %3138 = vadd.xlane.f32.xlu1 %v3137_v61 }
0x157d   :  { %v3134_v13 = vpop.permute.xlu1 %3133 }
0x157e   :  { %v3140_v22 = vsel %vm174_vm3, %v3134_v13, 0.0 }
0x157f   :  { %3065 = vadd.xlane.f32.xlu0 %v3064_v14  ;;  %3176 = vadd.xlane.f32.xlu1 %v3175_v30 }
0x1581   :  { %v3172_v51 = vpop.permute.xlu1 %3171 }
0x1582   :  { %v3178_v8 = vsel %vm174_vm3, %v3172_v51, 0.0 }
0x1583   :  { %3103 = vadd.xlane.f32.xlu0 %v3102_v31  ;;  %2494 = vadd.xlane.f32.xlu1 %v2493_v63 }
0x1587   :  { %3141 = vadd.xlane.f32.xlu0 %v3140_v22 }
0x158b   :  { %3179 = vadd.xlane.f32.xlu0 %v3178_v8 }
0x158f   :  { %2497 = vadd.xlane.f32.xlu0 %v2496_v46 }
0x15b3   :  { %v2909_v38 = vpop.xlane.xlu0 %2908 }
0x15b4   :  { %8111 = vrcp.f32 %v2909_v38 }
0x15be   :  { %v8112_v51 = vpop.eup %8111 }
0x15bf   :  { %v2915_v19 = vmul.f32 %v8112_v51, %v9830_v37 }
0x15c0   :  { %v2912_v24 = vpop.xlane.xlu1 %2911 }
0x15c1   :  { %8113 = vrcp.f32 %v2912_v24 }
0x15cb   :  { %v8114_v46 = vpop.eup %8113 }
0x15f4   :  { %v2949_v39 = vpop.xlane.xlu0 %2948 }
0x15f5   :  { %8115 = vrcp.f32 %v2949_v39 }
0x15f8   :  { %v2987_v61 = vpop.xlane.xlu1 %2986 }
0x15f9   :  { %8117 = vrcp.f32 %v2987_v61 }
0x15fc   :  { %v3025_v33 = vpop.xlane.xlu1 %3024 }
0x15fd   :  { %8119 = vrcp.f32 %v3025_v33 }
0x15ff   :  { %v8116_v24 = vpop.eup %8115 }
0x1600   :  { %v3063_v52 = vpop.xlane.xlu1 %3062  ;;  %v2952_v2 = vpop.xlane.xlu0 %2951 }
0x1601   :  { %8121 = vrcp.f32 %v3063_v52 }
0x1602   :  { %8123 = vrcp.f32 %v2952_v2 }
0x1603   :  { %v8118_v61 = vpop.eup %8117 }
0x1604   :  { %v3101_v14 = vpop.xlane.xlu1 %3100  ;;  %v2990_v30 = vpop.xlane.xlu0 %2989 }
0x1605   :  { %8125 = vrcp.f32 %v3101_v14 }
0x1606   :  { %8127 = vrcp.f32 %v2990_v30 }
0x1607   :  { %v8120_v33 = vpop.eup %8119 }
0x1608   :  { %v3139_v13 = vpop.xlane.xlu1 %3138  ;;  %v3028_v31 = vpop.xlane.xlu0 %3027 }
0x1609   :  { %8129 = vrcp.f32 %v3139_v13 }
0x160a   :  { %8131 = vrcp.f32 %v3028_v31 }
0x160b   :  { %v8122_v2 = vpop.eup %8121 }
0x160c   :  { %v3177_v44 = vpop.xlane.xlu1 %3176  ;;  %v3066_v63 = vpop.xlane.xlu0 %3065 }
0x160d   :  { %8133 = vrcp.f32 %v3066_v63  ;;  %v8124_v14 = vpop.eup %8123 }
0x160f   :  { %v8126_v13 = vpop.eup %8125 }
0x1610   :  { %v3104_v21 = vpop.xlane.xlu0 %3103  ;;  %v2495_v22 = vpop.xlane.xlu1 %2494 }
0x1611   :  { %v2499_v8 = vmul.f32 0.015625, %v2495_v22  ;;  %8135 = vrcp.f32 %v3104_v21  ;;  %v8128_v63 = vpop.eup %8127  ;;  %v2955_v22 = vmul.f32 %v8116_v24, %v9768_v25 }
0x1612   :  { %8137 = vrcp.f32 %v3177_v44 }
0x1613   :  { %v9861_v38 = vsub.f32 %v2489_v42, %v2499_v8  ;;  %v8130_v21 = vpop.eup %8129  ;;  %v2993_v8 = vmul.f32 %v8118_v61, %v9778_v0  ;;  %v3185_v24 = vsel %vm174_vm3, %v2915_v19, %v2955_v22  ;;  %v3069_v0 = vmul.f32 %v8122_v2, %v9776_v55 }
0x1614   :  { %v3142_v39 = vpop.xlane.xlu0 %3141  ;;  %v8132_v42 = vpop.eup %8131 }
0x1615   :  { %8139 = vrcp.f32 %v3142_v39  ;;  %v2503_v52 = vmul.f32 %v9861_v38, %v9861_v38  ;;  %v2956_v39 = vmul.f32 %v8124_v14, %v9797_v26  ;;  %v3032_v18 = vmul.f32 %v8132_v42, %v9795_v15  ;;  %v7791_v14 = vld [vmem:[#allocation7 + $0x3c] ss:$136 sps:$4 sm:$0xff]  }
0x1616   :  { %v3187_v37 = vsel %vm927_vm14, %v3185_v24, %v2993_v8  ;;  %v3145_v15 = vmul.f32 %v8130_v21, %v9806_v56 }
0x1617   :  { %v2505_v30 = vsel %vm360_vm6, %v2503_v52, 0.0  ;;  %v8134_v44 = vpop.eup %8133  ;;  %v2994_v52 = vmul.f32 %v8128_v63, %v9788_v11  ;;  %v3107_v11 = vmul.f32 %v8126_v13, %v9786_v41  ;;  %v7793_v13 = vld [vmem:[#allocation7 + $0x25c] ss:$136 sps:$4 sm:$0xff]   ;;  %v7794_v63 = vld [vmem:[#allocation7 + $0x36c] ss:$136 sps:$4 sm:$0xff]  }
0x1618   :  { %v3180_v31 = vpop.xlane.xlu0 %3179  ;;  %2506 = vadd.xlane.f32.xlu1 %v2505_v30  ;;  %v2916_v30 = vmul.f32 %v8114_v46, %v9834_v35  ;;  %v3070_v26 = vmul.f32 %v8134_v44, %v9804_v53 }
0x1619   :  { %8141 = vrcp.f32 %v3180_v31  ;;  %v3031_v31 = vmul.f32 %v8120_v33, %v9766_v4 }
0x161b   :  { %v8136_v12 = vpop.eup %8135  ;;  %v3189_v55 = vsel %vm930_vm15, %v3187_v37, %v3031_v31 }
0x161c   :  { %v2498_v54 = vpop.xlane.xlu0 %2497  ;;  %v8138_v32 = vpop.eup %8137  ;;  %v3108_v35 = vmul.f32 %v8136_v12, %v9812_v28  ;;  %v3191_v41 = vsel %vm360_vm6, %v3189_v55, %v3069_v0 }
0x161d   :  { %v2500_v16 = vmul.f32 0.015625, %v2498_v54  ;;  %v3186_v54 = vsel %vm174_vm3, %v2916_v30, %v2956_v39  ;;  %v3193_v56 = vsel %vm935_vm1, %v3191_v41, %v3107_v11  ;;  %v6782_v30 = vld [vmem:[#allocation12 + $0x14] ss:$0 sm:$0xff] }
0x161e   :  { %v3188_v4 = vsel %vm927_vm14, %v3186_v54, %v2994_v52  ;;  %v3195_v33 = vsel %vm938_vm2, %v3193_v56, %v3145_v15 }
0x161f   :  { %v8140_v25 = vpop.eup %8139  ;;  %v2502_v61 = vsub.f32 %v9857_v47, %v2500_v16  ;;  %v3190_v53 = vsel %vm930_vm15, %v3188_v4, %v3032_v18  ;;  %v3183_v16 = vmul.f32 %v8138_v32, %v9814_v36 }
0x1620   :  { %v3146_v19 = vmul.f32 %v8140_v25, %v9820_v60  ;;  %v3192_v12 = vsel %vm360_vm6, %v3190_v53, %v3070_v26  ;;  %v6783_v25 = vld [vmem:[#allocation12 + $0x15] ss:$0 sm:$0xff] }
0x1621   :  { %v2504_v51 = vmul.f32 %v2502_v61, %v2502_v61  ;;  %v3194_v60 = vsel %vm935_vm1, %v3192_v12, %v3108_v35  ;;  %v3197_v32 = vsel %vm941_vm4, %v3195_v33, %v3183_v16 }
0x1622   :  { %v3196_v18 = vsel %vm938_vm2, %v3194_v60, %v3146_v19 }
0x1623   :  { %v8142_v47 = vpop.eup %8141  ;;  %v2508_v46 = vsel %vm360_vm6, %v2504_v51, 0.0 }
0x1624   :  { %v3184_v28 = vmul.f32 %v8142_v47, %v9824_v57  ;;  %2509 = vadd.xlane.f32.xlu0 %v2508_v46  ;;  %v7792_v57 = vld [vmem:[#allocation7 + $0x14c] ss:$136 sps:$4 sm:$0xff]   ;;  %v6804_v46 = vld [vmem:[#allocation12 + $0x19] ss:$0 sm:$0xff] }
0x1626   :  { %v3198_v36 = vsel %vm941_vm4, %v3196_v18, %v3184_v28 }
0x1627   :  { %v3199_v2 = vpack.c.bf16 %v3198_v36, %v3197_v32 }
0x1629   :  { %7445 = vmatmul.mubr.bf16.vlgmr.msra.gmra.mrb[44].mxu1 %v3199_v2 }
0x162a   :  { %7456 = vmatprep.mubr.msk.bf16.mxu1 %vm8556_vm0, %v11061_v17  ;;  %7449 = vmatpush3.bf16.msra.mxu1 %v7791_v14 }
0x162b   :  { %7450 = vmatprep.subr.bf16.mxu1 %v11061_v17 }
0x162e   :  { %7451 = vmatpush3.bf16.msra.mxu1 %v7792_v57 }
0x162f   :  { %7452 = vmatprep.subr.bf16.mxu1 %v11061_v17 }
0x1632   :  { %7453 = vmatpush3.bf16.msra.mxu1 %v7793_v13 }
0x1633   :  { %7454 = vmatprep.subr.bf16.mxu1 %v11061_v17 }
0x1636   :  { %7455 = vmatpush3.bf16.msra.mxu1 %v7794_v63 }
0x1637   :  { %7460 = vmatprep.subr.bf16.mxu1 %v11061_v17 }
0x16a5   :  { %v2507_v21 = vpop.xlane.xlu1 %2506 }
0x16a6   :  { %v2511_v42 = vmul.f32 0.015625, %v2507_v21 }
0x16a8   :  { %v2513_v22 = vadd.f32 1e-05, %v2511_v42 }
0x16aa   :  { %8143 = vrsqrt.f32 %v2513_v22  ;;  %v7797_v22 = vld [vmem:[#allocation7 + $0x48] ss:$136 sps:$4 sm:$0xff]  }
0x16ab   :  { %3507 = vmatprep.subr.bf16.mxu0 %v7797_v22 }
0x16b1   :  { %v2510_v44 = vpop.xlane.xlu0 %2509 }
0x16b2   :  { %v2512_v8 = vmul.f32 0.015625, %v2510_v44  ;;  %v7798_v44 = vld [vmem:[#allocation7 + $0x154] ss:$136 sps:$4 sm:$0xff]  }
0x16b4   :  { %v8144_v39 = vpop.eup %8143  ;;  %v2514_v52 = vadd.f32 1e-05, %v2512_v8  ;;  %v7803_v8 = vld [vmem:[#allocation7 + $0x268] ss:$136 sps:$4 sm:$0xff]  }
0x16b5   :  { %v2517_v31 = vmul.f32 %v8144_v39, %v9861_v38  ;;  %v7801_v39 = vld [vmem:[#allocation7 + $0x264] ss:$136 sps:$4 sm:$0xff]  }
0x16b6   :  { %8145 = vrsqrt.f32 %v2514_v52  ;;  %v7806_v52 = vld [vmem:[#allocation7 + $0x378] ss:$136 sps:$4 sm:$0xff]  }
0x16b7   :  { %v2525_v24 = vmul.f32 %v6782_v30, %v2517_v31 }
0x16b9   :  { %v2533_v0 = vadd.f32 %v6783_v25, %v2525_v24 }
0x16bb   :  { %v2537_v26 = vsel %vm360_vm6, %v2533_v0, 0.0 }
0x16bc   :  { %2538 = vadd.xlane.f32.xlu1 %v2537_v26 }
0x16c0   :  { %v8146_v37 = vpop.eup %8145 }
0x16c1   :  { %v2518_v54 = vmul.f32 %v8146_v37, %v2502_v61 }
0x16c3   :  { %v2526_v11 = vmul.f32 %v6782_v30, %v2518_v54  ;;  %v7804_v30 = vld [vmem:[#allocation7 + $0x374] ss:$136 sps:$4 sm:$0xff]  }
0x16c5   :  { %v2534_v35 = vadd.f32 %v6783_v25, %v2526_v11 }
0x16c7   :  { %v2540_v4 = vsel %vm360_vm6, %v2534_v35, 0.0 }
0x16c8   :  { %2541 = vadd.xlane.f32.xlu0 %v2540_v4 }
0x16fc   :  { %v3234_v15 = vpop.f32.mrb[44].mxu1 }
0x16fd   :  { %v7446_v19 = vpop.f32.mrb[45].mxu1 }
0x16fe   :  { %v3237_v51 = vpop.f32.mrb[46].mxu1 }
0x16ff   :  { %v3249_v55 = vpack.c.bf16 %v3237_v51, %v3234_v15  ;;  %v7447_v53 = vpop.f32.mrb[47].mxu1 }
0x1701   :  { %7457 = vmatmul.mubr.msk.bf16.vlgmr.msra.gmra.mrb[48].mxu1 %vm360_vm6, %v3249_v55 }
0x1702   :  { %7468 = vmatprep.mubr.msk.bf16.mxu1 %vm8556_vm0, %v11061_v17 }
0x1749   :  { %v2539_v38 = vpop.xlane.xlu1 %2538 }
0x174a   :  { %v2543_v47 = vmul.f32 0.015625, %v2539_v38 }
0x174c   :  { %v2545_v12 = vsub.f32 %v2533_v0, %v2543_v47  ;;  %v6784_v47 = vld [vmem:[#allocation12 + $0x38] ss:$0 sm:$0xff] }
0x174e   :  { %v2547_v57 = vmul.f32 %v2545_v12, %v2545_v12 }
0x1750   :  { %v2549_v21 = vsel %vm360_vm6, %v2547_v57, 0.0 }
0x1755   :  { %v2542_v16 = vpop.xlane.xlu0 %2541 }
0x1756   :  { %v2544_v61 = vmul.f32 0.015625, %v2542_v16 }
0x1758   :  { %v2546_v33 = vsub.f32 %v2534_v35, %v2544_v61 }
0x175a   :  { %v2548_v63 = vmul.f32 %v2546_v33, %v2546_v33 }
0x175c   :  { %v2552_v42 = vsel %vm360_vm6, %v2548_v63, 0.0 }
0x17d4   :  { %v3318_v41 = vpop.f32.mrb[48].mxu1 }
0x17d5   :  { %v3319_v28 = vadd.f32 %v6804_v46, %v3318_v41  ;;  %v7458_v56 = vpop.f32.mrb[49].mxu1 }
0x17d6   :  { %v3321_v60 = vpop.f32.mrb[50].mxu1  ;;  %v6785_v56 = vld [vmem:[#allocation12 + $0x39] ss:$0 sm:$0xff] }
0x17d7   :  { %v3325_v18 = vadd.f32 %v3319_v28, %v9497_v23  ;;  %v3322_v32 = vadd.f32 %v6804_v46, %v3321_v60  ;;  %v7459_v36 = vpop.f32.mrb[51].mxu1  ;;  %v7795_v23 = vld [vmem:[#allocation7 + $0x44] ss:$136 sps:$4 sm:$0xff]  }
0x17d8   :  { %3508 = vmatpush1.bf16.msra.mxu0 %v7795_v23 }
0x17d9   :  { %v3326_v2 = vadd.f32 %v3322_v32, %v9500_v29  ;;  %v3329_v14 = vsel %vm360_vm6, %v3325_v18, 0.0  ;;  %v7800_v29 = vld [vmem:[#allocation7 + $0x158] ss:$136 sps:$4 sm:$0xff]  }
0x17da   :  { %3330 = vadd.xlane.f32.xlu1 %v3329_v14  ;;  %3509 = vmatprep.subr.bf16.mxu0 %v7800_v29  ;;  %v7809_v14 = vld [vmem:[#allocation7 + $0x260] ss:$136 sps:$4 sm:$0xff]  }
0x17db   :  { %v3332_v13 = vsel %vm360_vm6, %v3326_v2, 0.0 }
0x17dc   :  { %3333 = vadd.xlane.f32.xlu0 %v3332_v13  ;;  %3510 = vmatpush1.bf16.msra.mxu0 %v7798_v44  ;;  %v6810_v44 = vld [vmem:[#allocation12 + $0x1a] ss:$0 sm:$0xff] }
0x17dd   :  { %3511 = vmatprep.subr.bf16.mxu0 %v7803_v8 }
0x17de   :  { %2550 = vadd.xlane.f32.xlu1 %v2549_v21 }
0x17e0   :  { %2553 = vadd.xlane.f32.xlu0 %v2552_v42  ;;  %3512 = vmatpush1.bf16.msra.mxu0 %v7801_v39 }
0x17e1   :  { %3513 = vmatprep.subr.bf16.mxu0 %v7806_v52 }
0x17e4   :  { %3514 = vmatpush1.bf16.msra.mxu0 %v7804_v30  ;;  %v6811_v30 = vld [vmem:[#allocation12 + $0x1b] ss:$0 sm:$0xff] }
0x17e5   :  { %7492 = vmatprep.subr.bf16.mxu0 %v11061_v17 }
0x1867   :  { %v3331_v31 = vpop.xlane.xlu1 %3330 }
0x1868   :  { %v3335_v25 = vmul.f32 0.015625, %v3331_v31 }
0x1869   :  { %v3334_v24 = vpop.xlane.xlu0 %3333 }
0x186a   :  { %v3337_v0 = vsub.f32 %v3325_v18, %v3335_v25  ;;  %v3336_v26 = vmul.f32 0.015625, %v3334_v24 }
0x186b   :  { %v2551_v37 = vpop.xlane.xlu1 %2550 }
0x186c   :  { %v3338_v54 = vsub.f32 %v3326_v2, %v3336_v26  ;;  %v2555_v11 = vmul.f32 0.015625, %v2551_v37  ;;  %v3339_v35 = vmul.f32 %v3337_v0, %v3337_v0  ;;  %v7807_v2 = vld [vmem:[#allocation7 + $0x40] ss:$136 sps:$4 sm:$0xff]   ;;  %v6827_v37 = vld [vmem:[#allocation12 + $0x1d] ss:$0 sm:$0xff] }
0x186d   :  { %v2554_v4 = vpop.xlane.xlu0 %2553  ;;  %7461 = vmatpush3.bf16.msra.mxu1 %v7807_v2 }
0x186e   :  { %v2557_v15 = vadd.f32 1e-05, %v2555_v11  ;;  %v2556_v19 = vmul.f32 0.015625, %v2554_v4  ;;  %v3341_v51 = vsel %vm360_vm6, %v3339_v35, 0.0  ;;  %v3340_v55 = vmul.f32 %v3338_v54, %v3338_v54  ;;  %7462 = vmatprep.subr.bf16.mxu1 %v11061_v17  ;;  %v6828_v11 = vld [vmem:[#allocation12 + $0x1e] ss:$0 sm:$0xff] }
0x186f   :  { %3342 = vadd.xlane.f32.xlu1 %v3341_v51 }
0x1870   :  { %8147 = vrsqrt.f32 %v2557_v15  ;;  %v2558_v53 = vadd.f32 1e-05, %v2556_v19  ;;  %v3344_v38 = vsel %vm360_vm6, %v3340_v55, 0.0 }
0x1871   :  { %3345 = vadd.xlane.f32.xlu0 %v3344_v38 }
0x1872   :  { %8149 = vrsqrt.f32 %v2558_v53 }
0x187a   :  { %v8148_v16 = vpop.eup %8147 }
0x187b   :  { %v2561_v46 = vmul.f32 %v8148_v16, %v2545_v12  ;;  %v7808_v12 = vld [vmem:[#allocation7 + $0x150] ss:$136 sps:$4 sm:$0xff]  }
0x187c   :  { %v8150_v61 = vpop.eup %8149  ;;  %7463 = vmatpush3.bf16.msra.mxu1 %v7808_v12 }
0x187d   :  { %v2569_v41 = vmul.f32 %v6784_v47, %v2561_v46  ;;  %v2562_v28 = vmul.f32 %v8150_v61, %v2546_v33  ;;  %7464 = vmatprep.subr.bf16.mxu1 %v11061_v17  ;;  %v7810_v33 = vld [vmem:[#allocation7 + $0x370] ss:$136 sps:$4 sm:$0xff]  }
0x187f   :  { %v2570_v60 = vmul.f32 %v6784_v47, %v2562_v28  ;;  %v2577_v18 = vadd.f32 %v6785_v56, %v2569_v41 }
0x1880   :  { %7465 = vmatpush3.bf16.msra.mxu1 %v7809_v14 }
0x1881   :  { %v2578_v32 = vadd.f32 %v6785_v56, %v2570_v60  ;;  %7466 = vmatprep.subr.bf16.mxu1 %v11061_v17 }
0x1883   :  { %v9919_v36 = vpack.c.bf16 %v2578_v32, %v2577_v18 }
0x1884   :  { %7467 = vmatpush3.bf16.msra.mxu1 %v7810_v33 }
0x1885   :  { %6826 = vmatmul.mubr.msk.bf16.vlgmr.msra.gmra.mrb[32].mxu0 %vm360_vm6, %v9919_v36  ;;  %7472 = vmatprep.subr.bf16.mxu1 %v11061_v17 }
0x1886   :  { %7508 = vmatprep.mubr.msk.bf16.mxu0 %vm8556_vm0, %v11061_v17 }
0x18fc   :  { %v3343_v57 = vpop.xlane.xlu1 %3342 }
0x18fd   :  { %v3347_v13 = vmul.f32 0.015625, %v3343_v57 }
0x18fe   :  { %v3346_v63 = vpop.xlane.xlu0 %3345 }
0x18ff   :  { %v3349_v21 = vadd.f32 1e-05, %v3347_v13  ;;  %v3348_v42 = vmul.f32 0.015625, %v3346_v63 }
0x1901   :  { %8151 = vrsqrt.f32 %v3349_v21  ;;  %v3350_v22 = vadd.f32 1e-05, %v3348_v42 }
0x1903   :  { %8153 = vrsqrt.f32 %v3350_v22 }
0x190b   :  { %v8152_v23 = vpop.eup %8151 }
0x190c   :  { %v3353_v29 = vmul.f32 %v8152_v23, %v3337_v0 }
0x190d   :  { %v8154_v8 = vpop.eup %8153 }
0x190e   :  { %v3361_v39 = vmul.f32 %v6810_v44, %v3353_v29  ;;  %v3354_v52 = vmul.f32 %v8154_v8, %v3338_v54 }
0x1910   :  { %v3362_v31 = vmul.f32 %v6810_v44, %v3354_v52  ;;  %v9929_v25 = vadd.f32 %v6811_v30, %v3361_v39 }
0x1912   :  { %v9931_v24 = vadd.f32 %v6811_v30, %v3362_v31 }
0x1914   :  { %v3379_v26 = vpack.c.bf16 %v9931_v24, %v9929_v25 }
0x1916   :  { %7469 = vmatmul.mubr.msk.bf16.vlgmr.msra.gmra.mrb[52].mxu1 %vm360_vm6, %v3379_v26 }
0x1917   :  { %7488 = vmatprep.mubr.msk.bf16.mxu1 %vm8556_vm0, %v11061_v17 }
0x1958   :  { %v3541_v0 = vpop.f32.mrb[32].mxu0 }
0x1959   :  { %v3557_v35 = vadd.f32 %v6827_v37, %v3541_v0  ;;  %v3543_v4 = vpop.f32.mrb[33].mxu0 }
0x195a   :  { %v3566_v54 = vadd.f32 %v6828_v11, %v3543_v4  ;;  %v3545_v15 = vpop.f32.mrb[34].mxu0 }
0x195b   :  { %v3558_v19 = vadd.f32 %v6827_v37, %v3545_v15  ;;  %v3547_v51 = vpop.f32.mrb[35].mxu0  ;;  %v3568_v55 = vmul.f32 %v3557_v35, %v8835_v58  ;;  %v3570_v53 = vmul.f32 %v3557_v35, %v8838_v59  ;;  %v9941_v38 = vmul.f32 %v3557_v35, %v8840_v62 }
0x195c   :  { %v3567_v16 = vadd.f32 %v6828_v11, %v3547_v51  ;;  %v3592_v47 = vmul.f32 %v3566_v54, %v8835_v58  ;;  %v3594_v46 = vmul.f32 %v3566_v54, %v8838_v59  ;;  %v3596_v61 = vmul.f32 %v3566_v54, %v8840_v62 }
0x195d   :  { %v3569_v41 = vmul.f32 %v3558_v19, %v8835_v58  ;;  %v3571_v28 = vmul.f32 %v3558_v19, %v8838_v59  ;;  %v3598_v56 = vmul.f32 %v3566_v54, %v8842_v3  ;;  %v3573_v60 = vmul.f32 %v3558_v19, %v8840_v62 }
0x195e   :  { %v3593_v18 = vmul.f32 %v3567_v16, %v8835_v58  ;;  %v3595_v32 = vmul.f32 %v3567_v16, %v8838_v59  ;;  %v3597_v2 = vmul.f32 %v3567_v16, %v8840_v62  ;;  %v3599_v12 = vmul.f32 %v3567_v16, %v8842_v3 }
0x195f   :  { %v3584_v14 = vpack.c.bf16 %v3569_v41, %v3568_v55  ;;  %v3585_v33 = vpack.c.bf16 %v3571_v28, %v3570_v53  ;;  %v3586_v57 = vpack.c.bf16 %v3573_v60, %v9941_v38  ;;  %v3600_v23 = vmul.f32 %v3566_v54, %v11070_v50 }
0x1960   :  { %v3608_v13 = vpack.c.bf16 %v3593_v18, %v3592_v47  ;;  %v3609_v63 = vpack.c.bf16 %v3595_v32, %v3594_v46  ;;  %v3610_v21 = vpack.c.bf16 %v3597_v2, %v3596_v61  ;;  %v3611_v42 = vpack.c.bf16 %v3599_v12, %v3598_v56  ;;  %v9981_v32 = vld [vmem:[#allocation6] sm:$0xff]  ;;  %v9983_v2 = vld [vmem:[#allocation6 + $0x8] sm:$0xff] }
0x1961   :  { %v3621_v22 = vsel %vm360_vm6, %v3584_v14, 0  ;;  %v3601_v44 = vmul.f32 %v3567_v16, %v11070_v50  ;;  %v3602_v29 = vmul.f32 %v3566_v54, %v8846_v5  ;;  %v3603_v8 = vmul.f32 %v3567_v16, %v8846_v5  ;;  %3713 = vrot.lane.b32.xlu1 %v9981_v32, %s8552_s15  ;;  %3715 = vrot.lane.b32.xlu0 %v9983_v2, %s8552_s15 }
0x1962   :  { %7473 = vmatpush3.bf16.xpose.msra.mxu1 %v3621_v22  ;;  %7493 = vmatpush3.bf16.msra.mxu0 %v3608_v13  ;;  %v3574_v39 = vmul.f32 %v3557_v35, %v8842_v3  ;;  %v3575_v30 = vmul.f32 %v3558_v19, %v8842_v3  ;;  %v3604_v31 = vmul.f32 %v3566_v54, %v8848_v9  ;;  %v3624_v56 = vsel %vm360_vm6, %v3585_v33, 0  ;;  %v6812_v13 = vld [vmem:[#allocation12 + $0x1c] ss:$0 sm:$0xff] }
0x1963   :  { %7494 = vmatprep.subr.bf16.mxu0 %v11061_v17  ;;  %7474 = vmatprep.subr.bf16.mxu1 %v11061_v17  ;;  %v3612_v52 = vpack.c.bf16 %v3601_v44, %v3600_v23  ;;  %v3613_v26 = vpack.c.bf16 %v3603_v8, %v3602_v29  ;;  %v3605_v37 = vmul.f32 %v3567_v16, %v8848_v9 }
0x1964   :  { %v3606_v11 = vmul.f32 %v3566_v54, %v8850_v10  ;;  %v3607_v0 = vmul.f32 %v3567_v16, %v8850_v10  ;;  %v3587_v4 = vpack.c.bf16 %v3575_v30, %v3574_v39  ;;  %v3576_v15 = vmul.f32 %v3557_v35, %v11070_v50 }
0x1965   :  { %v3577_v51 = vmul.f32 %v3558_v19, %v11070_v50  ;;  %v3614_v55 = vpack.c.bf16 %v3605_v37, %v3604_v31  ;;  %v3578_v38 = vmul.f32 %v3557_v35, %v8846_v5  ;;  %v3579_v47 = vmul.f32 %v3558_v19, %v8846_v5  ;;  %3751 = vrot.lane.b32.xlu1 %v9981_v32, %s8557_s29 }
0x1966   :  { %7495 = vmatpush3.bf16.msra.mxu0 %v3609_v63  ;;  %v3615_v53 = vpack.c.bf16 %v3607_v0, %v3606_v11  ;;  %v3580_v61 = vmul.f32 %v3557_v35, %v8848_v9  ;;  %v3581_v54 = vmul.f32 %v3558_v19, %v8848_v9  ;;  %v3582_v41 = vmul.f32 %v3557_v35, %v8850_v10 }
0x1967   :  { %7496 = vmatprep.subr.bf16.mxu0 %v11061_v17  ;;  %v3588_v46 = vpack.c.bf16 %v3577_v51, %v3576_v15  ;;  %v3589_v16 = vpack.c.bf16 %v3579_v47, %v3578_v38  ;;  %v3583_v28 = vmul.f32 %v3558_v19, %v8850_v10  ;;  %v3627_v35 = vsel %vm360_vm6, %v3586_v57, 0  ;;  %3789 = vrot.lane.b32.xlu0 %v9981_v32, %s8558_s13 }
0x1968   :  { %v3590_v60 = vpack.c.bf16 %v3581_v54, %v3580_v61  ;;  %v3630_v19 = vsel %vm360_vm6, %v3587_v4, 0 }
0x1969   :  { %v3591_v18 = vpack.c.bf16 %v3583_v28, %v3582_v41  ;;  %3753 = vrot.lane.b32.xlu1 %v9983_v2, %s8557_s29  ;;  %v3633_v12 = vsel %vm360_vm6, %v3588_v46, 0  ;;  %v3636_v14 = vsel %vm360_vm6, %v3589_v16, 0 }
0x196a   :  { %7475 = vmatpush3.bf16.xpose.msra.mxu1 %v3624_v56  ;;  %7497 = vmatpush3.bf16.msra.mxu0 %v3610_v21  ;;  %v3639_v33 = vsel %vm360_vm6, %v3590_v60, 0 }
0x196b   :  { %7498 = vmatprep.subr.bf16.mxu0 %v11061_v17  ;;  %7476 = vmatprep.subr.bf16.mxu1 %v11061_v17  ;;  %v3642_v57 = vsel %vm360_vm6, %v3591_v18, 0 }
0x196c   :  { %3827 = vrot.lane.b32.xlu0 %v9981_v32, %s8546_s8 }
0x196d   :  { %3791 = vrot.lane.b32.xlu1 %v9983_v2, %s8558_s13 }
0x196e   :  { %7499 = vmatpush3.bf16.msra.mxu0 %v3611_v42 }
0x196f   :  { %7500 = vmatprep.subr.bf16.mxu0 %v11061_v17 }
0x1970   :  { %3865 = vrot.lane.b32.xlu0 %v9981_v32, %s8559_s17 }
0x1971   :  { %3829 = vrot.lane.b32.xlu1 %v9983_v2, %s8546_s8 }
0x1972   :  { %7477 = vmatpush3.bf16.xpose.msra.mxu1 %v3627_v35  ;;  %7501 = vmatpush3.bf16.msra.mxu0 %v3612_v52 }
0x1973   :  { %7502 = vmatprep.subr.bf16.mxu0 %v11061_v17  ;;  %7478 = vmatprep.subr.bf16.mxu1 %v11061_v17 }
0x1974   :  { %3903 = vrot.lane.b32.xlu0 %v9981_v32, %s8560_s4 }
0x1975   :  { %3867 = vrot.lane.b32.xlu1 %v9983_v2, %s8559_s17 }
0x1976   :  { %7503 = vmatpush3.bf16.msra.mxu0 %v3613_v26 }
0x1977   :  { %7504 = vmatprep.subr.bf16.mxu0 %v11061_v17 }
0x1978   :  { %3941 = vrot.lane.b32.xlu0 %v9981_v32, %s8561_s22 }
0x1979   :  { %3905 = vrot.lane.b32.xlu1 %v9983_v2, %s8560_s4 }
0x197a   :  { %7479 = vmatpush3.bf16.xpose.msra.mxu1 %v3630_v19  ;;  %7505 = vmatpush3.bf16.msra.mxu0 %v3614_v55 }
0x197b   :  { %7506 = vmatprep.subr.bf16.mxu0 %v11061_v17  ;;  %7480 = vmatprep.subr.bf16.mxu1 %v11061_v17 }
0x197d   :  { %3943 = vrot.lane.b32.xlu1 %v9983_v2, %s8561_s22 }
0x197e   :  { %7507 = vmatpush3.bf16.msra.mxu0 %v3615_v53 }
0x197f   :  { %7512 = vmatprep.subr.bf16.mxu0 %v11061_v17 }
0x1982   :  { %7481 = vmatpush3.bf16.xpose.msra.mxu1 %v3633_v12 }
0x1983   :  { %7482 = vmatprep.subr.bf16.mxu1 %v11061_v17 }
0x198a   :  { %7483 = vmatpush3.bf16.xpose.msra.mxu1 %v3636_v14 }
0x198b   :  { %7484 = vmatprep.subr.bf16.mxu1 %v11061_v17 }
0x1992   :  { %7485 = vmatpush3.bf16.xpose.msra.mxu1 %v3639_v33 }
0x1993   :  { %7486 = vmatprep.subr.bf16.mxu1 %v11061_v17 }
0x199a   :  { %7487 = vmatpush3.bf16.xpose.msra.mxu1 %v3642_v57 }
0x19d3   :  { %v10029_v8 = vpop.permute.xlu1 %3713  ;;  %v10031_v39 = vpop.permute.xlu0 %3715 }
0x19d4   :  { %11077 = vst [vmem:[#allocation24_spill] sm:$0xff] %v10031_v39 }
0x19d7   :  { %v10033_v52 = vpop.permute.xlu1 %3751 }
0x19d8   :  { %11078 = vst [vmem:[#allocation25_spill] sm:$0xff] %v10033_v52 }
0x19d9   :  { %v10035_v30 = vpop.permute.xlu0 %3789 }
0x19da   :  { %11079 = vst [vmem:[#allocation26_spill] sm:$0xff] %v10035_v30 }
0x19db   :  { %v10037_v31 = vpop.permute.xlu1 %3753 }
0x19dc   :  { %11080 = vst [vmem:[#allocation27_spill] sm:$0xff] %v10037_v31 }
0x19de   :  { %v10039_v26 = vpop.permute.xlu0 %3827 }
0x19df   :  { %11081 = vst [vmem:[#allocation28_spill] sm:$0xff] %v10039_v26  ;;  %v10041_v4 = vpop.permute.xlu1 %3791 }
0x19e0   :  { %11082 = vst [vmem:[#allocation29_spill] sm:$0xff] %v10041_v4 }
0x19e2   :  { %v10051_v16 = vpop.permute.xlu0 %3865 }
0x19e3   :  { %11083 = vst [vmem:[#allocation30_spill] sm:$0xff] %v10051_v16  ;;  %v10053_v41 = vpop.permute.xlu1 %3829 }
0x19e4   :  { %11084 = vst [vmem:[#allocation31_spill] sm:$0xff] %v10053_v41 }
0x19e6   :  { %v10062_v35 = vpop.permute.xlu0 %3903 }
0x19e7   :  { %11085 = vst [vmem:[#allocation32_spill] sm:$0xff] %v10062_v35  ;;  %v10073_v57 = vpop.permute.xlu1 %3867 }
0x19e8   :  { %11086 = vst [vmem:[#allocation33_spill] sm:$0xff] %v10073_v57 }
0x19e9   :  { %v3448_v63 = vpop.f32.mrb[52].mxu1 }
0x19ea   :  { %v7470_v21 = vpop.f32.mrb[53].mxu1  ;;  %v3449_v22 = vadd.f32 %v6812_v13, %v3448_v63 }
0x19eb   :  { %v3451_v42 = vpop.f32.mrb[54].mxu1 }
0x19ec   :  { %v3452_v23 = vadd.f32 %v6812_v13, %v3451_v42  ;;  %v7471_v44 = vpop.f32.mrb[55].mxu1 }
0x19ee   :  { %v3616_v29 = vpack.c.bf16 %v3452_v23, %v3449_v22  ;;  %v10085_v22 = vpop.permute.xlu0 %3941  ;;  %v10087_v23 = vpop.permute.xlu1 %3905 }
0x19ef   :  { %11087 = vst [vmem:[#allocation34_spill] sm:$0xff] %v10085_v22  ;;  %11088 = vst [vmem:[#allocation35_spill] sm:$0xff] %v10087_v23 }
0x19f0   :  { %7489 = vmatmul.mubr.msk.bf16.vlgmr.msra.gmra.mrb[56].mxu1 %vm360_vm6, %v3616_v29 }
0x1ac3   :  { %v3678_v37 = vpop.f32.mrb[56].mxu1 }
0x1ac4   :  { %v3685_v11 = vmul.f32 0.35355338, %v3678_v37  ;;  %v7490_v0 = vpop.f32.mrb[57].mxu1 }
0x1ac5   :  { %v3681_v15 = vpop.f32.mrb[58].mxu1 }
0x1ac6   :  { %v7491_v51 = vpop.f32.mrb[59].mxu1  ;;  %v3795_v55 = vadd.f32 %v10035_v30, %v3685_v11  ;;  %v3719_v53 = vadd.f32 %v10029_v8, %v3685_v11  ;;  %v3686_v38 = vmul.f32 0.35355338, %v3681_v15  ;;  %v10048_v61 = vadd.f32 %v10039_v26, %v3685_v11 }
0x1ac7   :  { %v3757_v54 = vadd.f32 %v10033_v52, %v3685_v11  ;;  %v10059_v60 = vadd.f32 %v10051_v16, %v3685_v11  ;;  %v10080_v21 = vadd.f32 %v10062_v35, %v3685_v11  ;;  %v10090_v44 = vadd.f32 %v10085_v22, %v3685_v11 }
0x1ac8   :  { %v3797_v47 = vsel %vm738_vm7, %v3795_v55, -inf  ;;  %v3721_v46 = vsel %vm660_vm8, %v3719_v53, -inf  ;;  %v3835_v28 = vsel %vm777_vm9, %v10048_v61, -inf  ;;  %v3758_v18 = vadd.f32 %v10037_v31, %v3686_v38 }
0x1ac9   :  { %3798 = vmax.xlane.f32.xlu1 %v3797_v47  ;;  %3722 = vmax.xlane.f32.xlu0 %v3721_v46  ;;  %v3759_v56 = vsel %vm699_vm10, %v3757_v54, -inf  ;;  %v3873_v19 = vsel %vm816_vm11, %v10059_v60, -inf  ;;  %v10068_v14 = vadd.f32 %v10031_v39, %v3686_v38  ;;  %v10071_v33 = vadd.f32 %v10041_v4, %v3686_v38 }
0x1aca   :  { %v3762_v12 = vsel %vm699_vm10, %v3758_v18, -inf  ;;  %v10083_v42 = vadd.f32 %v10053_v41, %v3686_v38  ;;  %v3911_v29 = vsel %vm855_vm12, %v10080_v21, -inf  ;;  %v10097_v0 = vadd.f32 %v10073_v57, %v3686_v38 }
0x1acb   :  { %v3724_v13 = vsel %vm660_vm8, %v10068_v14, -inf  ;;  %v3800_v63 = vsel %vm738_vm7, %v10071_v33, -inf  ;;  %v3949_v15 = vsel %vm894_vm13, %v10090_v44, -inf  ;;  %v10104_v47 = vadd.f32 %v3685_v11, %v9981_v32 }
0x1acc   :  { %v3838_v37 = vsel %vm777_vm9, %v10083_v42, -inf  ;;  %v3876_v51 = vsel %vm816_vm11, %v10097_v0, -inf  ;;  %v10107_v46 = vadd.f32 %v10087_v23, %v3686_v38  ;;  %v10121_v11 = vadd.f32 %v3686_v38, %v9983_v2 }
0x1acd   :  { %3836 = vmax.xlane.f32.xlu1 %v3835_v28  ;;  %3760 = vmax.xlane.f32.xlu0 %v3759_v56  ;;  %v10109_v28 = vpop.permute.xlu1 %3943 }
0x1ace   :  { %11089 = vst [vmem:[#allocation36_spill] sm:$0xff] %v10109_v28  ;;  %v10112_v56 = vadd.f32 %v10109_v28, %v3686_v38 }
0x1ad0   :  { %v3952_v32 = vsel %vm894_vm13, %v10112_v56, -inf }
0x1ad1   :  { %3874 = vmax.xlane.f32.xlu1 %v3873_v19  ;;  %3763 = vmax.xlane.f32.xlu0 %v3762_v12  ;;  %v3689_v19 = vsel %vm174_vm3, %v10104_v47, -inf  ;;  %v3914_v12 = vsel %vm855_vm12, %v10107_v46, -inf }
0x1ad5   :  { %3725 = vmax.xlane.f32.xlu1 %v3724_v13  ;;  %3801 = vmax.xlane.f32.xlu0 %v3800_v63  ;;  %v3692_v13 = vsel %vm174_vm3, %v10121_v11, -inf }
0x1ad9   :  { %3912 = vmax.xlane.f32.xlu1 %v3911_v29  ;;  %3839 = vmax.xlane.f32.xlu0 %v3838_v37 }
0x1add   :  { %3950 = vmax.xlane.f32.xlu1 %v3949_v15  ;;  %3877 = vmax.xlane.f32.xlu0 %v3876_v51 }
0x1ae1   :  { %3690 = vmax.xlane.f32.xlu1 %v3689_v19  ;;  %3915 = vmax.xlane.f32.xlu0 %v3914_v12 }
0x1ae5   :  { %3953 = vmax.xlane.f32.xlu0 %v3952_v32 }
0x1ae9   :  { %3693 = vmax.xlane.f32.xlu0 %v3692_v13 }
0x1b56   :  { %v3723_v63 = vpop.xlane.xlu0 %3722  ;;  %v3799_v29 = vpop.xlane.xlu1 %3798 }
0x1b57   :  { %v3727_v37 = vsub.f32 %v3719_v53, %v3723_v63  ;;  %v3803_v15 = vsub.f32 %v3795_v55, %v3799_v29 }
0x1b59   :  { %v3729_v51 = vmul.f32 1.442695, %v3727_v37  ;;  %v3805_v28 = vmul.f32 1.442695, %v3803_v15 }
0x1b5a   :  { %v3761_v22 = vpop.xlane.xlu0 %3760  ;;  %v3837_v19 = vpop.xlane.xlu1 %3836 }
0x1b5b   :  { %8155 = vpow2.f32 %v3729_v51  ;;  %v3765_v12 = vsub.f32 %v3757_v54, %v3761_v22  ;;  %v3841_v23 = vsub.f32 %v10048_v61, %v3837_v19 }
0x1b5c   :  { %8157 = vpow2.f32 %v3805_v28 }
0x1b5d   :  { %v3767_v2 = vmul.f32 1.442695, %v3765_v12  ;;  %v3843_v38 = vmul.f32 1.442695, %v3841_v23 }
0x1b5e   :  { %v3764_v32 = vpop.xlane.xlu0 %3763  ;;  %v3875_v35 = vpop.xlane.xlu1 %3874 }
0x1b5f   :  { %8159 = vpow2.f32 %v3767_v2  ;;  %v3766_v57 = vsub.f32 %v3758_v18, %v3764_v32  ;;  %v3879_v13 = vsub.f32 %v10059_v60, %v3875_v35 }
0x1b60   :  { %8161 = vpow2.f32 %v3843_v38 }
0x1b61   :  { %v3769_v53 = vmul.f32 1.442695, %v3766_v57  ;;  %v3881_v55 = vmul.f32 1.442695, %v3879_v13 }
0x1b62   :  { %v3802_v63 = vpop.xlane.xlu0 %3801  ;;  %v3726_v29 = vpop.xlane.xlu1 %3725 }
0x1b63   :  { %8163 = vpow2.f32 %v3769_v53  ;;  %v3804_v37 = vsub.f32 %v10071_v33, %v3802_v63  ;;  %v3728_v54 = vsub.f32 %v10068_v14, %v3726_v29 }
0x1b64   :  { %8165 = vpow2.f32 %v3881_v55 }
0x1b65   :  { %v10129_v61 = vpop.eup %8155  ;;  %v3807_v22 = vmul.f32 1.442695, %v3804_v37  ;;  %v3731_v23 = vmul.f32 1.442695, %v3728_v54 }
0x1b66   :  { %v10131_v28 = vpop.eup %8157  ;;  %3735 = vrot.lane.b32.xlu1 %v10129_v61, %s8561_s22  ;;  %v3840_v60 = vpop.xlane.xlu0 %3839 }
0x1b67   :  { %v3913_v18 = vpop.xlane.xlu1 %3912  ;;  %8167 = vpow2.f32 %v3807_v22  ;;  %v3842_v35 = vsub.f32 %v10083_v42, %v3840_v60  ;;  %3811 = vrot.lane.b32.xlu0 %v10131_v28, %s8559_s17 }
0x1b68   :  { %v3917_v14 = vsub.f32 %v10080_v21, %v3913_v18  ;;  %8169 = vpow2.f32 %v3731_v23 }
0x1b69   :  { %v10139_v33 = vpop.eup %8159  ;;  %v3845_v57 = vmul.f32 1.442695, %v3842_v35 }
0x1b6a   :  { %v3919_v15 = vmul.f32 1.442695, %v3917_v14  ;;  %v10141_v51 = vpop.eup %8161  ;;  %3773 = vrot.lane.b32.xlu1 %v10139_v33, %s8560_s4  ;;  %v3878_v19 = vpop.xlane.xlu0 %3877 }
0x1b6b   :  { %v3951_v12 = vpop.xlane.xlu1 %3950  ;;  %8171 = vpow2.f32 %v3845_v57  ;;  %v3880_v42 = vsub.f32 %v10097_v0, %v3878_v19  ;;  %3849 = vrot.lane.b32.xlu0 %v10141_v51, %s8546_s8 }
0x1b6c   :  { %v3955_v21 = vsub.f32 %v10090_v44, %v3951_v12  ;;  %8173 = vpow2.f32 %v3919_v15 }
0x1b6d   :  { %v10149_v2 = vpop.eup %8163  ;;  %v3883_v38 = vmul.f32 1.442695, %v3880_v42 }
0x1b6e   :  { %v3957_v32 = vmul.f32 1.442695, %v3955_v21  ;;  %v10151_v13 = vpop.eup %8165  ;;  %3775 = vrot.lane.b32.xlu1 %v10149_v2, %s8560_s4  ;;  %v3916_v53 = vpop.xlane.xlu0 %3915 }
0x1b6f   :  { %8175 = vpow2.f32 %v3883_v38  ;;  %v3918_v55 = vsub.f32 %v10107_v46, %v3916_v53  ;;  %3887 = vrot.lane.b32.xlu0 %v10151_v13, %s8558_s13  ;;  %v3691_v35 = vpop.xlane.xlu1 %3690 }
0x1b70   :  { %8177 = vpow2.f32 %v3957_v32  ;;  %v3695_v14 = vsub.f32 %v10104_v47, %v3691_v35 }
0x1b71   :  { %v10158_v0 = vpop.eup %8167  ;;  %v3921_v44 = vmul.f32 1.442695, %v3918_v55 }
0x1b72   :  { %v10160_v63 = vpop.eup %8169  ;;  %3813 = vrot.lane.b32.xlu1 %v10158_v0, %s8559_s17  ;;  %v3954_v29 = vpop.xlane.xlu0 %3953  ;;  %v3697_v57 = vmul.f32 1.442695, %v3695_v14 }
0x1b73   :  { %8179 = vpow2.f32 %v3921_v44  ;;  %v3956_v37 = vsub.f32 %v10112_v56, %v3954_v29  ;;  %3737 = vrot.lane.b32.xlu0 %v10160_v63, %s8561_s22 }
0x1b75   :  { %v10167_v46 = vpop.eup %8171  ;;  %v3959_v54 = vmul.f32 1.442695, %v3956_v37 }
0x1b76   :  { %v10169_v22 = vpop.eup %8173  ;;  %3851 = vrot.lane.b32.xlu1 %v10167_v46, %s8546_s8  ;;  %v3694_v15 = vpop.xlane.xlu0 %3693 }
0x1b77   :  { %8181 = vpow2.f32 %v3959_v54  ;;  %3925 = vrot.lane.b32.xlu0 %v10169_v22, %s8557_s29  ;;  %v3696_v19 = vsub.f32 %v10121_v11, %v3694_v15 }
0x1b78   :  { %8183 = vpow2.f32 %v3697_v57 }
0x1b79   :  { %v10175_v23 = vpop.eup %8175  ;;  %v3699_v12 = vmul.f32 1.442695, %v3696_v19 }
0x1b7a   :  { %v10177_v60 = vpop.eup %8177  ;;  %3889 = vrot.lane.b32.xlu1 %v10175_v23, %s8558_s13 }
0x1b7b   :  { %3963 = vrot.lane.b32.xlu0 %v10177_v60, %s8552_s15  ;;  %8185 = vpow2.f32 %v3699_v12 }
0x1b7d   :  { %v10183_v56 = vpop.eup %8179 }
0x1b7e   :  { %3927 = vrot.lane.b32.xlu1 %v10183_v56, %s8557_s29 }
0x1b81   :  { %v10187_v18 = vpop.eup %8181 }
0x1b82   :  { %3965 = vrot.lane.b32.xlu1 %v10187_v18, %s8552_s15  ;;  %v10193_v42 = vpop.eup %8183 }
0x1b83   :  { %v3701_v21 = vsel %vm174_vm3, %v10193_v42, 0.0 }
0x1b85   :  { %v10197_v38 = vpop.eup %8185 }
0x1b86   :  { %v3704_v32 = vsel %vm174_vm3, %v10197_v38, 0.0 }
0x1b9a   :  { %3702 = vadd.xlane.f32.xlu0 %v3701_v21 }
0x1ba6   :  { %3705 = vadd.xlane.f32.xlu1 %v3704_v32 }
0x1bd8   :  { %v3736_v47 = vpop.permute.xlu1 %3735 }
0x1bd9   :  { %v3812_v53 = vpop.permute.xlu0 %3811  ;;  %v3741_v55 = vsel %vm174_vm3, %v3736_v47, 0.0 }
0x1bda   :  { %3742 = vadd.xlane.f32.xlu0 %v3741_v55  ;;  %v3817_v35 = vsel %vm174_vm3, %v3812_v53, 0.0 }
0x1bdc   :  { %v3774_v11 = vpop.permute.xlu1 %3773 }
0x1bdd   :  { %v3850_v44 = vpop.permute.xlu0 %3849  ;;  %v3779_v29 = vsel %vm174_vm3, %v3774_v11, 0.0 }
0x1bde   :  { %3780 = vadd.xlane.f32.xlu1 %v3779_v29  ;;  %v3855_v15 = vsel %vm174_vm3, %v3850_v44, 0.0 }
0x1be0   :  { %v3776_v37 = vpop.permute.xlu1 %3775 }
0x1be1   :  { %v3888_v54 = vpop.permute.xlu0 %3887  ;;  %v3782_v47 = vsel %vm174_vm3, %v3776_v37, 0.0 }
0x1be2   :  { %3818 = vadd.xlane.f32.xlu1 %v3817_v35  ;;  %v3893_v32 = vsel %vm174_vm3, %v3888_v54, 0.0 }
0x1be4   :  { %v3814_v14 = vpop.permute.xlu1 %3813 }
0x1be5   :  { %v3738_v57 = vpop.permute.xlu0 %3737  ;;  %v3820_v11 = vsel %vm174_vm3, %v3814_v14, 0.0 }
0x1be6   :  { %v3744_v19 = vsel %vm174_vm3, %v3738_v57, 0.0  ;;  %3856 = vadd.xlane.f32.xlu1 %v3855_v15 }
0x1be7   :  { %3745 = vadd.xlane.f32.xlu0 %v3744_v19 }
0x1be8   :  { %v3852_v21 = vpop.permute.xlu1 %3851 }
0x1be9   :  { %v3926_v12 = vpop.permute.xlu0 %3925  ;;  %v3858_v35 = vsel %vm174_vm3, %v3852_v21, 0.0 }
0x1bea   :  { %3894 = vadd.xlane.f32.xlu1 %v3893_v32  ;;  %v3931_v55 = vsel %vm174_vm3, %v3926_v12, 0.0 }
0x1beb   :  { %3783 = vadd.xlane.f32.xlu0 %v3782_v47 }
0x1bec   :  { %v3890_v29 = vpop.permute.xlu1 %3889 }
0x1bed   :  { %v3964_v53 = vpop.permute.xlu0 %3963  ;;  %v3896_v54 = vsel %vm174_vm3, %v3890_v29, 0.0 }
0x1bee   :  { %3932 = vadd.xlane.f32.xlu1 %v3931_v55  ;;  %v3969_v44 = vsel %vm174_vm3, %v3964_v53, 0.0 }
0x1bef   :  { %3821 = vadd.xlane.f32.xlu0 %v3820_v11 }
0x1bf0   :  { %v3928_v57 = vpop.permute.xlu1 %3927 }
0x1bf1   :  { %v3934_v37 = vsel %vm174_vm3, %v3928_v57, 0.0 }
0x1bf2   :  { %3970 = vadd.xlane.f32.xlu1 %v3969_v44 }
0x1bf3   :  { %3859 = vadd.xlane.f32.xlu0 %v3858_v35 }
0x1bf4   :  { %v3966_v15 = vpop.permute.xlu1 %3965 }
0x1bf5   :  { %v3972_v19 = vsel %vm174_vm3, %v3966_v15, 0.0 }
0x1bf7   :  { %3897 = vadd.xlane.f32.xlu0 %v3896_v54 }
0x1bfb   :  { %3935 = vadd.xlane.f32.xlu0 %v3934_v37 }
0x1bff   :  { %3973 = vadd.xlane.f32.xlu0 %v3972_v19 }
0x1c27   :  { %v3703_v32 = vpop.xlane.xlu0 %3702 }
0x1c28   :  { %8187 = vrcp.f32 %v3703_v32 }
0x1c32   :  { %v8188_v37 = vpop.eup %8187 }
0x1c33   :  { %v3706_v14 = vpop.xlane.xlu1 %3705 }
0x1c34   :  { %8189 = vrcp.f32 %v3706_v14 }
0x1c3e   :  { %v8190_v19 = vpop.eup %8189 }
0x1c3f   :  { %v3710_v30 = vmul.f32 %v8190_v19, %v10197_v38 }
0x1c67   :  { %v3743_v55 = vpop.xlane.xlu0 %3742 }
0x1c68   :  { %8191 = vrcp.f32 %v3743_v55 }
0x1c6b   :  { %v3781_v12 = vpop.xlane.xlu1 %3780 }
0x1c6c   :  { %8193 = vrcp.f32 %v3781_v12 }
0x1c6f   :  { %v3819_v47 = vpop.xlane.xlu1 %3818 }
0x1c70   :  { %8195 = vrcp.f32 %v3819_v47 }
0x1c72   :  { %v8192_v16 = vpop.eup %8191 }
0x1c73   :  { %v3857_v53 = vpop.xlane.xlu1 %3856 }
0x1c74   :  { %v3746_v11 = vpop.xlane.xlu0 %3745  ;;  %8197 = vrcp.f32 %v3857_v53 }
0x1c75   :  { %8199 = vrcp.f32 %v3746_v11 }
0x1c76   :  { %v8194_v14 = vpop.eup %8193 }
0x1c77   :  { %v3895_v44 = vpop.xlane.xlu1 %3894 }
0x1c78   :  { %v3784_v21 = vpop.xlane.xlu0 %3783  ;;  %8201 = vrcp.f32 %v3895_v44 }
0x1c79   :  { %8203 = vrcp.f32 %v3784_v21 }
0x1c7a   :  { %v8196_v12 = vpop.eup %8195 }
0x1c7b   :  { %v3933_v35 = vpop.xlane.xlu1 %3932  ;;  %v3825_v31 = vmul.f32 %v8196_v12, %v10131_v28 }
0x1c7c   :  { %v3822_v29 = vpop.xlane.xlu0 %3821  ;;  %8205 = vrcp.f32 %v3933_v35 }
0x1c7d   :  { %8207 = vrcp.f32 %v3822_v29  ;;  %v3749_v29 = vmul.f32 %v8192_v16, %v10129_v61 }
0x1c7e   :  { %v8198_v47 = vpop.eup %8197 }
0x1c7f   :  { %v3971_v15 = vpop.xlane.xlu1 %3970  ;;  %v8200_v55 = vpop.eup %8199  ;;  %v3863_v39 = vmul.f32 %v8198_v47, %v10141_v51 }
0x1c80   :  { %v3860_v57 = vpop.xlane.xlu0 %3859 }
0x1c81   :  { %8209 = vrcp.f32 %v3860_v57  ;;  %v3750_v57 = vmul.f32 %v8200_v55, %v10160_v63 }
0x1c82   :  { %v8202_v53 = vpop.eup %8201 }
0x1c83   :  { %v8204_v44 = vpop.eup %8203 }
0x1c84   :  { %v3898_v54 = vpop.xlane.xlu0 %3897 }
0x1c85   :  { %8211 = vrcp.f32 %v3898_v54  ;;  %v3787_v54 = vmul.f32 %v8194_v14, %v10139_v33  ;;  %v3980_v33 = vsel %vm174_vm3, %v3710_v30, %v3750_v57  ;;  %v7814_v14 = vld [vmem:[#allocation7 + $0x37c] ss:$136 sps:$4 sm:$0xff]  }
0x1c86   :  { %8213 = vrcp.f32 %v3971_v15  ;;  %v8206_v21 = vpop.eup %8205  ;;  %v3788_v15 = vmul.f32 %v8204_v44, %v10149_v2  ;;  %v3901_v2 = vmul.f32 %v8202_v53, %v10151_v13 }
0x1c87   :  { %v8208_v35 = vpop.eup %8207  ;;  %v3939_v28 = vmul.f32 %v8206_v21, %v10169_v22  ;;  %v6830_v21 = vld [vmem:[#allocation12 + $0x1f] ss:$0 sm:$0xff] }
0x1c88   :  { %v3936_v32 = vpop.xlane.xlu0 %3935  ;;  %v3982_v38 = vsel %vm927_vm14, %v3980_v33, %v3788_v15 }
0x1c89   :  { %8215 = vrcp.f32 %v3936_v32  ;;  %v3709_v32 = vmul.f32 %v8188_v37, %v10193_v42 }
0x1c8b   :  { %v8210_v41 = vpop.eup %8209  ;;  %v3979_v61 = vsel %vm174_vm3, %v3709_v32, %v3749_v29 }
0x1c8c   :  { %v3974_v11 = vpop.xlane.xlu0 %3973  ;;  %v3864_v16 = vmul.f32 %v8210_v41, %v10167_v46  ;;  %v3981_v42 = vsel %vm927_vm14, %v3979_v61, %v3787_v54 }
0x1c8d   :  { %8217 = vrcp.f32 %v3974_v11  ;;  %v3826_v11 = vmul.f32 %v8208_v35, %v10158_v0  ;;  %v3983_v51 = vsel %vm930_vm15, %v3981_v42, %v3825_v31 }
0x1c8e   :  { %v3985_v30 = vsel %vm360_vm6, %v3983_v51, %v3863_v39  ;;  %v7812_v39 = vld [vmem:[#allocation7 + $0x15c] ss:$136 sps:$4 sm:$0xff]  }
0x1c8f   :  { %v8212_v26 = vpop.eup %8211  ;;  %v3984_v41 = vsel %vm930_vm15, %v3982_v38, %v3826_v11 }
0x1c90   :  { %v8214_v4 = vpop.eup %8213  ;;  %v3902_v63 = vmul.f32 %v8212_v26, %v10175_v23  ;;  %v3986_v13 = vsel %vm360_vm6, %v3984_v41, %v3864_v16  ;;  %v3987_v23 = vsel %vm935_vm1, %v3985_v30, %v3901_v2  ;;  %v7820_v30 = vld [vmem:[#allocation7 + $0x164] ss:$136 sps:$4 sm:$0xff]  }
0x1c91   :  { %v3977_v46 = vmul.f32 %v8214_v4, %v10177_v60  ;;  %v3989_v22 = vsel %vm938_vm2, %v3987_v23, %v3939_v28  ;;  %v7811_v4 = vld [vmem:[#allocation7 + $0x4c] ss:$136 sps:$4 sm:$0xff]   ;;  %v7821_v23 = vld [vmem:[#allocation7 + $0x270] ss:$136 sps:$4 sm:$0xff]  }
0x1c92   :  { %v3988_v19 = vsel %vm935_vm1, %v3986_v13, %v3902_v63  ;;  %v7818_v13 = vld [vmem:[#allocation7 + $0x160] ss:$136 sps:$4 sm:$0xff]  }
0x1c93   :  { %v8216_v52 = vpop.eup %8215  ;;  %v3991_v31 = vsel %vm941_vm4, %v3989_v22, %v3977_v46  ;;  %v7828_v22 = vld [vmem:[#allocation9 + $0x8] ss:$16 sps:$4 sm:$0xff]  }
0x1c94   :  { %v3940_v0 = vmul.f32 %v8216_v52, %v10183_v56 }
0x1c96   :  { %v3990_v52 = vsel %vm938_vm2, %v3988_v19, %v3940_v0  ;;  %v7827_v19 = vld [vmem:[#allocation9 + $0x108] ss:$16 sps:$4 sm:$0xff]  }
0x1c97   :  { %v8218_v37 = vpop.eup %8217  ;;  %7134 = vmatprep.subr.bf16.mxu1 %v7827_v19 }
0x1c98   :  { %v3978_v26 = vmul.f32 %v8218_v37, %v10187_v18  ;;  %v7813_v18 = vld [vmem:[#allocation7 + $0x26c] ss:$136 sps:$4 sm:$0xff]   ;;  %v7815_v37 = vld [vmem:[#allocation7 + $0x50] ss:$136 sps:$4 sm:$0xff]   ;;  %7135 = vmatpush3.bf16.msra.mxu1 %v7828_v22 }
0x1c9a   :  { %v3992_v56 = vsel %vm941_vm4, %v3990_v52, %v3978_v26  ;;  %v7823_v26 = vld [vmem:[#allocation7 + $0x274] ss:$136 sps:$4 sm:$0xff]   ;;  %v7829_v52 = vld [vmem:[#allocation9 + $0x128] ss:$16 sps:$4 sm:$0xff]  }
0x1c9b   :  { %v3993_v60 = vpack.c.bf16 %v3992_v56, %v3991_v31  ;;  %v7826_v31 = vld [vmem:[#allocation7 + $0x384] ss:$136 sps:$4 sm:$0xff]   ;;  %v7830_v56 = vld [vmem:[#allocation9 + $0x28] ss:$16 sps:$4 sm:$0xff]   ;;  %7136 = vmatprep.subr.bf16.mxu1 %v7829_v52 }
0x1c9c   :  { %7137 = vmatpush3.bf16.msra.mxu1 %v7830_v56 }
0x1c9d   :  { %7509 = vmatmul.mubr.bf16.vlgmr.msra.gmra.mrb[36].mxu0 %v3993_v60  ;;  %v7831_v60 = vld [vmem:[#allocation9 + $0x148] ss:$16 sps:$4 sm:$0xff]  }
0x1c9e   :  { %7513 = vmatpush3.bf16.msra.mxu0 %v7811_v4  ;;  %7520 = vmatprep.mubr.msk.bf16.mxu0 %vm8556_vm0, %v11061_v17  ;;  %v7824_v4 = vld [vmem:[#allocation7 + $0x380] ss:$136 sps:$4 sm:$0xff]  }
0x1c9f   :  { %7514 = vmatprep.subr.bf16.mxu0 %v11061_v17  ;;  %7138 = vmatprep.subr.bf16.mxu1 %v7831_v60 }
0x1ca2   :  { %7515 = vmatpush3.bf16.msra.mxu0 %v7812_v39  ;;  %v7832_v39 = vld [vmem:[#allocation9 + $0x48] ss:$16 sps:$4 sm:$0xff]  }
0x1ca3   :  { %7516 = vmatprep.subr.bf16.mxu0 %v11061_v17  ;;  %7139 = vmatpush3.bf16.msra.mxu1 %v7832_v39 }
0x1ca6   :  { %7517 = vmatpush3.bf16.msra.mxu0 %v7813_v18  ;;  %v7833_v18 = vld [vmem:[#allocation9 + $0x168] ss:$16 sps:$4 sm:$0xff]  }
0x1ca7   :  { %7518 = vmatprep.subr.bf16.mxu0 %v11061_v17  ;;  %7140 = vmatprep.subr.bf16.mxu1 %v7833_v18 }
0x1caa   :  { %7519 = vmatpush3.bf16.msra.mxu0 %v7814_v14  ;;  %v7834_v14 = vld [vmem:[#allocation9 + $0x68] ss:$16 sps:$4 sm:$0xff]  }
0x1cab   :  { %7141 = vmatpush3.bf16.msra.mxu1 %v7834_v14 }
0x1d70   :  { %v4028_v12 = vpop.f32.mrb[36].mxu0 }
0x1d71   :  { %v7510_v47 = vpop.f32.mrb[37].mxu0 }
0x1d72   :  { %v4031_v55 = vpop.f32.mrb[38].mxu0  ;;  %v7836_v47 = vld [vmem:[#allocation9 + $0x88] ss:$16 sps:$4 sm:$0xff]  }
0x1d73   :  { %v4043_v53 = vpack.c.bf16 %v4031_v55, %v4028_v12  ;;  %v7511_v44 = vpop.f32.mrb[39].mxu0  ;;  %v7835_v12 = vld [vmem:[#allocation9 + $0x188] ss:$16 sps:$4 sm:$0xff]  }
0x1d74   :  { %7142 = vmatprep.subr.bf16.mxu1 %v7835_v12  ;;  %v7837_v55 = vld [vmem:[#allocation9 + $0x1a8] ss:$16 sps:$4 sm:$0xff]  }
0x1d75   :  { %7521 = vmatmul.mubr.msk.bf16.vlgmr.msra.gmra.mrb[40].mxu0 %vm360_vm6, %v4043_v53  ;;  %7143 = vmatpush3.bf16.msra.mxu1 %v7836_v47  ;;  %v6847_v47 = vld [vmem:[#allocation12 + $0x24] ss:$0 sm:$0xff] }
0x1d76   :  { %4261 = vmatprep.mubr.bf16.mxu0 %v11062_v45  ;;  %7144 = vmatprep.subr.bf16.mxu1 %v7837_v55 }
0x1e48   :  { %v4112_v35 = vpop.f32.mrb[40].mxu0 }
0x1e49   :  { %v4113_v29 = vadd.f32 %v6830_v21, %v4112_v35  ;;  %v7522_v57 = vpop.f32.mrb[41].mxu0 }
0x1e4a   :  { %v4115_v54 = vpop.f32.mrb[42].mxu0 }
0x1e4b   :  { %v4119_v15 = vadd.f32 %v4113_v29, %v9929_v25  ;;  %v4116_v32 = vadd.f32 %v6830_v21, %v4115_v54  ;;  %v7523_v11 = vpop.f32.mrb[43].mxu0 }
0x1e4d   :  { %v4120_v16 = vadd.f32 %v4116_v32, %v9931_v24  ;;  %v4123_v61 = vsel %vm360_vm6, %v4119_v15, 0.0  ;;  %v7817_v24 = vld [vmem:[#allocation7 + $0x54] ss:$136 sps:$4 sm:$0xff]  }
0x1e4e   :  { %4124 = vadd.xlane.f32.xlu1 %v4123_v61  ;;  %4229 = vmatprep.subr.bf16.mxu0 %v7817_v24 }
0x1e4f   :  { %v4126_v33 = vsel %vm360_vm6, %v4120_v16, 0.0  ;;  %4230 = vmatpush1.bf16.msra.mxu0 %v7815_v37 }
0x1e50   :  { %4127 = vadd.xlane.f32.xlu0 %v4126_v33  ;;  %4231 = vmatprep.subr.bf16.mxu0 %v7820_v30  ;;  %v6837_v33 = vld [vmem:[#allocation12 + $0x21] ss:$0 sm:$0xff] }
0x1e53   :  { %4232 = vmatpush1.bf16.msra.mxu0 %v7818_v13 }
0x1e54   :  { %4233 = vmatprep.subr.bf16.mxu0 %v7823_v26 }
0x1e57   :  { %4234 = vmatpush1.bf16.msra.mxu0 %v7821_v23 }
0x1e58   :  { %4235 = vmatprep.subr.bf16.mxu0 %v7826_v31 }
0x1e5b   :  { %4236 = vmatpush1.bf16.msra.mxu0 %v7824_v4 }
0x1edb   :  { %v4125_v2 = vpop.xlane.xlu1 %4124 }
0x1edc   :  { %v4129_v63 = vmul.f32 0.015625, %v4125_v2 }
0x1edd   :  { %v4128_v42 = vpop.xlane.xlu0 %4127 }
0x1ede   :  { %v4131_v38 = vsub.f32 %v4119_v15, %v4129_v63  ;;  %v4130_v28 = vmul.f32 0.015625, %v4128_v42  ;;  %v6836_v15 = vld [vmem:[#allocation12 + $0x20] ss:$0 sm:$0xff] }
0x1ee0   :  { %v4132_v0 = vsub.f32 %v4120_v16, %v4130_v28  ;;  %v4133_v51 = vmul.f32 %v4131_v38, %v4131_v38 }
0x1ee2   :  { %v4135_v41 = vsel %vm360_vm6, %v4133_v51, 0.0  ;;  %v4134_v25 = vmul.f32 %v4132_v0, %v4132_v0  ;;  %v7838_v51 = vld [vmem:[#allocation9 + $0xa8] ss:$16 sps:$4 sm:$0xff]  }
0x1ee3   :  { %4136 = vadd.xlane.f32.xlu1 %v4135_v41  ;;  %7145 = vmatpush3.bf16.msra.mxu1 %v7838_v51  ;;  %v7839_v41 = vld [vmem:[#allocation9 + $0x1c8] ss:$16 sps:$4 sm:$0xff]  }
0x1ee4   :  { %v4138_v46 = vsel %vm360_vm6, %v4134_v25, 0.0  ;;  %v7840_v25 = vld [vmem:[#allocation9 + $0xc8] ss:$16 sps:$4 sm:$0xff]   ;;  %7146 = vmatprep.subr.bf16.mxu1 %v7839_v41 }
0x1ee5   :  { %4139 = vadd.xlane.f32.xlu0 %v4138_v46  ;;  %v7841_v46 = vld [vmem:[#allocation9 + $0x1e8] ss:$16 sps:$4 sm:$0xff]  }
0x1ee7   :  { %7147 = vmatpush3.bf16.msra.mxu1 %v7840_v25 }
0x1ee8   :  { %7148 = vmatprep.subr.bf16.mxu1 %v7841_v46 }
0x1f70   :  { %v4137_v53 = vpop.xlane.xlu1 %4136 }
0x1f71   :  { %v4141_v44 = vmul.f32 0.015625, %v4137_v53 }
0x1f72   :  { %v4140_v21 = vpop.xlane.xlu0 %4139 }
0x1f73   :  { %v4143_v35 = vadd.f32 1e-05, %v4141_v44  ;;  %v4142_v29 = vmul.f32 0.015625, %v4140_v21 }
0x1f75   :  { %8219 = vrsqrt.f32 %v4143_v35  ;;  %v4144_v57 = vadd.f32 1e-05, %v4142_v29 }
0x1f77   :  { %8221 = vrsqrt.f32 %v4144_v57 }
0x1f7f   :  { %v8220_v54 = vpop.eup %8219 }
0x1f80   :  { %v4147_v32 = vmul.f32 %v8220_v54, %v4131_v38  ;;  %v7842_v38 = vld [vmem:[#allocation9 + $0xe8] ss:$16 sps:$4 sm:$0xff]  }
0x1f81   :  { %v8222_v11 = vpop.eup %8221  ;;  %7149 = vmatpush3.bf16.msra.mxu1 %v7842_v38  ;;  %v7845_v38 = vld [vmem:[#allocation7 + $0x5c] ss:$136 sps:$4 sm:$0xff]  }
0x1f82   :  { %v4155_v16 = vmul.f32 %v6836_v15, %v4147_v32  ;;  %v4148_v61 = vmul.f32 %v8222_v11, %v4132_v0  ;;  %7536 = vmatprep.subr.bf16.mxu1 %v11061_v17  ;;  %v4174_v0 = vld [vmem:[#allocation12 + $0x22] sm:$0x3]  ;;  %4584 = vmatprep.subr.bf16.mxu0 %v7845_v38 }
0x1f83   :  { %v4179_v24 = vrot.slane %v4174_v0, %v8827_v48  ;;  %v4183_v37 = vrot.slane %v4174_v0, %v8829_v49  ;;  %v7848_v0 = vld [vmem:[#allocation7 + $0x16c] ss:$136 sps:$4 sm:$0xff]  }
0x1f84   :  { %v4156_v2 = vmul.f32 %v6836_v15, %v4148_v61  ;;  %v4163_v63 = vadd.f32 %v6837_v33, %v4155_v16 }
0x1f86   :  { %v4164_v42 = vadd.f32 %v6837_v33, %v4156_v2 }
0x1f88   :  { %v4173_v28 = vpack.c.bf16 %v4164_v42, %v4163_v63 }
0x1f8a   :  { %6846 = vmatmul.mubr.msk.bf16.vlgmr.msra.gmra.mrb[44].mxu0 %vm360_vm6, %v4173_v28 }
0x1f8b   :  { %4616 = vmatprep.mubr.bf16.mxu0 %v11062_v45 }
0x205d   :  { %v4263_v30 = vpop.f32.mrb[44].mxu0 }
0x205e   :  { %v4264_v13 = vadd.f32 %v4263_v30, %v4179_v24  ;;  %v4265_v26 = vpop.f32.mrb[45].mxu0  ;;  %v7849_v30 = vld [vmem:[#allocation7 + $0x278] ss:$136 sps:$4 sm:$0xff]  }
0x205f   :  { %v4266_v23 = vadd.f32 %v4265_v26, %v4183_v37  ;;  %v4267_v19 = vpop.f32.mrb[46].mxu0  ;;  %v7852_v26 = vld [vmem:[#allocation7 + $0x388] ss:$136 sps:$4 sm:$0xff]  }
0x2060   :  { %v4268_v22 = vadd.f32 %v4267_v19, %v4179_v24  ;;  %v4269_v52 = vpop.f32.mrb[47].mxu0  ;;  %v4272_v56 = vmax.f32 %v4264_v13, 0.0  ;;  %v7846_v24 = vld [vmem:[#allocation7 + $0x168] ss:$136 sps:$4 sm:$0xff]   ;;  %v7854_v13 = vld [vmem:[#allocation7 + $0x38c] ss:$136 sps:$4 sm:$0xff]  }
0x2061   :  { %v4270_v31 = vadd.f32 %v4269_v52, %v4183_v37  ;;  %v4273_v60 = vmax.f32 %v4266_v23, 0.0  ;;  %v7851_v37 = vld [vmem:[#allocation7 + $0x27c] ss:$136 sps:$4 sm:$0xff]  }
0x2062   :  { %v4274_v4 = vmax.f32 %v4268_v22, 0.0 }
0x2063   :  { %v4275_v39 = vmax.f32 %v4270_v31, 0.0 }
0x2064   :  { %v4308_v18 = vpack.c.bf16 %v4274_v4, %v4272_v56 }
0x2065   :  { %v4309_v14 = vpack.c.bf16 %v4275_v39, %v4273_v60  ;;  %v6864_v60 = vld [vmem:[#allocation12 + $0x25] ss:$0 sm:$0xff] }
0x2067   :  { %4445 = vmatprep.mubr.bf16.mxu1 %v4309_v14 }
0x2068   :  { %4446 = vmatmul.mubr.bf16.vlgmr.msra.gmra.mrb[60].mxu1 %v4308_v18 }
0x2069   :  { %7552 = vmatprep.mubr.msk.bf16.mxu1 %vm8556_vm0, %v11061_v17 }
0x213b   :  { %v7150_v12 = vpop.f32.mrb[60].mxu1 }
0x213c   :  { %v7151_v55 = vpop.f32.mrb[61].mxu1 }
0x213d   :  { %v7152_v53 = vadd.f32 %v7151_v55, %v7150_v12  ;;  %v7153_v44 = vpop.f32.mrb[62].mxu1 }
0x213e   :  { %v7154_v21 = vpop.f32.mrb[63].mxu1 }
0x213f   :  { %v4448_v35 = vadd.f32 %v7152_v53, %v6847_v47  ;;  %v7155_v29 = vadd.f32 %v7154_v21, %v7153_v44  ;;  %v7855_v21 = vld [vmem:[#allocation7 + $0x60] ss:$136 sps:$4 sm:$0xff]  }
0x2141   :  { %v4451_v57 = vadd.f32 %v7155_v29, %v6847_v47  ;;  %v4454_v54 = vadd.f32 %v4448_v35, %v4163_v63  ;;  %v6865_v47 = vld [vmem:[#allocation12 + $0x26] ss:$0 sm:$0xff]  ;;  %v7856_v29 = vld [vmem:[#allocation7 + $0x170] ss:$136 sps:$4 sm:$0xff]  }
0x2143   :  { %v4458_v15 = vsel %vm360_vm6, %v4454_v54, 0.0  ;;  %v4455_v32 = vadd.f32 %v4451_v57, %v4164_v42  ;;  %v7843_v42 = vld [vmem:[#allocation7 + $0x58] ss:$136 sps:$4 sm:$0xff]  }
0x2144   :  { %4459 = vadd.xlane.f32.xlu1 %v4458_v15  ;;  %4585 = vmatpush1.bf16.msra.mxu0 %v7843_v42  ;;  %v7857_v57 = vld [vmem:[#allocation7 + $0x280] ss:$136 sps:$4 sm:$0xff]  }
0x2145   :  { %v4461_v11 = vsel %vm360_vm6, %v4455_v32, 0.0  ;;  %4586 = vmatprep.subr.bf16.mxu0 %v7848_v0  ;;  %v6881_v15 = vld [vmem:[#allocation12 + $0x28] ss:$0 sm:$0xff] }
0x2146   :  { %4462 = vadd.xlane.f32.xlu0 %v4461_v11  ;;  %v6880_v11 = vld [vmem:[#allocation12 + $0x27] ss:$0 sm:$0xff] }
0x2148   :  { %4587 = vmatpush1.bf16.msra.mxu0 %v7846_v24 }
0x2149   :  { %4588 = vmatprep.subr.bf16.mxu0 %v7851_v37 }
0x214c   :  { %4589 = vmatpush1.bf16.msra.mxu0 %v7849_v30 }
0x214d   :  { %4590 = vmatprep.subr.bf16.mxu0 %v7854_v13 }
0x2150   :  { %4591 = vmatpush1.bf16.msra.mxu0 %v7852_v26 }
0x2151   :  { %7524 = vmatprep.subr.bf16.mxu0 %v11061_v17 }
0x21d1   :  { %v4460_v16 = vpop.xlane.xlu1 %4459 }
0x21d2   :  { %v4464_v61 = vmul.f32 0.015625, %v4460_v16 }
0x21d3   :  { %v4463_v33 = vpop.xlane.xlu0 %4462 }
0x21d4   :  { %v4466_v2 = vsub.f32 %v4454_v54, %v4464_v61  ;;  %v4465_v28 = vmul.f32 0.015625, %v4463_v33  ;;  %v7858_v54 = vld [vmem:[#allocation7 + $0x390] ss:$136 sps:$4 sm:$0xff]  }
0x21d6   :  { %v4467_v51 = vsub.f32 %v4455_v32, %v4465_v28  ;;  %v4468_v41 = vmul.f32 %v4466_v2, %v4466_v2 }
0x21d8   :  { %v4470_v25 = vsel %vm360_vm6, %v4468_v41, 0.0  ;;  %v4469_v46 = vmul.f32 %v4467_v51, %v4467_v51 }
0x21d9   :  { %4471 = vadd.xlane.f32.xlu1 %v4470_v25 }
0x21da   :  { %v4473_v63 = vsel %vm360_vm6, %v4469_v46, 0.0 }
0x21db   :  { %4474 = vadd.xlane.f32.xlu0 %v4473_v63 }
0x2266   :  { %v4472_v23 = vpop.xlane.xlu1 %4471 }
0x2267   :  { %v4476_v19 = vmul.f32 0.015625, %v4472_v23 }
0x2268   :  { %v4475_v22 = vpop.xlane.xlu0 %4474 }
0x2269   :  { %v4478_v52 = vadd.f32 1e-05, %v4476_v19  ;;  %v4477_v31 = vmul.f32 0.015625, %v4475_v22 }
0x226b   :  { %8223 = vrsqrt.f32 %v4478_v52  ;;  %v4479_v56 = vadd.f32 1e-05, %v4477_v31 }
0x226d   :  { %8225 = vrsqrt.f32 %v4479_v56 }
0x2275   :  { %v8224_v4 = vpop.eup %8223 }
0x2276   :  { %v4482_v39 = vmul.f32 %v8224_v4, %v4466_v2 }
0x2277   :  { %v8226_v18 = vpop.eup %8225 }
0x2278   :  { %v4490_v14 = vmul.f32 %v6864_v60, %v4482_v39  ;;  %v4483_v12 = vmul.f32 %v8226_v18, %v4467_v51 }
0x227a   :  { %v4491_v55 = vmul.f32 %v6864_v60, %v4483_v12  ;;  %v10270_v53 = vadd.f32 %v6865_v47, %v4490_v14 }
0x227c   :  { %v10272_v44 = vadd.f32 %v6865_v47, %v4491_v55 }
0x227e   :  { %v4516_v35 = vpack.c.bf16 %v10272_v44, %v10270_v53 }
0x2280   :  { %6878 = vmatmul.mubr.msk.bf16.vlgmr.msra.gmra.mrb[48].mxu0 %vm360_vm6, %v4516_v35 }
0x2281   :  { %7525 = vmatpush3.bf16.msra.mxu0 %v7855_v21  ;;  %7532 = vmatprep.mubr.msk.bf16.mxu0 %vm8556_vm0, %v11061_v17 }
0x2282   :  { %7526 = vmatprep.subr.bf16.mxu0 %v11061_v17 }
0x2285   :  { %7527 = vmatpush3.bf16.msra.mxu0 %v7856_v29 }
0x2286   :  { %7528 = vmatprep.subr.bf16.mxu0 %v11061_v17 }
0x2289   :  { %7529 = vmatpush3.bf16.msra.mxu0 %v7857_v57 }
0x228a   :  { %7530 = vmatprep.subr.bf16.mxu0 %v11061_v17 }
0x228d   :  { %7531 = vmatpush3.bf16.msra.mxu0 %v7858_v54 }
0x228e   :  { %7556 = vmatprep.subr.bf16.mxu0 %v11061_v17 }
0x2290   :  { %7533 = vmatmul.mubr.msk.bf16.vlgmr.msra.gmra.mrb[52].mxu0 %vm360_vm6, %v4516_v35  ;;  %v6882_v35 = vld [vmem:[#allocation12 + $0x29] ss:$0 sm:$0xff] }
0x2291   :  { %7572 = vmatprep.mubr.msk.bf16.mxu0 %vm8556_vm0, %v11061_v17 }
0x2353   :  { %v4618_v32 = vpop.f32.mrb[48].mxu0 }
0x2354   :  { %v4620_v16 = vpop.f32.mrb[49].mxu0  ;;  %v10286_v2 = vadd.f32 %v6880_v11, %v4618_v32 }
0x2355   :  { %v4684_v61 = vadd.f32 %v6881_v15, %v4620_v16  ;;  %v4622_v33 = vpop.f32.mrb[50].mxu0 }
0x2356   :  { %v10288_v28 = vadd.f32 %v6880_v11, %v4622_v33  ;;  %v4624_v51 = vpop.f32.mrb[51].mxu0 }
0x2357   :  { %v4685_v41 = vadd.f32 %v6881_v15, %v4624_v51  ;;  %v4695_v25 = vmul.f32 %v4684_v61, %v8835_v58  ;;  %v4697_v46 = vmul.f32 %v4684_v61, %v8838_v59  ;;  %v4699_v63 = vmul.f32 %v4684_v61, %v8840_v62 }
0x2358   :  { %v10296_v42 = vmul.f32 %v4684_v61, %v8842_v3  ;;  %v10299_v0 = vmul.f32 %v4684_v61, %v11070_v50  ;;  %v10302_v24 = vmul.f32 %v4684_v61, %v8846_v5  ;;  %v10315_v22 = vmul.f32 %v4684_v61, %v8848_v9 }
0x2359   :  { %v4696_v37 = vmul.f32 %v4685_v41, %v8835_v58  ;;  %v4698_v30 = vmul.f32 %v4685_v41, %v8838_v59  ;;  %v4700_v13 = vmul.f32 %v4685_v41, %v8840_v62  ;;  %v4702_v26 = vmul.f32 %v4685_v41, %v8842_v3 }
0x235a   :  { %v10309_v23 = vmul.f32 %v4685_v41, %v11070_v50  ;;  %v10312_v19 = vmul.f32 %v4685_v41, %v8846_v5  ;;  %v10318_v52 = vmul.f32 %v4685_v41, %v8848_v9  ;;  %v10329_v47 = vmul.f32 %v4684_v61, %v8850_v10 }
0x235b   :  { %v4711_v31 = vpack.c.bf16 %v4696_v37, %v4695_v25  ;;  %v4712_v56 = vpack.c.bf16 %v4698_v30, %v4697_v46  ;;  %v4713_v4 = vpack.c.bf16 %v4700_v13, %v4699_v63  ;;  %v4714_v60 = vpack.c.bf16 %v4702_v26, %v10296_v42 }
0x235c   :  { %v4715_v39 = vpack.c.bf16 %v10309_v23, %v10299_v0  ;;  %v4716_v18 = vpack.c.bf16 %v10312_v19, %v10302_v24  ;;  %v4717_v14 = vpack.c.bf16 %v10318_v52, %v10315_v22  ;;  %v10332_v55 = vmul.f32 %v4685_v41, %v8850_v10  ;;  %v7862_v22 = vld [vmem:[#allocation7 + $0x17c] ss:$136 sps:$4 sm:$0xff]   ;;  %v7867_v52 = vld [vmem:[#allocation7 + $0x290] ss:$136 sps:$4 sm:$0xff]  }
0x235d   :  { %v4748_v12 = vsel %vm360_vm6, %v4711_v31, 0  ;;  %v4751_v32 = vsel %vm360_vm6, %v4712_v56, 0  ;;  %v4754_v38 = vsel %vm360_vm6, %v4713_v4, 0 }
0x235e   :  { %7537 = vmatpush3.bf16.xpose.msra.mxu1 %v4748_v12  ;;  %v4760_v4 = vsel %vm360_vm6, %v4715_v39, 0  ;;  %v7861_v39 = vld [vmem:[#allocation7 + $0x70] ss:$136 sps:$4 sm:$0xff]   ;;  %v11090_v24 = vpack.c.bf16 %v10332_v55, %v10329_v47  ;;  %v7870_v47 = vld [vmem:[#allocation7 + $0x3a0] ss:$136 sps:$4 sm:$0xff]  }
0x235f   :  { %7538 = vmatprep.subr.bf16.mxu1 %v11061_v17  ;;  %v7868_v55 = vld [vmem:[#allocation7 + $0x39c] ss:$136 sps:$4 sm:$0xff]  }
0x2360   :  { %v4769_v19 = vsel %vm360_vm6, %v11090_v24, 0 }
0x2363   :  { %v4661_v29 = vpop.f32.mrb[52].mxu0 }
0x2364   :  { %v4693_v57 = vadd.f32 %v6882_v35, %v4661_v29  ;;  %v7534_v54 = vpop.f32.mrb[53].mxu0 }
0x2365   :  { %v4664_v15 = vpop.f32.mrb[54].mxu0 }
0x2366   :  { %v4694_v11 = vadd.f32 %v6882_v35, %v4664_v15  ;;  %v7535_v16 = vpop.f32.mrb[55].mxu0  ;;  %7539 = vmatpush3.bf16.xpose.msra.mxu1 %v4751_v32  ;;  %v4719_v61 = vmul.f32 %v4693_v57, %v8835_v58  ;;  %v4721_v33 = vmul.f32 %v4693_v57, %v8838_v59  ;;  %v4723_v51 = vmul.f32 %v4693_v57, %v8840_v62 }
0x2367   :  { %7540 = vmatprep.subr.bf16.mxu1 %v11061_v17  ;;  %v4725_v41 = vmul.f32 %v4693_v57, %v8842_v3  ;;  %v4727_v25 = vmul.f32 %v4693_v57, %v11070_v50  ;;  %v4729_v46 = vmul.f32 %v4693_v57, %v8846_v5  ;;  %v4731_v63 = vmul.f32 %v4693_v57, %v8848_v9 }
0x2368   :  { %v4720_v42 = vmul.f32 %v4694_v11, %v8835_v58  ;;  %v4722_v0 = vmul.f32 %v4694_v11, %v8838_v59  ;;  %v4724_v37 = vmul.f32 %v4694_v11, %v8840_v62  ;;  %v4726_v30 = vmul.f32 %v4694_v11, %v8842_v3 }
0x2369   :  { %v4728_v13 = vmul.f32 %v4694_v11, %v11070_v50  ;;  %v4730_v26 = vmul.f32 %v4694_v11, %v8846_v5  ;;  %v4732_v23 = vmul.f32 %v4694_v11, %v8848_v9  ;;  %v4733_v31 = vmul.f32 %v4693_v57, %v8850_v10 }
0x236a   :  { %v4735_v56 = vpack.c.bf16 %v4720_v42, %v4719_v61  ;;  %v4736_v12 = vpack.c.bf16 %v4722_v0, %v4721_v33  ;;  %v4737_v35 = vpack.c.bf16 %v4724_v37, %v4723_v51  ;;  %v4738_v29 = vpack.c.bf16 %v4726_v30, %v4725_v41 }
0x236b   :  { %v4739_v54 = vpack.c.bf16 %v4728_v13, %v4727_v25  ;;  %v4740_v15 = vpack.c.bf16 %v4730_v26, %v4729_v46  ;;  %v4741_v32 = vpack.c.bf16 %v4732_v23, %v4731_v63  ;;  %v4734_v16 = vmul.f32 %v4694_v11, %v8850_v10  ;;  %v11092_v13 = vld [vmem:[#allocation21_spill] sm:$0xff] }
0x236c   :  { %7557 = vmatpush3.bf16.msra.mxu0 %v4735_v56  ;;  %v4757_v57 = vsel %vm360_vm6, %v4714_v60, 0  ;;  %v4766_v60 = vsel %vm360_vm6, %v4717_v14, 0  ;;  %v11091_v11 = vpack.c.bf16 %v10288_v28, %v10286_v2  ;;  %v7865_v14 = vld [vmem:[#allocation7 + $0x28c] ss:$136 sps:$4 sm:$0xff]   ;;  %v11093_v23 = vld [vmem:[#allocation17_spill] sm:$0xff] }
0x236d   :  { %7558 = vmatprep.subr.bf16.mxu0 %v11061_v17  ;;  %v4742_v21 = vpack.c.bf16 %v4734_v16, %v4733_v31  ;;  %v6907_v31 = vld [vmem:[#allocation12 + $0x2e] ss:$0 sm:$0xff] }
0x236e   :  { %7541 = vmatpush3.bf16.xpose.msra.mxu1 %v4754_v38  ;;  %v4763_v38 = vsel %vm360_vm6, %v4716_v18, 0  ;;  %v7859_v18 = vld [vmem:[#allocation7 + $0x6c] ss:$136 sps:$4 sm:$0xff]  }
0x236f   :  { %7542 = vmatprep.subr.bf16.mxu1 %v11061_v17  ;;  %v11094_v56 = vld [vmem:[#allocation18_spill] sm:$0xff] }
0x2370   :  { %7559 = vmatpush3.bf16.msra.mxu0 %v4736_v12  ;;  %v11095_v12 = vld [vmem:[#allocation20_spill] sm:$0xff] }
0x2371   :  { %7560 = vmatprep.subr.bf16.mxu0 %v11061_v17 }
0x2374   :  { %7561 = vmatpush3.bf16.msra.mxu0 %v4737_v35 }
0x2375   :  { %7562 = vmatprep.subr.bf16.mxu0 %v11061_v17 }
0x2376   :  { %7543 = vmatpush3.bf16.xpose.msra.mxu1 %v4757_v57 }
0x2377   :  { %7544 = vmatprep.subr.bf16.mxu1 %v11061_v17 }
0x2378   :  { %7563 = vmatpush3.bf16.msra.mxu0 %v4738_v29  ;;  %v6908_v29 = vld [vmem:[#allocation12 + $0x2f] ss:$0 sm:$0xff] }
0x2379   :  { %7564 = vmatprep.subr.bf16.mxu0 %v11061_v17 }
0x237c   :  { %7565 = vmatpush3.bf16.msra.mxu0 %v4739_v54 }
0x237d   :  { %7566 = vmatprep.subr.bf16.mxu0 %v11061_v17 }
0x237e   :  { %7545 = vmatpush3.bf16.xpose.msra.mxu1 %v4760_v4 }
0x237f   :  { %7546 = vmatprep.subr.bf16.mxu1 %v11061_v17 }
0x2380   :  { %7567 = vmatpush3.bf16.msra.mxu0 %v4740_v15 }
0x2381   :  { %7568 = vmatprep.subr.bf16.mxu0 %v11061_v17 }
0x2384   :  { %7569 = vmatpush3.bf16.msra.mxu0 %v4741_v32 }
0x2385   :  { %7570 = vmatprep.subr.bf16.mxu0 %v11061_v17 }
0x2386   :  { %7547 = vmatpush3.bf16.xpose.msra.mxu1 %v4763_v38 }
0x2387   :  { %7548 = vmatprep.subr.bf16.mxu1 %v11061_v17 }
0x2388   :  { %7571 = vmatpush3.bf16.msra.mxu0 %v4742_v21  ;;  %v7864_v21 = vld [vmem:[#allocation7 + $0x180] ss:$136 sps:$4 sm:$0xff]  }
0x2389   :  { %7576 = vmatprep.subr.bf16.mxu0 %v11061_v17 }
0x238e   :  { %7549 = vmatpush3.bf16.xpose.msra.mxu1 %v4766_v60  ;;  %v11096_v60 = vld [vmem:[#allocation22_spill] sm:$0xff] }
0x238f   :  { %7550 = vmatprep.subr.bf16.mxu1 %v11061_v17 }
0x2396   :  { %7551 = vmatpush3.bf16.xpose.msra.mxu1 %v4769_v19 }
0x2397   :  { %5380 = vmatprep.subr.bf16.mxu1 %v7861_v39 }
0x239d   :  { %7553 = vmatmul.mubr.msk.bf16.vlgmr.msra.gmra.mrb[64].mxu1 %vm360_vm6, %v11091_v11  ;;  %v11097_v11 = vld [vmem:[#allocation23_spill] sm:$0xff] }
0x239e   :  { %5381 = vmatpush1.bf16.msra.mxu1 %v7859_v18  ;;  %5412 = vmatprep.mubr.bf16.mxu1 %v11062_v45 }
0x239f   :  { %5382 = vmatprep.subr.bf16.mxu1 %v7864_v21 }
0x23a2   :  { %5383 = vmatpush1.bf16.msra.mxu1 %v7862_v22 }
0x23a3   :  { %5384 = vmatprep.subr.bf16.mxu1 %v7867_v52 }
0x23a6   :  { %5385 = vmatpush1.bf16.msra.mxu1 %v7865_v14 }
0x23a7   :  { %5386 = vmatprep.subr.bf16.mxu1 %v7870_v47 }
0x23aa   :  { %5387 = vmatpush1.bf16.msra.mxu1 %v7868_v55 }
0x23ab   :  { %7620 = vmatprep.subr.bf16.mxu1 %v11061_v17 }
0x23ad   :  { %6906 = vmatmul.mubr.msk.bf16.vlgmr.msra.gmra.mrb[68].mxu1 %vm360_vm6, %v9919_v36 }
0x23ae   :  { %7636 = vmatprep.mubr.msk.bf16.mxu1 %vm8556_vm0, %v11061_v17 }
0x2470   :  { %v4805_v2 = vpop.f32.mrb[64].mxu1 }
0x2471   :  { %v10393_v28 = vmul.f32 0.35355338, %v4805_v2  ;;  %v7554_v61 = vpop.f32.mrb[65].mxu1 }
0x2472   :  { %v4808_v33 = vpop.f32.mrb[66].mxu1 }
0x2473   :  { %v10395_v51 = vmul.f32 0.35355338, %v4808_v33  ;;  %v7555_v41 = vpop.f32.mrb[67].mxu1  ;;  %v10399_v25 = vadd.f32 %v10393_v28, %v9658_v34  ;;  %v10409_v63 = vadd.f32 %v10393_v28, %v9662_v43  ;;  %v10435_v30 = vadd.f32 %v10393_v28, %v9682_v27 }
0x2474   :  { %v10453_v27 = vadd.f32 %v10393_v28, %v11095_v12 }
0x2475   :  { %v4840_v46 = vsel %vm660_vm8, %v10399_v25, -inf  ;;  %v10405_v36 = vadd.f32 %v10395_v51, %v9660_v20  ;;  %v10415_v0 = vadd.f32 %v10395_v51, %v9666_v40  ;;  %v4872_v34 = vsel %vm699_vm10, %v10409_v63, -inf }
0x2476   :  { %4841 = vmax.xlane.f32.xlu1 %v4840_v46  ;;  %v10421_v20 = vadd.f32 %v10393_v28, %v9664_v7  ;;  %v10427_v37 = vadd.f32 %v10395_v51, %v9670_v1  ;;  %v10431_v40 = vadd.f32 %v10393_v28, %v9668_v6  ;;  %v10441_v26 = vadd.f32 %v10395_v51, %v11092_v13 }
0x2477   :  { %v4843_v42 = vsel %vm660_vm8, %v10405_v36, -inf  ;;  %v4875_v43 = vsel %vm699_vm10, %v10415_v0, -inf  ;;  %v10445_v1 = vadd.f32 %v10393_v28, %v11093_v23  ;;  %v10449_v6 = vadd.f32 %v10395_v51, %v11094_v56 }
0x2478   :  { %4844 = vmax.xlane.f32.xlu0 %v4843_v42  ;;  %v4904_v7 = vsel %vm738_vm7, %v10421_v20, -inf  ;;  %v4907_v35 = vsel %vm738_vm7, %v10427_v37, -inf  ;;  %v4936_v15 = vsel %vm777_vm9, %v10431_v40, -inf  ;;  %v4968_v32 = vsel %vm816_vm11, %v10435_v30, -inf }
0x2479   :  { %v4939_v4 = vsel %vm777_vm9, %v10441_v26, -inf  ;;  %v5000_v38 = vsel %vm855_vm12, %v10445_v1, -inf  ;;  %v10469_v39 = vadd.f32 %v10395_v51, %v11096_v60  ;;  %v4971_v18 = vsel %vm816_vm11, %v10449_v6, -inf }
0x247a   :  { %4873 = vmax.xlane.f32.xlu1 %v4872_v34  ;;  %v5032_v21 = vsel %vm894_vm13, %v10453_v27, -inf  ;;  %v10477_v22 = vadd.f32 %v10395_v51, %v11097_v11 }
0x247b   :  { %v5003_v49 = vsel %vm855_vm12, %v10469_v39, -inf }
0x247c   :  { %4876 = vmax.xlane.f32.xlu0 %v4875_v43 }
0x247e   :  { %4905 = vmax.xlane.f32.xlu1 %v4904_v7 }
0x2480   :  { %4908 = vmax.xlane.f32.xlu0 %v4907_v35  ;;  %v5414_v54 = vpop.f32.mrb[68].mxu1 }
0x2481   :  { %v10461_v16 = vadd.f32 %v6907_v31, %v5414_v54  ;;  %v5416_v57 = vpop.f32.mrb[69].mxu1 }
0x2482   :  { %v5439_v24 = vadd.f32 %v6908_v29, %v5416_v57  ;;  %4937 = vmax.xlane.f32.xlu1 %v4936_v15  ;;  %v5418_v19 = vpop.f32.mrb[70].mxu1 }
0x2483   :  { %v10479_v52 = vadd.f32 %v6907_v31, %v5418_v19  ;;  %v5420_v14 = vpop.f32.mrb[71].mxu1  ;;  %v10483_v47 = vmul.f32 %v10461_v16, %v8835_v58  ;;  %v10487_v55 = vmul.f32 %v10461_v16, %v8838_v59  ;;  %v10491_v2 = vmul.f32 %v10461_v16, %v8840_v62 }
0x2484   :  { %v5440_v61 = vadd.f32 %v6908_v29, %v5420_v14  ;;  %4940 = vmax.xlane.f32.xlu0 %v4939_v4  ;;  %v5465_v33 = vmul.f32 %v5439_v24, %v8835_v58  ;;  %v5467_v41 = vmul.f32 %v5439_v24, %v8838_v59  ;;  %v5469_v46 = vmul.f32 %v5439_v24, %v8840_v62 }
0x2485   :  { %v10497_v42 = vmul.f32 %v5439_v24, %v8842_v3  ;;  %v10500_v34 = vmul.f32 %v5439_v24, %v11070_v50  ;;  %v10503_v43 = vmul.f32 %v5439_v24, %v8846_v5  ;;  %v10506_v7 = vmul.f32 %v5439_v24, %v8848_v9 }
0x2486   :  { %4969 = vmax.xlane.f32.xlu1 %v4968_v32  ;;  %v5466_v13 = vmul.f32 %v5440_v61, %v8835_v58  ;;  %v5468_v23 = vmul.f32 %v5440_v61, %v8838_v59  ;;  %v5470_v31 = vmul.f32 %v5440_v61, %v8840_v62  ;;  %v5472_v56 = vmul.f32 %v5440_v61, %v8842_v3 }
0x2487   :  { %v5474_v12 = vmul.f32 %v5440_v61, %v11070_v50  ;;  %v5476_v35 = vmul.f32 %v5440_v61, %v8846_v5  ;;  %v5478_v29 = vmul.f32 %v5440_v61, %v8848_v9  ;;  %v5479_v54 = vmul.f32 %v5439_v24, %v8850_v10 }
0x2488   :  { %4972 = vmax.xlane.f32.xlu0 %v4971_v18  ;;  %v5481_v15 = vpack.c.bf16 %v5466_v13, %v5465_v33  ;;  %v5482_v57 = vpack.c.bf16 %v5468_v23, %v5467_v41  ;;  %v5483_v32 = vpack.c.bf16 %v5470_v31, %v5469_v46  ;;  %v5484_v4 = vpack.c.bf16 %v5472_v56, %v10497_v42  ;;  %v8374_v13 = vld [vmem:[#allocation4 + $0x8] sm:$0xff] }
0x2489   :  { %v5485_v60 = vpack.c.bf16 %v5474_v12, %v10500_v34  ;;  %v5486_v19 = vpack.c.bf16 %v5476_v35, %v10503_v43  ;;  %v5487_v11 = vpack.c.bf16 %v5478_v29, %v10506_v7  ;;  %v5480_v14 = vmul.f32 %v5440_v61, %v8850_v10 }
0x248a   :  { %5001 = vmax.xlane.f32.xlu1 %v5000_v38  ;;  %7621 = vmatpush3.bf16.msra.mxu1 %v5481_v15  ;;  %v10525_v24 = vmul.f32 %v10479_v52, %v8835_v58  ;;  %v10529_v18 = vmul.f32 %v10479_v52, %v8838_v59  ;;  %v10533_v33 = vmul.f32 %v10479_v52, %v8840_v62  ;;  %v5035_v23 = vsel %vm894_vm13, %v10477_v22, -inf }
0x248b   :  { %7622 = vmatprep.subr.bf16.mxu1 %v11061_v17  ;;  %v5488_v61 = vpack.c.bf16 %v5480_v14, %v5479_v54  ;;  %v10538_v38 = vmul.f32 %v10461_v16, %v8842_v3  ;;  %v10542_v41 = vmul.f32 %v10479_v52, %v8842_v3  ;;  %v10546_v58 = vmul.f32 %v10461_v16, %v11070_v50  ;;  %v8373_v3 = vld [vmem:[#allocation4] sm:$0xff] }
0x248c   :  { %5004 = vmax.xlane.f32.xlu0 %v5003_v49  ;;  %v5457_v59 = vpack.c.bf16 %v10525_v24, %v10483_v47  ;;  %v5458_v62 = vpack.c.bf16 %v10529_v18, %v10487_v55  ;;  %v10556_v42 = vmul.f32 %v10479_v52, %v11070_v50  ;;  %v10559_v34 = vadd.f32 %v8373_v3, %v10393_v28 }
0x248d   :  { %v10565_v43 = vmul.f32 %v10461_v16, %v8846_v5  ;;  %v10569_v7 = vmul.f32 %v10479_v52, %v8846_v5  ;;  %v10572_v50 = vadd.f32 %v8374_v13, %v10395_v51  ;;  %v10583_v5 = vmul.f32 %v10461_v16, %v8848_v9 }
0x248e   :  { %5033 = vmax.xlane.f32.xlu1 %v5032_v21  ;;  %7623 = vmatpush3.bf16.msra.mxu1 %v5482_v57  ;;  %v10587_v21 = vmul.f32 %v10479_v52, %v8848_v9  ;;  %v10591_v51 = vmul.f32 %v10461_v16, %v8850_v10  ;;  %v10595_v56 = vmul.f32 %v10479_v52, %v8850_v10  ;;  %v4816_v12 = vsel %vm174_vm3, %v10559_v34, -inf }
0x248f   :  { %7624 = vmatprep.subr.bf16.mxu1 %v11061_v17  ;;  %v4819_v29 = vsel %vm174_vm3, %v10572_v50, -inf  ;;  %v11099_v24 = vpack.c.bf16 %v10542_v41, %v10538_v38  ;;  %v11100_v55 = vpack.c.bf16 %v10556_v42, %v10546_v58  ;;  %v6892_v42 = vld [vmem:[#allocation12 + $0x2d] ss:$0 sm:$0xff] }
0x2490   :  { %5036 = vmax.xlane.f32.xlu0 %v5035_v23  ;;  %v11102_v38 = vpack.c.bf16 %v10587_v21, %v10583_v5  ;;  %v11103_v58 = vpack.c.bf16 %v10595_v56, %v10591_v51 }
0x2491   :  { %v5506_v18 = vsel %vm360_vm6, %v11100_v55, 0  ;;  %v11116_v55 = vld [vmem:[#allocation36_spill] sm:$0xff] }
0x2492   :  { %4817 = vmax.xlane.f32.xlu1 %v4816_v12  ;;  %7625 = vmatpush3.bf16.msra.mxu1 %v5483_v32  ;;  %v5512_v41 = vsel %vm360_vm6, %v11102_v38, 0 }
0x2493   :  { %7626 = vmatprep.subr.bf16.mxu1 %v11061_v17 }
0x2494   :  { %4820 = vmax.xlane.f32.xlu0 %v4819_v29 }
0x2496   :  { %7627 = vmatpush3.bf16.msra.mxu1 %v5484_v4 }
0x2497   :  { %7628 = vmatprep.subr.bf16.mxu1 %v11061_v17 }
0x249a   :  { %7629 = vmatpush3.bf16.msra.mxu1 %v5485_v60 }
0x249b   :  { %7630 = vmatprep.subr.bf16.mxu1 %v11061_v17 }
0x249e   :  { %7631 = vmatpush3.bf16.msra.mxu1 %v5486_v19 }
0x249f   :  { %7632 = vmatprep.subr.bf16.mxu1 %v11061_v17 }
0x24a2   :  { %7633 = vmatpush3.bf16.msra.mxu1 %v5487_v11 }
0x24a3   :  { %7634 = vmatprep.subr.bf16.mxu1 %v11061_v17 }
0x24a6   :  { %7635 = vmatpush3.bf16.msra.mxu1 %v5488_v61 }
0x24a7   :  { %7640 = vmatprep.subr.bf16.mxu1 %v11061_v17 }
0x2503   :  { %v4842_v10 = vpop.xlane.xlu1 %4841 }
0x2504   :  { %v4846_v16 = vsub.f32 %v10399_v25, %v4842_v10 }
0x2505   :  { %v4845_v52 = vpop.xlane.xlu0 %4844 }
0x2506   :  { %v4848_v54 = vmul.f32 1.442695, %v4846_v16  ;;  %v4847_v16 = vsub.f32 %v10405_v36, %v4845_v52 }
0x2507   :  { %v4874_v15 = vpop.xlane.xlu1 %4873 }
0x2508   :  { %8227 = vpow2.f32 %v4848_v54  ;;  %v4878_v57 = vsub.f32 %v10409_v63, %v4874_v15 }
0x2509   :  { %v4877_v32 = vpop.xlane.xlu0 %4876 }
0x250a   :  { %v4880_v4 = vmul.f32 1.442695, %v4878_v57  ;;  %v4879_v60 = vsub.f32 %v10415_v0, %v4877_v32 }
0x250b   :  { %v4906_v19 = vpop.xlane.xlu1 %4905 }
0x250c   :  { %8229 = vpow2.f32 %v4880_v4  ;;  %v4882_v11 = vmul.f32 1.442695, %v4879_v60  ;;  %v4910_v14 = vsub.f32 %v10421_v20, %v4906_v19  ;;  %v4850_v4 = vmul.f32 1.442695, %v4847_v16 }
0x250d   :  { %v4909_v61 = vpop.xlane.xlu0 %4908 }
0x250e   :  { %v4912_v3 = vmul.f32 1.442695, %v4910_v14  ;;  %v4911_v13 = vsub.f32 %v10427_v37, %v4909_v61  ;;  %8231 = vpow2.f32 %v4882_v11 }
0x250f   :  { %v4938_v25 = vpop.xlane.xlu1 %4937 }
0x2510   :  { %8233 = vpow2.f32 %v4912_v3  ;;  %v4914_v23 = vmul.f32 1.442695, %v4911_v13  ;;  %v4942_v12 = vsub.f32 %v10431_v40, %v4938_v25 }
0x2511   :  { %v4941_v63 = vpop.xlane.xlu0 %4940 }
0x2512   :  { %v10617_v29 = vpop.eup %8227  ;;  %v4944_v10 = vmul.f32 1.442695, %v4942_v12  ;;  %v4943_v0 = vsub.f32 %v10441_v26, %v4941_v63  ;;  %8235 = vpow2.f32 %v4914_v23 }
0x2513   :  { %v4970_v20 = vpop.xlane.xlu1 %4969  ;;  %4854 = vrot.lane.b32.xlu1 %v10617_v29, %s8561_s22 }
0x2514   :  { %8237 = vpow2.f32 %v4944_v10  ;;  %v4946_v37 = vmul.f32 1.442695, %v4943_v0  ;;  %v4974_v54 = vsub.f32 %v10435_v30, %v4970_v20 }
0x2515   :  { %v4973_v15 = vpop.xlane.xlu0 %4972 }
0x2516   :  { %v10624_v57 = vpop.eup %8229  ;;  %v4976_v40 = vmul.f32 1.442695, %v4974_v54  ;;  %v4975_v32 = vsub.f32 %v10449_v6, %v4973_v15  ;;  %8239 = vpow2.f32 %v4946_v37 }
0x2517   :  { %v5002_v26 = vpop.xlane.xlu1 %5001  ;;  %4886 = vrot.lane.b32.xlu1 %v10624_v57, %s8560_s4 }
0x2518   :  { %8241 = vpow2.f32 %v4976_v40  ;;  %v4978_v36 = vmul.f32 1.442695, %v4975_v32  ;;  %v5006_v52 = vsub.f32 %v10445_v1, %v5002_v26  ;;  %v10630_v60 = vpop.eup %8231 }
0x2519   :  { %v5005_v19 = vpop.xlane.xlu0 %5004  ;;  %8243 = vpow2.f32 %v4850_v4 }
0x251a   :  { %v10632_v30 = vpop.eup %8233  ;;  %v5007_v11 = vsub.f32 %v10469_v39, %v5005_v19  ;;  %v5008_v14 = vmul.f32 1.442695, %v5006_v52  ;;  %8245 = vpow2.f32 %v4978_v36 }
0x251b   :  { %v5034_v6 = vpop.xlane.xlu1 %5033  ;;  %4888 = vrot.lane.b32.xlu1 %v10630_v60, %s8560_s4  ;;  %4918 = vrot.lane.b32.xlu0 %v10632_v30, %s8559_s17 }
0x251c   :  { %v5010_v61 = vmul.f32 1.442695, %v5007_v11  ;;  %v5038_v1 = vsub.f32 %v10453_v27, %v5034_v6  ;;  %v10640_v3 = vpop.eup %8235  ;;  %8247 = vpow2.f32 %v5008_v14 }
0x251d   :  { %v5037_v13 = vpop.xlane.xlu0 %5036 }
0x251e   :  { %v10642_v25 = vpop.eup %8237  ;;  %v5039_v39 = vsub.f32 %v10477_v22, %v5037_v13  ;;  %v5040_v23 = vmul.f32 1.442695, %v5038_v1  ;;  %8249 = vpow2.f32 %v5010_v61 }
0x251f   :  { %4920 = vrot.lane.b32.xlu1 %v10640_v3, %s8559_s17  ;;  %4950 = vrot.lane.b32.xlu0 %v10642_v25, %s8546_s8  ;;  %v4818_v54 = vpop.xlane.xlu1 %4817 }
0x2520   :  { %v5042_v12 = vmul.f32 1.442695, %v5039_v39  ;;  %v10649_v63 = vpop.eup %8239  ;;  %8251 = vpow2.f32 %v5040_v23  ;;  %v4822_v15 = vsub.f32 %v10559_v34, %v4818_v54 }
0x2521   :  { %v4821_v40 = vpop.xlane.xlu0 %4820 }
0x2522   :  { %v10651_v27 = vpop.eup %8241  ;;  %8253 = vpow2.f32 %v5042_v12  ;;  %v4824_v32 = vmul.f32 1.442695, %v4822_v15  ;;  %v4823_v4 = vsub.f32 %v10572_v50, %v4821_v40 }
0x2523   :  { %4952 = vrot.lane.b32.xlu1 %v10649_v63, %s8546_s8  ;;  %4982 = vrot.lane.b32.xlu0 %v10651_v27, %s8558_s13  ;;  %v10657_v22 = vpop.eup %8243 }
0x2524   :  { %v10659_v10 = vpop.eup %8245  ;;  %8255 = vpow2.f32 %v4824_v32  ;;  %v4826_v26 = vmul.f32 1.442695, %v4823_v4 }
0x2526   :  { %v10665_v0 = vpop.eup %8247  ;;  %8257 = vpow2.f32 %v4826_v26 }
0x2527   :  { %4984 = vrot.lane.b32.xlu1 %v10659_v10, %s8558_s13  ;;  %4856 = vrot.lane.b32.xlu0 %v10657_v22, %s8561_s22 }
0x2528   :  { %v10667_v16 = vpop.eup %8249 }
0x252a   :  { %v10673_v20 = vpop.eup %8251 }
0x252b   :  { %5016 = vrot.lane.b32.xlu1 %v10667_v16, %s8557_s29  ;;  %5014 = vrot.lane.b32.xlu0 %v10665_v0, %s8557_s29 }
0x252c   :  { %v10675_v37 = vpop.eup %8253 }
0x252e   :  { %v10683_v36 = vpop.eup %8255 }
0x252f   :  { %5048 = vrot.lane.b32.xlu1 %v10675_v37, %s8552_s15  ;;  %5046 = vrot.lane.b32.xlu0 %v10673_v20, %s8552_s15  ;;  %v4828_v52 = vsel %vm174_vm3, %v10683_v36, 0.0 }
0x2530   :  { %v10687_v19 = vpop.eup %8257 }
0x2531   :  { %v4831_v11 = vsel %vm174_vm3, %v10687_v19, 0.0 }
0x254e   :  { %4829 = vadd.xlane.f32.xlu0 %v4828_v52 }
0x2553   :  { %4832 = vadd.xlane.f32.xlu1 %v4831_v11 }
0x2585   :  { %v4855_v34 = vpop.permute.xlu1 %4854 }
0x2586   :  { %v4860_v14 = vsel %vm174_vm3, %v4855_v34, 0.0 }
0x2587   :  { %4861 = vadd.xlane.f32.xlu0 %v4860_v14 }
0x2589   :  { %v4887_v50 = vpop.permute.xlu1 %4886 }
0x258a   :  { %v4892_v6 = vsel %vm174_vm3, %v4887_v50, 0.0 }
0x258b   :  { %4893 = vadd.xlane.f32.xlu1 %v4892_v6 }
0x258d   :  { %v4919_v61 = vpop.permute.xlu0 %4918  ;;  %v4889_v13 = vpop.permute.xlu1 %4888 }
0x258e   :  { %v4924_v1 = vsel %vm174_vm3, %v4919_v61, 0.0  ;;  %v4895_v52 = vsel %vm174_vm3, %v4889_v13, 0.0 }
0x258f   :  { %4925 = vadd.xlane.f32.xlu1 %v4924_v1 }
0x2591   :  { %v4951_v39 = vpop.permute.xlu0 %4950  ;;  %v4921_v15 = vpop.permute.xlu1 %4920 }
0x2592   :  { %v4956_v23 = vsel %vm174_vm3, %v4951_v39, 0.0  ;;  %v4927_v14 = vsel %vm174_vm3, %v4921_v15, 0.0 }
0x2593   :  { %4957 = vadd.xlane.f32.xlu1 %v4956_v23 }
0x2595   :  { %v4983_v12 = vpop.permute.xlu0 %4982  ;;  %v4953_v4 = vpop.permute.xlu1 %4952 }
0x2596   :  { %v4988_v54 = vsel %vm174_vm3, %v4983_v12, 0.0  ;;  %v4959_v61 = vsel %vm174_vm3, %v4953_v4, 0.0 }
0x2597   :  { %4989 = vadd.xlane.f32.xlu1 %v4988_v54 }
0x2599   :  { %v4857_v40 = vpop.permute.xlu0 %4856  ;;  %v4985_v6 = vpop.permute.xlu1 %4984 }
0x259a   :  { %v4863_v32 = vsel %vm174_vm3, %v4857_v40, 0.0  ;;  %v4991_v39 = vsel %vm174_vm3, %v4985_v6, 0.0 }
0x259b   :  { %4864 = vadd.xlane.f32.xlu0 %v4863_v32 }
0x259d   :  { %v5015_v26 = vpop.permute.xlu0 %5014  ;;  %v5017_v1 = vpop.permute.xlu1 %5016 }
0x259e   :  { %v5020_v11 = vsel %vm174_vm3, %v5015_v26, 0.0  ;;  %v5023_v13 = vsel %vm174_vm3, %v5017_v1, 0.0 }
0x259f   :  { %4896 = vadd.xlane.f32.xlu0 %v4895_v52  ;;  %5021 = vadd.xlane.f32.xlu1 %v5020_v11 }
0x25a1   :  { %v5047_v34 = vpop.permute.xlu0 %5046  ;;  %v5049_v23 = vpop.permute.xlu1 %5048 }
0x25a2   :  { %v5052_v50 = vsel %vm174_vm3, %v5047_v34, 0.0  ;;  %v5055_v12 = vsel %vm174_vm3, %v5049_v23, 0.0 }
0x25a3   :  { %4928 = vadd.xlane.f32.xlu0 %v4927_v14  ;;  %5053 = vadd.xlane.f32.xlu1 %v5052_v50 }
0x25a7   :  { %4960 = vadd.xlane.f32.xlu0 %v4959_v61 }
0x25ab   :  { %4992 = vadd.xlane.f32.xlu0 %v4991_v39 }
0x25af   :  { %5024 = vadd.xlane.f32.xlu0 %v5023_v13 }
0x25b3   :  { %5056 = vadd.xlane.f32.xlu0 %v5055_v12 }
0x25db   :  { %v4830_v40 = vpop.xlane.xlu0 %4829 }
0x25dc   :  { %8259 = vrcp.f32 %v4830_v40 }
0x25e0   :  { %v4833_v54 = vpop.xlane.xlu1 %4832 }
0x25e1   :  { %8261 = vrcp.f32 %v4833_v54 }
0x25e6   :  { %v8260_v1 = vpop.eup %8259 }
0x25eb   :  { %v8262_v13 = vpop.eup %8261 }
0x25ec   :  { %v4837_v31 = vmul.f32 %v8262_v13, %v10687_v19 }
0x2614   :  { %v4862_v26 = vpop.xlane.xlu0 %4861 }
0x2615   :  { %8263 = vrcp.f32 %v4862_v26 }
0x2618   :  { %v4894_v15 = vpop.xlane.xlu1 %4893 }
0x2619   :  { %8265 = vrcp.f32 %v4894_v15 }
0x261c   :  { %v4926_v32 = vpop.xlane.xlu1 %4925 }
0x261d   :  { %8267 = vrcp.f32 %v4926_v32 }
0x261f   :  { %v8264_v23 = vpop.eup %8263 }
0x2620   :  { %v4958_v11 = vpop.xlane.xlu1 %4957 }
0x2621   :  { %8269 = vrcp.f32 %v4958_v11 }
0x2623   :  { %v8266_v12 = vpop.eup %8265 }
0x2624   :  { %v4990_v34 = vpop.xlane.xlu1 %4989 }
0x2625   :  { %8271 = vrcp.f32 %v4990_v34 }
0x2627   :  { %v8268_v15 = vpop.eup %8267 }
0x2628   :  { %v4865_v52 = vpop.xlane.xlu0 %4864  ;;  %v4932_v28 = vmul.f32 %v8268_v15, %v10632_v30  ;;  %v7874_v15 = vld [vmem:[#allocation7 + $0x394] ss:$136 sps:$4 sm:$0xff]  }
0x2629   :  { %8273 = vrcp.f32 %v4865_v52 }
0x262b   :  { %v8270_v40 = vpop.eup %8269 }
0x262c   :  { %v4897_v4 = vpop.xlane.xlu0 %4896  ;;  %v5022_v50 = vpop.xlane.xlu1 %5021  ;;  %v4964_v46 = vmul.f32 %v8270_v40, %v10642_v25 }
0x262d   :  { %8275 = vrcp.f32 %v5022_v50 }
0x262e   :  { %8277 = vrcp.f32 %v4897_v4 }
0x262f   :  { %v8272_v32 = vpop.eup %8271 }
0x2630   :  { %v4929_v14 = vpop.xlane.xlu0 %4928  ;;  %v5054_v39 = vpop.xlane.xlu1 %5053 }
0x2631   :  { %8279 = vrcp.f32 %v4929_v14  ;;  %v4868_v14 = vmul.f32 %v8264_v23, %v10617_v29 }
0x2633   :  { %v8274_v26 = vpop.eup %8273 }
0x2634   :  { %v4961_v6 = vpop.xlane.xlu0 %4960 }
0x2635   :  { %8281 = vrcp.f32 %v4961_v6  ;;  %v4869_v6 = vmul.f32 %v8274_v26, %v10657_v22 }
0x2637   :  { %v8276_v52 = vpop.eup %8275 }
0x2638   :  { %v4993_v61 = vpop.xlane.xlu0 %4992  ;;  %v8278_v4 = vpop.eup %8277  ;;  %v5028_v19 = vmul.f32 %v8276_v52, %v10665_v0 }
0x2639   :  { %8283 = vrcp.f32 %v4993_v61  ;;  %v4900_v61 = vmul.f32 %v8266_v12, %v10624_v57  ;;  %v4996_v57 = vmul.f32 %v8272_v32, %v10651_v27 }
0x263a   :  { %8285 = vrcp.f32 %v5054_v39  ;;  %v4901_v39 = vmul.f32 %v8278_v4, %v10630_v60  ;;  %v5063_v60 = vsel %vm174_vm3, %v4837_v31, %v4869_v6 }
0x263b   :  { %v8280_v34 = vpop.eup %8279 }
0x263c   :  { %v5025_v54 = vpop.xlane.xlu0 %5024  ;;  %v5065_v30 = vsel %vm927_vm14, %v5063_v60, %v4901_v39 }
0x263d   :  { %8287 = vrcp.f32 %v5025_v54  ;;  %v4836_v54 = vmul.f32 %v8260_v1, %v10683_v36 }
0x263f   :  { %v8282_v50 = vpop.eup %8281  ;;  %v5062_v22 = vsel %vm174_vm3, %v4836_v54, %v4868_v14 }
0x2640   :  { %v5057_v11 = vpop.xlane.xlu0 %5056  ;;  %v4965_v29 = vmul.f32 %v8282_v50, %v10649_v63  ;;  %v5064_v36 = vsel %vm927_vm14, %v5062_v22, %v4900_v61 }
0x2641   :  { %8289 = vrcp.f32 %v5057_v11  ;;  %v4933_v11 = vmul.f32 %v8280_v34, %v10640_v3  ;;  %v5066_v25 = vsel %vm930_vm15, %v5064_v36, %v4932_v28  ;;  %v6884_v34 = vld [vmem:[#allocation12 + $0x2a] ss:$0 sm:$0xff] }
0x2642   :  { %v5068_v27 = vsel %vm360_vm6, %v5066_v25, %v4964_v46  ;;  %v7872_v46 = vld [vmem:[#allocation7 + $0x174] ss:$136 sps:$4 sm:$0xff]  }
0x2643   :  { %v8284_v9 = vpop.eup %8283  ;;  %v5067_v1 = vsel %vm930_vm15, %v5065_v30, %v4933_v11 }
0x2644   :  { %v8286_v35 = vpop.eup %8285  ;;  %v4997_v23 = vmul.f32 %v8284_v9, %v10659_v10  ;;  %v5069_v31 = vsel %vm360_vm6, %v5067_v1, %v4965_v29  ;;  %v5070_v10 = vsel %vm935_vm1, %v5068_v27, %v4996_v57  ;;  %v7877_v27 = vld [vmem:[#allocation7 + $0x288] ss:$136 sps:$4 sm:$0xff]  }
0x2645   :  { %v5060_v63 = vmul.f32 %v8286_v35, %v10673_v20  ;;  %v5072_v12 = vsel %vm938_vm2, %v5070_v10, %v5028_v19 }
0x2646   :  { %v5071_v0 = vsel %vm935_vm1, %v5069_v31, %v4997_v23  ;;  %v7878_v31 = vld [vmem:[#allocation7 + $0x398] ss:$136 sps:$4 sm:$0xff]  }
0x2647   :  { %v8288_v49 = vpop.eup %8287  ;;  %v5074_v28 = vsel %vm941_vm4, %v5072_v12, %v5060_v63 }
0x2648   :  { %v5029_v3 = vmul.f32 %v8288_v49, %v10667_v16  ;;  %v7871_v16 = vld [vmem:[#allocation7 + $0x64] ss:$136 sps:$4 sm:$0xff]  }
0x264a   :  { %v5073_v49 = vsel %vm938_vm2, %v5071_v0, %v5029_v3 }
0x264b   :  { %v8290_v13 = vpop.eup %8289 }
0x264c   :  { %v5061_v9 = vmul.f32 %v8290_v13, %v10675_v37  ;;  %v7873_v37 = vld [vmem:[#allocation7 + $0x284] ss:$136 sps:$4 sm:$0xff]   ;;  %v7876_v13 = vld [vmem:[#allocation7 + $0x178] ss:$136 sps:$4 sm:$0xff]  }
0x264e   :  { %v5075_v35 = vsel %vm941_vm4, %v5073_v49, %v5061_v9 }
0x264f   :  { %v5076_v20 = vpack.c.bf16 %v5075_v35, %v5074_v28 }
0x2651   :  { %7573 = vmatmul.mubr.bf16.vlgmr.msra.gmra.mrb[56].mxu0 %v5076_v20 }
0x2652   :  { %7577 = vmatpush3.bf16.msra.mxu0 %v7871_v16  ;;  %7584 = vmatprep.mubr.msk.bf16.mxu0 %vm8556_vm0, %v11061_v17  ;;  %v6890_v16 = vld [vmem:[#allocation12 + $0x2b] ss:$0 sm:$0xff] }
0x2653   :  { %7578 = vmatprep.subr.bf16.mxu0 %v11061_v17 }
0x2656   :  { %7579 = vmatpush3.bf16.msra.mxu0 %v7872_v46 }
0x2657   :  { %7580 = vmatprep.subr.bf16.mxu0 %v11061_v17 }
0x265a   :  { %7581 = vmatpush3.bf16.msra.mxu0 %v7873_v37 }
0x265b   :  { %7582 = vmatprep.subr.bf16.mxu0 %v11061_v17 }
0x265e   :  { %7583 = vmatpush3.bf16.msra.mxu0 %v7874_v15 }
0x265f   :  { %7588 = vmatprep.subr.bf16.mxu0 %v11061_v17 }
0x2724   :  { %v5111_v40 = vpop.f32.mrb[56].mxu0 }
0x2725   :  { %v7574_v32 = vpop.f32.mrb[57].mxu0 }
0x2726   :  { %v5114_v26 = vpop.f32.mrb[58].mxu0 }
0x2727   :  { %v5126_v52 = vpack.c.bf16 %v5114_v26, %v5111_v40  ;;  %v7575_v4 = vpop.f32.mrb[59].mxu0  ;;  %v6891_v40 = vld [vmem:[#allocation12 + $0x2c] ss:$0 sm:$0xff] }
0x2729   :  { %7585 = vmatmul.mubr.msk.bf16.vlgmr.msra.gmra.mrb[60].mxu0 %vm360_vm6, %v5126_v52 }
0x272a   :  { %7596 = vmatprep.mubr.msk.bf16.mxu0 %vm8556_vm0, %v11061_v17 }
0x27fc   :  { %v5195_v50 = vpop.f32.mrb[60].mxu0 }
0x27fd   :  { %v5196_v14 = vadd.f32 %v6884_v34, %v5195_v50  ;;  %v7586_v6 = vpop.f32.mrb[61].mxu0  ;;  %v5497_v50 = vsel %vm360_vm6, %v5458_v62, 0  ;;  %v5515_v62 = vsel %vm360_vm6, %v11103_v58, 0  ;;  %v8376_v58 = vld [vmem:[#allocation6 + $0x8] sm:$0xff] }
0x27fe   :  { %v5198_v61 = vpop.f32.mrb[62].mxu0 }
0x27ff   :  { %v5202_v39 = vadd.f32 %v5196_v14, %v10270_v53  ;;  %v5199_v54 = vadd.f32 %v6884_v34, %v5198_v61  ;;  %v7587_v11 = vpop.f32.mrb[63].mxu0  ;;  %v5494_v34 = vsel %vm360_vm6, %v5457_v59, 0  ;;  %v11098_v14 = vpack.c.bf16 %v10533_v33, %v10491_v2 }
0x2800   :  { %v5503_v59 = vsel %vm360_vm6, %v11099_v24, 0  ;;  %v11101_v2 = vpack.c.bf16 %v10569_v7, %v10565_v43 }
0x2801   :  { %v5203_v29 = vadd.f32 %v5199_v54, %v10272_v44  ;;  %v5206_v22 = vsel %vm360_vm6, %v5202_v39, 0.0  ;;  %v7875_v44 = vld [vmem:[#allocation7 + $0x68] ss:$136 sps:$4 sm:$0xff]   ;;  %v5500_v47 = vsel %vm360_vm6, %v11098_v14, 0 }
0x2802   :  { %5207 = vadd.xlane.f32.xlu1 %v5206_v22  ;;  %7589 = vmatpush3.bf16.msra.mxu0 %v7875_v44  ;;  %v5509_v33 = vsel %vm360_vm6, %v11101_v2, 0 }
0x2803   :  { %v5209_v57 = vsel %vm360_vm6, %v5203_v29, 0.0  ;;  %7590 = vmatprep.subr.bf16.mxu0 %v11061_v17 }
0x2804   :  { %5210 = vadd.xlane.f32.xlu0 %v5209_v57 }
0x2806   :  { %7591 = vmatpush3.bf16.msra.mxu0 %v7876_v13  ;;  %v11108_v13 = vld [vmem:[#allocation29_spill] sm:$0xff] }
0x2807   :  { %7592 = vmatprep.subr.bf16.mxu0 %v11061_v17 }
0x280a   :  { %7593 = vmatpush3.bf16.msra.mxu0 %v7877_v27 }
0x280b   :  { %7594 = vmatprep.subr.bf16.mxu0 %v11061_v17 }
0x280e   :  { %7595 = vmatpush3.bf16.msra.mxu0 %v7878_v31 }
0x280f   :  { %7600 = vmatprep.subr.bf16.mxu0 %v11061_v17 }
0x288f   :  { %v5208_v60 = vpop.xlane.xlu1 %5207 }
0x2890   :  { %v5212_v23 = vmul.f32 0.015625, %v5208_v60 }
0x2891   :  { %v5211_v36 = vpop.xlane.xlu0 %5210 }
0x2892   :  { %v5214_v19 = vsub.f32 %v5202_v39, %v5212_v23  ;;  %v5213_v30 = vmul.f32 0.015625, %v5211_v36  ;;  %v11104_v23 = vld [vmem:[#allocation24_spill] sm:$0xff] }
0x2894   :  { %v5215_v3 = vsub.f32 %v5203_v29, %v5213_v30  ;;  %v5216_v25 = vmul.f32 %v5214_v19, %v5214_v19 }
0x2896   :  { %v5218_v63 = vsel %vm360_vm6, %v5216_v25, 0.0  ;;  %v5217_v53 = vmul.f32 %v5215_v3, %v5215_v3  ;;  %v11106_v25 = vld [vmem:[#allocation27_spill] sm:$0xff] }
0x2897   :  { %5219 = vadd.xlane.f32.xlu1 %v5218_v63 }
0x2898   :  { %v5221_v1 = vsel %vm360_vm6, %v5217_v53, 0.0 }
0x2899   :  { %5222 = vadd.xlane.f32.xlu0 %v5221_v1  ;;  %v11107_v1 = vld [vmem:[#allocation26_spill] sm:$0xff] }
0x2924   :  { %v5220_v9 = vpop.xlane.xlu1 %5219 }
0x2925   :  { %v5224_v10 = vmul.f32 0.015625, %v5220_v9  ;;  %v11109_v9 = vld [vmem:[#allocation28_spill] sm:$0xff] }
0x2926   :  { %v5223_v0 = vpop.xlane.xlu0 %5222 }
0x2927   :  { %v5226_v12 = vadd.f32 1e-05, %v5224_v10  ;;  %v5225_v49 = vmul.f32 0.015625, %v5223_v0 }
0x2929   :  { %8291 = vrsqrt.f32 %v5226_v12  ;;  %v5227_v28 = vadd.f32 1e-05, %v5225_v49  ;;  %v11110_v12 = vld [vmem:[#allocation31_spill] sm:$0xff] }
0x292b   :  { %8293 = vrsqrt.f32 %v5227_v28 }
0x2933   :  { %v8292_v35 = vpop.eup %8291 }
0x2934   :  { %v5230_v20 = vmul.f32 %v8292_v35, %v5214_v19  ;;  %v11105_v19 = vld [vmem:[#allocation25_spill] sm:$0xff]  ;;  %v11111_v35 = vld [vmem:[#allocation30_spill] sm:$0xff] }
0x2935   :  { %v8294_v46 = vpop.eup %8293 }
0x2936   :  { %v5238_v37 = vmul.f32 %v6890_v16, %v5230_v20  ;;  %v5231_v15 = vmul.f32 %v8294_v46, %v5215_v3  ;;  %v11112_v46 = vld [vmem:[#allocation33_spill] sm:$0xff] }
0x2938   :  { %v5239_v32 = vmul.f32 %v6890_v16, %v5231_v15  ;;  %v10754_v26 = vadd.f32 %v6891_v40, %v5238_v37 }
0x293a   :  { %v10756_v52 = vadd.f32 %v6891_v40, %v5239_v32  ;;  %v11113_v40 = vld [vmem:[#allocation32_spill] sm:$0xff] }
0x293c   :  { %v5256_v4 = vpack.c.bf16 %v10756_v52, %v10754_v26 }
0x293e   :  { %7597 = vmatmul.mubr.msk.bf16.vlgmr.msra.gmra.mrb[64].mxu0 %vm360_vm6, %v5256_v4 }
0x293f   :  { %7601 = vmatpush3.bf16.xpose.msra.mxu0 %v5494_v34  ;;  %7616 = vmatprep.mubr.msk.bf16.mxu0 %vm8556_vm0, %v11061_v17  ;;  %v11114_v34 = vld [vmem:[#allocation35_spill] sm:$0xff] }
0x2940   :  { %7602 = vmatprep.subr.bf16.mxu0 %v11061_v17 }
0x2947   :  { %7603 = vmatpush3.bf16.xpose.msra.mxu0 %v5497_v50 }
0x2948   :  { %7604 = vmatprep.subr.bf16.mxu0 %v11061_v17 }
0x294f   :  { %7605 = vmatpush3.bf16.xpose.msra.mxu0 %v5500_v47  ;;  %v11115_v47 = vld [vmem:[#allocation34_spill] sm:$0xff] }
0x2950   :  { %7606 = vmatprep.subr.bf16.mxu0 %v11061_v17 }
0x2957   :  { %7607 = vmatpush3.bf16.xpose.msra.mxu0 %v5503_v59 }
0x2958   :  { %7608 = vmatprep.subr.bf16.mxu0 %v11061_v17 }
0x295f   :  { %7609 = vmatpush3.bf16.xpose.msra.mxu0 %v5506_v18 }
0x2960   :  { %7610 = vmatprep.subr.bf16.mxu0 %v11061_v17 }
0x2967   :  { %7611 = vmatpush3.bf16.xpose.msra.mxu0 %v5509_v33  ;;  %v8375_v33 = vld [vmem:[#allocation6] sm:$0xff] }
0x2968   :  { %7612 = vmatprep.subr.bf16.mxu0 %v11061_v17 }
0x296f   :  { %7613 = vmatpush3.bf16.xpose.msra.mxu0 %v5512_v41 }
0x2970   :  { %7614 = vmatprep.subr.bf16.mxu0 %v11061_v17 }
0x2977   :  { %7615 = vmatpush3.bf16.xpose.msra.mxu0 %v5515_v62 }
0x2a11   :  { %v5325_v43 = vpop.f32.mrb[64].mxu0 }
0x2a12   :  { %v7598_v7 = vpop.f32.mrb[65].mxu0  ;;  %v5326_v61 = vadd.f32 %v6892_v42, %v5325_v43 }
0x2a13   :  { %v5328_v6 = vpop.f32.mrb[66].mxu0 }
0x2a14   :  { %v5329_v39 = vadd.f32 %v6892_v42, %v5328_v6  ;;  %v7599_v54 = vpop.f32.mrb[67].mxu0 }
0x2a16   :  { %v5489_v11 = vpack.c.bf16 %v5329_v39, %v5326_v61 }
0x2a18   :  { %7617 = vmatmul.mubr.msk.bf16.vlgmr.msra.gmra.mrb[68].mxu0 %vm360_vm6, %v5489_v11 }
0x2aeb   :  { %v5551_v5 = vpop.f32.mrb[68].mxu0 }
0x2aec   :  { %v5558_v21 = vmul.f32 0.35355338, %v5551_v5  ;;  %v7618_v29 = vpop.f32.mrb[69].mxu0 }
0x2aed   :  { %v5554_v22 = vpop.f32.mrb[70].mxu0 }
0x2aee   :  { %v5559_v57 = vmul.f32 0.35355338, %v5554_v22  ;;  %v7619_v60 = vpop.f32.mrb[71].mxu0  ;;  %v5584_v51 = vadd.f32 %v5558_v21, %v10029_v8  ;;  %v5616_v30 = vadd.f32 %v5558_v21, %v11105_v19  ;;  %v5648_v44 = vadd.f32 %v5558_v21, %v11107_v1 }
0x2aef   :  { %v5680_v10 = vadd.f32 %v5558_v21, %v11109_v9  ;;  %v10824_v16 = vadd.f32 %v5558_v21, %v11111_v35  ;;  %v10834_v32 = vadd.f32 %v5558_v21, %v11113_v40  ;;  %v10844_v24 = vadd.f32 %v5558_v21, %v11115_v47 }
0x2af0   :  { %v5586_v56 = vsel %vm660_vm8, %v5584_v51, -inf  ;;  %v10806_v36 = vadd.f32 %v5559_v57, %v11104_v23  ;;  %v5617_v63 = vadd.f32 %v5559_v57, %v11106_v25  ;;  %v5618_v53 = vsel %vm699_vm10, %v5616_v30, -inf }
0x2af1   :  { %5587 = vmax.xlane.f32.xlu1 %v5586_v56  ;;  %v5649_v27 = vadd.f32 %v5559_v57, %v11108_v13  ;;  %v5650_v31 = vsel %vm738_vm7, %v5648_v44, -inf  ;;  %v10820_v49 = vadd.f32 %v5559_v57, %v11110_v12  ;;  %v5682_v28 = vsel %vm777_vm9, %v5680_v10, -inf }
0x2af2   :  { %v5589_v3 = vsel %vm660_vm8, %v10806_v36, -inf  ;;  %v5621_v8 = vsel %vm699_vm10, %v5617_v63, -inf  ;;  %v10829_v37 = vadd.f32 %v5559_v57, %v11112_v46  ;;  %v5714_v15 = vsel %vm816_vm11, %v10824_v16, -inf }
0x2af3   :  { %5590 = vmax.xlane.f32.xlu0 %v5589_v3  ;;  %v5653_v0 = vsel %vm738_vm7, %v5649_v27, -inf  ;;  %v5685_v20 = vsel %vm777_vm9, %v10820_v49, -inf  ;;  %v10839_v50 = vadd.f32 %v5559_v57, %v11114_v34  ;;  %v5746_v14 = vsel %vm855_vm12, %v10834_v32, -inf }
0x2af4   :  { %v5717_v4 = vsel %vm816_vm11, %v10829_v37, -inf  ;;  %v10849_v18 = vadd.f32 %v5559_v57, %v11116_v55  ;;  %v5778_v2 = vsel %vm894_vm13, %v10844_v24, -inf  ;;  %v10853_v38 = vadd.f32 %v8375_v33, %v5558_v21 }
0x2af5   :  { %5619 = vmax.xlane.f32.xlu1 %v5618_v53  ;;  %v5749_v59 = vsel %vm855_vm12, %v10839_v50, -inf  ;;  %v10857_v62 = vadd.f32 %v8376_v58, %v5559_v57 }
0x2af6   :  { %v5781_v41 = vsel %vm894_vm13, %v10849_v18, -inf  ;;  %v5562_v42 = vsel %vm174_vm3, %v10853_v38, -inf }
0x2af7   :  { %5622 = vmax.xlane.f32.xlu0 %v5621_v8  ;;  %v5565_v43 = vsel %vm174_vm3, %v10857_v62, -inf }
0x2af9   :  { %5651 = vmax.xlane.f32.xlu1 %v5650_v31 }
0x2afb   :  { %5654 = vmax.xlane.f32.xlu0 %v5653_v0 }
0x2afd   :  { %5683 = vmax.xlane.f32.xlu1 %v5682_v28 }
0x2aff   :  { %5686 = vmax.xlane.f32.xlu0 %v5685_v20 }
0x2b01   :  { %5715 = vmax.xlane.f32.xlu1 %v5714_v15 }
0x2b03   :  { %5718 = vmax.xlane.f32.xlu0 %v5717_v4 }
0x2b05   :  { %5747 = vmax.xlane.f32.xlu1 %v5746_v14 }
0x2b07   :  { %5750 = vmax.xlane.f32.xlu0 %v5749_v59 }
0x2b09   :  { %5779 = vmax.xlane.f32.xlu1 %v5778_v2 }
0x2b0b   :  { %5782 = vmax.xlane.f32.xlu0 %v5781_v41 }
0x2b0d   :  { %5563 = vmax.xlane.f32.xlu1 %v5562_v42 }
0x2b0f   :  { %5566 = vmax.xlane.f32.xlu0 %v5565_v43 }
0x2b7e   :  { %v5588_v7 = vpop.xlane.xlu1 %5587 }
0x2b7f   :  { %v5592_v6 = vsub.f32 %v5584_v51, %v5588_v7 }
0x2b80   :  { %v5591_v61 = vpop.xlane.xlu0 %5590 }
0x2b81   :  { %v5594_v39 = vmul.f32 1.442695, %v5592_v6 }
0x2b82   :  { %v5620_v54 = vpop.xlane.xlu1 %5619 }
0x2b83   :  { %8295 = vpow2.f32 %v5594_v39  ;;  %v5624_v11 = vsub.f32 %v5616_v30, %v5620_v54 }
0x2b84   :  { %v5623_v5 = vpop.xlane.xlu0 %5622 }
0x2b85   :  { %v5626_v21 = vmul.f32 1.442695, %v5624_v11  ;;  %v5625_v29 = vsub.f32 %v5617_v63, %v5623_v5  ;;  %v5593_v63 = vsub.f32 %v10806_v36, %v5591_v61 }
0x2b86   :  { %v5652_v22 = vpop.xlane.xlu1 %5651 }
0x2b87   :  { %8297 = vpow2.f32 %v5626_v21  ;;  %v5628_v57 = vmul.f32 1.442695, %v5625_v29  ;;  %v5656_v60 = vsub.f32 %v5648_v44, %v5652_v22  ;;  %v5596_v12 = vmul.f32 1.442695, %v5593_v63 }
0x2b88   :  { %v5655_v56 = vpop.xlane.xlu0 %5654 }
0x2b89   :  { %v5658_v23 = vmul.f32 1.442695, %v5656_v60  ;;  %v5657_v19 = vsub.f32 %v5649_v27, %v5655_v56  ;;  %8299 = vpow2.f32 %v5628_v57 }
0x2b8a   :  { %v5684_v3 = vpop.xlane.xlu1 %5683 }
0x2b8b   :  { %8301 = vpow2.f32 %v5658_v23  ;;  %v5660_v25 = vmul.f32 1.442695, %v5657_v19  ;;  %v5688_v51 = vsub.f32 %v5680_v10, %v5684_v3 }
0x2b8c   :  { %v5687_v53 = vpop.xlane.xlu0 %5686 }
0x2b8d   :  { %v10863_v1 = vpop.eup %8295  ;;  %v5690_v8 = vmul.f32 1.442695, %v5688_v51  ;;  %v5689_v30 = vsub.f32 %v10820_v49, %v5687_v53  ;;  %8303 = vpow2.f32 %v5660_v25 }
0x2b8e   :  { %v5716_v13 = vpop.xlane.xlu1 %5715  ;;  %5600 = vrot.lane.b32.xlu1 %v10863_v1, %s8561_s22 }
0x2b8f   :  { %8305 = vpow2.f32 %v5690_v8  ;;  %v5692_v44 = vmul.f32 1.442695, %v5689_v30  ;;  %v5720_v27 = vsub.f32 %v10824_v16, %v5716_v13 }
0x2b90   :  { %v5719_v31 = vpop.xlane.xlu0 %5718 }
0x2b91   :  { %v10870_v9 = vpop.eup %8297  ;;  %v5722_v10 = vmul.f32 1.442695, %v5720_v27  ;;  %v5721_v0 = vsub.f32 %v10829_v37, %v5719_v31  ;;  %8307 = vpow2.f32 %v5692_v44 }
0x2b92   :  { %v5748_v49 = vpop.xlane.xlu1 %5747  ;;  %5632 = vrot.lane.b32.xlu1 %v10870_v9, %s8560_s4 }
0x2b93   :  { %8309 = vpow2.f32 %v5722_v10  ;;  %v5724_v36 = vmul.f32 1.442695, %v5721_v0  ;;  %v5752_v28 = vsub.f32 %v10834_v32, %v5748_v49  ;;  %v10876_v35 = vpop.eup %8299 }
0x2b94   :  { %v5751_v20 = vpop.xlane.xlu0 %5750  ;;  %8311 = vpow2.f32 %v5596_v12 }
0x2b95   :  { %v10878_v16 = vpop.eup %8301  ;;  %v5753_v46 = vsub.f32 %v10839_v50, %v5751_v20  ;;  %v5754_v15 = vmul.f32 1.442695, %v5752_v28  ;;  %8313 = vpow2.f32 %v5724_v36 }
0x2b96   :  { %v5780_v37 = vpop.xlane.xlu1 %5779  ;;  %5634 = vrot.lane.b32.xlu1 %v10876_v35, %s8560_s4  ;;  %5664 = vrot.lane.b32.xlu0 %v10878_v16, %s8559_s17 }
0x2b97   :  { %v5756_v40 = vmul.f32 1.442695, %v5753_v46  ;;  %v5784_v32 = vsub.f32 %v10844_v24, %v5780_v37  ;;  %v10886_v4 = vpop.eup %8303  ;;  %8315 = vpow2.f32 %v5754_v15 }
0x2b98   :  { %v5783_v34 = vpop.xlane.xlu0 %5782 }
0x2b99   :  { %v10888_v14 = vpop.eup %8305  ;;  %v5785_v50 = vsub.f32 %v10849_v18, %v5783_v34  ;;  %v5786_v47 = vmul.f32 1.442695, %v5784_v32  ;;  %8317 = vpow2.f32 %v5756_v40 }
0x2b9a   :  { %5666 = vrot.lane.b32.xlu1 %v10886_v4, %s8559_s17  ;;  %5696 = vrot.lane.b32.xlu0 %v10888_v14, %s8546_s8  ;;  %v5564_v43 = vpop.xlane.xlu1 %5563 }
0x2b9b   :  { %v5788_v59 = vmul.f32 1.442695, %v5785_v50  ;;  %v10895_v55 = vpop.eup %8307  ;;  %8319 = vpow2.f32 %v5786_v47  ;;  %v5568_v7 = vsub.f32 %v10853_v38, %v5564_v43 }
0x2b9c   :  { %v5567_v6 = vpop.xlane.xlu0 %5566 }
0x2b9d   :  { %v10897_v24 = vpop.eup %8309  ;;  %8321 = vpow2.f32 %v5788_v59  ;;  %v5570_v61 = vmul.f32 1.442695, %v5568_v7  ;;  %v5569_v39 = vsub.f32 %v10857_v62, %v5567_v6 }
0x2b9e   :  { %5698 = vrot.lane.b32.xlu1 %v10895_v55, %s8546_s8  ;;  %5728 = vrot.lane.b32.xlu0 %v10897_v24, %s8558_s13  ;;  %v10903_v18 = vpop.eup %8311 }
0x2b9f   :  { %v10905_v2 = vpop.eup %8313  ;;  %8323 = vpow2.f32 %v5570_v61  ;;  %v5572_v54 = vmul.f32 1.442695, %v5569_v39 }
0x2ba1   :  { %v10911_v33 = vpop.eup %8315  ;;  %8325 = vpow2.f32 %v5572_v54 }
0x2ba2   :  { %5730 = vrot.lane.b32.xlu1 %v10905_v2, %s8558_s13  ;;  %5602 = vrot.lane.b32.xlu0 %v10903_v18, %s8561_s22 }
0x2ba3   :  { %v10913_v41 = vpop.eup %8317 }
0x2ba5   :  { %v10919_v58 = vpop.eup %8319 }
0x2ba6   :  { %5762 = vrot.lane.b32.xlu1 %v10913_v41, %s8557_s29  ;;  %5760 = vrot.lane.b32.xlu0 %v10911_v33, %s8557_s29 }
0x2ba7   :  { %v10921_v42 = vpop.eup %8321 }
0x2ba9   :  { %v10929_v11 = vpop.eup %8323 }
0x2baa   :  { %5794 = vrot.lane.b32.xlu1 %v10921_v42, %s8552_s15  ;;  %5792 = vrot.lane.b32.xlu0 %v10919_v58, %s8552_s15  ;;  %v5574_v5 = vsel %vm174_vm3, %v10929_v11, 0.0 }
0x2bab   :  { %v10933_v21 = vpop.eup %8325 }
0x2bac   :  { %v5577_v29 = vsel %vm174_vm3, %v10933_v21, 0.0 }
0x2bc9   :  { %5575 = vadd.xlane.f32.xlu0 %v5574_v5 }
0x2bce   :  { %5578 = vadd.xlane.f32.xlu1 %v5577_v29 }
0x2c00   :  { %v5601_v38 = vpop.permute.xlu1 %5600 }
0x2c01   :  { %v5606_v22 = vsel %vm174_vm3, %v5601_v38, 0.0 }
0x2c02   :  { %5607 = vadd.xlane.f32.xlu0 %v5606_v22 }
0x2c04   :  { %v5633_v62 = vpop.permute.xlu1 %5632 }
0x2c05   :  { %v5638_v57 = vsel %vm174_vm3, %v5633_v62, 0.0 }
0x2c06   :  { %5639 = vadd.xlane.f32.xlu1 %v5638_v57 }
0x2c08   :  { %v5665_v60 = vpop.permute.xlu0 %5664  ;;  %v5635_v23 = vpop.permute.xlu1 %5634 }
0x2c09   :  { %v5670_v56 = vsel %vm174_vm3, %v5665_v60, 0.0  ;;  %v5641_v44 = vsel %vm174_vm3, %v5635_v23, 0.0 }
0x2c0a   :  { %5671 = vadd.xlane.f32.xlu1 %v5670_v56 }
0x2c0c   :  { %v5697_v19 = vpop.permute.xlu0 %5696  ;;  %v5667_v53 = vpop.permute.xlu1 %5666 }
0x2c0d   :  { %v5702_v3 = vsel %vm174_vm3, %v5697_v19, 0.0  ;;  %v5673_v10 = vsel %vm174_vm3, %v5667_v53, 0.0 }
0x2c0e   :  { %5703 = vadd.xlane.f32.xlu1 %v5702_v3 }
0x2c10   :  { %v5729_v25 = vpop.permute.xlu0 %5728  ;;  %v5699_v63 = vpop.permute.xlu1 %5698 }
0x2c11   :  { %v5734_v51 = vsel %vm174_vm3, %v5729_v25, 0.0  ;;  %v5705_v49 = vsel %vm174_vm3, %v5699_v63, 0.0 }
0x2c12   :  { %5735 = vadd.xlane.f32.xlu1 %v5734_v51 }
0x2c14   :  { %v5603_v8 = vpop.permute.xlu0 %5602  ;;  %v5731_v12 = vpop.permute.xlu1 %5730 }
0x2c15   :  { %v5609_v30 = vsel %vm174_vm3, %v5603_v8, 0.0  ;;  %v5737_v28 = vsel %vm174_vm3, %v5731_v12, 0.0 }
0x2c16   :  { %5610 = vadd.xlane.f32.xlu0 %v5609_v30 }
0x2c18   :  { %v5761_v13 = vpop.permute.xlu0 %5760  ;;  %v5763_v36 = vpop.permute.xlu1 %5762 }
0x2c19   :  { %v5766_v27 = vsel %vm174_vm3, %v5761_v13, 0.0  ;;  %v5769_v20 = vsel %vm174_vm3, %v5763_v36, 0.0 }
0x2c1a   :  { %5642 = vadd.xlane.f32.xlu0 %v5641_v44  ;;  %5767 = vadd.xlane.f32.xlu1 %v5766_v27 }
0x2c1c   :  { %v5793_v31 = vpop.permute.xlu0 %5792  ;;  %v5795_v46 = vpop.permute.xlu1 %5794 }
0x2c1d   :  { %v5798_v0 = vsel %vm174_vm3, %v5793_v31, 0.0  ;;  %v5801_v15 = vsel %vm174_vm3, %v5795_v46, 0.0 }
0x2c1e   :  { %5674 = vadd.xlane.f32.xlu0 %v5673_v10  ;;  %5799 = vadd.xlane.f32.xlu1 %v5798_v0 }
0x2c22   :  { %5706 = vadd.xlane.f32.xlu0 %v5705_v49 }
0x2c26   :  { %5738 = vadd.xlane.f32.xlu0 %v5737_v28 }
0x2c2a   :  { %5770 = vadd.xlane.f32.xlu0 %v5769_v20 }
0x2c2e   :  { %5802 = vadd.xlane.f32.xlu0 %v5801_v15 }
0x2c56   :  { %v5576_v32 = vpop.xlane.xlu0 %5575 }
0x2c57   :  { %8327 = vrcp.f32 %v5576_v32 }
0x2c5b   :  { %v5579_v37 = vpop.xlane.xlu1 %5578 }
0x2c5c   :  { %8329 = vrcp.f32 %v5579_v37 }
0x2c61   :  { %v8328_v5 = vpop.eup %8327 }
0x2c62   :  { %v5582_v10 = vmul.f32 %v8328_v5, %v10929_v11  ;;  %v6910_v5 = vld [vmem:[#allocation12 + $0x30] ss:$0 sm:$0xff] }
0x2c66   :  { %v8330_v38 = vpop.eup %8329 }
0x2c67   :  { %v5583_v0 = vmul.f32 %v8330_v38, %v10933_v21 }
0x2c8f   :  { %v5608_v50 = vpop.xlane.xlu0 %5607 }
0x2c90   :  { %8331 = vrcp.f32 %v5608_v50  ;;  %v7879_v50 = vld [vmem:[#allocation7 + $0x74] ss:$136 sps:$4 sm:$0xff]  }
0x2c93   :  { %v5640_v40 = vpop.xlane.xlu1 %5639 }
0x2c94   :  { %8333 = vrcp.f32 %v5640_v40 }
0x2c97   :  { %v5672_v34 = vpop.xlane.xlu1 %5671 }
0x2c98   :  { %8335 = vrcp.f32 %v5672_v34 }
0x2c9a   :  { %v8332_v22 = vpop.eup %8331 }
0x2c9b   :  { %v5704_v59 = vpop.xlane.xlu1 %5703  ;;  %v5614_v30 = vmul.f32 %v8332_v22, %v10863_v1 }
0x2c9c   :  { %8337 = vrcp.f32 %v5704_v59  ;;  %v7880_v59 = vld [vmem:[#allocation7 + $0x184] ss:$136 sps:$4 sm:$0xff]  }
0x2c9e   :  { %v8334_v62 = vpop.eup %8333 }
0x2c9f   :  { %v5736_v7 = vpop.xlane.xlu1 %5735  ;;  %v5646_v44 = vmul.f32 %v8334_v62, %v10870_v9 }
0x2ca0   :  { %8339 = vrcp.f32 %v5736_v7 }
0x2ca2   :  { %v8336_v60 = vpop.eup %8335 }
0x2ca3   :  { %v5611_v47 = vpop.xlane.xlu0 %5610  ;;  %v5678_v12 = vmul.f32 %v8336_v60, %v10878_v16 }
0x2ca4   :  { %8341 = vrcp.f32 %v5611_v47 }
0x2ca6   :  { %v8338_v56 = vpop.eup %8337 }
0x2ca7   :  { %v5643_v43 = vpop.xlane.xlu0 %5642  ;;  %v5768_v61 = vpop.xlane.xlu1 %5767  ;;  %v5710_v28 = vmul.f32 %v8338_v56, %v10888_v14 }
0x2ca8   :  { %8343 = vrcp.f32 %v5768_v61 }
0x2ca9   :  { %8345 = vrcp.f32 %v5643_v43  ;;  %v7882_v43 = vld [vmem:[#allocation7 + $0x3a4] ss:$136 sps:$4 sm:$0xff]  }
0x2caa   :  { %v8340_v23 = vpop.eup %8339 }
0x2cab   :  { %v5675_v6 = vpop.xlane.xlu0 %5674  ;;  %v5800_v29 = vpop.xlane.xlu1 %5799  ;;  %v5742_v9 = vmul.f32 %v8340_v23, %v10897_v24 }
0x2cac   :  { %8347 = vrcp.f32 %v5675_v6 }
0x2cae   :  { %v8342_v19 = vpop.eup %8341 }
0x2caf   :  { %v5707_v39 = vpop.xlane.xlu0 %5706  ;;  %v5615_v63 = vmul.f32 %v8342_v19, %v10903_v18  ;;  %v5808_v18 = vsel %vm174_vm3, %v5582_v10, %v5614_v30  ;;  %v7886_v10 = vld [vmem:[#allocation7 + $0x188] ss:$136 sps:$4 sm:$0xff]  }
0x2cb0   :  { %8349 = vrcp.f32 %v5707_v39  ;;  %v5810_v11 = vsel %vm927_vm14, %v5808_v18, %v5646_v44  ;;  %v7898_v18 = vld [vmem:[#allocation9 + $0x2c] ss:$16 sps:$4 sm:$0xff]  }
0x2cb1   :  { %v5812_v14 = vsel %vm930_vm15, %v5810_v11, %v5678_v12  ;;  %v7895_v12 = vld [vmem:[#allocation9 + $0x10c] ss:$16 sps:$4 sm:$0xff]  }
0x2cb2   :  { %v8344_v25 = vpop.eup %8343  ;;  %v5814_v24 = vsel %vm360_vm6, %v5812_v14, %v5710_v28  ;;  %v7889_v28 = vld [vmem:[#allocation7 + $0x298] ss:$136 sps:$4 sm:$0xff]   ;;  %7212 = vmatprep.subr.bf16.mxu0 %v7895_v12  ;;  %v7901_v11 = vld [vmem:[#allocation9 + $0x16c] ss:$16 sps:$4 sm:$0xff]  }
0x2cb3   :  { %v5739_v54 = vpop.xlane.xlu0 %5738  ;;  %v8346_v51 = vpop.eup %8345  ;;  %v5774_v21 = vmul.f32 %v8344_v25, %v10911_v33  ;;  %v5816_v40 = vsel %vm935_vm1, %v5814_v24, %v5742_v9  ;;  %v7899_v9 = vld [vmem:[#allocation9 + $0x14c] ss:$16 sps:$4 sm:$0xff]  }
0x2cb4   :  { %8351 = vrcp.f32 %v5739_v54  ;;  %v5647_v27 = vmul.f32 %v8346_v51, %v10876_v35  ;;  %v5809_v35 = vsel %vm174_vm3, %v5583_v0, %v5615_v63  ;;  %v7891_v0 = vld [vmem:[#allocation7 + $0x29c] ss:$136 sps:$4 sm:$0xff]  }
0x2cb5   :  { %8353 = vrcp.f32 %v5800_v29  ;;  %v5818_v32 = vsel %vm938_vm2, %v5816_v40, %v5774_v21  ;;  %v7902_v21 = vld [vmem:[#allocation9 + $0x6c] ss:$16 sps:$4 sm:$0xff]  }
0x2cb6   :  { %v8348_v53 = vpop.eup %8347  ;;  %v5811_v16 = vsel %vm927_vm14, %v5809_v35, %v5647_v27  ;;  %v7885_v27 = vld [vmem:[#allocation7 + $0x7c] ss:$136 sps:$4 sm:$0xff]   ;;  %v7892_v35 = vld [vmem:[#allocation7 + $0x3a8] ss:$136 sps:$4 sm:$0xff]  }
0x2cb7   :  { %v5771_v57 = vpop.xlane.xlu0 %5770  ;;  %v5679_v49 = vmul.f32 %v8348_v53, %v10886_v4  ;;  %v7905_v14 = vld [vmem:[#allocation9 + $0x1ac] ss:$16 sps:$4 sm:$0xff]  }
0x2cb8   :  { %8355 = vrcp.f32 %v5771_v57 }
0x2cb9   :  { %v5813_v46 = vsel %vm930_vm15, %v5811_v16, %v5679_v49  ;;  %v7896_v49 = vld [vmem:[#allocation9 + $0xc] ss:$16 sps:$4 sm:$0xff]  }
0x2cba   :  { %v8350_v8 = vpop.eup %8349  ;;  %7213 = vmatpush3.bf16.msra.mxu0 %v7896_v49  ;;  %v7903_v16 = vld [vmem:[#allocation9 + $0x18c] ss:$16 sps:$4 sm:$0xff]  }
0x2cbb   :  { %v5803_v3 = vpop.xlane.xlu0 %5802  ;;  %v5711_v1 = vmul.f32 %v8350_v8, %v10895_v55 }
0x2cbc   :  { %8357 = vrcp.f32 %v5803_v3 }
0x2cbd   :  { %v5815_v37 = vsel %vm360_vm6, %v5813_v46, %v5711_v1  ;;  %v7894_v1 = vld [vmem:[#allocation7 + $0x3ac] ss:$136 sps:$4 sm:$0xff]  }
0x2cbe   :  { %v8352_v13 = vpop.eup %8351 }
0x2cbf   :  { %v8354_v31 = vpop.eup %8353  ;;  %v5743_v20 = vmul.f32 %v8352_v13, %v10905_v2 }
0x2cc0   :  { %v5806_v55 = vmul.f32 %v8354_v31, %v10919_v58  ;;  %v7888_v31 = vld [vmem:[#allocation7 + $0x18c] ss:$136 sps:$4 sm:$0xff]  }
0x2cc1   :  { %v5817_v33 = vsel %vm935_vm1, %v5815_v37, %v5743_v20  ;;  %v7900_v20 = vld [vmem:[#allocation9 + $0x4c] ss:$16 sps:$4 sm:$0xff]  }
0x2cc2   :  { %v8356_v36 = vpop.eup %8355  ;;  %v5820_v34 = vsel %vm941_vm4, %v5818_v32, %v5806_v55 }
0x2cc3   :  { %v5775_v4 = vmul.f32 %v8356_v36, %v10913_v41  ;;  %v7897_v36 = vld [vmem:[#allocation9 + $0x12c] ss:$16 sps:$4 sm:$0xff]  }
0x2cc4   :  { %7214 = vmatprep.subr.bf16.mxu0 %v7897_v36 }
0x2cc5   :  { %v5819_v41 = vsel %vm938_vm2, %v5817_v33, %v5775_v4  ;;  %7215 = vmatpush3.bf16.msra.mxu0 %v7898_v18  ;;  %v7904_v4 = vld [vmem:[#allocation9 + $0x8c] ss:$16 sps:$4 sm:$0xff]   ;;  %v6916_v33 = vld [vmem:[#allocation12 + $0x31] ss:$0 sm:$0xff] }
0x2cc6   :  { %v8358_v15 = vpop.eup %8357  ;;  %7216 = vmatprep.subr.bf16.mxu0 %v7899_v9 }
0x2cc7   :  { %v5807_v2 = vmul.f32 %v8358_v15, %v10921_v42  ;;  %v7881_v42 = vld [vmem:[#allocation7 + $0x294] ss:$136 sps:$4 sm:$0xff]  }
0x2cc9   :  { %v5821_v58 = vsel %vm941_vm4, %v5819_v41, %v5807_v2  ;;  %7217 = vmatpush3.bf16.msra.mxu0 %v7900_v20 }
0x2cca   :  { %v5822_v47 = vpack.c.bf16 %v5821_v58, %v5820_v34  ;;  %7218 = vmatprep.subr.bf16.mxu0 %v7901_v11 }
0x2ccc   :  { %7637 = vmatmul.mubr.bf16.vlgmr.msra.gmra.mrb[72].mxu1 %v5822_v47 }
0x2ccd   :  { %7641 = vmatpush3.bf16.msra.mxu1 %v7879_v50  ;;  %7648 = vmatprep.mubr.msk.bf16.mxu1 %vm8556_vm0, %v11061_v17  ;;  %v6917_v50 = vld [vmem:[#allocation12 + $0x32] ss:$0 sm:$0xff] }
0x2cce   :  { %7642 = vmatprep.subr.bf16.mxu1 %v11061_v17  ;;  %7219 = vmatpush3.bf16.msra.mxu0 %v7902_v21 }
0x2ccf   :  { %7220 = vmatprep.subr.bf16.mxu0 %v7903_v16 }
0x2cd1   :  { %7643 = vmatpush3.bf16.msra.mxu1 %v7880_v59 }
0x2cd2   :  { %7644 = vmatprep.subr.bf16.mxu1 %v11061_v17  ;;  %7221 = vmatpush3.bf16.msra.mxu0 %v7904_v4 }
0x2cd3   :  { %7222 = vmatprep.subr.bf16.mxu0 %v7905_v14 }
0x2cd5   :  { %7645 = vmatpush3.bf16.msra.mxu1 %v7881_v42 }
0x2cd6   :  { %7646 = vmatprep.subr.bf16.mxu1 %v11061_v17 }
0x2cd9   :  { %7647 = vmatpush3.bf16.msra.mxu1 %v7882_v43 }
0x2cda   :  { %6058 = vmatprep.subr.bf16.mxu1 %v7885_v27 }
0x2d9f   :  { %v5857_v7 = vpop.f32.mrb[72].mxu1 }
0x2da0   :  { %v7638_v6 = vpop.f32.mrb[73].mxu1 }
0x2da1   :  { %v5860_v61 = vpop.f32.mrb[74].mxu1  ;;  %v7907_v6 = vld [vmem:[#allocation9 + $0x1cc] ss:$16 sps:$4 sm:$0xff]  }
0x2da2   :  { %v5872_v39 = vpack.c.bf16 %v5860_v61, %v5857_v7  ;;  %v7639_v54 = vpop.f32.mrb[75].mxu1  ;;  %v7906_v7 = vld [vmem:[#allocation9 + $0xac] ss:$16 sps:$4 sm:$0xff]  }
0x2da3   :  { %7223 = vmatpush3.bf16.msra.mxu0 %v7906_v7  ;;  %v7908_v61 = vld [vmem:[#allocation9 + $0xcc] ss:$16 sps:$4 sm:$0xff]  }
0x2da4   :  { %7649 = vmatmul.mubr.msk.bf16.vlgmr.msra.gmra.mrb[76].mxu1 %vm360_vm6, %v5872_v39  ;;  %v7909_v39 = vld [vmem:[#allocation9 + $0x1ec] ss:$16 sps:$4 sm:$0xff]   ;;  %7224 = vmatprep.subr.bf16.mxu0 %v7907_v6 }
0x2da5   :  { %6090 = vmatprep.mubr.bf16.mxu1 %v11062_v45  ;;  %v7910_v54 = vld [vmem:[#allocation9 + $0xec] ss:$16 sps:$4 sm:$0xff]  }
0x2da7   :  { %7225 = vmatpush3.bf16.msra.mxu0 %v7908_v61 }
0x2da8   :  { %7226 = vmatprep.subr.bf16.mxu0 %v7909_v39 }
0x2dab   :  { %7227 = vmatpush3.bf16.msra.mxu0 %v7910_v54 }
0x2e77   :  { %v5941_v29 = vpop.f32.mrb[76].mxu1 }
0x2e78   :  { %v5942_v38 = vadd.f32 %v6910_v5, %v5941_v29  ;;  %v7650_v22 = vpop.f32.mrb[77].mxu1 }
0x2e79   :  { %v5944_v62 = vpop.f32.mrb[78].mxu1 }
0x2e7a   :  { %v5948_v57 = vadd.f32 %v5942_v38, %v10754_v26  ;;  %v5945_v60 = vadd.f32 %v6910_v5, %v5944_v62  ;;  %v7651_v17 = vpop.f32.mrb[79].mxu1  ;;  %v6003_v5 = vld [vmem:[#allocation12 + $0x33] sm:$0x3] }
0x2e7b   :  { %v6008_v29 = vrot.slane %v6003_v5, %v8827_v48  ;;  %v11117_v38 = vld [vmem:[#allocation19_spill] sm:$0xff] }
0x2e7c   :  { %v5949_v56 = vadd.f32 %v5945_v60, %v10756_v52  ;;  %v5952_v23 = vsel %vm360_vm6, %v5948_v57, 0.0  ;;  %v7883_v52 = vld [vmem:[#allocation7 + $0x78] ss:$136 sps:$4 sm:$0xff]   ;;  %v6012_v22 = vrot.slane %v6003_v5, %v11117_v38 }
0x2e7d   :  { %5953 = vadd.xlane.f32.xlu1 %v5952_v23  ;;  %6059 = vmatpush1.bf16.msra.mxu1 %v7883_v52 }
0x2e7e   :  { %v5955_v19 = vsel %vm360_vm6, %v5949_v56, 0.0  ;;  %6060 = vmatprep.subr.bf16.mxu1 %v7888_v31 }
0x2e7f   :  { %5956 = vadd.xlane.f32.xlu0 %v5955_v19 }
0x2e81   :  { %6061 = vmatpush1.bf16.msra.mxu1 %v7886_v10 }
0x2e82   :  { %6062 = vmatprep.subr.bf16.mxu1 %v7891_v0 }
0x2e85   :  { %6063 = vmatpush1.bf16.msra.mxu1 %v7889_v28 }
0x2e86   :  { %6064 = vmatprep.subr.bf16.mxu1 %v7894_v1 }
0x2e89   :  { %6065 = vmatpush1.bf16.msra.mxu1 %v7892_v35 }
0x2f0a   :  { %v5954_v3 = vpop.xlane.xlu1 %5953 }
0x2f0b   :  { %v5958_v25 = vmul.f32 0.015625, %v5954_v3 }
0x2f0c   :  { %v5957_v51 = vpop.xlane.xlu0 %5956 }
0x2f0d   :  { %v5960_v53 = vsub.f32 %v5948_v57, %v5958_v25  ;;  %v5959_v8 = vmul.f32 0.015625, %v5957_v51 }
0x2f0f   :  { %v5961_v30 = vsub.f32 %v5949_v56, %v5959_v8  ;;  %v5962_v63 = vmul.f32 %v5960_v53, %v5960_v53 }
0x2f11   :  { %v5964_v13 = vsel %vm360_vm6, %v5962_v63, 0.0  ;;  %v5963_v26 = vmul.f32 %v5961_v30, %v5961_v30 }
0x2f12   :  { %5965 = vadd.xlane.f32.xlu1 %v5964_v13  ;;  %v6927_v13 = vld [vmem:[#allocation12 + $0x35] ss:$0 sm:$0xff] }
0x2f13   :  { %v5967_v44 = vsel %vm360_vm6, %v5963_v26, 0.0 }
0x2f14   :  { %5968 = vadd.xlane.f32.xlu0 %v5967_v44 }
0x2f9f   :  { %v5966_v55 = vpop.xlane.xlu1 %5965 }
0x2fa0   :  { %v5970_v46 = vmul.f32 0.015625, %v5966_v55 }
0x2fa1   :  { %v5969_v15 = vpop.xlane.xlu0 %5968 }
0x2fa2   :  { %v5972_v24 = vadd.f32 1e-05, %v5970_v46  ;;  %v5971_v37 = vmul.f32 0.015625, %v5969_v15 }
0x2fa4   :  { %8359 = vrsqrt.f32 %v5972_v24  ;;  %v5973_v2 = vadd.f32 1e-05, %v5971_v37 }
0x2fa6   :  { %8361 = vrsqrt.f32 %v5973_v2 }
0x2fae   :  { %v8360_v40 = vpop.eup %8359 }
0x2faf   :  { %v5976_v32 = vmul.f32 %v8360_v40, %v5960_v53 }
0x2fb0   :  { %v8362_v41 = vpop.eup %8361 }
0x2fb1   :  { %v5984_v34 = vmul.f32 %v6916_v33, %v5976_v32  ;;  %v5977_v58 = vmul.f32 %v8362_v41, %v5961_v30 }
0x2fb3   :  { %v5985_v47 = vmul.f32 %v6916_v33, %v5977_v58  ;;  %v5992_v59 = vadd.f32 %v6917_v50, %v5984_v34  ;;  %v6944_v33 = vld [vmem:[#allocation12 + $0x36] ss:$0 sm:$0xff]  ;;  %v6945_v34 = vld [vmem:[#allocation12 + $0x37] ss:$0 sm:$0xff] }
0x2fb5   :  { %v5993_v42 = vadd.f32 %v6917_v50, %v5985_v47 }
0x2fb7   :  { %v6002_v43 = vpack.c.bf16 %v5993_v42, %v5992_v59 }
0x2fb9   :  { %6926 = vmatmul.mubr.msk.bf16.vlgmr.msra.gmra.mrb[80].mxu1 %vm360_vm6, %v6002_v43 }
0x2fba   :  { %6469 = vmatprep.mubr.bf16.mxu1 %v11062_v45 }
0x308c   :  { %v6092_v62 = vpop.f32.mrb[80].mxu1 }
0x308d   :  { %v6093_v57 = vadd.f32 %v6092_v62, %v6008_v29  ;;  %v6094_v60 = vpop.f32.mrb[81].mxu1 }
0x308e   :  { %v6095_v17 = vadd.f32 %v6094_v60, %v6012_v22  ;;  %v6096_v45 = vpop.f32.mrb[82].mxu1 }
0x308f   :  { %v6097_v56 = vadd.f32 %v6096_v45, %v6008_v29  ;;  %v6098_v23 = vpop.f32.mrb[83].mxu1  ;;  %v6101_v3 = vmax.f32 %v6093_v57, 0.0  ;;  %v7913_v45 = vld [vmem:[#allocation7 + $0x84] ss:$136 sps:$4 sm:$0xff]  }
0x3090   :  { %v6099_v19 = vadd.f32 %v6098_v23, %v6012_v22  ;;  %v6102_v51 = vmax.f32 %v6095_v17, 0.0  ;;  %v7911_v17 = vld [vmem:[#allocation7 + $0x80] ss:$136 sps:$4 sm:$0xff]   ;;  %6437 = vmatprep.subr.bf16.mxu1 %v7913_v45  ;;  %v7914_v23 = vld [vmem:[#allocation7 + $0x190] ss:$136 sps:$4 sm:$0xff]  }
0x3091   :  { %v6103_v25 = vmax.f32 %v6097_v56, 0.0  ;;  %v7916_v56 = vld [vmem:[#allocation7 + $0x194] ss:$136 sps:$4 sm:$0xff]   ;;  %6438 = vmatpush1.bf16.msra.mxu1 %v7911_v17 }
0x3092   :  { %v6104_v53 = vmax.f32 %v6099_v19, 0.0  ;;  %6439 = vmatprep.subr.bf16.mxu1 %v7916_v56  ;;  %v7919_v19 = vld [vmem:[#allocation7 + $0x2a4] ss:$136 sps:$4 sm:$0xff]  }
0x3093   :  { %v6137_v8 = vpack.c.bf16 %v6103_v25, %v6101_v3  ;;  %v7917_v3 = vld [vmem:[#allocation7 + $0x2a0] ss:$136 sps:$4 sm:$0xff]   ;;  %v7922_v25 = vld [vmem:[#allocation7 + $0x3b4] ss:$136 sps:$4 sm:$0xff]  }
0x3094   :  { %v6138_v30 = vpack.c.bf16 %v6104_v53, %v6102_v51  ;;  %v7920_v51 = vld [vmem:[#allocation7 + $0x3b0] ss:$136 sps:$4 sm:$0xff]   ;;  %v7923_v53 = vld [vmem:[#allocation10 + $0x40] sm:$0xff]  }
0x3095   :  { %6440 = vmatpush1.bf16.msra.mxu1 %v7914_v23 }
0x3096   :  { %6274 = vmatprep.mubr.bf16.mxu0 %v6138_v30  ;;  %6441 = vmatprep.subr.bf16.mxu1 %v7919_v19 }
0x3097   :  { %6275 = vmatmul.mubr.bf16.vlgmr.msra.gmra.mrb[72].mxu0 %v6137_v8 }
0x3099   :  { %6442 = vmatpush1.bf16.msra.mxu1 %v7917_v3 }
0x309a   :  { %6443 = vmatprep.subr.bf16.mxu1 %v7922_v25 }
0x309d   :  { %6444 = vmatpush1.bf16.msra.mxu1 %v7920_v51 }
0x309e   :  { %7234 = vmatprep.subr.bf16.mxu1 %v7923_v53 }
0x316a   :  { %v7228_v63 = vpop.f32.mrb[72].mxu0 }
0x316b   :  { %v7229_v26 = vpop.f32.mrb[73].mxu0 }
0x316c   :  { %v7230_v44 = vadd.f32 %v7229_v26, %v7228_v63  ;;  %v7231_v52 = vpop.f32.mrb[74].mxu0 }
0x316d   :  { %v7232_v27 = vpop.f32.mrb[75].mxu0 }
0x316e   :  { %v6277_v31 = vadd.f32 %v7230_v44, %v6927_v13  ;;  %v7233_v10 = vadd.f32 %v7232_v27, %v7231_v52  ;;  %v6946_v27 = vld [vmem:[#allocation12 + $0x3a] ss:$0 sm:$0xff] }
0x3170   :  { %v6280_v0 = vadd.f32 %v7233_v10, %v6927_v13  ;;  %v6283_v12 = vadd.f32 %v6277_v31, %v5992_v59 }
0x3172   :  { %v6287_v49 = vsel %vm360_vm6, %v6283_v12, 0.0  ;;  %v6284_v36 = vadd.f32 %v6280_v0, %v5993_v42 }
0x3173   :  { %6288 = vadd.xlane.f32.xlu1 %v6287_v49  ;;  %v6947_v49 = vld [vmem:[#allocation12 + $0x3b] ss:$0 sm:$0xff] }
0x3174   :  { %v6290_v28 = vsel %vm360_vm6, %v6284_v36, 0.0 }
0x3175   :  { %6291 = vadd.xlane.f32.xlu0 %v6290_v28 }
0x3200   :  { %v6289_v1 = vpop.xlane.xlu1 %6288 }
0x3201   :  { %v6293_v18 = vmul.f32 0.015625, %v6289_v1 }
0x3202   :  { %v6292_v9 = vpop.xlane.xlu0 %6291 }
0x3203   :  { %v6295_v35 = vsub.f32 %v6283_v12, %v6293_v18  ;;  %v6294_v20 = vmul.f32 0.015625, %v6292_v9  ;;  %v7924_v18 = vld [vmem:[#allocation10] sm:$0xff]  }
0x3205   :  { %v6296_v11 = vsub.f32 %v6284_v36, %v6294_v20  ;;  %v6297_v21 = vmul.f32 %v6295_v35, %v6295_v35  ;;  %v7926_v20 = vld [vmem:[#allocation10 + $0x8] sm:$0xff]  }
0x3207   :  { %v6299_v16 = vsel %vm360_vm6, %v6297_v21, 0.0  ;;  %v6298_v4 = vmul.f32 %v6296_v11, %v6296_v11  ;;  %v7928_v21 = vld [vmem:[#allocation10 + $0x10] sm:$0xff]  }
0x3208   :  { %6300 = vadd.xlane.f32.xlu1 %v6299_v16  ;;  %v7929_v16 = vld [vmem:[#allocation10 + $0x58] sm:$0xff]  }
0x3209   :  { %v6302_v14 = vsel %vm360_vm6, %v6298_v4, 0.0  ;;  %v7930_v4 = vld [vmem:[#allocation10 + $0x18] sm:$0xff]  }
0x320a   :  { %6303 = vadd.xlane.f32.xlu0 %v6302_v14  ;;  %v7931_v14 = vld [vmem:[#allocation10 + $0x60] sm:$0xff]  }
0x3295   :  { %v6301_v55 = vpop.xlane.xlu1 %6300 }
0x3296   :  { %v6305_v46 = vmul.f32 0.015625, %v6301_v55  ;;  %v7932_v55 = vld [vmem:[#allocation10 + $0x20] sm:$0xff]  }
0x3297   :  { %v6304_v15 = vpop.xlane.xlu0 %6303 }
0x3298   :  { %v6307_v24 = vadd.f32 1e-05, %v6305_v46  ;;  %v6306_v37 = vmul.f32 0.015625, %v6304_v15  ;;  %v7933_v46 = vld [vmem:[#allocation10 + $0x68] sm:$0xff]  }
0x3299   :  { %v7934_v15 = vld [vmem:[#allocation10 + $0x28] sm:$0xff]  }
0x329a   :  { %8363 = vrsqrt.f32 %v6307_v24  ;;  %v6308_v2 = vadd.f32 1e-05, %v6306_v37  ;;  %v7935_v24 = vld [vmem:[#allocation10 + $0x70] sm:$0xff]  }
0x329b   :  { %v7936_v37 = vld [vmem:[#allocation10 + $0x30] sm:$0xff]  }
0x329c   :  { %8365 = vrsqrt.f32 %v6308_v2  ;;  %v7937_v2 = vld [vmem:[#allocation10 + $0x78] sm:$0xff]  }
0x32a4   :  { %v8364_v40 = vpop.eup %8363 }
0x32a5   :  { %v6311_v32 = vmul.f32 %v8364_v40, %v6295_v35  ;;  %v7925_v35 = vld [vmem:[#allocation10 + $0x48] sm:$0xff]   ;;  %v7938_v40 = vld [vmem:[#allocation10 + $0x38] sm:$0xff]  }
0x32a6   :  { %v8366_v41 = vpop.eup %8365 }
0x32a7   :  { %v6319_v58 = vmul.f32 %v6944_v33, %v6311_v32  ;;  %v6312_v50 = vmul.f32 %v8366_v41, %v6296_v11  ;;  %v7927_v11 = vld [vmem:[#allocation10 + $0x50] sm:$0xff]  }
0x32a9   :  { %v6327_v47 = vadd.f32 %v6945_v34, %v6319_v58  ;;  %v6320_v59 = vmul.f32 %v6944_v33, %v6312_v50  ;;  %v6382_v33 = vld [vmem:[#allocation12 + $0x3c] sm:$0x3] }
0x32aa   :  { %v6387_v32 = vrot.slane %v6382_v33, %v8827_v48  ;;  %v6391_v41 = vrot.slane %v6382_v33, %v11117_v38  ;;  %v6957_v48 = vld [vmem:[#allocation12 + $0x3e] ss:$0 sm:$0xff] }
0x32ab   :  { %v6331_v42 = vsel %vm360_vm6, %v6327_v47, 0.0  ;;  %v6328_v43 = vadd.f32 %v6945_v34, %v6320_v59 }
0x32ac   :  { %6332 = vadd.xlane.f32.xlu1 %v6331_v42 }
0x32ad   :  { %v6334_v7 = vsel %vm360_vm6, %v6328_v43, 0.0 }
0x32ae   :  { %6335 = vadd.xlane.f32.xlu0 %v6334_v7 }
0x3339   :  { %v6333_v6 = vpop.xlane.xlu1 %6332 }
0x333a   :  { %v6337_v61 = vmul.f32 0.015625, %v6333_v6 }
0x333b   :  { %v6336_v39 = vpop.xlane.xlu0 %6335 }
0x333c   :  { %v6339_v54 = vsub.f32 %v6327_v47, %v6337_v61  ;;  %v6338_v5 = vmul.f32 0.015625, %v6336_v39 }
0x333e   :  { %v6340_v29 = vsub.f32 %v6328_v43, %v6338_v5  ;;  %v6341_v22 = vmul.f32 %v6339_v54, %v6339_v54 }
0x3340   :  { %v6343_v62 = vsel %vm360_vm6, %v6341_v22, 0.0  ;;  %v6342_v57 = vmul.f32 %v6340_v29, %v6340_v29 }
0x3341   :  { %6344 = vadd.xlane.f32.xlu1 %v6343_v62 }
0x3342   :  { %v6346_v60 = vsel %vm360_vm6, %v6342_v57, 0.0 }
0x3343   :  { %6347 = vadd.xlane.f32.xlu0 %v6346_v60 }
0x33ce   :  { %v6345_v8 = vpop.xlane.xlu1 %6344 }
0x33cf   :  { %v6349_v30 = vmul.f32 0.015625, %v6345_v8 }
0x33d0   :  { %v6348_v63 = vpop.xlane.xlu0 %6347 }
0x33d1   :  { %v6351_v13 = vadd.f32 1e-05, %v6349_v30  ;;  %v6350_v26 = vmul.f32 0.015625, %v6348_v63 }
0x33d3   :  { %8367 = vrsqrt.f32 %v6351_v13  ;;  %v6352_v44 = vadd.f32 1e-05, %v6350_v26 }
0x33d5   :  { %8369 = vrsqrt.f32 %v6352_v44 }
0x33dd   :  { %v8368_v52 = vpop.eup %8367 }
0x33de   :  { %v6355_v31 = vmul.f32 %v8368_v52, %v6339_v54 }
0x33df   :  { %v8370_v10 = vpop.eup %8369 }
0x33e0   :  { %v6363_v0 = vmul.f32 %v6946_v27, %v6355_v31  ;;  %v6356_v12 = vmul.f32 %v8370_v10, %v6340_v29 }
0x33e2   :  { %v6364_v36 = vmul.f32 %v6946_v27, %v6356_v12  ;;  %v6371_v28 = vadd.f32 %v6947_v49, %v6363_v0 }
0x33e4   :  { %v6372_v1 = vadd.f32 %v6947_v49, %v6364_v36 }
0x33e6   :  { %v6381_v9 = vpack.c.bf16 %v6372_v1, %v6371_v28 }
0x33e8   :  { %6956 = vmatmul.mubr.msk.bf16.vlgmr.msra.gmra.mrb[84].mxu1 %vm360_vm6, %v6381_v9 }
0x33e9   :  { %7235 = vmatpush3.bf16.msra.mxu1 %v7924_v18 }
0x33ea   :  { %7236 = vmatprep.subr.bf16.mxu1 %v7925_v35 }
0x33ed   :  { %7237 = vmatpush3.bf16.msra.mxu1 %v7926_v20 }
0x33ee   :  { %7238 = vmatprep.subr.bf16.mxu1 %v7927_v11 }
0x33f1   :  { %7239 = vmatpush3.bf16.msra.mxu1 %v7928_v21 }
0x33f2   :  { %7240 = vmatprep.subr.bf16.mxu1 %v7929_v16 }
0x33f5   :  { %7241 = vmatpush3.bf16.msra.mxu1 %v7930_v4 }
0x33f6   :  { %7242 = vmatprep.subr.bf16.mxu1 %v7931_v14 }
0x33f9   :  { %7243 = vmatpush3.bf16.msra.mxu1 %v7932_v55 }
0x33fa   :  { %7244 = vmatprep.subr.bf16.mxu1 %v7933_v46 }
0x33fd   :  { %7245 = vmatpush3.bf16.msra.mxu1 %v7934_v15 }
0x33fe   :  { %7246 = vmatprep.subr.bf16.mxu1 %v7935_v24 }
0x3401   :  { %7247 = vmatpush3.bf16.msra.mxu1 %v7936_v37 }
0x3402   :  { %7248 = vmatprep.subr.bf16.mxu1 %v7937_v2 }
0x3405   :  { %7249 = vmatpush3.bf16.msra.mxu1 %v7938_v40 }
0x34bb   :  { %v6471_v34 = vpop.f32.mrb[84].mxu1 }
0x34bc   :  { %v6472_v58 = vadd.f32 %v6471_v34, %v6387_v32  ;;  %v6473_v50 = vpop.f32.mrb[85].mxu1 }
0x34bd   :  { %v6474_v47 = vadd.f32 %v6473_v50, %v6391_v41  ;;  %v6475_v59 = vpop.f32.mrb[86].mxu1 }
0x34be   :  { %v6476_v42 = vadd.f32 %v6475_v59, %v6387_v32  ;;  %v6477_v43 = vpop.f32.mrb[87].mxu1  ;;  %v6480_v6 = vmax.f32 %v6472_v58, 0.0 }
0x34bf   :  { %v6478_v7 = vadd.f32 %v6477_v43, %v6391_v41  ;;  %v6481_v39 = vmax.f32 %v6474_v47, 0.0 }
0x34c0   :  { %v6482_v61 = vmax.f32 %v6476_v42, 0.0 }
0x34c1   :  { %v6483_v54 = vmax.f32 %v6478_v7, 0.0 }
0x34c2   :  { %v6484_v5 = vpack.c.bf16 %v6482_v61, %v6480_v6 }
0x34c3   :  { %v6485_v29 = vpack.c.bf16 %v6483_v54, %v6481_v39 }
0x34c5   :  { %6653 = vmatprep.mubr.bf16.mxu1 %v6485_v29 }
0x34c6   :  { %6654 = vmatmul.mubr.bf16.vlgmr.msra.gmra.mrb[88].mxu1 %v6484_v5 }
0x3599   :  { %v7250_v22 = vpop.f32.mrb[88].mxu1 }
0x359a   :  { %v7251_v62 = vpop.f32.mrb[89].mxu1 }
0x359b   :  { %v7252_v38 = vadd.f32 %v7251_v62, %v7250_v22  ;;  %v7253_v57 = vpop.f32.mrb[90].mxu1 }
0x359c   :  { %v7254_v60 = vpop.f32.mrb[91].mxu1 }
0x359d   :  { %v6656_v17 = vadd.f32 %v7252_v38, %v6957_v48  ;;  %v7255_v45 = vadd.f32 %v7254_v60, %v7253_v57 }
0x359f   :  { %6662 = vst [vmem:[%s11027_s12] sm:$0xff] %v6656_v17  ;;  %v6659_v56 = vadd.f32 %v7255_v45, %v6957_v48 }
0x35a1   :  { %6663 = vst [vmem:[%s11027_s12 + $0x8] sm:$0xff] %v6659_v56 }
0x35a2   :  { %6668 = vsyncpa [#allocation3], 1 }
0x35a3   :  { %6669 = vsyncpa [#allocation5], 1 }
0x35a4   :  { %6670 = vsyncpa [#allocation8], 1 }
0x35a5   :  { %6671 = vsyncpa [#allocation11], 1 }

</bundles_post_ra>
